<compile_context>
chip_gen: v6e
topology: v6e:2x2x1
jax: 0.10.0
libtpu: 0.0.40
codegen_flags: <defaults>
</compile_context>

<pallas_src>
import numpy as np
import jax
import jax.numpy as jnp
from jax import lax
from jax.experimental import pallas as pl
from jax.experimental.pallas import tpu as pltpu

jax.config.update("jax_default_matmul_precision", "highest")

# ----------------------------- configuration --------------------------------
B = 2                    # sentence pairs
SEQ_LEN = 8
MAX_DEPTH = SEQ_LEN      # depth columns in left/right/write node arrays
WORD_DIM = 16            # word_embedding_dim
MODEL_DIM = 32           # model_dim; tree-LSTM size = MODEL_DIM // 2
SIZE = MODEL_DIM // 2
VOCAB = 50
LN_EPS = 1e-6
BATCH = 2 * B            # premise + hypothesis stacked along batch


# ------------------- Pallas kernel: encoder + golden-tree LSTM --------------
def _tree_kernel(
    idx_ref,                          # (4, MAX_DEPTH, BATCH, 1) int32: l, r, w, w_mask
    tok_ref,                          # (BATCH, SEQ_LEN, WORD_DIM) f32 word embeddings
    we_ref, be_ref,                   # encoder weights (WORD_DIM, D), (1, D)
    gl_ref, bl_ref, gr_ref, br_ref,   # layer-norm params, (1, D) each
    wl_ref, wr_ref, bias_ref,         # gate weights (D, 5S) x2, bias (1, 5S)
    out_ref,                          # (BATCH, D)
    buf_ref, hc_ref,                  # scratch: (BATCH, 2L, D), (BATCH, D)
):
    batch, seq_len, word_dim = tok_ref.shape
    d = buf_ref.shape[-1]
    size = d // 2
    two_l = 2 * seq_len
    num_steps = idx_ref.shape[1] - 1      # reference covers steps 0 .. max_depth-2

    # ---- init: fused context encoder, one MXU dot for all batch*seq rows ----
    tok2d = tok_ref[...].reshape(batch * seq_len, word_dim)
    emb = (jnp.dot(tok2d, we_ref[...], preferred_element_type=jnp.float32)
           + be_ref[...])
    buf_ref[:, :seq_len, :] = emb.reshape(batch, seq_len, d)
    buf_ref[:, seq_len:, :] = jnp.zeros((batch, seq_len, d), jnp.float32)

    # ---- hoisted loop invariants (kept in vregs across the unrolled loop) ----
    g_l = gl_ref[...]; b_l = bl_ref[...]
    g_r = gr_ref[...]; b_r = br_ref[...]
    w_l = wl_ref[...]; w_r = wr_ref[...]
    bias = bias_ref[...]
    node_iota = lax.broadcasted_iota(jnp.int32, (batch, two_l, 1), 1)

    def layer_norm(x, g, bb):
        mu = jnp.mean(x, axis=-1, keepdims=True)
        xc = x - mu
        var = jnp.sum(xc * xc, axis=-1, keepdims=True) / (d - 1)
        inv = pl.reciprocal(jnp.sqrt(var) + LN_EPS, approx=False)  # exact, matches ref
        return xc * inv * g + bb

    state = None
    for t in range(num_steps):                  # fully unrolled static loop
        l_col = idx_ref[0, t]                   # (BATCH, 1) int32
        r_col = idx_ref[1, t]
        w_col = idx_ref[2, t]
        m_col = idx_ref[3, t]

        # vectorized one-hot gather of children (no per-batch dynamic loads)
        buf = buf_ref[...]                                        # (B, 2L, D)
        mask_l = node_iota == l_col[:, None, :]                   # (B, 2L, 1)
        mask_r = node_iota == r_col[:, None, :]
        left = jnp.sum(jnp.where(mask_l, buf, 0.0), axis=1)       # (B, D)
        right = jnp.sum(jnp.where(mask_r, buf, 0.0), axis=1)

        ln_l = layer_norm(left, g_l, b_l)
        ln_r = layer_norm(right, g_r, b_r)

        # two dots instead of concat([ln_l, ln_r]) @ [W_l; W_r] -> no lane concat
        gates = (jnp.dot(ln_l, w_l, preferred_element_type=jnp.float32)
                 + jnp.dot(ln_r, w_r, preferred_element_type=jnp.float32)
                 + bias)

        i_g = jax.nn.sigmoid(gates[:, 0 * size:1 * size])
        fl_g = jax.nn.sigmoid(gates[:, 1 * size:2 * size])
        fr_g = jax.nn.sigmoid(gates[:, 2 * size:3 * size])
        o_g = jax.nn.sigmoid(gates[:, 3 * size:4 * size])
        cell = jnp.tanh(gates[:, 4 * size:5 * size])

        c_t = fl_g * ln_l[:, size:] + fr_g * ln_r[:, size:] + i_g * cell
        h_t = o_g * jnp.tanh(c_t)

        # assemble [h | c] in lane-halves of a persistent scratch (no concat)
        hc_ref[:, :size] = h_t
        hc_ref[:, size:] = c_t
        new_state = hc_ref[...]                                   # (B, D)

        # vectorized scatter: one full-tile blend (padded steps hit trash row)
        mask_w = node_iota == w_col[:, None, :]                   # (B, 2L, 1)
        buf_ref[...] = jnp.where(mask_w, new_state[:, None, :], buf)

        if t == 0:
            state = new_state
        else:
            state = jnp.where(m_col != 0, new_state, state)       # single select

    out_ref[...] = state                                          # single final store


def tree_pallas(tok, l, r, w, w_mask, p):
    batch, seq_len, word_dim = tok.shape
    d = p["W_enc"].shape[1]
    size = d // 2
    max_depth = l.shape[1]

    # Step-major int32 index table (l, r, w, w_mask) with batch on the minor
    # axes so the kernel reads each step's indices as a (batch, 1) vector —
    # replaces per-batch SMEM scalar reads and the pre-broadcast f32 mask.
    idx = jnp.stack([l, r, w, w_mask], axis=0).astype(jnp.int32)   # (4, batch, depth)
    idx = jnp.transpose(idx, (0, 2, 1))[..., None]                 # (4, depth, batch, 1)

    grid_spec = pltpu.PrefetchScalarGridSpec(
        num_scalar_prefetch=0,
        grid=(1,),                      # single fused kernel body (no batch split)
        in_specs=[
            pl.BlockSpec((4, max_depth, batch, 1), lambda i: (0, 0, 0, 0)),  # idx
            pl.BlockSpec((batch, seq_len, word_dim), lambda i: (0, 0, 0)),   # tok
            pl.BlockSpec((word_dim, d), lambda i: (0, 0)),                   # W_enc
            pl.BlockSpec((1, d), lambda i: (0, 0)),                          # b_enc
            pl.BlockSpec((1, d), lambda i: (0, 0)),                          # g_l
            pl.BlockSpec((1, d), lambda i: (0, 0)),                          # b_l
            pl.BlockSpec((1, d), lambda i: (0, 0)),                          # g_r
            pl.BlockSpec((1, d), lambda i: (0, 0)),                          # b_r
            pl.BlockSpec((d, 5 * size), lambda i: (0, 0)),                   # W_l
            pl.BlockSpec((d, 5 * size), lambda i: (0, 0)),                   # W_r
            pl.BlockSpec((1, 5 * size), lambda i: (0, 0)),                   # bias
        ],
        out_specs=pl.BlockSpec((batch, d), lambda i: (0, 0)),
        scratch_shapes=[
            pltpu.VMEM((batch, 2 * seq_len, d), jnp.float32),   # node buffer
            pltpu.VMEM((batch, d), jnp.float32),                # [h|c] assembly
        ],
    )
    out = pl.pallas_call(
        _tree_kernel,
        out_shape=jax.ShapeDtypeStruct((batch, d), jnp.float32),
        grid_spec=grid_spec,
        compiler_params=pltpu.CompilerParams(
            dimension_semantics=("arbitrary",)),
    )(idx, tok, p["W_enc"], p["b_enc"].reshape(1, d),
      p["g_l"], p["b_l"], p["g_r"], p["b_r"], p["W_l"], p["W_r"], p["bias"])
    return out


# ------------------------------ glue (unwrap) --------------------------------
def unwrap_sentence_pair(sentences):
    return np.concatenate([sentences[:, :, 0], sentences[:, :, 1]], axis=0)


def unwrap_tree(lefts, rights, writes):
    max_len = lefts.shape[1]
    l = np.concatenate([lefts[:, :, 0], lefts[:, :, 1]], axis=0).astype(np.int64)
    r = np.concatenate([rights[:, :, 0], rights[:, :, 1]], axis=0).astype(np.int64)
    w = np.concatenate([writes[:, :, 0], writes[:, :, 1]], axis=0).astype(np.int64)
    l = l - (l >= 200).astype(np.int64) * (200 - max_len)
    r = r - (r >= 200).astype(np.int64) * (200 - max_len)
    w = w - (w >= 201).astype(np.int64) * (201 - max_len)
    w_mask = (w >= 0).astype(np.int64)
    w = w + (w <= 0).astype(np.int64) * (2 * max_len)
    # Clamp degenerate / padded write indices (mask==0, or the w==0 remap which
    # the PyTorch code leaves out of range) into the per-batch trash row
    # 2*max_len-1 so the in-kernel one-hot scatter always targets a real row.
    w = np.minimum(w, 2 * max_len - 1)
    return (jnp.asarray(l, jnp.int32), jnp.asarray(r, jnp.int32),
            jnp.asarray(w, jnp.int32), jnp.asarray(w_mask, jnp.int32))


def golden_binary_tree_forward(sentences, left_nodes, right_nodes, write_nodes, p):
    x = unwrap_sentence_pair(sentences)                              # (2B, L)
    l, r, w, w_mask = unwrap_tree(left_nodes, right_nodes, write_nodes)
    # run_embed: table lookup stays in plain XLA (gather); the context encoder
    # matmul, identity reshapes / chunk-cat and eval-mode dropout are fused
    # into the single tree kernel.
    tok = jnp.take(p["embed"], jnp.asarray(x, jnp.int32), axis=0)    # (2B, L, WORD_DIM)
    return tree_pallas(tok, l, r, w, w_mask, p)


# ----------------------------- pure-JAX reference ----------------------------
def reference_forward(sentences, left_nodes, right_nodes, write_nodes, p):
    x = unwrap_sentence_pair(sentences)
    l, r, w, w_mask = unwrap_tree(left_nodes, right_nodes, write_nodes)
    tok = jnp.take(p["embed"], jnp.asarray(x, jnp.int32), axis=0)
    emb = (tok.reshape(-1, WORD_DIM) @ p["W_enc"] + p["b_enc"]).reshape(
        BATCH, SEQ_LEN, MODEL_DIM)

    d, size = MODEL_DIM, SIZE
    leaf = jnp.concatenate([emb, jnp.zeros_like(emb)], axis=1).reshape(
        BATCH * 2 * SEQ_LEN, d)
    base = jnp.arange(BATCH) * (2 * SEQ_LEN)

    def ln(xv, g, bb):
        mu = jnp.mean(xv, -1, keepdims=True)
        var = jnp.sum((xv - mu) ** 2, -1, keepdims=True) / (d - 1)
        return (xv - mu) / (jnp.sqrt(var) + LN_EPS) * g + bb

    def compose(left, right):
        ln_l = ln(left, p["g_l"], p["b_l"])
        ln_r = ln(right, p["g_r"], p["b_r"])
        gates = ln_l @ p["W_l"] + ln_r @ p["W_r"] + p["bias"]
        i_g = jax.nn.sigmoid(gates[:, :size])
        fl = jax.nn.sigmoid(gates[:, size:2 * size])
        fr = jax.nn.sigmoid(gates[:, 2 * size:3 * size])
        o = jax.nn.sigmoid(gates[:, 3 * size:4 * size])
        cell = jnp.tanh(gates[:, 4 * size:])
        c = fl * ln_l[:, size:] + fr * ln_r[:, size:] + i_g * cell
        h = o * jnp.tanh(c)
        return jnp.concatenate([h, c], axis=-1)

    state = compose(leaf[base + l[:, 0]], leaf[base + r[:, 0]])
    leaf = leaf.at[base + w[:, 0]].set(state)
    for i in range(1, MAX_DEPTH - 1):
        new = compose(leaf[base + l[:, i]], leaf[base + r[:, i]])
        leaf = leaf.at[base + w[:, i]].set(new)
        m = w_mask[:, i:i + 1].astype(jnp.float32)
        state = (1.0 - m) * state + m * new
    return state


# ----------------------------- synthetic inputs ------------------------------
def build_tree_columns(num_leaves):
    """Left-branching golden tree over `num_leaves` leaves, raw SPINN encoding
    (non-terminal reads encoded as 200+k, writes as 201+k, padding write = -1)."""
    l = np.zeros(MAX_DEPTH, np.int64)
    r = np.zeros(MAX_DEPTH, np.int64)
    w = np.zeros(MAX_DEPTH, np.int64)
    for i in range(MAX_DEPTH):
        if i == 0:
            ld, rd, wd = 0, 1, SEQ_LEN
        elif i <= num_leaves - 2:
            ld, rd, wd = SEQ_LEN + i - 1, i + 1, SEQ_LEN + i
        else:
            ld, rd, wd = 0, 1, None                      # padded step
        l[i] = ld if ld < SEQ_LEN else ld + (200 - MAX_DEPTH)
        r[i] = rd if rd < SEQ_LEN else rd + (200 - MAX_DEPTH)
        w[i] = -1 if wd is None else (wd if wd < SEQ_LEN else wd + (201 - MAX_DEPTH))
    return l, r, w


def make_params(key):
    ks = jax.random.split(key, 9)
    p = {
        "embed": jax.random.normal(ks[0], (VOCAB, WORD_DIM), jnp.float32) * 0.5,
        "W_enc": jax.random.normal(ks[1], (WORD_DIM, MODEL_DIM), jnp.float32)
                 / np.sqrt(WORD_DIM),
        "b_enc": jax.random.normal(ks[2], (MODEL_DIM,), jnp.float32) * 0.1,
        "g_l": 1.0 + 0.1 * jax.random.normal(ks[3], (1, MODEL_DIM), jnp.float32),
        "b_l": 0.1 * jax.random.normal(ks[4], (1, MODEL_DIM), jnp.float32),
        "g_r": 1.0 + 0.1 * jax.random.normal(ks[5], (1, MODEL_DIM), jnp.float32),
        "b_r": 0.1 * jax.random.normal(ks[6], (1, MODEL_DIM), jnp.float32),
        "W_l": jax.random.normal(ks[7], (MODEL_DIM, 5 * SIZE), jnp.float32)
               / np.sqrt(MODEL_DIM),
        "W_r": jax.random.normal(ks[8], (MODEL_DIM, 5 * SIZE), jnp.float32)
               / np.sqrt(MODEL_DIM),
    }
    p["bias"] = jnp.zeros((1, 5 * SIZE), jnp.float32) + 0.05
    return p


if __name__ == "__main__":
    key = jax.random.PRNGKey(0)
    pkey, skey = jax.random.split(key)
    params = make_params(pkey)

    sentences = np.asarray(
        jax.random.randint(skey, (B, SEQ_LEN, 2), 0, VOCAB), dtype=np.int64)

    # trees with different numbers of leaves to exercise the write mask
    leaves = {(0, 0): 8, (1, 0): 7, (0, 1): 8, (1, 1): 6}
    left_nodes = np.zeros((B, MAX_DEPTH, 2), np.int64)
    right_nodes = np.zeros((B, MAX_DEPTH, 2), np.int64)
    write_nodes = np.zeros((B, MAX_DEPTH, 2), np.int64)
    for b in range(B):
        for s in range(2):
            lc, rc, wc = build_tree_columns(leaves[(b, s)])
            left_nodes[b, :, s] = lc
            right_nodes[b, :, s] = rc
            write_nodes[b, :, s] = wc

    out = golden_binary_tree_forward(sentences, left_nodes, right_nodes,
                                     write_nodes, params)
    out = jax.block_until_ready(out)

    ref = reference_forward(sentences, left_nodes, right_nodes, write_nodes, params)
    ref = jax.block_until_ready(ref)

    np.testing.assert_allclose(np.asarray(out), np.asarray(ref),
                               rtol=1e-4, atol=1e-4)
    print("KERNEL_OK")
</pallas_src>

<mosaic_0001>
module attributes {stable_mosaic.version = 11 : i64} {
  func.func @_tree_kernel(%arg0: i32, %arg1: memref<4x8x4x1xi32, #tpu.memory_space<vmem>>, %arg2: memref<4x8x16xf32, #tpu.memory_space<vmem>>, %arg3: memref<16x32xf32, #tpu.memory_space<vmem>>, %arg4: memref<1x32xf32, #tpu.memory_space<vmem>>, %arg5: memref<1x32xf32, #tpu.memory_space<vmem>>, %arg6: memref<1x32xf32, #tpu.memory_space<vmem>>, %arg7: memref<1x32xf32, #tpu.memory_space<vmem>>, %arg8: memref<1x32xf32, #tpu.memory_space<vmem>>, %arg9: memref<32x80xf32, #tpu.memory_space<vmem>>, %arg10: memref<32x80xf32, #tpu.memory_space<vmem>>, %arg11: memref<1x80xf32, #tpu.memory_space<vmem>>, %arg12: memref<4x32xf32, #tpu.memory_space<vmem>>, %arg13: memref<4x16x32xf32, #tpu.memory_space<vmem>>, %arg14: memref<4x32xf32, #tpu.memory_space<vmem>>) attributes {dimension_semantics = [#tpu.dimension_semantics<arbitrary>], iteration_bounds = array<i64: 1>, scalar_prefetch = 0 : i64, scratch_operands = 2 : i64, tpu.core_type = #tpu.core_type<tc>, window_params = [{pipeline_mode = #tpu.pipeline_mode<synchronous>, transform_indices = @transform_0, window_bounds = array<i64: 4, 8, 4, 1>}, {pipeline_mode = #tpu.pipeline_mode<synchronous>, transform_indices = @transform_1, window_bounds = array<i64: 4, 8, 16>}, {pipeline_mode = #tpu.pipeline_mode<synchronous>, transform_indices = @transform_2, window_bounds = array<i64: 16, 32>}, {pipeline_mode = #tpu.pipeline_mode<synchronous>, transform_indices = @transform_3, window_bounds = array<i64: 1, 32>}, {pipeline_mode = #tpu.pipeline_mode<synchronous>, transform_indices = @transform_4, window_bounds = array<i64: 1, 32>}, {pipeline_mode = #tpu.pipeline_mode<synchronous>, transform_indices = @transform_5, window_bounds = array<i64: 1, 32>}, {pipeline_mode = #tpu.pipeline_mode<synchronous>, transform_indices = @transform_6, window_bounds = array<i64: 1, 32>}, {pipeline_mode = #tpu.pipeline_mode<synchronous>, transform_indices = @transform_7, window_bounds = array<i64: 1, 32>}, {pipeline_mode = #tpu.pipeline_mode<synchronous>, transform_indices = @transform_8, window_bounds = array<i64: 32, 80>}, {pipeline_mode = #tpu.pipeline_mode<synchronous>, transform_indices = @transform_9, window_bounds = array<i64: 32, 80>}, {pipeline_mode = #tpu.pipeline_mode<synchronous>, transform_indices = @transform_10, window_bounds = array<i64: 1, 80>}, {pipeline_mode = #tpu.pipeline_mode<synchronous>, transform_indices = @transform_11, window_bounds = array<i64: 4, 32>}]} {
    %c0 = arith.constant 0 : index
    %c0_0 = arith.constant 0 : index
    %c0_1 = arith.constant 0 : index
    %0 = vector.load %arg2[%c0, %c0_0, %c0_1] : memref<4x8x16xf32, #tpu.memory_space<vmem>>, vector<4x8x16xf32>
    %1 = vector.shape_cast %0 : vector<4x8x16xf32> to vector<32x16xf32>
    %c0_2 = arith.constant 0 : index
    %c0_3 = arith.constant 0 : index
    %2 = vector.load %arg3[%c0_2, %c0_3] : memref<16x32xf32, #tpu.memory_space<vmem>>, vector<16x32xf32>
    %cst = arith.constant dense<0.000000e+00> : vector<32x32xf32>
    %3 = tpu.matmul %1, %2, %cst {dimension_numbers = #tpu.dot_dimension_numbers<[1], [0], [0], [1], [0, 0, 1, 1], [], []>, precision = #tpu.contract_precision<fp32>} : vector<32x16xf32>, vector<16x32xf32>, vector<32x32xf32> -> vector<32x32xf32>
    %c0_4 = arith.constant 0 : index
    %c0_5 = arith.constant 0 : index
    %4 = vector.load %arg4[%c0_4, %c0_5] : memref<1x32xf32, #tpu.memory_space<vmem>>, vector<1x32xf32>
    %5 = vector.broadcast %4 : vector<1x32xf32> to vector<32x32xf32>
    %6 = arith.addf %3, %5 : vector<32x32xf32>
    %7 = vector.shape_cast %6 : vector<32x32xf32> to vector<4x8x32xf32>
    %c0_6 = arith.constant 0 : index
    %c0_7 = arith.constant 0 : index
    %c0_8 = arith.constant 0 : index
    %8 = vector.load %arg13[%c0_6, %c0_7, %c0_8] : memref<4x16x32xf32, #tpu.memory_space<vmem>>, vector<4x8x32xf32>
    tpu.vector_store %arg13[%c0_6, %c0_7, %c0_8], %7 {strides = array<i32>} : memref<4x16x32xf32, #tpu.memory_space<vmem>>, vector<4x8x32xf32>,
    %cst_9 = arith.constant 0.000000e+00 : f32
    %9 = vector.broadcast %cst_9 : f32 to vector<4x8x32xf32>
    %c0_10 = arith.constant 0 : index
    %c8 = arith.constant 8 : index
    %c0_11 = arith.constant 0 : index
    %10 = vector.load %arg13[%c0_10, %c8, %c0_11] : memref<4x16x32xf32, #tpu.memory_space<vmem>>, vector<4x8x32xf32>
    tpu.vector_store %arg13[%c0_10, %c8, %c0_11], %9 {strides = array<i32>} : memref<4x16x32xf32, #tpu.memory_space<vmem>>, vector<4x8x32xf32>,
    %c0_12 = arith.constant 0 : index
    %c0_13 = arith.constant 0 : index
    %11 = vector.load %arg5[%c0_12, %c0_13] : memref<1x32xf32, #tpu.memory_space<vmem>>, vector<1x32xf32>
    %c0_14 = arith.constant 0 : index
    %c0_15 = arith.constant 0 : index
    %12 = vector.load %arg6[%c0_14, %c0_15] : memref<1x32xf32, #tpu.memory_space<vmem>>, vector<1x32xf32>
    %c0_16 = arith.constant 0 : index
    %c0_17 = arith.constant 0 : index
    %13 = vector.load %arg7[%c0_16, %c0_17] : memref<1x32xf32, #tpu.memory_space<vmem>>, vector<1x32xf32>
    %c0_18 = arith.constant 0 : index
    %c0_19 = arith.constant 0 : index
    %14 = vector.load %arg8[%c0_18, %c0_19] : memref<1x32xf32, #tpu.memory_space<vmem>>, vector<1x32xf32>
    %c0_20 = arith.constant 0 : index
    %c0_21 = arith.constant 0 : index
    %15 = vector.load %arg9[%c0_20, %c0_21] : memref<32x80xf32, #tpu.memory_space<vmem>>, vector<32x80xf32>
    %c0_22 = arith.constant 0 : index
    %c0_23 = arith.constant 0 : index
    %16 = vector.load %arg10[%c0_22, %c0_23] : memref<32x80xf32, #tpu.memory_space<vmem>>, vector<32x80xf32>
    %c0_24 = arith.constant 0 : index
    %c0_25 = arith.constant 0 : index
    %17 = vector.load %arg11[%c0_24, %c0_25] : memref<1x80xf32, #tpu.memory_space<vmem>>, vector<1x80xf32>
    %18 = tpu.iota {dimensions = array<i32: 1>} : vector<4x16x1xi32>
    %c0_26 = arith.constant 0 : index
    %c0_27 = arith.constant 0 : index
    %c0_28 = arith.constant 0 : index
    %c0_29 = arith.constant 0 : index
    %19 = vector.load %arg1[%c0_26, %c0_27, %c0_28, %c0_29] : memref<4x8x4x1xi32, #tpu.memory_space<vmem>>, vector<1x1x4x1xi32>
    %20 = vector.shape_cast %19 : vector<1x1x4x1xi32> to vector<4x1xi32>
    %c1 = arith.constant 1 : index
    %c0_30 = arith.constant 0 : index
    %c0_31 = arith.constant 0 : index
    %c0_32 = arith.constant 0 : index
    %21 = vector.load %arg1[%c1, %c0_30, %c0_31, %c0_32] : memref<4x8x4x1xi32, #tpu.memory_space<vmem>>, vector<1x1x4x1xi32>
    %22 = vector.shape_cast %21 : vector<1x1x4x1xi32> to vector<4x1xi32>
    %c2 = arith.constant 2 : index
    %c0_33 = arith.constant 0 : index
    %c0_34 = arith.constant 0 : index
    %c0_35 = arith.constant 0 : index
    %23 = vector.load %arg1[%c2, %c0_33, %c0_34, %c0_35] : memref<4x8x4x1xi32, #tpu.memory_space<vmem>>, vector<1x1x4x1xi32>
    %24 = vector.shape_cast %23 : vector<1x1x4x1xi32> to vector<4x1xi32>
    %c0_36 = arith.constant 0 : index
    %c0_37 = arith.constant 0 : index
    %c0_38 = arith.constant 0 : index
    %25 = vector.load %arg13[%c0_36, %c0_37, %c0_38] : memref<4x16x32xf32, #tpu.memory_space<vmem>>, vector<4x16x32xf32>
    %26 = vector.shape_cast %20 : vector<4x1xi32> to vector<4x1x1xi32>
    %27 = vector.broadcast %26 : vector<4x1x1xi32> to vector<4x16x1xi32>
    %28 = arith.cmpi eq, %18, %27 : vector<4x16x1xi32>
    %29 = vector.shape_cast %22 : vector<4x1xi32> to vector<4x1x1xi32>
    %30 = vector.broadcast %29 : vector<4x1x1xi32> to vector<4x16x1xi32>
    %31 = arith.cmpi eq, %18, %30 : vector<4x16x1xi32>
    %cst_39 = arith.constant 0.000000e+00 : f32
    %32 = vector.shape_cast %28 : vector<4x16x1xi1> to vector<4x16x1xi1>
    %33 = vector.broadcast %32 : vector<4x16x1xi1> to vector<4x16x32xi1>
    %34 = vector.broadcast %cst_39 : f32 to vector<4x16x32xf32>
    %35 = arith.select %33, %25, %34 : vector<4x16x32xi1>, vector<4x16x32xf32>
    %cst_40 = arith.constant dense<0.000000e+00> : vector<4x32xf32>
    %36 = vector.multi_reduction <add>, %35, %cst_40 [1] : vector<4x16x32xf32> to vector<4x32xf32>
    %cst_41 = arith.constant 0.000000e+00 : f32
    %37 = vector.shape_cast %31 : vector<4x16x1xi1> to vector<4x16x1xi1>
    %38 = vector.broadcast %37 : vector<4x16x1xi1> to vector<4x16x32xi1>
    %39 = vector.broadcast %cst_41 : f32 to vector<4x16x32xf32>
    %40 = arith.select %38, %25, %39 : vector<4x16x32xi1>, vector<4x16x32xf32>
    %cst_42 = arith.constant dense<0.000000e+00> : vector<4x32xf32>
    %41 = vector.multi_reduction <add>, %40, %cst_42 [1] : vector<4x16x32xf32> to vector<4x32xf32>
    %cst_43 = arith.constant dense<0.000000e+00> : vector<4xf32>
    %42 = vector.multi_reduction <add>, %36, %cst_43 [1] : vector<4x32xf32> to vector<4xf32>
    %43 = vector.shape_cast %42 : vector<4xf32> to vector<4x1xf32>
    %cst_44 = arith.constant 3.200000e+01 : f32
    %44 = vector.broadcast %cst_44 : f32 to vector<4x1xf32>
    %45 = arith.divf %43, %44 : vector<4x1xf32>
    %46 = vector.broadcast %45 : vector<4x1xf32> to vector<4x32xf32>
    %47 = arith.subf %36, %46 : vector<4x32xf32>
    %48 = arith.mulf %47, %47 : vector<4x32xf32>
    %cst_45 = arith.constant dense<0.000000e+00> : vector<4xf32>
    %49 = vector.multi_reduction <add>, %48, %cst_45 [1] : vector<4x32xf32> to vector<4xf32>
    %50 = vector.shape_cast %49 : vector<4xf32> to vector<4x1xf32>
    %cst_46 = arith.constant 3.100000e+01 : f32
    %51 = vector.broadcast %cst_46 : f32 to vector<4x1xf32>
    %52 = arith.divf %50, %51 : vector<4x1xf32>
    %53 = math.sqrt %52 : vector<4x1xf32>
    %cst_47 = arith.constant 9.99999997E-7 : f32
    %54 = vector.broadcast %cst_47 : f32 to vector<4x1xf32>
    %55 = arith.addf %53, %54 : vector<4x1xf32>
    %56 = tpu.reciprocal %55 : vector<4x1xf32> -> vector<4x1xf32>
    %57 = vector.broadcast %56 : vector<4x1xf32> to vector<4x32xf32>
    %58 = arith.mulf %47, %57 : vector<4x32xf32>
    %59 = vector.broadcast %11 : vector<1x32xf32> to vector<4x32xf32>
    %60 = arith.mulf %58, %59 : vector<4x32xf32>
    %61 = vector.broadcast %12 : vector<1x32xf32> to vector<4x32xf32>
    %62 = arith.addf %60, %61 : vector<4x32xf32>
    %cst_48 = arith.constant dense<0.000000e+00> : vector<4xf32>
    %63 = vector.multi_reduction <add>, %41, %cst_48 [1] : vector<4x32xf32> to vector<4xf32>
    %64 = vector.shape_cast %63 : vector<4xf32> to vector<4x1xf32>
    %cst_49 = arith.constant 3.200000e+01 : f32
    %65 = vector.broadcast %cst_49 : f32 to vector<4x1xf32>
    %66 = arith.divf %64, %65 : vector<4x1xf32>
    %67 = vector.broadcast %66 : vector<4x1xf32> to vector<4x32xf32>
    %68 = arith.subf %41, %67 : vector<4x32xf32>
    %69 = arith.mulf %68, %68 : vector<4x32xf32>
    %cst_50 = arith.constant dense<0.000000e+00> : vector<4xf32>
    %70 = vector.multi_reduction <add>, %69, %cst_50 [1] : vector<4x32xf32> to vector<4xf32>
    %71 = vector.shape_cast %70 : vector<4xf32> to vector<4x1xf32>
    %cst_51 = arith.constant 3.100000e+01 : f32
    %72 = vector.broadcast %cst_51 : f32 to vector<4x1xf32>
    %73 = arith.divf %71, %72 : vector<4x1xf32>
    %74 = math.sqrt %73 : vector<4x1xf32>
    %cst_52 = arith.constant 9.99999997E-7 : f32
    %75 = vector.broadcast %cst_52 : f32 to vector<4x1xf32>
    %76 = arith.addf %74, %75 : vector<4x1xf32>
    %77 = tpu.reciprocal %76 : vector<4x1xf32> -> vector<4x1xf32>
    %78 = vector.broadcast %77 : vector<4x1xf32> to vector<4x32xf32>
    %79 = arith.mulf %68, %78 : vector<4x32xf32>
    %80 = vector.broadcast %13 : vector<1x32xf32> to vector<4x32xf32>
    %81 = arith.mulf %79, %80 : vector<4x32xf32>
    %82 = vector.broadcast %14 : vector<1x32xf32> to vector<4x32xf32>
    %83 = arith.addf %81, %82 : vector<4x32xf32>
    %cst_53 = arith.constant dense<0.000000e+00> : vector<4x80xf32>
    %84 = tpu.matmul %62, %15, %cst_53 {dimension_numbers = #tpu.dot_dimension_numbers<[1], [0], [0], [1], [0, 0, 1, 1], [], []>, precision = #tpu.contract_precision<fp32>} : vector<4x32xf32>, vector<32x80xf32>, vector<4x80xf32> -> vector<4x80xf32>
    %cst_54 = arith.constant dense<0.000000e+00> : vector<4x80xf32>
    %85 = tpu.matmul %83, %16, %cst_54 {dimension_numbers = #tpu.dot_dimension_numbers<[1], [0], [0], [1], [0, 0, 1, 1], [], []>, precision = #tpu.contract_precision<fp32>} : vector<4x32xf32>, vector<32x80xf32>, vector<4x80xf32> -> vector<4x80xf32>
    %86 = arith.addf %84, %85 : vector<4x80xf32>
    %87 = vector.broadcast %17 : vector<1x80xf32> to vector<4x80xf32>
    %88 = arith.addf %86, %87 : vector<4x80xf32>
    %89 = vector.extract_strided_slice %88 {offsets = [0, 0], sizes = [4, 16], strides = [1, 1]} : vector<4x80xf32> to vector<4x16xf32>
    %90 = arith.negf %89 : vector<4x16xf32>
    %91 = math.exp %90 : vector<4x16xf32>
    %cst_55 = arith.constant 1.000000e+00 : f32
    %92 = vector.broadcast %cst_55 : f32 to vector<4x16xf32>
    %93 = arith.addf %92, %91 : vector<4x16xf32>
    %94 = arith.divf %92, %93 : vector<4x16xf32>
    %95 = vector.extract_strided_slice %88 {offsets = [0, 16], sizes = [4, 16], strides = [1, 1]} : vector<4x80xf32> to vector<4x16xf32>
    %96 = arith.negf %95 : vector<4x16xf32>
    %97 = math.exp %96 : vector<4x16xf32>
    %cst_56 = arith.constant 1.000000e+00 : f32
    %98 = vector.broadcast %cst_56 : f32 to vector<4x16xf32>
    %99 = arith.addf %98, %97 : vector<4x16xf32>
    %100 = arith.divf %98, %99 : vector<4x16xf32>
    %101 = vector.extract_strided_slice %88 {offsets = [0, 32], sizes = [4, 16], strides = [1, 1]} : vector<4x80xf32> to vector<4x16xf32>
    %102 = arith.negf %101 : vector<4x16xf32>
    %103 = math.exp %102 : vector<4x16xf32>
    %cst_57 = arith.constant 1.000000e+00 : f32
    %104 = vector.broadcast %cst_57 : f32 to vector<4x16xf32>
    %105 = arith.addf %104, %103 : vector<4x16xf32>
    %106 = arith.divf %104, %105 : vector<4x16xf32>
    %107 = vector.extract_strided_slice %88 {offsets = [0, 48], sizes = [4, 16], strides = [1, 1]} : vector<4x80xf32> to vector<4x16xf32>
    %108 = arith.negf %107 : vector<4x16xf32>
    %109 = math.exp %108 : vector<4x16xf32>
    %cst_58 = arith.constant 1.000000e+00 : f32
    %110 = vector.broadcast %cst_58 : f32 to vector<4x16xf32>
    %111 = arith.addf %110, %109 : vector<4x16xf32>
    %112 = arith.divf %110, %111 : vector<4x16xf32>
    %113 = vector.extract_strided_slice %88 {offsets = [0, 64], sizes = [4, 16], strides = [1, 1]} : vector<4x80xf32> to vector<4x16xf32>
    %114 = math.tanh %113 : vector<4x16xf32>
    %115 = vector.extract_strided_slice %62 {offsets = [0, 16], sizes = [4, 16], strides = [1, 1]} : vector<4x32xf32> to vector<4x16xf32>
    %116 = arith.mulf %100, %115 : vector<4x16xf32>
    %117 = vector.extract_strided_slice %83 {offsets = [0, 16], sizes = [4, 16], strides = [1, 1]} : vector<4x32xf32> to vector<4x16xf32>
    %118 = arith.mulf %106, %117 : vector<4x16xf32>
    %119 = arith.addf %116, %118 : vector<4x16xf32>
    %120 = arith.mulf %94, %114 : vector<4x16xf32>
    %121 = arith.addf %119, %120 : vector<4x16xf32>
    %122 = math.tanh %121 : vector<4x16xf32>
    %123 = arith.mulf %112, %122 : vector<4x16xf32>
    %c0_59 = arith.constant 0 : index
    %c0_60 = arith.constant 0 : index
    %124 = vector.load %arg14[%c0_59, %c0_60] : memref<4x32xf32, #tpu.memory_space<vmem>>, vector<4x16xf32>
    tpu.vector_store %arg14[%c0_59, %c0_60], %123 {strides = array<i32>} : memref<4x32xf32, #tpu.memory_space<vmem>>, vector<4x16xf32>,
    %c0_61 = arith.constant 0 : index
    %c16 = arith.constant 16 : index
    %125 = vector.load %arg14[%c0_61, %c16] : memref<4x32xf32, #tpu.memory_space<vmem>>, vector<4x16xf32>
    tpu.vector_store %arg14[%c0_61, %c16], %121 {strides = array<i32>} : memref<4x32xf32, #tpu.memory_space<vmem>>, vector<4x16xf32>,
    %c0_62 = arith.constant 0 : index
    %c0_63 = arith.constant 0 : index
    %126 = vector.load %arg14[%c0_62, %c0_63] : memref<4x32xf32, #tpu.memory_space<vmem>>, vector<4x32xf32>
    %127 = vector.shape_cast %24 : vector<4x1xi32> to vector<4x1x1xi32>
    %128 = vector.broadcast %127 : vector<4x1x1xi32> to vector<4x16x1xi32>
    %129 = arith.cmpi eq, %18, %128 : vector<4x16x1xi32>
    %130 = vector.shape_cast %126 : vector<4x32xf32> to vector<4x1x32xf32>
    %131 = vector.shape_cast %129 : vector<4x16x1xi1> to vector<4x16x1xi1>
    %132 = vector.broadcast %131 : vector<4x16x1xi1> to vector<4x16x32xi1>
    %133 = vector.shape_cast %130 : vector<4x1x32xf32> to vector<4x1x32xf32>
    %134 = vector.broadcast %133 : vector<4x1x32xf32> to vector<4x16x32xf32>
    %135 = arith.select %132, %134, %25 : vector<4x16x32xi1>, vector<4x16x32xf32>
    %c0_64 = arith.constant 0 : index
    %c0_65 = arith.constant 0 : index
    %c0_66 = arith.constant 0 : index
    %136 = vector.load %arg13[%c0_64, %c0_65, %c0_66] : memref<4x16x32xf32, #tpu.memory_space<vmem>>, vector<4x16x32xf32>
    tpu.vector_store %arg13[%c0_64, %c0_65, %c0_66], %135 {strides = array<i32>} : memref<4x16x32xf32, #tpu.memory_space<vmem>>, vector<4x16x32xf32>,
    %c0_67 = arith.constant 0 : index
    %c1_68 = arith.constant 1 : index
    %c0_69 = arith.constant 0 : index
    %c0_70 = arith.constant 0 : index
    %137 = vector.load %arg1[%c0_67, %c1_68, %c0_69, %c0_70] : memref<4x8x4x1xi32, #tpu.memory_space<vmem>>, vector<1x1x4x1xi32>
    %138 = vector.shape_cast %137 : vector<1x1x4x1xi32> to vector<4x1xi32>
    %c1_71 = arith.constant 1 : index
    %c1_72 = arith.constant 1 : index
    %c0_73 = arith.constant 0 : index
    %c0_74 = arith.constant 0 : index
    %139 = vector.load %arg1[%c1_71, %c1_72, %c0_73, %c0_74] : memref<4x8x4x1xi32, #tpu.memory_space<vmem>>, vector<1x1x4x1xi32>
    %140 = vector.shape_cast %139 : vector<1x1x4x1xi32> to vector<4x1xi32>
    %c2_75 = arith.constant 2 : index
    %c1_76 = arith.constant 1 : index
    %c0_77 = arith.constant 0 : index
    %c0_78 = arith.constant 0 : index
    %141 = vector.load %arg1[%c2_75, %c1_76, %c0_77, %c0_78] : memref<4x8x4x1xi32, #tpu.memory_space<vmem>>, vector<1x1x4x1xi32>
    %142 = vector.shape_cast %141 : vector<1x1x4x1xi32> to vector<4x1xi32>
    %c3 = arith.constant 3 : index
    %c1_79 = arith.constant 1 : index
    %c0_80 = arith.constant 0 : index
    %c0_81 = arith.constant 0 : index
    %143 = vector.load %arg1[%c3, %c1_79, %c0_80, %c0_81] : memref<4x8x4x1xi32, #tpu.memory_space<vmem>>, vector<1x1x4x1xi32>
    %144 = vector.shape_cast %143 : vector<1x1x4x1xi32> to vector<4x1xi32>
    %c0_82 = arith.constant 0 : index
    %c0_83 = arith.constant 0 : index
    %c0_84 = arith.constant 0 : index
    %145 = vector.load %arg13[%c0_82, %c0_83, %c0_84] : memref<4x16x32xf32, #tpu.memory_space<vmem>>, vector<4x16x32xf32>
    %146 = vector.shape_cast %138 : vector<4x1xi32> to vector<4x1x1xi32>
    %147 = vector.broadcast %146 : vector<4x1x1xi32> to vector<4x16x1xi32>
    %148 = arith.cmpi eq, %18, %147 : vector<4x16x1xi32>
    %149 = vector.shape_cast %140 : vector<4x1xi32> to vector<4x1x1xi32>
    %150 = vector.broadcast %149 : vector<4x1x1xi32> to vector<4x16x1xi32>
    %151 = arith.cmpi eq, %18, %150 : vector<4x16x1xi32>
    %cst_85 = arith.constant 0.000000e+00 : f32
    %152 = vector.shape_cast %148 : vector<4x16x1xi1> to vector<4x16x1xi1>
    %153 = vector.broadcast %152 : vector<4x16x1xi1> to vector<4x16x32xi1>
    %154 = vector.broadcast %cst_85 : f32 to vector<4x16x32xf32>
    %155 = arith.select %153, %145, %154 : vector<4x16x32xi1>, vector<4x16x32xf32>
    %cst_86 = arith.constant dense<0.000000e+00> : vector<4x32xf32>
    %156 = vector.multi_reduction <add>, %155, %cst_86 [1] : vector<4x16x32xf32> to vector<4x32xf32>
    %cst_87 = arith.constant 0.000000e+00 : f32
    %157 = vector.shape_cast %151 : vector<4x16x1xi1> to vector<4x16x1xi1>
    %158 = vector.broadcast %157 : vector<4x16x1xi1> to vector<4x16x32xi1>
    %159 = vector.broadcast %cst_87 : f32 to vector<4x16x32xf32>
    %160 = arith.select %158, %145, %159 : vector<4x16x32xi1>, vector<4x16x32xf32>
    %cst_88 = arith.constant dense<0.000000e+00> : vector<4x32xf32>
    %161 = vector.multi_reduction <add>, %160, %cst_88 [1] : vector<4x16x32xf32> to vector<4x32xf32>
    %cst_89 = arith.constant dense<0.000000e+00> : vector<4xf32>
    %162 = vector.multi_reduction <add>, %156, %cst_89 [1] : vector<4x32xf32> to vector<4xf32>
    %163 = vector.shape_cast %162 : vector<4xf32> to vector<4x1xf32>
    %cst_90 = arith.constant 3.200000e+01 : f32
    %164 = vector.broadcast %cst_90 : f32 to vector<4x1xf32>
    %165 = arith.divf %163, %164 : vector<4x1xf32>
    %166 = vector.broadcast %165 : vector<4x1xf32> to vector<4x32xf32>
    %167 = arith.subf %156, %166 : vector<4x32xf32>
    %168 = arith.mulf %167, %167 : vector<4x32xf32>
    %cst_91 = arith.constant dense<0.000000e+00> : vector<4xf32>
    %169 = vector.multi_reduction <add>, %168, %cst_91 [1] : vector<4x32xf32> to vector<4xf32>
    %170 = vector.shape_cast %169 : vector<4xf32> to vector<4x1xf32>
    %cst_92 = arith.constant 3.100000e+01 : f32
    %171 = vector.broadcast %cst_92 : f32 to vector<4x1xf32>
    %172 = arith.divf %170, %171 : vector<4x1xf32>
    %173 = math.sqrt %172 : vector<4x1xf32>
    %cst_93 = arith.constant 9.99999997E-7 : f32
    %174 = vector.broadcast %cst_93 : f32 to vector<4x1xf32>
    %175 = arith.addf %173, %174 : vector<4x1xf32>
    %176 = tpu.reciprocal %175 : vector<4x1xf32> -> vector<4x1xf32>
    %177 = vector.broadcast %176 : vector<4x1xf32> to vector<4x32xf32>
    %178 = arith.mulf %167, %177 : vector<4x32xf32>
    %179 = vector.broadcast %11 : vector<1x32xf32> to vector<4x32xf32>
    %180 = arith.mulf %178, %179 : vector<4x32xf32>
    %181 = vector.broadcast %12 : vector<1x32xf32> to vector<4x32xf32>
    %182 = arith.addf %180, %181 : vector<4x32xf32>
    %cst_94 = arith.constant dense<0.000000e+00> : vector<4xf32>
    %183 = vector.multi_reduction <add>, %161, %cst_94 [1] : vector<4x32xf32> to vector<4xf32>
    %184 = vector.shape_cast %183 : vector<4xf32> to vector<4x1xf32>
    %cst_95 = arith.constant 3.200000e+01 : f32
    %185 = vector.broadcast %cst_95 : f32 to vector<4x1xf32>
    %186 = arith.divf %184, %185 : vector<4x1xf32>
    %187 = vector.broadcast %186 : vector<4x1xf32> to vector<4x32xf32>
    %188 = arith.subf %161, %187 : vector<4x32xf32>
    %189 = arith.mulf %188, %188 : vector<4x32xf32>
    %cst_96 = arith.constant dense<0.000000e+00> : vector<4xf32>
    %190 = vector.multi_reduction <add>, %189, %cst_96 [1] : vector<4x32xf32> to vector<4xf32>
    %191 = vector.shape_cast %190 : vector<4xf32> to vector<4x1xf32>
    %cst_97 = arith.constant 3.100000e+01 : f32
    %192 = vector.broadcast %cst_97 : f32 to vector<4x1xf32>
    %193 = arith.divf %191, %192 : vector<4x1xf32>
    %194 = math.sqrt %193 : vector<4x1xf32>
    %cst_98 = arith.constant 9.99999997E-7 : f32
    %195 = vector.broadcast %cst_98 : f32 to vector<4x1xf32>
    %196 = arith.addf %194, %195 : vector<4x1xf32>
    %197 = tpu.reciprocal %196 : vector<4x1xf32> -> vector<4x1xf32>
    %198 = vector.broadcast %197 : vector<4x1xf32> to vector<4x32xf32>
    %199 = arith.mulf %188, %198 : vector<4x32xf32>
    %200 = vector.broadcast %13 : vector<1x32xf32> to vector<4x32xf32>
    %201 = arith.mulf %199, %200 : vector<4x32xf32>
    %202 = vector.broadcast %14 : vector<1x32xf32> to vector<4x32xf32>
    %203 = arith.addf %201, %202 : vector<4x32xf32>
    %cst_99 = arith.constant dense<0.000000e+00> : vector<4x80xf32>
    %204 = tpu.matmul %182, %15, %cst_99 {dimension_numbers = #tpu.dot_dimension_numbers<[1], [0], [0], [1], [0, 0, 1, 1], [], []>, precision = #tpu.contract_precision<fp32>} : vector<4x32xf32>, vector<32x80xf32>, vector<4x80xf32> -> vector<4x80xf32>
    %cst_100 = arith.constant dense<0.000000e+00> : vector<4x80xf32>
    %205 = tpu.matmul %203, %16, %cst_100 {dimension_numbers = #tpu.dot_dimension_numbers<[1], [0], [0], [1], [0, 0, 1, 1], [], []>, precision = #tpu.contract_precision<fp32>} : vector<4x32xf32>, vector<32x80xf32>, vector<4x80xf32> -> vector<4x80xf32>
    %206 = arith.addf %204, %205 : vector<4x80xf32>
    %207 = vector.broadcast %17 : vector<1x80xf32> to vector<4x80xf32>
    %208 = arith.addf %206, %207 : vector<4x80xf32>
    %209 = vector.extract_strided_slice %208 {offsets = [0, 0], sizes = [4, 16], strides = [1, 1]} : vector<4x80xf32> to vector<4x16xf32>
    %210 = arith.negf %209 : vector<4x16xf32>
    %211 = math.exp %210 : vector<4x16xf32>
    %cst_101 = arith.constant 1.000000e+00 : f32
    %212 = vector.broadcast %cst_101 : f32 to vector<4x16xf32>
    %213 = arith.addf %212, %211 : vector<4x16xf32>
    %214 = arith.divf %212, %213 : vector<4x16xf32>
    %215 = vector.extract_strided_slice %208 {offsets = [0, 16], sizes = [4, 16], strides = [1, 1]} : vector<4x80xf32> to vector<4x16xf32>
    %216 = arith.negf %215 : vector<4x16xf32>
    %217 = math.exp %216 : vector<4x16xf32>
    %cst_102 = arith.constant 1.000000e+00 : f32
    %218 = vector.broadcast %cst_102 : f32 to vector<4x16xf32>
    %219 = arith.addf %218, %217 : vector<4x16xf32>
    %220 = arith.divf %218, %219 : vector<4x16xf32>
    %221 = vector.extract_strided_slice %208 {offsets = [0, 32], sizes = [4, 16], strides = [1, 1]} : vector<4x80xf32> to vector<4x16xf32>
    %222 = arith.negf %221 : vector<4x16xf32>
    %223 = math.exp %222 : vector<4x16xf32>
    %cst_103 = arith.constant 1.000000e+00 : f32
    %224 = vector.broadcast %cst_103 : f32 to vector<4x16xf32>
    %225 = arith.addf %224, %223 : vector<4x16xf32>
    %226 = arith.divf %224, %225 : vector<4x16xf32>
    %227 = vector.extract_strided_slice %208 {offsets = [0, 48], sizes = [4, 16], strides = [1, 1]} : vector<4x80xf32> to vector<4x16xf32>
    %228 = arith.negf %227 : vector<4x16xf32>
    %229 = math.exp %228 : vector<4x16xf32>
    %cst_104 = arith.constant 1.000000e+00 : f32
    %230 = vector.broadcast %cst_104 : f32 to vector<4x16xf32>
    %231 = arith.addf %230, %229 : vector<4x16xf32>
    %232 = arith.divf %230, %231 : vector<4x16xf32>
    %233 = vector.extract_strided_slice %208 {offsets = [0, 64], sizes = [4, 16], strides = [1, 1]} : vector<4x80xf32> to vector<4x16xf32>
    %234 = math.tanh %233 : vector<4x16xf32>
    %235 = vector.extract_strided_slice %182 {offsets = [0, 16], sizes = [4, 16], strides = [1, 1]} : vector<4x32xf32> to vector<4x16xf32>
    %236 = arith.mulf %220, %235 : vector<4x16xf32>
    %237 = vector.extract_strided_slice %203 {offsets = [0, 16], sizes = [4, 16], strides = [1, 1]} : vector<4x32xf32> to vector<4x16xf32>
    %238 = arith.mulf %226, %237 : vector<4x16xf32>
    %239 = arith.addf %236, %238 : vector<4x16xf32>
    %240 = arith.mulf %214, %234 : vector<4x16xf32>
    %241 = arith.addf %239, %240 : vector<4x16xf32>
    %242 = math.tanh %241 : vector<4x16xf32>
    %243 = arith.mulf %232, %242 : vector<4x16xf32>
    %c0_105 = arith.constant 0 : index
    %c0_106 = arith.constant 0 : index
    %244 = vector.load %arg14[%c0_105, %c0_106] : memref<4x32xf32, #tpu.memory_space<vmem>>, vector<4x16xf32>
    tpu.vector_store %arg14[%c0_105, %c0_106], %243 {strides = array<i32>} : memref<4x32xf32, #tpu.memory_space<vmem>>, vector<4x16xf32>,
    %c0_107 = arith.constant 0 : index
    %c16_108 = arith.constant 16 : index
    %245 = vector.load %arg14[%c0_107, %c16_108] : memref<4x32xf32, #tpu.memory_space<vmem>>, vector<4x16xf32>
    tpu.vector_store %arg14[%c0_107, %c16_108], %241 {strides = array<i32>} : memref<4x32xf32, #tpu.memory_space<vmem>>, vector<4x16xf32>,
    %c0_109 = arith.constant 0 : index
    %c0_110 = arith.constant 0 : index
    %246 = vector.load %arg14[%c0_109, %c0_110] : memref<4x32xf32, #tpu.memory_space<vmem>>, vector<4x32xf32>
    %247 = vector.shape_cast %142 : vector<4x1xi32> to vector<4x1x1xi32>
    %248 = vector.broadcast %247 : vector<4x1x1xi32> to vector<4x16x1xi32>
    %249 = arith.cmpi eq, %18, %248 : vector<4x16x1xi32>
    %250 = vector.shape_cast %246 : vector<4x32xf32> to vector<4x1x32xf32>
    %251 = vector.shape_cast %249 : vector<4x16x1xi1> to vector<4x16x1xi1>
    %252 = vector.broadcast %251 : vector<4x16x1xi1> to vector<4x16x32xi1>
    %253 = vector.shape_cast %250 : vector<4x1x32xf32> to vector<4x1x32xf32>
    %254 = vector.broadcast %253 : vector<4x1x32xf32> to vector<4x16x32xf32>
    %255 = arith.select %252, %254, %145 : vector<4x16x32xi1>, vector<4x16x32xf32>
    %c0_111 = arith.constant 0 : index
    %c0_112 = arith.constant 0 : index
    %c0_113 = arith.constant 0 : index
    %256 = vector.load %arg13[%c0_111, %c0_112, %c0_113] : memref<4x16x32xf32, #tpu.memory_space<vmem>>, vector<4x16x32xf32>
    tpu.vector_store %arg13[%c0_111, %c0_112, %c0_113], %255 {strides = array<i32>} : memref<4x16x32xf32, #tpu.memory_space<vmem>>, vector<4x16x32xf32>,
    %c0_i32 = arith.constant 0 : i32
    %257 = vector.broadcast %c0_i32 : i32 to vector<4x1xi32>
    %258 = arith.cmpi ne, %144, %257 : vector<4x1xi32>
    %259 = vector.shape_cast %258 : vector<4x1xi1> to vector<4x1xi1>
    %260 = vector.broadcast %259 : vector<4x1xi1> to vector<4x32xi1>
    %261 = arith.select %260, %246, %126 : vector<4x32xi1>, vector<4x32xf32>
    %c0_114 = arith.constant 0 : index
    %c2_115 = arith.constant 2 : index
    %c0_116 = arith.constant 0 : index
    %c0_117 = arith.constant 0 : index
    %262 = vector.load %arg1[%c0_114, %c2_115, %c0_116, %c0_117] : memref<4x8x4x1xi32, #tpu.memory_space<vmem>>, vector<1x1x4x1xi32>
    %263 = vector.shape_cast %262 : vector<1x1x4x1xi32> to vector<4x1xi32>
    %c1_118 = arith.constant 1 : index
    %c2_119 = arith.constant 2 : index
    %c0_120 = arith.constant 0 : index
    %c0_121 = arith.constant 0 : index
    %264 = vector.load %arg1[%c1_118, %c2_119, %c0_120, %c0_121] : memref<4x8x4x1xi32, #tpu.memory_space<vmem>>, vector<1x1x4x1xi32>
    %265 = vector.shape_cast %264 : vector<1x1x4x1xi32> to vector<4x1xi32>
    %c2_122 = arith.constant 2 : index
    %c2_123 = arith.constant 2 : index
    %c0_124 = arith.constant 0 : index
    %c0_125 = arith.constant 0 : index
    %266 = vector.load %arg1[%c2_122, %c2_123, %c0_124, %c0_125] : memref<4x8x4x1xi32, #tpu.memory_space<vmem>>, vector<1x1x4x1xi32>
    %267 = vector.shape_cast %266 : vector<1x1x4x1xi32> to vector<4x1xi32>
    %c3_126 = arith.constant 3 : index
    %c2_127 = arith.constant 2 : index
    %c0_128 = arith.constant 0 : index
    %c0_129 = arith.constant 0 : index
    %268 = vector.load %arg1[%c3_126, %c2_127, %c0_128, %c0_129] : memref<4x8x4x1xi32, #tpu.memory_space<vmem>>, vector<1x1x4x1xi32>
    %269 = vector.shape_cast %268 : vector<1x1x4x1xi32> to vector<4x1xi32>
    %c0_130 = arith.constant 0 : index
    %c0_131 = arith.constant 0 : index
    %c0_132 = arith.constant 0 : index
    %270 = vector.load %arg13[%c0_130, %c0_131, %c0_132] : memref<4x16x32xf32, #tpu.memory_space<vmem>>, vector<4x16x32xf32>
    %271 = vector.shape_cast %263 : vector<4x1xi32> to vector<4x1x1xi32>
    %272 = vector.broadcast %271 : vector<4x1x1xi32> to vector<4x16x1xi32>
    %273 = arith.cmpi eq, %18, %272 : vector<4x16x1xi32>
    %274 = vector.shape_cast %265 : vector<4x1xi32> to vector<4x1x1xi32>
    %275 = vector.broadcast %274 : vector<4x1x1xi32> to vector<4x16x1xi32>
    %276 = arith.cmpi eq, %18, %275 : vector<4x16x1xi32>
    %cst_133 = arith.constant 0.000000e+00 : f32
    %277 = vector.shape_cast %273 : vector<4x16x1xi1> to vector<4x16x1xi1>
    %278 = vector.broadcast %277 : vector<4x16x1xi1> to vector<4x16x32xi1>
    %279 = vector.broadcast %cst_133 : f32 to vector<4x16x32xf32>
    %280 = arith.select %278, %270, %279 : vector<4x16x32xi1>, vector<4x16x32xf32>
    %cst_134 = arith.constant dense<0.000000e+00> : vector<4x32xf32>
    %281 = vector.multi_reduction <add>, %280, %cst_134 [1] : vector<4x16x32xf32> to vector<4x32xf32>
    %cst_135 = arith.constant 0.000000e+00 : f32
    %282 = vector.shape_cast %276 : vector<4x16x1xi1> to vector<4x16x1xi1>
    %283 = vector.broadcast %282 : vector<4x16x1xi1> to vector<4x16x32xi1>
    %284 = vector.broadcast %cst_135 : f32 to vector<4x16x32xf32>
    %285 = arith.select %283, %270, %284 : vector<4x16x32xi1>, vector<4x16x32xf32>
    %cst_136 = arith.constant dense<0.000000e+00> : vector<4x32xf32>
    %286 = vector.multi_reduction <add>, %285, %cst_136 [1] : vector<4x16x32xf32> to vector<4x32xf32>
    %cst_137 = arith.constant dense<0.000000e+00> : vector<4xf32>
    %287 = vector.multi_reduction <add>, %281, %cst_137 [1] : vector<4x32xf32> to vector<4xf32>
    %288 = vector.shape_cast %287 : vector<4xf32> to vector<4x1xf32>
    %cst_138 = arith.constant 3.200000e+01 : f32
    %289 = vector.broadcast %cst_138 : f32 to vector<4x1xf32>
    %290 = arith.divf %288, %289 : vector<4x1xf32>
    %291 = vector.broadcast %290 : vector<4x1xf32> to vector<4x32xf32>
    %292 = arith.subf %281, %291 : vector<4x32xf32>
    %293 = arith.mulf %292, %292 : vector<4x32xf32>
    %cst_139 = arith.constant dense<0.000000e+00> : vector<4xf32>
    %294 = vector.multi_reduction <add>, %293, %cst_139 [1] : vector<4x32xf32> to vector<4xf32>
    %295 = vector.shape_cast %294 : vector<4xf32> to vector<4x1xf32>
    %cst_140 = arith.constant 3.100000e+01 : f32
    %296 = vector.broadcast %cst_140 : f32 to vector<4x1xf32>
    %297 = arith.divf %295, %296 : vector<4x1xf32>
    %298 = math.sqrt %297 : vector<4x1xf32>
    %cst_141 = arith.constant 9.99999997E-7 : f32
    %299 = vector.broadcast %cst_141 : f32 to vector<4x1xf32>
    %300 = arith.addf %298, %299 : vector<4x1xf32>
    %301 = tpu.reciprocal %300 : vector<4x1xf32> -> vector<4x1xf32>
    %302 = vector.broadcast %301 : vector<4x1xf32> to vector<4x32xf32>
    %303 = arith.mulf %292, %302 : vector<4x32xf32>
    %304 = vector.broadcast %11 : vector<1x32xf32> to vector<4x32xf32>
    %305 = arith.mulf %303, %304 : vector<4x32xf32>
    %306 = vector.broadcast %12 : vector<1x32xf32> to vector<4x32xf32>
    %307 = arith.addf %305, %306 : vector<4x32xf32>
    %cst_142 = arith.constant dense<0.000000e+00> : vector<4xf32>
    %308 = vector.multi_reduction <add>, %286, %cst_142 [1] : vector<4x32xf32> to vector<4xf32>
    %309 = vector.shape_cast %308 : vector<4xf32> to vector<4x1xf32>
    %cst_143 = arith.constant 3.200000e+01 : f32
    %310 = vector.broadcast %cst_143 : f32 to vector<4x1xf32>
    %311 = arith.divf %309, %310 : vector<4x1xf32>
    %312 = vector.broadcast %311 : vector<4x1xf32> to vector<4x32xf32>
    %313 = arith.subf %286, %312 : vector<4x32xf32>
    %314 = arith.mulf %313, %313 : vector<4x32xf32>
    %cst_144 = arith.constant dense<0.000000e+00> : vector<4xf32>
    %315 = vector.multi_reduction <add>, %314, %cst_144 [1] : vector<4x32xf32> to vector<4xf32>
    %316 = vector.shape_cast %315 : vector<4xf32> to vector<4x1xf32>
    %cst_145 = arith.constant 3.100000e+01 : f32
    %317 = vector.broadcast %cst_145 : f32 to vector<4x1xf32>
    %318 = arith.divf %316, %317 : vector<4x1xf32>
    %319 = math.sqrt %318 : vector<4x1xf32>
    %cst_146 = arith.constant 9.99999997E-7 : f32
    %320 = vector.broadcast %cst_146 : f32 to vector<4x1xf32>
    %321 = arith.addf %319, %320 : vector<4x1xf32>
    %322 = tpu.reciprocal %321 : vector<4x1xf32> -> vector<4x1xf32>
    %323 = vector.broadcast %322 : vector<4x1xf32> to vector<4x32xf32>
    %324 = arith.mulf %313, %323 : vector<4x32xf32>
    %325 = vector.broadcast %13 : vector<1x32xf32> to vector<4x32xf32>
    %326 = arith.mulf %324, %325 : vector<4x32xf32>
    %327 = vector.broadcast %14 : vector<1x32xf32> to vector<4x32xf32>
    %328 = arith.addf %326, %327 : vector<4x32xf32>
    %cst_147 = arith.constant dense<0.000000e+00> : vector<4x80xf32>
    %329 = tpu.matmul %307, %15, %cst_147 {dimension_numbers = #tpu.dot_dimension_numbers<[1], [0], [0], [1], [0, 0, 1, 1], [], []>, precision = #tpu.contract_precision<fp32>} : vector<4x32xf32>, vector<32x80xf32>, vector<4x80xf32> -> vector<4x80xf32>
    %cst_148 = arith.constant dense<0.000000e+00> : vector<4x80xf32>
    %330 = tpu.matmul %328, %16, %cst_148 {dimension_numbers = #tpu.dot_dimension_numbers<[1], [0], [0], [1], [0, 0, 1, 1], [], []>, precision = #tpu.contract_precision<fp32>} : vector<4x32xf32>, vector<32x80xf32>, vector<4x80xf32> -> vector<4x80xf32>
    %331 = arith.addf %329, %330 : vector<4x80xf32>
    %332 = vector.broadcast %17 : vector<1x80xf32> to vector<4x80xf32>
    %333 = arith.addf %331, %332 : vector<4x80xf32>
    %334 = vector.extract_strided_slice %333 {offsets = [0, 0], sizes = [4, 16], strides = [1, 1]} : vector<4x80xf32> to vector<4x16xf32>
    %335 = arith.negf %334 : vector<4x16xf32>
    %336 = math.exp %335 : vector<4x16xf32>
    %cst_149 = arith.constant 1.000000e+00 : f32
    %337 = vector.broadcast %cst_149 : f32 to vector<4x16xf32>
    %338 = arith.addf %337, %336 : vector<4x16xf32>
    %339 = arith.divf %337, %338 : vector<4x16xf32>
    %340 = vector.extract_strided_slice %333 {offsets = [0, 16], sizes = [4, 16], strides = [1, 1]} : vector<4x80xf32> to vector<4x16xf32>
    %341 = arith.negf %340 : vector<4x16xf32>
    %342 = math.exp %341 : vector<4x16xf32>
    %cst_150 = arith.constant 1.000000e+00 : f32
    %343 = vector.broadcast %cst_150 : f32 to vector<4x16xf32>
    %344 = arith.addf %343, %342 : vector<4x16xf32>
    %345 = arith.divf %343, %344 : vector<4x16xf32>
    %346 = vector.extract_strided_slice %333 {offsets = [0, 32], sizes = [4, 16], strides = [1, 1]} : vector<4x80xf32> to vector<4x16xf32>
    %347 = arith.negf %346 : vector<4x16xf32>
    %348 = math.exp %347 : vector<4x16xf32>
    %cst_151 = arith.constant 1.000000e+00 : f32
    %349 = vector.broadcast %cst_151 : f32 to vector<4x16xf32>
    %350 = arith.addf %349, %348 : vector<4x16xf32>
    %351 = arith.divf %349, %350 : vector<4x16xf32>
    %352 = vector.extract_strided_slice %333 {offsets = [0, 48], sizes = [4, 16], strides = [1, 1]} : vector<4x80xf32> to vector<4x16xf32>
    %353 = arith.negf %352 : vector<4x16xf32>
    %354 = math.exp %353 : vector<4x16xf32>
    %cst_152 = arith.constant 1.000000e+00 : f32
    %355 = vector.broadcast %cst_152 : f32 to vector<4x16xf32>
    %356 = arith.addf %355, %354 : vector<4x16xf32>
    %357 = arith.divf %355, %356 : vector<4x16xf32>
    %358 = vector.extract_strided_slice %333 {offsets = [0, 64], sizes = [4, 16], strides = [1, 1]} : vector<4x80xf32> to vector<4x16xf32>
    %359 = math.tanh %358 : vector<4x16xf32>
    %360 = vector.extract_strided_slice %307 {offsets = [0, 16], sizes = [4, 16], strides = [1, 1]} : vector<4x32xf32> to vector<4x16xf32>
    %361 = arith.mulf %345, %360 : vector<4x16xf32>
    %362 = vector.extract_strided_slice %328 {offsets = [0, 16], sizes = [4, 16], strides = [1, 1]} : vector<4x32xf32> to vector<4x16xf32>
    %363 = arith.mulf %351, %362 : vector<4x16xf32>
    %364 = arith.addf %361, %363 : vector<4x16xf32>
    %365 = arith.mulf %339, %359 : vector<4x16xf32>
    %366 = arith.addf %364, %365 : vector<4x16xf32>
    %367 = math.tanh %366 : vector<4x16xf32>
    %368 = arith.mulf %357, %367 : vector<4x16xf32>
    %c0_153 = arith.constant 0 : index
    %c0_154 = arith.constant 0 : index
    %369 = vector.load %arg14[%c0_153, %c0_154] : memref<4x32xf32, #tpu.memory_space<vmem>>, vector<4x16xf32>
    tpu.vector_store %arg14[%c0_153, %c0_154], %368 {strides = array<i32>} : memref<4x32xf32, #tpu.memory_space<vmem>>, vector<4x16xf32>,
    %c0_155 = arith.constant 0 : index
    %c16_156 = arith.constant 16 : index
    %370 = vector.load %arg14[%c0_155, %c16_156] : memref<4x32xf32, #tpu.memory_space<vmem>>, vector<4x16xf32>
    tpu.vector_store %arg14[%c0_155, %c16_156], %366 {strides = array<i32>} : memref<4x32xf32, #tpu.memory_space<vmem>>, vector<4x16xf32>,
    %c0_157 = arith.constant 0 : index
    %c0_158 = arith.constant 0 : index
    %371 = vector.load %arg14[%c0_157, %c0_158] : memref<4x32xf32, #tpu.memory_space<vmem>>, vector<4x32xf32>
    %372 = vector.shape_cast %267 : vector<4x1xi32> to vector<4x1x1xi32>
    %373 = vector.broadcast %372 : vector<4x1x1xi32> to vector<4x16x1xi32>
    %374 = arith.cmpi eq, %18, %373 : vector<4x16x1xi32>
    %375 = vector.shape_cast %371 : vector<4x32xf32> to vector<4x1x32xf32>
    %376 = vector.shape_cast %374 : vector<4x16x1xi1> to vector<4x16x1xi1>
    %377 = vector.broadcast %376 : vector<4x16x1xi1> to vector<4x16x32xi1>
    %378 = vector.shape_cast %375 : vector<4x1x32xf32> to vector<4x1x32xf32>
    %379 = vector.broadcast %378 : vector<4x1x32xf32> to vector<4x16x32xf32>
    %380 = arith.select %377, %379, %270 : vector<4x16x32xi1>, vector<4x16x32xf32>
    %c0_159 = arith.constant 0 : index
    %c0_160 = arith.constant 0 : index
    %c0_161 = arith.constant 0 : index
    %381 = vector.load %arg13[%c0_159, %c0_160, %c0_161] : memref<4x16x32xf32, #tpu.memory_space<vmem>>, vector<4x16x32xf32>
    tpu.vector_store %arg13[%c0_159, %c0_160, %c0_161], %380 {strides = array<i32>} : memref<4x16x32xf32, #tpu.memory_space<vmem>>, vector<4x16x32xf32>,
    %c0_i32_162 = arith.constant 0 : i32
    %382 = vector.broadcast %c0_i32_162 : i32 to vector<4x1xi32>
    %383 = arith.cmpi ne, %269, %382 : vector<4x1xi32>
    %384 = vector.shape_cast %383 : vector<4x1xi1> to vector<4x1xi1>
    %385 = vector.broadcast %384 : vector<4x1xi1> to vector<4x32xi1>
    %386 = arith.select %385, %371, %261 : vector<4x32xi1>, vector<4x32xf32>
    %c0_163 = arith.constant 0 : index
    %c3_164 = arith.constant 3 : index
    %c0_165 = arith.constant 0 : index
    %c0_166 = arith.constant 0 : index
    %387 = vector.load %arg1[%c0_163, %c3_164, %c0_165, %c0_166] : memref<4x8x4x1xi32, #tpu.memory_space<vmem>>, vector<1x1x4x1xi32>
    %388 = vector.shape_cast %387 : vector<1x1x4x1xi32> to vector<4x1xi32>
    %c1_167 = arith.constant 1 : index
    %c3_168 = arith.constant 3 : index
    %c0_169 = arith.constant 0 : index
    %c0_170 = arith.constant 0 : index
    %389 = vector.load %arg1[%c1_167, %c3_168, %c0_169, %c0_170] : memref<4x8x4x1xi32, #tpu.memory_space<vmem>>, vector<1x1x4x1xi32>
    %390 = vector.shape_cast %389 : vector<1x1x4x1xi32> to vector<4x1xi32>
    %c2_171 = arith.constant 2 : index
    %c3_172 = arith.constant 3 : index
    %c0_173 = arith.constant 0 : index
    %c0_174 = arith.constant 0 : index
    %391 = vector.load %arg1[%c2_171, %c3_172, %c0_173, %c0_174] : memref<4x8x4x1xi32, #tpu.memory_space<vmem>>, vector<1x1x4x1xi32>
    %392 = vector.shape_cast %391 : vector<1x1x4x1xi32> to vector<4x1xi32>
    %c3_175 = arith.constant 3 : index
    %c3_176 = arith.constant 3 : index
    %c0_177 = arith.constant 0 : index
    %c0_178 = arith.constant 0 : index
    %393 = vector.load %arg1[%c3_175, %c3_176, %c0_177, %c0_178] : memref<4x8x4x1xi32, #tpu.memory_space<vmem>>, vector<1x1x4x1xi32>
    %394 = vector.shape_cast %393 : vector<1x1x4x1xi32> to vector<4x1xi32>
    %c0_179 = arith.constant 0 : index
    %c0_180 = arith.constant 0 : index
    %c0_181 = arith.constant 0 : index
    %395 = vector.load %arg13[%c0_179, %c0_180, %c0_181] : memref<4x16x32xf32, #tpu.memory_space<vmem>>, vector<4x16x32xf32>
    %396 = vector.shape_cast %388 : vector<4x1xi32> to vector<4x1x1xi32>
    %397 = vector.broadcast %396 : vector<4x1x1xi32> to vector<4x16x1xi32>
    %398 = arith.cmpi eq, %18, %397 : vector<4x16x1xi32>
    %399 = vector.shape_cast %390 : vector<4x1xi32> to vector<4x1x1xi32>
    %400 = vector.broadcast %399 : vector<4x1x1xi32> to vector<4x16x1xi32>
    %401 = arith.cmpi eq, %18, %400 : vector<4x16x1xi32>
    %cst_182 = arith.constant 0.000000e+00 : f32
    %402 = vector.shape_cast %398 : vector<4x16x1xi1> to vector<4x16x1xi1>
    %403 = vector.broadcast %402 : vector<4x16x1xi1> to vector<4x16x32xi1>
    %404 = vector.broadcast %cst_182 : f32 to vector<4x16x32xf32>
    %405 = arith.select %403, %395, %404 : vector<4x16x32xi1>, vector<4x16x32xf32>
    %cst_183 = arith.constant dense<0.000000e+00> : vector<4x32xf32>
    %406 = vector.multi_reduction <add>, %405, %cst_183 [1] : vector<4x16x32xf32> to vector<4x32xf32>
    %cst_184 = arith.constant 0.000000e+00 : f32
    %407 = vector.shape_cast %401 : vector<4x16x1xi1> to vector<4x16x1xi1>
    %408 = vector.broadcast %407 : vector<4x16x1xi1> to vector<4x16x32xi1>
    %409 = vector.broadcast %cst_184 : f32 to vector<4x16x32xf32>
    %410 = arith.select %408, %395, %409 : vector<4x16x32xi1>, vector<4x16x32xf32>
    %cst_185 = arith.constant dense<0.000000e+00> : vector<4x32xf32>
    %411 = vector.multi_reduction <add>, %410, %cst_185 [1] : vector<4x16x32xf32> to vector<4x32xf32>
    %cst_186 = arith.constant dense<0.000000e+00> : vector<4xf32>
    %412 = vector.multi_reduction <add>, %406, %cst_186 [1] : vector<4x32xf32> to vector<4xf32>
    %413 = vector.shape_cast %412 : vector<4xf32> to vector<4x1xf32>
    %cst_187 = arith.constant 3.200000e+01 : f32
    %414 = vector.broadcast %cst_187 : f32 to vector<4x1xf32>
    %415 = arith.divf %413, %414 : vector<4x1xf32>
    %416 = vector.broadcast %415 : vector<4x1xf32> to vector<4x32xf32>
    %417 = arith.subf %406, %416 : vector<4x32xf32>
    %418 = arith.mulf %417, %417 : vector<4x32xf32>
    %cst_188 = arith.constant dense<0.000000e+00> : vector<4xf32>
    %419 = vector.multi_reduction <add>, %418, %cst_188 [1] : vector<4x32xf32> to vector<4xf32>
    %420 = vector.shape_cast %419 : vector<4xf32> to vector<4x1xf32>
    %cst_189 = arith.constant 3.100000e+01 : f32
    %421 = vector.broadcast %cst_189 : f32 to vector<4x1xf32>
    %422 = arith.divf %420, %421 : vector<4x1xf32>
    %423 = math.sqrt %422 : vector<4x1xf32>
    %cst_190 = arith.constant 9.99999997E-7 : f32
    %424 = vector.broadcast %cst_190 : f32 to vector<4x1xf32>
    %425 = arith.addf %423, %424 : vector<4x1xf32>
    %426 = tpu.reciprocal %425 : vector<4x1xf32> -> vector<4x1xf32>
    %427 = vector.broadcast %426 : vector<4x1xf32> to vector<4x32xf32>
    %428 = arith.mulf %417, %427 : vector<4x32xf32>
    %429 = vector.broadcast %11 : vector<1x32xf32> to vector<4x32xf32>
    %430 = arith.mulf %428, %429 : vector<4x32xf32>
    %431 = vector.broadcast %12 : vector<1x32xf32> to vector<4x32xf32>
    %432 = arith.addf %430, %431 : vector<4x32xf32>
    %cst_191 = arith.constant dense<0.000000e+00> : vector<4xf32>
    %433 = vector.multi_reduction <add>, %411, %cst_191 [1] : vector<4x32xf32> to vector<4xf32>
    %434 = vector.shape_cast %433 : vector<4xf32> to vector<4x1xf32>
    %cst_192 = arith.constant 3.200000e+01 : f32
    %435 = vector.broadcast %cst_192 : f32 to vector<4x1xf32>
    %436 = arith.divf %434, %435 : vector<4x1xf32>
    %437 = vector.broadcast %436 : vector<4x1xf32> to vector<4x32xf32>
    %438 = arith.subf %411, %437 : vector<4x32xf32>
    %439 = arith.mulf %438, %438 : vector<4x32xf32>
    %cst_193 = arith.constant dense<0.000000e+00> : vector<4xf32>
    %440 = vector.multi_reduction <add>, %439, %cst_193 [1] : vector<4x32xf32> to vector<4xf32>
    %441 = vector.shape_cast %440 : vector<4xf32> to vector<4x1xf32>
    %cst_194 = arith.constant 3.100000e+01 : f32
    %442 = vector.broadcast %cst_194 : f32 to vector<4x1xf32>
    %443 = arith.divf %441, %442 : vector<4x1xf32>
    %444 = math.sqrt %443 : vector<4x1xf32>
    %cst_195 = arith.constant 9.99999997E-7 : f32
    %445 = vector.broadcast %cst_195 : f32 to vector<4x1xf32>
    %446 = arith.addf %444, %445 : vector<4x1xf32>
    %447 = tpu.reciprocal %446 : vector<4x1xf32> -> vector<4x1xf32>
    %448 = vector.broadcast %447 : vector<4x1xf32> to vector<4x32xf32>
    %449 = arith.mulf %438, %448 : vector<4x32xf32>
    %450 = vector.broadcast %13 : vector<1x32xf32> to vector<4x32xf32>
    %451 = arith.mulf %449, %450 : vector<4x32xf32>
    %452 = vector.broadcast %14 : vector<1x32xf32> to vector<4x32xf32>
    %453 = arith.addf %451, %452 : vector<4x32xf32>
    %cst_196 = arith.constant dense<0.000000e+00> : vector<4x80xf32>
    %454 = tpu.matmul %432, %15, %cst_196 {dimension_numbers = #tpu.dot_dimension_numbers<[1], [0], [0], [1], [0, 0, 1, 1], [], []>, precision = #tpu.contract_precision<fp32>} : vector<4x32xf32>, vector<32x80xf32>, vector<4x80xf32> -> vector<4x80xf32>
    %cst_197 = arith.constant dense<0.000000e+00> : vector<4x80xf32>
    %455 = tpu.matmul %453, %16, %cst_197 {dimension_numbers = #tpu.dot_dimension_numbers<[1], [0], [0], [1], [0, 0, 1, 1], [], []>, precision = #tpu.contract_precision<fp32>} : vector<4x32xf32>, vector<32x80xf32>, vector<4x80xf32> -> vector<4x80xf32>
    %456 = arith.addf %454, %455 : vector<4x80xf32>
    %457 = vector.broadcast %17 : vector<1x80xf32> to vector<4x80xf32>
    %458 = arith.addf %456, %457 : vector<4x80xf32>
    %459 = vector.extract_strided_slice %458 {offsets = [0, 0], sizes = [4, 16], strides = [1, 1]} : vector<4x80xf32> to vector<4x16xf32>
    %460 = arith.negf %459 : vector<4x16xf32>
    %461 = math.exp %460 : vector<4x16xf32>
    %cst_198 = arith.constant 1.000000e+00 : f32
    %462 = vector.broadcast %cst_198 : f32 to vector<4x16xf32>
    %463 = arith.addf %462, %461 : vector<4x16xf32>
    %464 = arith.divf %462, %463 : vector<4x16xf32>
    %465 = vector.extract_strided_slice %458 {offsets = [0, 16], sizes = [4, 16], strides = [1, 1]} : vector<4x80xf32> to vector<4x16xf32>
    %466 = arith.negf %465 : vector<4x16xf32>
    %467 = math.exp %466 : vector<4x16xf32>
    %cst_199 = arith.constant 1.000000e+00 : f32
    %468 = vector.broadcast %cst_199 : f32 to vector<4x16xf32>
    %469 = arith.addf %468, %467 : vector<4x16xf32>
    %470 = arith.divf %468, %469 : vector<4x16xf32>
    %471 = vector.extract_strided_slice %458 {offsets = [0, 32], sizes = [4, 16], strides = [1, 1]} : vector<4x80xf32> to vector<4x16xf32>
    %472 = arith.negf %471 : vector<4x16xf32>
    %473 = math.exp %472 : vector<4x16xf32>
    %cst_200 = arith.constant 1.000000e+00 : f32
    %474 = vector.broadcast %cst_200 : f32 to vector<4x16xf32>
    %475 = arith.addf %474, %473 : vector<4x16xf32>
    %476 = arith.divf %474, %475 : vector<4x16xf32>
    %477 = vector.extract_strided_slice %458 {offsets = [0, 48], sizes = [4, 16], strides = [1, 1]} : vector<4x80xf32> to vector<4x16xf32>
    %478 = arith.negf %477 : vector<4x16xf32>
    %479 = math.exp %478 : vector<4x16xf32>
    %cst_201 = arith.constant 1.000000e+00 : f32
    %480 = vector.broadcast %cst_201 : f32 to vector<4x16xf32>
    %481 = arith.addf %480, %479 : vector<4x16xf32>
    %482 = arith.divf %480, %481 : vector<4x16xf32>
    %483 = vector.extract_strided_slice %458 {offsets = [0, 64], sizes = [4, 16], strides = [1, 1]} : vector<4x80xf32> to vector<4x16xf32>
    %484 = math.tanh %483 : vector<4x16xf32>
    %485 = vector.extract_strided_slice %432 {offsets = [0, 16], sizes = [4, 16], strides = [1, 1]} : vector<4x32xf32> to vector<4x16xf32>
    %486 = arith.mulf %470, %485 : vector<4x16xf32>
    %487 = vector.extract_strided_slice %453 {offsets = [0, 16], sizes = [4, 16], strides = [1, 1]} : vector<4x32xf32> to vector<4x16xf32>
    %488 = arith.mulf %476, %487 : vector<4x16xf32>
    %489 = arith.addf %486, %488 : vector<4x16xf32>
    %490 = arith.mulf %464, %484 : vector<4x16xf32>
    %491 = arith.addf %489, %490 : vector<4x16xf32>
    %492 = math.tanh %491 : vector<4x16xf32>
    %493 = arith.mulf %482, %492 : vector<4x16xf32>
    %c0_202 = arith.constant 0 : index
    %c0_203 = arith.constant 0 : index
    %494 = vector.load %arg14[%c0_202, %c0_203] : memref<4x32xf32, #tpu.memory_space<vmem>>, vector<4x16xf32>
    tpu.vector_store %arg14[%c0_202, %c0_203], %493 {strides = array<i32>} : memref<4x32xf32, #tpu.memory_space<vmem>>, vector<4x16xf32>,
    %c0_204 = arith.constant 0 : index
    %c16_205 = arith.constant 16 : index
    %495 = vector.load %arg14[%c0_204, %c16_205] : memref<4x32xf32, #tpu.memory_space<vmem>>, vector<4x16xf32>
    tpu.vector_store %arg14[%c0_204, %c16_205], %491 {strides = array<i32>} : memref<4x32xf32, #tpu.memory_space<vmem>>, vector<4x16xf32>,
    %c0_206 = arith.constant 0 : index
    %c0_207 = arith.constant 0 : index
    %496 = vector.load %arg14[%c0_206, %c0_207] : memref<4x32xf32, #tpu.memory_space<vmem>>, vector<4x32xf32>
    %497 = vector.shape_cast %392 : vector<4x1xi32> to vector<4x1x1xi32>
    %498 = vector.broadcast %497 : vector<4x1x1xi32> to vector<4x16x1xi32>
    %499 = arith.cmpi eq, %18, %498 : vector<4x16x1xi32>
    %500 = vector.shape_cast %496 : vector<4x32xf32> to vector<4x1x32xf32>
    %501 = vector.shape_cast %499 : vector<4x16x1xi1> to vector<4x16x1xi1>
    %502 = vector.broadcast %501 : vector<4x16x1xi1> to vector<4x16x32xi1>
    %503 = vector.shape_cast %500 : vector<4x1x32xf32> to vector<4x1x32xf32>
    %504 = vector.broadcast %503 : vector<4x1x32xf32> to vector<4x16x32xf32>
    %505 = arith.select %502, %504, %395 : vector<4x16x32xi1>, vector<4x16x32xf32>
    %c0_208 = arith.constant 0 : index
    %c0_209 = arith.constant 0 : index
    %c0_210 = arith.constant 0 : index
    %506 = vector.load %arg13[%c0_208, %c0_209, %c0_210] : memref<4x16x32xf32, #tpu.memory_space<vmem>>, vector<4x16x32xf32>
    tpu.vector_store %arg13[%c0_208, %c0_209, %c0_210], %505 {strides = array<i32>} : memref<4x16x32xf32, #tpu.memory_space<vmem>>, vector<4x16x32xf32>,
    %c0_i32_211 = arith.constant 0 : i32
    %507 = vector.broadcast %c0_i32_211 : i32 to vector<4x1xi32>
    %508 = arith.cmpi ne, %394, %507 : vector<4x1xi32>
    %509 = vector.shape_cast %508 : vector<4x1xi1> to vector<4x1xi1>
    %510 = vector.broadcast %509 : vector<4x1xi1> to vector<4x32xi1>
    %511 = arith.select %510, %496, %386 : vector<4x32xi1>, vector<4x32xf32>
    %c0_212 = arith.constant 0 : index
    %c4 = arith.constant 4 : index
    %c0_213 = arith.constant 0 : index
    %c0_214 = arith.constant 0 : index
    %512 = vector.load %arg1[%c0_212, %c4, %c0_213, %c0_214] : memref<4x8x4x1xi32, #tpu.memory_space<vmem>>, vector<1x1x4x1xi32>
    %513 = vector.shape_cast %512 : vector<1x1x4x1xi32> to vector<4x1xi32>
    %c1_215 = arith.constant 1 : index
    %c4_216 = arith.constant 4 : index
    %c0_217 = arith.constant 0 : index
    %c0_218 = arith.constant 0 : index
    %514 = vector.load %arg1[%c1_215, %c4_216, %c0_217, %c0_218] : memref<4x8x4x1xi32, #tpu.memory_space<vmem>>, vector<1x1x4x1xi32>
    %515 = vector.shape_cast %514 : vector<1x1x4x1xi32> to vector<4x1xi32>
    %c2_219 = arith.constant 2 : index
    %c4_220 = arith.constant 4 : index
    %c0_221 = arith.constant 0 : index
    %c0_222 = arith.constant 0 : index
    %516 = vector.load %arg1[%c2_219, %c4_220, %c0_221, %c0_222] : memref<4x8x4x1xi32, #tpu.memory_space<vmem>>, vector<1x1x4x1xi32>
    %517 = vector.shape_cast %516 : vector<1x1x4x1xi32> to vector<4x1xi32>
    %c3_223 = arith.constant 3 : index
    %c4_224 = arith.constant 4 : index
    %c0_225 = arith.constant 0 : index
    %c0_226 = arith.constant 0 : index
    %518 = vector.load %arg1[%c3_223, %c4_224, %c0_225, %c0_226] : memref<4x8x4x1xi32, #tpu.memory_space<vmem>>, vector<1x1x4x1xi32>
    %519 = vector.shape_cast %518 : vector<1x1x4x1xi32> to vector<4x1xi32>
    %c0_227 = arith.constant 0 : index
    %c0_228 = arith.constant 0 : index
    %c0_229 = arith.constant 0 : index
    %520 = vector.load %arg13[%c0_227, %c0_228, %c0_229] : memref<4x16x32xf32, #tpu.memory_space<vmem>>, vector<4x16x32xf32>
    %521 = vector.shape_cast %513 : vector<4x1xi32> to vector<4x1x1xi32>
    %522 = vector.broadcast %521 : vector<4x1x1xi32> to vector<4x16x1xi32>
    %523 = arith.cmpi eq, %18, %522 : vector<4x16x1xi32>
    %524 = vector.shape_cast %515 : vector<4x1xi32> to vector<4x1x1xi32>
    %525 = vector.broadcast %524 : vector<4x1x1xi32> to vector<4x16x1xi32>
    %526 = arith.cmpi eq, %18, %525 : vector<4x16x1xi32>
    %cst_230 = arith.constant 0.000000e+00 : f32
    %527 = vector.shape_cast %523 : vector<4x16x1xi1> to vector<4x16x1xi1>
    %528 = vector.broadcast %527 : vector<4x16x1xi1> to vector<4x16x32xi1>
    %529 = vector.broadcast %cst_230 : f32 to vector<4x16x32xf32>
    %530 = arith.select %528, %520, %529 : vector<4x16x32xi1>, vector<4x16x32xf32>
    %cst_231 = arith.constant dense<0.000000e+00> : vector<4x32xf32>
    %531 = vector.multi_reduction <add>, %530, %cst_231 [1] : vector<4x16x32xf32> to vector<4x32xf32>
    %cst_232 = arith.constant 0.000000e+00 : f32
    %532 = vector.shape_cast %526 : vector<4x16x1xi1> to vector<4x16x1xi1>
    %533 = vector.broadcast %532 : vector<4x16x1xi1> to vector<4x16x32xi1>
    %534 = vector.broadcast %cst_232 : f32 to vector<4x16x32xf32>
    %535 = arith.select %533, %520, %534 : vector<4x16x32xi1>, vector<4x16x32xf32>
    %cst_233 = arith.constant dense<0.000000e+00> : vector<4x32xf32>
    %536 = vector.multi_reduction <add>, %535, %cst_233 [1] : vector<4x16x32xf32> to vector<4x32xf32>
    %cst_234 = arith.constant dense<0.000000e+00> : vector<4xf32>
    %537 = vector.multi_reduction <add>, %531, %cst_234 [1] : vector<4x32xf32> to vector<4xf32>
    %538 = vector.shape_cast %537 : vector<4xf32> to vector<4x1xf32>
    %cst_235 = arith.constant 3.200000e+01 : f32
    %539 = vector.broadcast %cst_235 : f32 to vector<4x1xf32>
    %540 = arith.divf %538, %539 : vector<4x1xf32>
    %541 = vector.broadcast %540 : vector<4x1xf32> to vector<4x32xf32>
    %542 = arith.subf %531, %541 : vector<4x32xf32>
    %543 = arith.mulf %542, %542 : vector<4x32xf32>
    %cst_236 = arith.constant dense<0.000000e+00> : vector<4xf32>
    %544 = vector.multi_reduction <add>, %543, %cst_236 [1] : vector<4x32xf32> to vector<4xf32>
    %545 = vector.shape_cast %544 : vector<4xf32> to vector<4x1xf32>
    %cst_237 = arith.constant 3.100000e+01 : f32
    %546 = vector.broadcast %cst_237 : f32 to vector<4x1xf32>
    %547 = arith.divf %545, %546 : vector<4x1xf32>
    %548 = math.sqrt %547 : vector<4x1xf32>
    %cst_238 = arith.constant 9.99999997E-7 : f32
    %549 = vector.broadcast %cst_238 : f32 to vector<4x1xf32>
    %550 = arith.addf %548, %549 : vector<4x1xf32>
    %551 = tpu.reciprocal %550 : vector<4x1xf32> -> vector<4x1xf32>
    %552 = vector.broadcast %551 : vector<4x1xf32> to vector<4x32xf32>
    %553 = arith.mulf %542, %552 : vector<4x32xf32>
    %554 = vector.broadcast %11 : vector<1x32xf32> to vector<4x32xf32>
    %555 = arith.mulf %553, %554 : vector<4x32xf32>
    %556 = vector.broadcast %12 : vector<1x32xf32> to vector<4x32xf32>
    %557 = arith.addf %555, %556 : vector<4x32xf32>
    %cst_239 = arith.constant dense<0.000000e+00> : vector<4xf32>
    %558 = vector.multi_reduction <add>, %536, %cst_239 [1] : vector<4x32xf32> to vector<4xf32>
    %559 = vector.shape_cast %558 : vector<4xf32> to vector<4x1xf32>
    %cst_240 = arith.constant 3.200000e+01 : f32
    %560 = vector.broadcast %cst_240 : f32 to vector<4x1xf32>
    %561 = arith.divf %559, %560 : vector<4x1xf32>
    %562 = vector.broadcast %561 : vector<4x1xf32> to vector<4x32xf32>
    %563 = arith.subf %536, %562 : vector<4x32xf32>
    %564 = arith.mulf %563, %563 : vector<4x32xf32>
    %cst_241 = arith.constant dense<0.000000e+00> : vector<4xf32>
    %565 = vector.multi_reduction <add>, %564, %cst_241 [1] : vector<4x32xf32> to vector<4xf32>
    %566 = vector.shape_cast %565 : vector<4xf32> to vector<4x1xf32>
    %cst_242 = arith.constant 3.100000e+01 : f32
    %567 = vector.broadcast %cst_242 : f32 to vector<4x1xf32>
    %568 = arith.divf %566, %567 : vector<4x1xf32>
    %569 = math.sqrt %568 : vector<4x1xf32>
    %cst_243 = arith.constant 9.99999997E-7 : f32
    %570 = vector.broadcast %cst_243 : f32 to vector<4x1xf32>
    %571 = arith.addf %569, %570 : vector<4x1xf32>
    %572 = tpu.reciprocal %571 : vector<4x1xf32> -> vector<4x1xf32>
    %573 = vector.broadcast %572 : vector<4x1xf32> to vector<4x32xf32>
    %574 = arith.mulf %563, %573 : vector<4x32xf32>
    %575 = vector.broadcast %13 : vector<1x32xf32> to vector<4x32xf32>
    %576 = arith.mulf %574, %575 : vector<4x32xf32>
    %577 = vector.broadcast %14 : vector<1x32xf32> to vector<4x32xf32>
    %578 = arith.addf %576, %577 : vector<4x32xf32>
    %cst_244 = arith.constant dense<0.000000e+00> : vector<4x80xf32>
    %579 = tpu.matmul %557, %15, %cst_244 {dimension_numbers = #tpu.dot_dimension_numbers<[1], [0], [0], [1], [0, 0, 1, 1], [], []>, precision = #tpu.contract_precision<fp32>} : vector<4x32xf32>, vector<32x80xf32>, vector<4x80xf32> -> vector<4x80xf32>
    %cst_245 = arith.constant dense<0.000000e+00> : vector<4x80xf32>
    %580 = tpu.matmul %578, %16, %cst_245 {dimension_numbers = #tpu.dot_dimension_numbers<[1], [0], [0], [1], [0, 0, 1, 1], [], []>, precision = #tpu.contract_precision<fp32>} : vector<4x32xf32>, vector<32x80xf32>, vector<4x80xf32> -> vector<4x80xf32>
    %581 = arith.addf %579, %580 : vector<4x80xf32>
    %582 = vector.broadcast %17 : vector<1x80xf32> to vector<4x80xf32>
    %583 = arith.addf %581, %582 : vector<4x80xf32>
    %584 = vector.extract_strided_slice %583 {offsets = [0, 0], sizes = [4, 16], strides = [1, 1]} : vector<4x80xf32> to vector<4x16xf32>
    %585 = arith.negf %584 : vector<4x16xf32>
    %586 = math.exp %585 : vector<4x16xf32>
    %cst_246 = arith.constant 1.000000e+00 : f32
    %587 = vector.broadcast %cst_246 : f32 to vector<4x16xf32>
    %588 = arith.addf %587, %586 : vector<4x16xf32>
    %589 = arith.divf %587, %588 : vector<4x16xf32>
    %590 = vector.extract_strided_slice %583 {offsets = [0, 16], sizes = [4, 16], strides = [1, 1]} : vector<4x80xf32> to vector<4x16xf32>
    %591 = arith.negf %590 : vector<4x16xf32>
    %592 = math.exp %591 : vector<4x16xf32>
    %cst_247 = arith.constant 1.000000e+00 : f32
    %593 = vector.broadcast %cst_247 : f32 to vector<4x16xf32>
    %594 = arith.addf %593, %592 : vector<4x16xf32>
    %595 = arith.divf %593, %594 : vector<4x16xf32>
    %596 = vector.extract_strided_slice %583 {offsets = [0, 32], sizes = [4, 16], strides = [1, 1]} : vector<4x80xf32> to vector<4x16xf32>
    %597 = arith.negf %596 : vector<4x16xf32>
    %598 = math.exp %597 : vector<4x16xf32>
    %cst_248 = arith.constant 1.000000e+00 : f32
    %599 = vector.broadcast %cst_248 : f32 to vector<4x16xf32>
    %600 = arith.addf %599, %598 : vector<4x16xf32>
    %601 = arith.divf %599, %600 : vector<4x16xf32>
    %602 = vector.extract_strided_slice %583 {offsets = [0, 48], sizes = [4, 16], strides = [1, 1]} : vector<4x80xf32> to vector<4x16xf32>
    %603 = arith.negf %602 : vector<4x16xf32>
    %604 = math.exp %603 : vector<4x16xf32>
    %cst_249 = arith.constant 1.000000e+00 : f32
    %605 = vector.broadcast %cst_249 : f32 to vector<4x16xf32>
    %606 = arith.addf %605, %604 : vector<4x16xf32>
    %607 = arith.divf %605, %606 : vector<4x16xf32>
    %608 = vector.extract_strided_slice %583 {offsets = [0, 64], sizes = [4, 16], strides = [1, 1]} : vector<4x80xf32> to vector<4x16xf32>
    %609 = math.tanh %608 : vector<4x16xf32>
    %610 = vector.extract_strided_slice %557 {offsets = [0, 16], sizes = [4, 16], strides = [1, 1]} : vector<4x32xf32> to vector<4x16xf32>
    %611 = arith.mulf %595, %610 : vector<4x16xf32>
    %612 = vector.extract_strided_slice %578 {offsets = [0, 16], sizes = [4, 16], strides = [1, 1]} : vector<4x32xf32> to vector<4x16xf32>
    %613 = arith.mulf %601, %612 : vector<4x16xf32>
    %614 = arith.addf %611, %613 : vector<4x16xf32>
    %615 = arith.mulf %589, %609 : vector<4x16xf32>
    %616 = arith.addf %614, %615 : vector<4x16xf32>
    %617 = math.tanh %616 : vector<4x16xf32>
    %618 = arith.mulf %607, %617 : vector<4x16xf32>
    %c0_250 = arith.constant 0 : index
    %c0_251 = arith.constant 0 : index
    %619 = vector.load %arg14[%c0_250, %c0_251] : memref<4x32xf32, #tpu.memory_space<vmem>>, vector<4x16xf32>
    tpu.vector_store %arg14[%c0_250, %c0_251], %618 {strides = array<i32>} : memref<4x32xf32, #tpu.memory_space<vmem>>, vector<4x16xf32>,
    %c0_252 = arith.constant 0 : index
    %c16_253 = arith.constant 16 : index
    %620 = vector.load %arg14[%c0_252, %c16_253] : memref<4x32xf32, #tpu.memory_space<vmem>>, vector<4x16xf32>
    tpu.vector_store %arg14[%c0_252, %c16_253], %616 {strides = array<i32>} : memref<4x32xf32, #tpu.memory_space<vmem>>, vector<4x16xf32>,
    %c0_254 = arith.constant 0 : index
    %c0_255 = arith.constant 0 : index
    %621 = vector.load %arg14[%c0_254, %c0_255] : memref<4x32xf32, #tpu.memory_space<vmem>>, vector<4x32xf32>
    %622 = vector.shape_cast %517 : vector<4x1xi32> to vector<4x1x1xi32>
    %623 = vector.broadcast %622 : vector<4x1x1xi32> to vector<4x16x1xi32>
    %624 = arith.cmpi eq, %18, %623 : vector<4x16x1xi32>
    %625 = vector.shape_cast %621 : vector<4x32xf32> to vector<4x1x32xf32>
    %626 = vector.shape_cast %624 : vector<4x16x1xi1> to vector<4x16x1xi1>
    %627 = vector.broadcast %626 : vector<4x16x1xi1> to vector<4x16x32xi1>
    %628 = vector.shape_cast %625 : vector<4x1x32xf32> to vector<4x1x32xf32>
    %629 = vector.broadcast %628 : vector<4x1x32xf32> to vector<4x16x32xf32>
    %630 = arith.select %627, %629, %520 : vector<4x16x32xi1>, vector<4x16x32xf32>
    %c0_256 = arith.constant 0 : index
    %c0_257 = arith.constant 0 : index
    %c0_258 = arith.constant 0 : index
    %631 = vector.load %arg13[%c0_256, %c0_257, %c0_258] : memref<4x16x32xf32, #tpu.memory_space<vmem>>, vector<4x16x32xf32>
    tpu.vector_store %arg13[%c0_256, %c0_257, %c0_258], %630 {strides = array<i32>} : memref<4x16x32xf32, #tpu.memory_space<vmem>>, vector<4x16x32xf32>,
    %c0_i32_259 = arith.constant 0 : i32
    %632 = vector.broadcast %c0_i32_259 : i32 to vector<4x1xi32>
    %633 = arith.cmpi ne, %519, %632 : vector<4x1xi32>
    %634 = vector.shape_cast %633 : vector<4x1xi1> to vector<4x1xi1>
    %635 = vector.broadcast %634 : vector<4x1xi1> to vector<4x32xi1>
    %636 = arith.select %635, %621, %511 : vector<4x32xi1>, vector<4x32xf32>
    %c0_260 = arith.constant 0 : index
    %c5 = arith.constant 5 : index
    %c0_261 = arith.constant 0 : index
    %c0_262 = arith.constant 0 : index
    %637 = vector.load %arg1[%c0_260, %c5, %c0_261, %c0_262] : memref<4x8x4x1xi32, #tpu.memory_space<vmem>>, vector<1x1x4x1xi32>
    %638 = vector.shape_cast %637 : vector<1x1x4x1xi32> to vector<4x1xi32>
    %c1_263 = arith.constant 1 : index
    %c5_264 = arith.constant 5 : index
    %c0_265 = arith.constant 0 : index
    %c0_266 = arith.constant 0 : index
    %639 = vector.load %arg1[%c1_263, %c5_264, %c0_265, %c0_266] : memref<4x8x4x1xi32, #tpu.memory_space<vmem>>, vector<1x1x4x1xi32>
    %640 = vector.shape_cast %639 : vector<1x1x4x1xi32> to vector<4x1xi32>
    %c2_267 = arith.constant 2 : index
    %c5_268 = arith.constant 5 : index
    %c0_269 = arith.constant 0 : index
    %c0_270 = arith.constant 0 : index
    %641 = vector.load %arg1[%c2_267, %c5_268, %c0_269, %c0_270] : memref<4x8x4x1xi32, #tpu.memory_space<vmem>>, vector<1x1x4x1xi32>
    %642 = vector.shape_cast %641 : vector<1x1x4x1xi32> to vector<4x1xi32>
    %c3_271 = arith.constant 3 : index
    %c5_272 = arith.constant 5 : index
    %c0_273 = arith.constant 0 : index
    %c0_274 = arith.constant 0 : index
    %643 = vector.load %arg1[%c3_271, %c5_272, %c0_273, %c0_274] : memref<4x8x4x1xi32, #tpu.memory_space<vmem>>, vector<1x1x4x1xi32>
    %644 = vector.shape_cast %643 : vector<1x1x4x1xi32> to vector<4x1xi32>
    %c0_275 = arith.constant 0 : index
    %c0_276 = arith.constant 0 : index
    %c0_277 = arith.constant 0 : index
    %645 = vector.load %arg13[%c0_275, %c0_276, %c0_277] : memref<4x16x32xf32, #tpu.memory_space<vmem>>, vector<4x16x32xf32>
    %646 = vector.shape_cast %638 : vector<4x1xi32> to vector<4x1x1xi32>
    %647 = vector.broadcast %646 : vector<4x1x1xi32> to vector<4x16x1xi32>
    %648 = arith.cmpi eq, %18, %647 : vector<4x16x1xi32>
    %649 = vector.shape_cast %640 : vector<4x1xi32> to vector<4x1x1xi32>
    %650 = vector.broadcast %649 : vector<4x1x1xi32> to vector<4x16x1xi32>
    %651 = arith.cmpi eq, %18, %650 : vector<4x16x1xi32>
    %cst_278 = arith.constant 0.000000e+00 : f32
    %652 = vector.shape_cast %648 : vector<4x16x1xi1> to vector<4x16x1xi1>
    %653 = vector.broadcast %652 : vector<4x16x1xi1> to vector<4x16x32xi1>
    %654 = vector.broadcast %cst_278 : f32 to vector<4x16x32xf32>
    %655 = arith.select %653, %645, %654 : vector<4x16x32xi1>, vector<4x16x32xf32>
    %cst_279 = arith.constant dense<0.000000e+00> : vector<4x32xf32>
    %656 = vector.multi_reduction <add>, %655, %cst_279 [1] : vector<4x16x32xf32> to vector<4x32xf32>
    %cst_280 = arith.constant 0.000000e+00 : f32
    %657 = vector.shape_cast %651 : vector<4x16x1xi1> to vector<4x16x1xi1>
    %658 = vector.broadcast %657 : vector<4x16x1xi1> to vector<4x16x32xi1>
    %659 = vector.broadcast %cst_280 : f32 to vector<4x16x32xf32>
    %660 = arith.select %658, %645, %659 : vector<4x16x32xi1>, vector<4x16x32xf32>
    %cst_281 = arith.constant dense<0.000000e+00> : vector<4x32xf32>
    %661 = vector.multi_reduction <add>, %660, %cst_281 [1] : vector<4x16x32xf32> to vector<4x32xf32>
    %cst_282 = arith.constant dense<0.000000e+00> : vector<4xf32>
    %662 = vector.multi_reduction <add>, %656, %cst_282 [1] : vector<4x32xf32> to vector<4xf32>
    %663 = vector.shape_cast %662 : vector<4xf32> to vector<4x1xf32>
    %cst_283 = arith.constant 3.200000e+01 : f32
    %664 = vector.broadcast %cst_283 : f32 to vector<4x1xf32>
    %665 = arith.divf %663, %664 : vector<4x1xf32>
    %666 = vector.broadcast %665 : vector<4x1xf32> to vector<4x32xf32>
    %667 = arith.subf %656, %666 : vector<4x32xf32>
    %668 = arith.mulf %667, %667 : vector<4x32xf32>
    %cst_284 = arith.constant dense<0.000000e+00> : vector<4xf32>
    %669 = vector.multi_reduction <add>, %668, %cst_284 [1] : vector<4x32xf32> to vector<4xf32>
    %670 = vector.shape_cast %669 : vector<4xf32> to vector<4x1xf32>
    %cst_285 = arith.constant 3.100000e+01 : f32
    %671 = vector.broadcast %cst_285 : f32 to vector<4x1xf32>
    %672 = arith.divf %670, %671 : vector<4x1xf32>
    %673 = math.sqrt %672 : vector<4x1xf32>
    %cst_286 = arith.constant 9.99999997E-7 : f32
    %674 = vector.broadcast %cst_286 : f32 to vector<4x1xf32>
    %675 = arith.addf %673, %674 : vector<4x1xf32>
    %676 = tpu.reciprocal %675 : vector<4x1xf32> -> vector<4x1xf32>
    %677 = vector.broadcast %676 : vector<4x1xf32> to vector<4x32xf32>
    %678 = arith.mulf %667, %677 : vector<4x32xf32>
    %679 = vector.broadcast %11 : vector<1x32xf32> to vector<4x32xf32>
    %680 = arith.mulf %678, %679 : vector<4x32xf32>
    %681 = vector.broadcast %12 : vector<1x32xf32> to vector<4x32xf32>
    %682 = arith.addf %680, %681 : vector<4x32xf32>
    %cst_287 = arith.constant dense<0.000000e+00> : vector<4xf32>
    %683 = vector.multi_reduction <add>, %661, %cst_287 [1] : vector<4x32xf32> to vector<4xf32>
    %684 = vector.shape_cast %683 : vector<4xf32> to vector<4x1xf32>
    %cst_288 = arith.constant 3.200000e+01 : f32
    %685 = vector.broadcast %cst_288 : f32 to vector<4x1xf32>
    %686 = arith.divf %684, %685 : vector<4x1xf32>
    %687 = vector.broadcast %686 : vector<4x1xf32> to vector<4x32xf32>
    %688 = arith.subf %661, %687 : vector<4x32xf32>
    %689 = arith.mulf %688, %688 : vector<4x32xf32>
    %cst_289 = arith.constant dense<0.000000e+00> : vector<4xf32>
    %690 = vector.multi_reduction <add>, %689, %cst_289 [1] : vector<4x32xf32> to vector<4xf32>
    %691 = vector.shape_cast %690 : vector<4xf32> to vector<4x1xf32>
    %cst_290 = arith.constant 3.100000e+01 : f32
    %692 = vector.broadcast %cst_290 : f32 to vector<4x1xf32>
    %693 = arith.divf %691, %692 : vector<4x1xf32>
    %694 = math.sqrt %693 : vector<4x1xf32>
    %cst_291 = arith.constant 9.99999997E-7 : f32
    %695 = vector.broadcast %cst_291 : f32 to vector<4x1xf32>
    %696 = arith.addf %694, %695 : vector<4x1xf32>
    %697 = tpu.reciprocal %696 : vector<4x1xf32> -> vector<4x1xf32>
    %698 = vector.broadcast %697 : vector<4x1xf32> to vector<4x32xf32>
    %699 = arith.mulf %688, %698 : vector<4x32xf32>
    %700 = vector.broadcast %13 : vector<1x32xf32> to vector<4x32xf32>
    %701 = arith.mulf %699, %700 : vector<4x32xf32>
    %702 = vector.broadcast %14 : vector<1x32xf32> to vector<4x32xf32>
    %703 = arith.addf %701, %702 : vector<4x32xf32>
    %cst_292 = arith.constant dense<0.000000e+00> : vector<4x80xf32>
    %704 = tpu.matmul %682, %15, %cst_292 {dimension_numbers = #tpu.dot_dimension_numbers<[1], [0], [0], [1], [0, 0, 1, 1], [], []>, precision = #tpu.contract_precision<fp32>} : vector<4x32xf32>, vector<32x80xf32>, vector<4x80xf32> -> vector<4x80xf32>
    %cst_293 = arith.constant dense<0.000000e+00> : vector<4x80xf32>
    %705 = tpu.matmul %703, %16, %cst_293 {dimension_numbers = #tpu.dot_dimension_numbers<[1], [0], [0], [1], [0, 0, 1, 1], [], []>, precision = #tpu.contract_precision<fp32>} : vector<4x32xf32>, vector<32x80xf32>, vector<4x80xf32> -> vector<4x80xf32>
    %706 = arith.addf %704, %705 : vector<4x80xf32>
    %707 = vector.broadcast %17 : vector<1x80xf32> to vector<4x80xf32>
    %708 = arith.addf %706, %707 : vector<4x80xf32>
    %709 = vector.extract_strided_slice %708 {offsets = [0, 0], sizes = [4, 16], strides = [1, 1]} : vector<4x80xf32> to vector<4x16xf32>
    %710 = arith.negf %709 : vector<4x16xf32>
    %711 = math.exp %710 : vector<4x16xf32>
    %cst_294 = arith.constant 1.000000e+00 : f32
    %712 = vector.broadcast %cst_294 : f32 to vector<4x16xf32>
    %713 = arith.addf %712, %711 : vector<4x16xf32>
    %714 = arith.divf %712, %713 : vector<4x16xf32>
    %715 = vector.extract_strided_slice %708 {offsets = [0, 16], sizes = [4, 16], strides = [1, 1]} : vector<4x80xf32> to vector<4x16xf32>
    %716 = arith.negf %715 : vector<4x16xf32>
    %717 = math.exp %716 : vector<4x16xf32>
    %cst_295 = arith.constant 1.000000e+00 : f32
    %718 = vector.broadcast %cst_295 : f32 to vector<4x16xf32>
    %719 = arith.addf %718, %717 : vector<4x16xf32>
    %720 = arith.divf %718, %719 : vector<4x16xf32>
    %721 = vector.extract_strided_slice %708 {offsets = [0, 32], sizes = [4, 16], strides = [1, 1]} : vector<4x80xf32> to vector<4x16xf32>
    %722 = arith.negf %721 : vector<4x16xf32>
    %723 = math.exp %722 : vector<4x16xf32>
    %cst_296 = arith.constant 1.000000e+00 : f32
    %724 = vector.broadcast %cst_296 : f32 to vector<4x16xf32>
    %725 = arith.addf %724, %723 : vector<4x16xf32>
    %726 = arith.divf %724, %725 : vector<4x16xf32>
    %727 = vector.extract_strided_slice %708 {offsets = [0, 48], sizes = [4, 16], strides = [1, 1]} : vector<4x80xf32> to vector<4x16xf32>
    %728 = arith.negf %727 : vector<4x16xf32>
    %729 = math.exp %728 : vector<4x16xf32>
    %cst_297 = arith.constant 1.000000e+00 : f32
    %730 = vector.broadcast %cst_297 : f32 to vector<4x16xf32>
    %731 = arith.addf %730, %729 : vector<4x16xf32>
    %732 = arith.divf %730, %731 : vector<4x16xf32>
    %733 = vector.extract_strided_slice %708 {offsets = [0, 64], sizes = [4, 16], strides = [1, 1]} : vector<4x80xf32> to vector<4x16xf32>
    %734 = math.tanh %733 : vector<4x16xf32>
    %735 = vector.extract_strided_slice %682 {offsets = [0, 16], sizes = [4, 16], strides = [1, 1]} : vector<4x32xf32> to vector<4x16xf32>
    %736 = arith.mulf %720, %735 : vector<4x16xf32>
    %737 = vector.extract_strided_slice %703 {offsets = [0, 16], sizes = [4, 16], strides = [1, 1]} : vector<4x32xf32> to vector<4x16xf32>
    %738 = arith.mulf %726, %737 : vector<4x16xf32>
    %739 = arith.addf %736, %738 : vector<4x16xf32>
    %740 = arith.mulf %714, %734 : vector<4x16xf32>
    %741 = arith.addf %739, %740 : vector<4x16xf32>
    %742 = math.tanh %741 : vector<4x16xf32>
    %743 = arith.mulf %732, %742 : vector<4x16xf32>
    %c0_298 = arith.constant 0 : index
    %c0_299 = arith.constant 0 : index
    %744 = vector.load %arg14[%c0_298, %c0_299] : memref<4x32xf32, #tpu.memory_space<vmem>>, vector<4x16xf32>
    tpu.vector_store %arg14[%c0_298, %c0_299], %743 {strides = array<i32>} : memref<4x32xf32, #tpu.memory_space<vmem>>, vector<4x16xf32>,
    %c0_300 = arith.constant 0 : index
    %c16_301 = arith.constant 16 : index
    %745 = vector.load %arg14[%c0_300, %c16_301] : memref<4x32xf32, #tpu.memory_space<vmem>>, vector<4x16xf32>
    tpu.vector_store %arg14[%c0_300, %c16_301], %741 {strides = array<i32>} : memref<4x32xf32, #tpu.memory_space<vmem>>, vector<4x16xf32>,
    %c0_302 = arith.constant 0 : index
    %c0_303 = arith.constant 0 : index
    %746 = vector.load %arg14[%c0_302, %c0_303] : memref<4x32xf32, #tpu.memory_space<vmem>>, vector<4x32xf32>
    %747 = vector.shape_cast %642 : vector<4x1xi32> to vector<4x1x1xi32>
    %748 = vector.broadcast %747 : vector<4x1x1xi32> to vector<4x16x1xi32>
    %749 = arith.cmpi eq, %18, %748 : vector<4x16x1xi32>
    %750 = vector.shape_cast %746 : vector<4x32xf32> to vector<4x1x32xf32>
    %751 = vector.shape_cast %749 : vector<4x16x1xi1> to vector<4x16x1xi1>
    %752 = vector.broadcast %751 : vector<4x16x1xi1> to vector<4x16x32xi1>
    %753 = vector.shape_cast %750 : vector<4x1x32xf32> to vector<4x1x32xf32>
    %754 = vector.broadcast %753 : vector<4x1x32xf32> to vector<4x16x32xf32>
    %755 = arith.select %752, %754, %645 : vector<4x16x32xi1>, vector<4x16x32xf32>
    %c0_304 = arith.constant 0 : index
    %c0_305 = arith.constant 0 : index
    %c0_306 = arith.constant 0 : index
    %756 = vector.load %arg13[%c0_304, %c0_305, %c0_306] : memref<4x16x32xf32, #tpu.memory_space<vmem>>, vector<4x16x32xf32>
    tpu.vector_store %arg13[%c0_304, %c0_305, %c0_306], %755 {strides = array<i32>} : memref<4x16x32xf32, #tpu.memory_space<vmem>>, vector<4x16x32xf32>,
    %c0_i32_307 = arith.constant 0 : i32
    %757 = vector.broadcast %c0_i32_307 : i32 to vector<4x1xi32>
    %758 = arith.cmpi ne, %644, %757 : vector<4x1xi32>
    %759 = vector.shape_cast %758 : vector<4x1xi1> to vector<4x1xi1>
    %760 = vector.broadcast %759 : vector<4x1xi1> to vector<4x32xi1>
    %761 = arith.select %760, %746, %636 : vector<4x32xi1>, vector<4x32xf32>
    %c0_308 = arith.constant 0 : index
    %c6 = arith.constant 6 : index
    %c0_309 = arith.constant 0 : index
    %c0_310 = arith.constant 0 : index
    %762 = vector.load %arg1[%c0_308, %c6, %c0_309, %c0_310] : memref<4x8x4x1xi32, #tpu.memory_space<vmem>>, vector<1x1x4x1xi32>
    %763 = vector.shape_cast %762 : vector<1x1x4x1xi32> to vector<4x1xi32>
    %c1_311 = arith.constant 1 : index
    %c6_312 = arith.constant 6 : index
    %c0_313 = arith.constant 0 : index
    %c0_314 = arith.constant 0 : index
    %764 = vector.load %arg1[%c1_311, %c6_312, %c0_313, %c0_314] : memref<4x8x4x1xi32, #tpu.memory_space<vmem>>, vector<1x1x4x1xi32>
    %765 = vector.shape_cast %764 : vector<1x1x4x1xi32> to vector<4x1xi32>
    %c2_315 = arith.constant 2 : index
    %c6_316 = arith.constant 6 : index
    %c0_317 = arith.constant 0 : index
    %c0_318 = arith.constant 0 : index
    %766 = vector.load %arg1[%c2_315, %c6_316, %c0_317, %c0_318] : memref<4x8x4x1xi32, #tpu.memory_space<vmem>>, vector<1x1x4x1xi32>
    %767 = vector.shape_cast %766 : vector<1x1x4x1xi32> to vector<4x1xi32>
    %c3_319 = arith.constant 3 : index
    %c6_320 = arith.constant 6 : index
    %c0_321 = arith.constant 0 : index
    %c0_322 = arith.constant 0 : index
    %768 = vector.load %arg1[%c3_319, %c6_320, %c0_321, %c0_322] : memref<4x8x4x1xi32, #tpu.memory_space<vmem>>, vector<1x1x4x1xi32>
    %769 = vector.shape_cast %768 : vector<1x1x4x1xi32> to vector<4x1xi32>
    %c0_323 = arith.constant 0 : index
    %c0_324 = arith.constant 0 : index
    %c0_325 = arith.constant 0 : index
    %770 = vector.load %arg13[%c0_323, %c0_324, %c0_325] : memref<4x16x32xf32, #tpu.memory_space<vmem>>, vector<4x16x32xf32>
    %771 = vector.shape_cast %763 : vector<4x1xi32> to vector<4x1x1xi32>
    %772 = vector.broadcast %771 : vector<4x1x1xi32> to vector<4x16x1xi32>
    %773 = arith.cmpi eq, %18, %772 : vector<4x16x1xi32>
    %774 = vector.shape_cast %765 : vector<4x1xi32> to vector<4x1x1xi32>
    %775 = vector.broadcast %774 : vector<4x1x1xi32> to vector<4x16x1xi32>
    %776 = arith.cmpi eq, %18, %775 : vector<4x16x1xi32>
    %cst_326 = arith.constant 0.000000e+00 : f32
    %777 = vector.shape_cast %773 : vector<4x16x1xi1> to vector<4x16x1xi1>
    %778 = vector.broadcast %777 : vector<4x16x1xi1> to vector<4x16x32xi1>
    %779 = vector.broadcast %cst_326 : f32 to vector<4x16x32xf32>
    %780 = arith.select %778, %770, %779 : vector<4x16x32xi1>, vector<4x16x32xf32>
    %cst_327 = arith.constant dense<0.000000e+00> : vector<4x32xf32>
    %781 = vector.multi_reduction <add>, %780, %cst_327 [1] : vector<4x16x32xf32> to vector<4x32xf32>
    %cst_328 = arith.constant 0.000000e+00 : f32
    %782 = vector.shape_cast %776 : vector<4x16x1xi1> to vector<4x16x1xi1>
    %783 = vector.broadcast %782 : vector<4x16x1xi1> to vector<4x16x32xi1>
    %784 = vector.broadcast %cst_328 : f32 to vector<4x16x32xf32>
    %785 = arith.select %783, %770, %784 : vector<4x16x32xi1>, vector<4x16x32xf32>
    %cst_329 = arith.constant dense<0.000000e+00> : vector<4x32xf32>
    %786 = vector.multi_reduction <add>, %785, %cst_329 [1] : vector<4x16x32xf32> to vector<4x32xf32>
    %cst_330 = arith.constant dense<0.000000e+00> : vector<4xf32>
    %787 = vector.multi_reduction <add>, %781, %cst_330 [1] : vector<4x32xf32> to vector<4xf32>
    %788 = vector.shape_cast %787 : vector<4xf32> to vector<4x1xf32>
    %cst_331 = arith.constant 3.200000e+01 : f32
    %789 = vector.broadcast %cst_331 : f32 to vector<4x1xf32>
    %790 = arith.divf %788, %789 : vector<4x1xf32>
    %791 = vector.broadcast %790 : vector<4x1xf32> to vector<4x32xf32>
    %792 = arith.subf %781, %791 : vector<4x32xf32>
    %793 = arith.mulf %792, %792 : vector<4x32xf32>
    %cst_332 = arith.constant dense<0.000000e+00> : vector<4xf32>
    %794 = vector.multi_reduction <add>, %793, %cst_332 [1] : vector<4x32xf32> to vector<4xf32>
    %795 = vector.shape_cast %794 : vector<4xf32> to vector<4x1xf32>
    %cst_333 = arith.constant 3.100000e+01 : f32
    %796 = vector.broadcast %cst_333 : f32 to vector<4x1xf32>
    %797 = arith.divf %795, %796 : vector<4x1xf32>
    %798 = math.sqrt %797 : vector<4x1xf32>
    %cst_334 = arith.constant 9.99999997E-7 : f32
    %799 = vector.broadcast %cst_334 : f32 to vector<4x1xf32>
    %800 = arith.addf %798, %799 : vector<4x1xf32>
    %801 = tpu.reciprocal %800 : vector<4x1xf32> -> vector<4x1xf32>
    %802 = vector.broadcast %801 : vector<4x1xf32> to vector<4x32xf32>
    %803 = arith.mulf %792, %802 : vector<4x32xf32>
    %804 = vector.broadcast %11 : vector<1x32xf32> to vector<4x32xf32>
    %805 = arith.mulf %803, %804 : vector<4x32xf32>
    %806 = vector.broadcast %12 : vector<1x32xf32> to vector<4x32xf32>
    %807 = arith.addf %805, %806 : vector<4x32xf32>
    %cst_335 = arith.constant dense<0.000000e+00> : vector<4xf32>
    %808 = vector.multi_reduction <add>, %786, %cst_335 [1] : vector<4x32xf32> to vector<4xf32>
    %809 = vector.shape_cast %808 : vector<4xf32> to vector<4x1xf32>
    %cst_336 = arith.constant 3.200000e+01 : f32
    %810 = vector.broadcast %cst_336 : f32 to vector<4x1xf32>
    %811 = arith.divf %809, %810 : vector<4x1xf32>
    %812 = vector.broadcast %811 : vector<4x1xf32> to vector<4x32xf32>
    %813 = arith.subf %786, %812 : vector<4x32xf32>
    %814 = arith.mulf %813, %813 : vector<4x32xf32>
    %cst_337 = arith.constant dense<0.000000e+00> : vector<4xf32>
    %815 = vector.multi_reduction <add>, %814, %cst_337 [1] : vector<4x32xf32> to vector<4xf32>
    %816 = vector.shape_cast %815 : vector<4xf32> to vector<4x1xf32>
    %cst_338 = arith.constant 3.100000e+01 : f32
    %817 = vector.broadcast %cst_338 : f32 to vector<4x1xf32>
    %818 = arith.divf %816, %817 : vector<4x1xf32>
    %819 = math.sqrt %818 : vector<4x1xf32>
    %cst_339 = arith.constant 9.99999997E-7 : f32
    %820 = vector.broadcast %cst_339 : f32 to vector<4x1xf32>
    %821 = arith.addf %819, %820 : vector<4x1xf32>
    %822 = tpu.reciprocal %821 : vector<4x1xf32> -> vector<4x1xf32>
    %823 = vector.broadcast %822 : vector<4x1xf32> to vector<4x32xf32>
    %824 = arith.mulf %813, %823 : vector<4x32xf32>
    %825 = vector.broadcast %13 : vector<1x32xf32> to vector<4x32xf32>
    %826 = arith.mulf %824, %825 : vector<4x32xf32>
    %827 = vector.broadcast %14 : vector<1x32xf32> to vector<4x32xf32>
    %828 = arith.addf %826, %827 : vector<4x32xf32>
    %cst_340 = arith.constant dense<0.000000e+00> : vector<4x80xf32>
    %829 = tpu.matmul %807, %15, %cst_340 {dimension_numbers = #tpu.dot_dimension_numbers<[1], [0], [0], [1], [0, 0, 1, 1], [], []>, precision = #tpu.contract_precision<fp32>} : vector<4x32xf32>, vector<32x80xf32>, vector<4x80xf32> -> vector<4x80xf32>
    %cst_341 = arith.constant dense<0.000000e+00> : vector<4x80xf32>
    %830 = tpu.matmul %828, %16, %cst_341 {dimension_numbers = #tpu.dot_dimension_numbers<[1], [0], [0], [1], [0, 0, 1, 1], [], []>, precision = #tpu.contract_precision<fp32>} : vector<4x32xf32>, vector<32x80xf32>, vector<4x80xf32> -> vector<4x80xf32>
    %831 = arith.addf %829, %830 : vector<4x80xf32>
    %832 = vector.broadcast %17 : vector<1x80xf32> to vector<4x80xf32>
    %833 = arith.addf %831, %832 : vector<4x80xf32>
    %834 = vector.extract_strided_slice %833 {offsets = [0, 0], sizes = [4, 16], strides = [1, 1]} : vector<4x80xf32> to vector<4x16xf32>
    %835 = arith.negf %834 : vector<4x16xf32>
    %836 = math.exp %835 : vector<4x16xf32>
    %cst_342 = arith.constant 1.000000e+00 : f32
    %837 = vector.broadcast %cst_342 : f32 to vector<4x16xf32>
    %838 = arith.addf %837, %836 : vector<4x16xf32>
    %839 = arith.divf %837, %838 : vector<4x16xf32>
    %840 = vector.extract_strided_slice %833 {offsets = [0, 16], sizes = [4, 16], strides = [1, 1]} : vector<4x80xf32> to vector<4x16xf32>
    %841 = arith.negf %840 : vector<4x16xf32>
    %842 = math.exp %841 : vector<4x16xf32>
    %cst_343 = arith.constant 1.000000e+00 : f32
    %843 = vector.broadcast %cst_343 : f32 to vector<4x16xf32>
    %844 = arith.addf %843, %842 : vector<4x16xf32>
    %845 = arith.divf %843, %844 : vector<4x16xf32>
    %846 = vector.extract_strided_slice %833 {offsets = [0, 32], sizes = [4, 16], strides = [1, 1]} : vector<4x80xf32> to vector<4x16xf32>
    %847 = arith.negf %846 : vector<4x16xf32>
    %848 = math.exp %847 : vector<4x16xf32>
    %cst_344 = arith.constant 1.000000e+00 : f32
    %849 = vector.broadcast %cst_344 : f32 to vector<4x16xf32>
    %850 = arith.addf %849, %848 : vector<4x16xf32>
    %851 = arith.divf %849, %850 : vector<4x16xf32>
    %852 = vector.extract_strided_slice %833 {offsets = [0, 48], sizes = [4, 16], strides = [1, 1]} : vector<4x80xf32> to vector<4x16xf32>
    %853 = arith.negf %852 : vector<4x16xf32>
    %854 = math.exp %853 : vector<4x16xf32>
    %cst_345 = arith.constant 1.000000e+00 : f32
    %855 = vector.broadcast %cst_345 : f32 to vector<4x16xf32>
    %856 = arith.addf %855, %854 : vector<4x16xf32>
    %857 = arith.divf %855, %856 : vector<4x16xf32>
    %858 = vector.extract_strided_slice %833 {offsets = [0, 64], sizes = [4, 16], strides = [1, 1]} : vector<4x80xf32> to vector<4x16xf32>
    %859 = math.tanh %858 : vector<4x16xf32>
    %860 = vector.extract_strided_slice %807 {offsets = [0, 16], sizes = [4, 16], strides = [1, 1]} : vector<4x32xf32> to vector<4x16xf32>
    %861 = arith.mulf %845, %860 : vector<4x16xf32>
    %862 = vector.extract_strided_slice %828 {offsets = [0, 16], sizes = [4, 16], strides = [1, 1]} : vector<4x32xf32> to vector<4x16xf32>
    %863 = arith.mulf %851, %862 : vector<4x16xf32>
    %864 = arith.addf %861, %863 : vector<4x16xf32>
    %865 = arith.mulf %839, %859 : vector<4x16xf32>
    %866 = arith.addf %864, %865 : vector<4x16xf32>
    %867 = math.tanh %866 : vector<4x16xf32>
    %868 = arith.mulf %857, %867 : vector<4x16xf32>
    %c0_346 = arith.constant 0 : index
    %c0_347 = arith.constant 0 : index
    %869 = vector.load %arg14[%c0_346, %c0_347] : memref<4x32xf32, #tpu.memory_space<vmem>>, vector<4x16xf32>
    tpu.vector_store %arg14[%c0_346, %c0_347], %868 {strides = array<i32>} : memref<4x32xf32, #tpu.memory_space<vmem>>, vector<4x16xf32>,
    %c0_348 = arith.constant 0 : index
    %c16_349 = arith.constant 16 : index
    %870 = vector.load %arg14[%c0_348, %c16_349] : memref<4x32xf32, #tpu.memory_space<vmem>>, vector<4x16xf32>
    tpu.vector_store %arg14[%c0_348, %c16_349], %866 {strides = array<i32>} : memref<4x32xf32, #tpu.memory_space<vmem>>, vector<4x16xf32>,
    %c0_350 = arith.constant 0 : index
    %c0_351 = arith.constant 0 : index
    %871 = vector.load %arg14[%c0_350, %c0_351] : memref<4x32xf32, #tpu.memory_space<vmem>>, vector<4x32xf32>
    %872 = vector.shape_cast %767 : vector<4x1xi32> to vector<4x1x1xi32>
    %873 = vector.broadcast %872 : vector<4x1x1xi32> to vector<4x16x1xi32>
    %874 = arith.cmpi eq, %18, %873 : vector<4x16x1xi32>
    %875 = vector.shape_cast %871 : vector<4x32xf32> to vector<4x1x32xf32>
    %876 = vector.shape_cast %874 : vector<4x16x1xi1> to vector<4x16x1xi1>
    %877 = vector.broadcast %876 : vector<4x16x1xi1> to vector<4x16x32xi1>
    %878 = vector.shape_cast %875 : vector<4x1x32xf32> to vector<4x1x32xf32>
    %879 = vector.broadcast %878 : vector<4x1x32xf32> to vector<4x16x32xf32>
    %880 = arith.select %877, %879, %770 : vector<4x16x32xi1>, vector<4x16x32xf32>
    %c0_352 = arith.constant 0 : index
    %c0_353 = arith.constant 0 : index
    %c0_354 = arith.constant 0 : index
    %881 = vector.load %arg13[%c0_352, %c0_353, %c0_354] : memref<4x16x32xf32, #tpu.memory_space<vmem>>, vector<4x16x32xf32>
    tpu.vector_store %arg13[%c0_352, %c0_353, %c0_354], %880 {strides = array<i32>} : memref<4x16x32xf32, #tpu.memory_space<vmem>>, vector<4x16x32xf32>,
    %c0_i32_355 = arith.constant 0 : i32
    %882 = vector.broadcast %c0_i32_355 : i32 to vector<4x1xi32>
    %883 = arith.cmpi ne, %769, %882 : vector<4x1xi32>
    %884 = vector.shape_cast %883 : vector<4x1xi1> to vector<4x1xi1>
    %885 = vector.broadcast %884 : vector<4x1xi1> to vector<4x32xi1>
    %886 = arith.select %885, %871, %761 : vector<4x32xi1>, vector<4x32xf32>
    %c0_356 = arith.constant 0 : index
    %c0_357 = arith.constant 0 : index
    %887 = vector.load %arg12[%c0_356, %c0_357] : memref<4x32xf32, #tpu.memory_space<vmem>>, vector<4x32xf32>
    tpu.vector_store %arg12[%c0_356, %c0_357], %886 {strides = array<i32>} : memref<4x32xf32, #tpu.memory_space<vmem>>, vector<4x32xf32>,
    return
  }
  func.func @transform_0(%arg0: i32) -> (i32, i32, i32, i32) {
    %c0_i32 = arith.constant 0 : i32
    %c0_i32_0 = arith.constant 0 : i32
    %c0_i32_1 = arith.constant 0 : i32
    %c0_i32_2 = arith.constant 0 : i32
    %c0_i32_3 = arith.constant 0 : i32
    return %c0_i32, %c0_i32_0, %c0_i32_1, %c0_i32_2 : i32, i32, i32, i32
  }
  func.func @transform_1(%arg0: i32) -> (i32, i32, i32) {
    %c0_i32 = arith.constant 0 : i32
    %c0_i32_0 = arith.constant 0 : i32
    %c0_i32_1 = arith.constant 0 : i32
    %c0_i32_2 = arith.constant 0 : i32
    return %c0_i32, %c0_i32_0, %c0_i32_1 : i32, i32, i32
  }
  func.func @transform_2(%arg0: i32) -> (i32, i32) {
    %c0_i32 = arith.constant 0 : i32
    %c0_i32_0 = arith.constant 0 : i32
    %c0_i32_1 = arith.constant 0 : i32
    return %c0_i32, %c0_i32_0 : i32, i32
  }
  func.func @transform_3(%arg0: i32) -> (i32, i32) {
    %c0_i32 = arith.constant 0 : i32
    %c0_i32_0 = arith.constant 0 : i32
    %c0_i32_1 = arith.constant 0 : i32
    return %c0_i32, %c0_i32_0 : i32, i32
  }
  func.func @transform_4(%arg0: i32) -> (i32, i32) {
    %c0_i32 = arith.constant 0 : i32
    %c0_i32_0 = arith.constant 0 : i32
    %c0_i32_1 = arith.constant 0 : i32
    return %c0_i32, %c0_i32_0 : i32, i32
  }
  func.func @transform_5(%arg0: i32) -> (i32, i32) {
    %c0_i32 = arith.constant 0 : i32
    %c0_i32_0 = arith.constant 0 : i32
    %c0_i32_1 = arith.constant 0 : i32
    return %c0_i32, %c0_i32_0 : i32, i32
  }
  func.func @transform_6(%arg0: i32) -> (i32, i32) {
    %c0_i32 = arith.constant 0 : i32
    %c0_i32_0 = arith.constant 0 : i32
    %c0_i32_1 = arith.constant 0 : i32
    return %c0_i32, %c0_i32_0 : i32, i32
  }
  func.func @transform_7(%arg0: i32) -> (i32, i32) {
    %c0_i32 = arith.constant 0 : i32
    %c0_i32_0 = arith.constant 0 : i32
    %c0_i32_1 = arith.constant 0 : i32
    return %c0_i32, %c0_i32_0 : i32, i32
  }
  func.func @transform_8(%arg0: i32) -> (i32, i32) {
    %c0_i32 = arith.constant 0 : i32
    %c0_i32_0 = arith.constant 0 : i32
    %c0_i32_1 = arith.constant 0 : i32
    return %c0_i32, %c0_i32_0 : i32, i32
  }
  func.func @transform_9(%arg0: i32) -> (i32, i32) {
    %c0_i32 = arith.constant 0 : i32
    %c0_i32_0 = arith.constant 0 : i32
    %c0_i32_1 = arith.constant 0 : i32
    return %c0_i32, %c0_i32_0 : i32, i32
  }
  func.func @transform_10(%arg0: i32) -> (i32, i32) {
    %c0_i32 = arith.constant 0 : i32
    %c0_i32_0 = arith.constant 0 : i32
    %c0_i32_1 = arith.constant 0 : i32
    return %c0_i32, %c0_i32_0 : i32, i32
  }
  func.func @transform_11(%arg0: i32) -> (i32, i32) {
    %c0_i32 = arith.constant 0 : i32
    %c0_i32_0 = arith.constant 0 : i32
    %c0_i32_1 = arith.constant 0 : i32
    return %c0_i32, %c0_i32_0 : i32, i32
  }
}

</mosaic_0001>

<bundles_post_ra>
// kernel: tpu_custom_call.1
= control target key start
LH: loop header
LB: loop body
LE: loop exit
PB: predicated region body
PF: predicated region fallthrough
CT: control target
= control target key end

     0   :  { %vm52_vm0 = vcmask 130048   ;;  %v16644_v9 = vmov 0   ;;  %s16630_s0 = inlined_call_operand.vmem [shape: s32[4,8,4,1], index: 0, kind: input, shape index: {}]   ;;  %s16631_s1 = inlined_call_operand.vmem [shape: f32[4,8,16], index: 1, kind: input, shape index: {}]   ;;  %s16632_s2 = inlined_call_operand.vmem [shape: f32[16,32], index: 2, kind: input, shape index: {}]   ;;  %s16633_s3 = inlined_call_operand.vmem [shape: f32[1,32], index: 3, kind: input, shape index: {}]   ;;  %s16634_s4 = inlined_call_operand.vmem [shape: f32[1,32], index: 4, kind: input, shape index: {}]   ;;  %s16635_s5 = inlined_call_operand.vmem [shape: f32[1,32], index: 5, kind: input, shape index: {}]   ;;  %s16636_s6 = inlined_call_operand.vmem [shape: f32[1,32], index: 6, kind: input, shape index: {}]   ;;  %s16637_s7 = inlined_call_operand.vmem [shape: f32[1,32], index: 7, kind: input, shape index: {}]   ;;  %s16638_s8 = inlined_call_operand.vmem [shape: f32[32,80], index: 8, kind: input, shape index: {}]   ;;  %s16639_s9 = inlined_call_operand.vmem [shape: f32[32,80], index: 9, kind: input, shape index: {}]   ;;  %s16640_s10 = inlined_call_operand.vmem [shape: f32[1,80], index: 10, kind: input, shape index: {}]   ;;  %s16641_s11 = inlined_call_operand.hbm [shape: f32[4,32], index: 11, kind: output, shape index: {}]  }
   0x1   :  { %v44_v0 = vld [vmem:[%s16632_s2 + $0x8] sm:$0xff]  ;;  %v43_v1 = vld [vmem:[%s16632_s2] sm:$0xff]  ;;  %v41_v7 = vld [vmem:[%s16631_s1 + $0x10] sm:$0xff]  ;;  %13544 = vset.pattern.permute.xlu1 %v16644_v9  ;;  %13543 = vset.pattern.permute.xlu0 %v16644_v9 }
   0x2   :  { %v39_v2 = vld [vmem:[%s16631_s1] sm:$0xff]  ;;  %v13842_v3 = vand.u32 4294901760, %v44_v0  ;;  %v13844_v4 = vand.u32 4294901760, %v43_v1  ;;  %v40_v6 = vld [vmem:[%s16631_s1 + $0x8] sm:$0xff]  ;;  %v42_v8 = vld [vmem:[%s16631_s1 + $0x18] sm:$0xff]  ;;  %v60_v12 = vsel %vm52_vm0, %v41_v7, 0 }
   0x3   :  { %v54_v5 = vsel %vm52_vm0, %v39_v2, 0  ;;  %v57_v11 = vsel %vm52_vm0, %v40_v6, 0  ;;  %v63_v13 = vsel %vm52_vm0, %v42_v8, 0 }
   0x4   :  { %v13857_v10 = vand.u32 4294901760, %v54_v5 }
   0x5   :  { %16 = vsyncpa [#allocation5], 0  ;;  %12549 = vmatprep.subr.mxu0 %v13842_v3  ;;  %v202_v14 = vsub.f32 %v44_v0, %v13842_v3  ;;  %v13861_v15 = vand.u32 4294901760, %v57_v11  ;;  %v209_v16 = vsub.f32 %v43_v1, %v13844_v4  ;;  %v13864_v17 = vand.u32 4294901760, %v60_v12  ;;  %s13767_s26 = smov 16   ;;  %s13768_s16 = smov 64  }
   0x6   :  { %12550 = vmatpush3.msra.mxu0 %v13842_v3  ;;  %v133_v18 = vsub.f32 %v54_v5, %v13857_v10  ;;  %12563 = vmatprep.mubr.f32.mxu1 %v13857_v10  ;;  %v13869_v19 = vand.u32 4294901760, %v63_v13  ;;  %v675_v20 = vlaneseq  ;;  %v13764_v27 = vmov 1966171168   ;;  %s13769_s17 = smov 112   ;;  %s13770_s20 = smov 32  }
   0x7   :  { %12551 = vmatprep.subr.mxu0 %v13844_v4  ;;  %v203_v21 = vand.u32 4294901760, %v202_v14  ;;  %v143_v22 = vsub.f32 %v57_v11, %v13861_v15  ;;  %v13873_v23 = vand.u32 4294901760, %v209_v16  ;;  %v13876_v24 = vsub.f32 %v60_v12, %v13864_v17  ;;  %v12037_v41 = vld.sshfl [vmem:[%s16630_s0 + $0x20] sm:$0x33 pattern:$0x75316420] }
   0x8   :  { %12552 = vmatpush3.msra.mxu0 %v13844_v4  ;;  %v134_v25 = vand.u32 4294901760, %v133_v18  ;;  %v13880_v26 = vsub.f32 %v63_v13, %v13869_v19  ;;  %v700_v28 = vunpack.c.l.s4 %v13764_v27  ;;  %v13885_v35 = vshrl.u32 %v675_v20, 7  ;;  %v12036_v60 = vld.sshfl [vmem:[%s16630_s0] sm:$0x33 pattern:$0x75316420] }
   0x9   :  { %v204_v29 = vsub.f32 %v202_v14, %v203_v21  ;;  %v144_v30 = vand.u32 4294901760, %v143_v22  ;;  %v211_v31 = vsub.f32 %v209_v16, %v13873_v23  ;;  %12569 = vmatprep.subr.mxu0 %v202_v14  ;;  %v154_v32 = vand.u32 4294901760, %v13876_v24  ;;  %s13771_s24 = smov 80  }
   0xa   :  { %v135_v33 = vsub.f32 %v133_v18, %v134_v25  ;;  %v164_v34 = vand.u32 4294901760, %v13880_v26  ;;  %16688 = vst [vmem:[#allocation7_spill] sm:$0xff] %v13885_v35  ;;  %v701_v36 = vunpack.c.0.s8 %v700_v28  ;;  %v746_v47 = vcombine.high %v12037_v41, %v12037_v41 }
   0xb   :  { %v205_v37 = vand.u32 4294901760, %v204_v29  ;;  %v145_v38 = vsub.f32 %v143_v22, %v144_v30  ;;  %v212_v39 = vand.u32 4294901760, %v211_v31  ;;  %v155_v40 = vsub.f32 %v13876_v24, %v154_v32  ;;  %v12033_v31 = vld [vmem:[%s16633_s3] ss:$0 sm:$0xff] }
   0xc   :  { %v136_v42 = vand.u32 4294901760, %v135_v33  ;;  %v165_v43 = vsub.f32 %v13880_v26, %v164_v34  ;;  %v13893_v46 = vsub.s32 %v701_v36, %v13885_v35  ;;  %v13899_v49 = vsub.s32 0, %v13885_v35 }
   0xd   :  { %12559 = vmatprep.subr.mxu1 %v205_v37  ;;  %v146_v44 = vand.u32 4294901760, %v145_v38  ;;  %v156_v45 = vand.u32 4294901760, %v155_v40  ;;  %v13914_v54 = vadd.s32 8, %v13885_v35  ;;  %vm653_vm5 = vcmask 261120  }
   0xe   :  { %12553 = vmatprep.mubr.f32.mxu0 %v136_v42  ;;  %12560 = vmatpush3.msra.mxu1 %v205_v37  ;;  %16689 = vst [vmem:[#allocation8_spill] sm:$0xff] %v13893_v46  ;;  %v166_v48 = vand.u32 4294901760, %v165_v43  ;;  %16690 = vst [vmem:[#allocation9_spill] sm:$0xff] %v13899_v49  ;;  %v760_v50 = vrot.slane %v746_v47, %v13893_v46  ;;  %v753_v51 = vrot.slane %v12037_v41, %v13893_v46  ;;  %v16642_v61 = vmov 0.0  }
   0xf   :  { %12554 = vmatmul.mubr.f32.vlgmr.msra.gmra.mxu0 %v146_v44  ;;  %12561 = vmatprep.subr.mxu1 %v212_v39  ;;  %16691 = vst [vmem:[#allocation10_spill] sm:$0xff] %v13914_v54  ;;  %659 = vst.msk [vmem:[#allocation2 + $0x18] sm:$0xff] %vm653_vm5, %v16642_v61  ;;  %v698_v63 = vcombine.high %v12036_v60, %v12036_v60  ;;  %v705_v2 = vrot.slane %v12036_v60, %v13893_v46 }
  0x10   :  { %12562 = vmatpush3.msra.mxu1 %v212_v39  ;;  %12570 = vmatpush3.msra.mxu0 %v202_v14  ;;  %v770_v52 = vrot.slane %v760_v50, %v13899_v49  ;;  %v766_v53 = vrot.slane %v753_v51, %v13899_v49  ;;  %v761_v55 = vcombine.high %v753_v51, %v753_v51 }
  0x11   :  { %12564 = vmatmul.mubr.f32.vlgmr.msra.gmra.mxu1 %v13861_v15  ;;  %12579 = vmatprep.subr.mxu1 %v13842_v3  ;;  %v762_v59 = vcombine.high %v760_v50, %v760_v50  ;;  %658 = vst.msk [vmem:[#allocation2 + $0x8] sm:$0xff] %vm653_vm5, %v16642_v61  ;;  %660 = vst.msk [vmem:[#allocation2 + $0x28] sm:$0xff] %vm653_vm5, %v16642_v61  ;;  %v718_v5 = vrot.slane %v705_v2, %v13899_v49 }
  0x12   :  { %12556 = vmatprep.mubr.f32.mxu0 %v156_v45  ;;  %12580 = vmatpush3.msra.mxu1 %v13842_v3  ;;  %vm781_vm1 = vcmp.eq.s32.totalorder %v13885_v35, %v770_v52  ;;  %vm779_vm2 = vcmp.eq.s32.totalorder %v13885_v35, %v766_v53  ;;  %vm782_vm3 = vcmp.eq.s32.totalorder %v13914_v54, %v770_v52 }
  0x13   :  { %12557 = vmatmul.mubr.f32.gmra.mxu0 %v166_v48  ;;  %12571 = vmatprep.subr.mxu0 %v209_v16  ;;  %v873_v56 = vsel %vm781_vm1, 1, %v16644_v9  ;;  %v871_v57 = vsel %vm779_vm2, 1, %v16644_v9  ;;  %v774_v58 = vrot.slane %v761_v55, %v13899_v49  ;;  %vm780_vm4 = vcmp.eq.s32.totalorder %v13914_v54, %v766_v53  ;;  %661 = vst.msk [vmem:[#allocation2 + $0x38] sm:$0xff] %vm653_vm5, %v16642_v61 }
  0x14   :  { %12566 = vmatprep.mubr.f32.mxu1 %v13864_v17  ;;  %12572 = vmatpush3.msra.mxu0 %v209_v16  ;;  %v874_v62 = vsel %vm782_vm3, 1, %v16644_v9  ;;  %v872_v0 = vsel %vm780_vm4, 1, %v16644_v9  ;;  %v778_v1 = vrot.slane %v762_v59, %v13899_v49  ;;  %v712_v6 = vrot.slane %v698_v63, %v13893_v46 }
  0x15   :  { %12567 = vmatmul.mubr.f32.gmra.mxu1 %v13869_v19  ;;  %12581 = vmatprep.subr.mxu1 %v13844_v4  ;;  %vm784_vm6 = vcmp.eq.s32.totalorder %v13914_v54, %v774_v58  ;;  %vm783_vm7 = vcmp.eq.s32.totalorder %v13885_v35, %v774_v58  ;;  %vm732_vm10 = vcmp.eq.s32.totalorder %v13914_v54, %v718_v5 }
  0x16   :  { %12573 = vmatprep.mubr.f32.mxu0 %v133_v18  ;;  %12582 = vmatpush3.msra.mxu1 %v13844_v4  ;;  %vm786_vm8 = vcmp.eq.s32.totalorder %v13914_v54, %v778_v1  ;;  %vm785_vm9 = vcmp.eq.s32.totalorder %v13885_v35, %v778_v1  ;;  %v713_v11 = vcombine.high %v705_v2, %v705_v2  ;;  %v788_v12 = vsel %vm732_vm10, 1, %v16644_v9 }
  0x17   :  { %12574 = vmatmul.mubr.f32.vlgmr.msra.gmra.mxu0 %v143_v22  ;;  %12589 = vmatprep.subr.mxu0 %v203_v21  ;;  %v878_v7 = vsel %vm786_vm8, 1, %v16644_v9  ;;  %v877_v8 = vsel %vm785_vm9, 1, %v16644_v9  ;;  %vm731_vm11 = vcmp.eq.s32.totalorder %v13885_v35, %v718_v5 }
  0x18   :  { %12583 = vmatprep.mubr.f32.mxu1 %v134_v25  ;;  %12590 = vmatpush3.msra.mxu0 %v203_v21  ;;  %v787_v13 = vsel %vm731_vm11, 1, %v16644_v9  ;;  %v726_v14 = vrot.slane %v713_v11, %v13899_v49 }
  0x19   :  { %12584 = vmatmul.mubr.f32.vlgmr.msra.gmra.mxu1 %v144_v30  ;;  %12599 = vmatprep.subr.mxu1 %v13842_v3 }
  0x1a   :  { %12576 = vmatprep.mubr.f32.mxu0 %v13876_v24  ;;  %12600 = vmatpush3.msra.mxu1 %v13842_v3  ;;  %v876_v3 = vsel %vm784_vm6, 1, %v16644_v9  ;;  %vm736_vm14 = vcmp.eq.s32.totalorder %v13914_v54, %v726_v14  ;;  %vm735_vm15 = vcmp.eq.s32.totalorder %v13885_v35, %v726_v14 }
  0x1b   :  { %12577 = vmatmul.mubr.f32.gmra.mxu0 %v13880_v26  ;;  %12591 = vmatprep.subr.mxu0 %v13873_v23  ;;  %v791_v20 = vsel %vm735_vm15, 1, %v16644_v9 }
  0x1c   :  { %12586 = vmatprep.mubr.f32.mxu1 %v154_v32  ;;  %12592 = vmatpush3.msra.mxu0 %v13873_v23 }
  0x1d   :  { %12587 = vmatmul.mubr.f32.gmra.mxu1 %v164_v34  ;;  %12601 = vmatprep.subr.mxu1 %v13844_v4 }
  0x1e   :  { %12593 = vmatprep.mubr.f32.mxu0 %v13857_v10  ;;  %12602 = vmatpush3.msra.mxu1 %v13844_v4  ;;  %v875_v4 = vsel %vm783_vm7, 1, %v16644_v9 }
  0x1f   :  { %12594 = vmatmul.mubr.f32.vlgmr.msra.gmra.mxu0 %v13861_v15  ;;  %12603 = vmatprep.mubr.f32.mxu1 %v13857_v10  ;;  %v722_v10 = vrot.slane %v712_v6, %v13899_v49 }
  0x20   :  { %12596 = vmatprep.mubr.f32.mxu0 %v13864_v17  ;;  %886 = vperm.xlu1 %13544, %v873_v56  }
  0x21   :  { %12604 = vmatmul.mubr.f32.vlgmr.msra.gmra.mxu1 %v13861_v15  ;;  %880 = vperm.xlu0 %13543, %v871_v57   ;;  %vm734_vm12 = vcmp.eq.s32.totalorder %v13914_v54, %v722_v10  ;;  %v714_v15 = vcombine.high %v712_v6, %v712_v6  ;;  %vm733_vm13 = vcmp.eq.s32.totalorder %v13885_v35, %v722_v10 }
  0x22   :  { %12606 = vmatprep.mubr.f32.mxu1 %v13864_v17  ;;  %12620 = vmatprep.subr.mxu1 %v16642_v61  ;;  %v790_v16 = vsel %vm734_vm12, 1, %v16644_v9  ;;  %v789_v17 = vsel %vm733_vm13, 1, %v16644_v9 }
  0x23   :  { %12597 = vmatmul.mubr.f32.gmra.mxu0 %v13869_v19  ;;  %12609 = vmatprep.subr.mxu0 %v16642_v61  ;;  %v730_v18 = vrot.slane %v714_v15, %v13899_v49 }
  0x24   :  { %889 = vperm.xlu1 %13544, %v874_v62  }
  0x25   :  { %12607 = vmatmul.mubr.f32.gmra.mxu1 %v13869_v19  ;;  %883 = vperm.xlu0 %13543, %v872_v0   ;;  %v792_v19 = vsel %vm736_vm14, 1, %v16644_v9  ;;  %vm738_vm0 = vcmp.eq.s32.totalorder %v13914_v54, %v730_v18  ;;  %vm737_vm1 = vcmp.eq.s32.totalorder %v13885_v35, %v730_v18 }
  0x26   :  { %v794_v21 = vsel %vm738_vm0, 1, %v16644_v9  ;;  %v793_v22 = vsel %vm737_vm1, 1, %v16644_v9 }
  0x28   :  { %895 = vperm.xlu1 %13544, %v876_v3  }
  0x29   :  { %892 = vperm.xlu0 %13543, %v875_v4  }
  0x2c   :  { %901 = vperm.xlu1 %13544, %v878_v7  }
  0x2d   :  { %898 = vperm.xlu0 %13543, %v877_v8  }
  0x30   :  { %799 = vperm.xlu1 %13544, %v788_v12  }
  0x31   :  { %796 = vperm.xlu0 %13543, %v787_v13   ;;  %v686_v13 = vld [vmem:[#allocation2 + $0x18] sm:$0xff] }
  0x34   :  { %805 = vperm.xlu1 %13544, %v790_v16  }
  0x35   :  { %802 = vperm.xlu0 %13543, %v789_v17   ;;  %v684_v17 = vld [vmem:[#allocation2 + $0x8] sm:$0xff] }
  0x38   :  { %811 = vperm.xlu1 %13544, %v792_v19  }
  0x39   :  { %808 = vperm.xlu0 %13543, %v791_v20   ;;  %v688_v20 = vld [vmem:[#allocation2 + $0x28] sm:$0xff] }
  0x3c   :  { %817 = vperm.xlu1 %13544, %v794_v21  }
  0x3d   :  { %814 = vperm.xlu0 %13543, %v793_v22  }
  0x9b   :  { %v13983_v23 = vpop.permute.xlu1 %886 }
  0x9c   :  { %v13985_v24 = vpop.permute.xlu0 %880  ;;  %vm905_vm9 = vcmp.eq.s32.totalorder %v13983_v23, 1 }
  0x9d   :  { %vm903_vm11 = vcmp.eq.s32.totalorder %v13985_v24, 1 }
  0x9f   :  { %v890_v25 = vpop.permute.xlu1 %889 }
  0xa0   :  { %v13987_v26 = vpop.permute.xlu0 %883  ;;  %vm906_vm2 = vcmp.eq.s32.totalorder %v890_v25, 1 }
  0xa1   :  { %vm904_vm3 = vcmp.eq.s32.totalorder %v13987_v26, 1 }
  0xa3   :  { %v13989_v27 = vpop.permute.xlu1 %895 }
  0xa4   :  { %v13991_v28 = vpop.permute.xlu0 %892  ;;  %vm908_vm4 = vcmp.eq.s32.totalorder %v13989_v27, 1 }
  0xa5   :  { %vm907_vm13 = vcmp.eq.s32.totalorder %v13991_v28, 1 }
  0xa7   :  { %v13993_v29 = vpop.permute.xlu1 %901 }
  0xa8   :  { %v13998_v38 = vpop.permute.xlu0 %898  ;;  %vm910_vm6 = vcmp.eq.s32.totalorder %v13993_v29, 1 }
  0xa9   :  { %vm909_vm14 = vcmp.eq.s32.totalorder %v13998_v38, 1 }
  0xab   :  { %v14000_v39 = vpop.permute.xlu1 %799 }
  0xac   :  { %v14002_v55 = vpop.permute.xlu0 %796  ;;  %vm820_vm7 = vcmp.eq.s32.totalorder %v14000_v39, 1 }
  0xad   :  { %vm819_vm15 = vcmp.eq.s32.totalorder %v14002_v55, 1 }
  0xaf   :  { %v806_v56 = vpop.permute.xlu1 %805 }
  0xb0   :  { %v803_v7 = vpop.permute.xlu0 %802  ;;  %vm822_vm8 = vcmp.eq.s32.totalorder %v806_v56, 1 }
  0xb1   :  { %v830_v27 = vsel %vm822_vm8, %v686_v13, 0.0  ;;  %vm821_vm0 = vcmp.eq.s32.totalorder %v803_v7, 1  ;;  %vm13766_vm8 = vmmov 0  }
  0xb2   :  { %12628 = vmatprep.mubr.msk.f32.mxu1 %vm13766_vm8, %v16642_v61  ;;  %12617 = vmatprep.mubr.msk.f32.mxu0 %vm13766_vm8, %v16642_v61 }
  0xb3   :  { %v812_v10 = vpop.permute.xlu1 %811 }
  0xb4   :  { %v14009_v26 = vpop.permute.xlu0 %808  ;;  %vm824_vm10 = vcmp.eq.s32.totalorder %v812_v10, 1 }
  0xb5   :  { %v832_v29 = vsel %vm824_vm10, %v688_v20, 0.0  ;;  %vm823_vm1 = vcmp.eq.s32.totalorder %v14009_v26, 1 }
  0xb8   :  { %v815_v56 = vpop.permute.xlu0 %814 }
  0xcf   :  { %v12555_v30 = vpop.f32.mrf.mxu0 }
  0xd0   :  { %v149_v37 = vadd.f32 %v12555_v30, %v12033_v31 }
  0xd1   :  { %v138_v32 = vpop.f32.mrf.mxu0  ;;  %v12565_v33 = vpop.f32.mrf.mxu1 }
  0xd2   :  { %v139_v42 = vadd.f32 %v12033_v31, %v138_v32  ;;  %v256_v45 = vadd.f32 %v12565_v33, %v149_v37  ;;  %v690_v32 = vld [vmem:[#allocation2 + $0x38] sm:$0xff] }
  0xd3   :  { %v12558_v34 = vpop.f32.mrf.mxu0  ;;  %v249_v36 = vpop.f32.mrf.mxu1 }
  0xd4   :  { %v169_v47 = vadd.f32 %v12558_v34, %v12033_v31  ;;  %v250_v51 = vadd.f32 %v249_v36, %v139_v42  ;;  %v912_v34 = vsel %vm904_vm3, %v684_v17, 0.0  ;;  %vm959_vm3 = vcmask 1041409  }
  0xd5   :  { %v158_v40 = vpop.f32.mrf.mxu0  ;;  %v12568_v41 = vpop.f32.mrf.mxu1 }
  0xd6   :  { %v159_v52 = vadd.f32 %v12033_v31, %v158_v40  ;;  %v268_v59 = vadd.f32 %v12568_v41, %v169_v47  ;;  %v914_v31 = vsel %vm906_vm2, %v686_v13, 0.0  ;;  %v818_v40 = vpop.permute.xlu1 %817  ;;  %v916_v41 = vsel %vm908_vm4, %v688_v20, 0.0 }
  0xd7   :  { %v261_v43 = vpop.f32.mrf.mxu1  ;;  %v12575_v44 = vpop.f32.mrf.mxu0  ;;  %v929_v47 = vsel %vm653_vm5, %v914_v31, 0.0  ;;  %vm826_vm12 = vcmp.eq.s32.totalorder %v818_v40, 1  ;;  %vm825_vm2 = vcmp.eq.s32.totalorder %v815_v56, 1  ;;  %vm961_vm4 = vcmask 1042434  }
  0xd8   :  { %v351_v53 = vadd.f32 %v12575_v44, %v256_v45  ;;  %v262_v0 = vadd.f32 %v261_v43, %v159_v52  ;;  %v918_v43 = vsel %vm910_vm6, %v690_v32, 0.0  ;;  %v828_v44 = vsel %vm820_vm7, %v684_v17, 0.0 }
  0xd9   :  { %v343_v48 = vpop.f32.mrf.mxu0  ;;  %v12585_v50 = vpop.f32.mrf.mxu1  ;;  %v947_v39 = vsel %vm653_vm5, %v918_v43, 0.0  ;;  %vm963_vm6 = vcmask 1043459   ;;  %vm966_vm7 = vcmask 257024  }
  0xda   :  { %v344_v60 = vadd.f32 %v343_v48, %v250_v51  ;;  %v448_v1 = vadd.f32 %v12585_v50, %v351_v53  ;;  %v920_v48 = vsel %vm653_vm5, %v912_v34, 0.0  ;;  %v938_v50 = vsel %vm653_vm5, %v916_v41, 0.0 }
  0xdb   :  { %v12578_v57 = vpop.f32.mrf.mxu0  ;;  %v439_v58 = vpop.f32.mrf.mxu1  ;;  %v836_v51 = vsel %vm653_vm5, %v828_v44, 0.0  ;;  %v845_v53 = vsel %vm653_vm5, %v830_v27, 0.0 }
  0xdc   :  { %v365_v2 = vadd.f32 %v12578_v57, %v268_v59  ;;  %v440_v5 = vadd.f32 %v439_v58, %v344_v60  ;;  %v834_v57 = vsel %vm826_vm12, %v690_v32, 0.0  ;;  %v854_v60 = vsel %vm653_vm5, %v832_v29, 0.0 }
  0xdd   :  { %v357_v62 = vpop.f32.mrf.mxu0  ;;  %v12588_v63 = vpop.f32.mrf.mxu1 }
  0xde   :  { %v358_v6 = vadd.f32 %v357_v62, %v262_v0  ;;  %v464_v14 = vadd.f32 %v12588_v63, %v365_v2 }
  0xdf   :  { %v455_v3 = vpop.f32.mrf.mxu1  ;;  %v12595_v4 = vpop.f32.mrf.mxu0 }
  0xe0   :  { %v547_v8 = vadd.f32 %v12595_v4, %v448_v1  ;;  %v456_v21 = vadd.f32 %v455_v3, %v358_v6 }
  0xe1   :  { %v540_v11 = vpop.f32.mrf.mxu0  ;;  %v12605_v12 = vpop.f32.mrf.mxu1 }
  0xe2   :  { %v541_v15 = vadd.f32 %v540_v11, %v440_v5  ;;  %v638_v16 = vadd.f32 %v12605_v12, %v547_v8  ;;  %v863_v5 = vsel %vm653_vm5, %v834_v57, 0.0 }
  0xe3   :  { %v12598_v18 = vpop.f32.mrf.mxu0  ;;  %v631_v19 = vpop.f32.mrf.mxu1 }
  0xe4   :  { %655 = vst.msk [vmem:[#allocation2 + $0x10] sm:$0xff] %vm653_vm5, %v638_v16  ;;  %v559_v22 = vadd.f32 %v12598_v18, %v464_v14  ;;  %v632_v30 = vadd.f32 %v631_v19, %v541_v15 }
  0xe5   :  { %v552_v25 = vpop.f32.mrf.mxu0  ;;  %v12608_v33 = vpop.f32.mrf.mxu1 }
  0xe6   :  { %654 = vst.msk [vmem:[#allocation2] sm:$0xff] %vm653_vm5, %v632_v30  ;;  %v553_v36 = vadd.f32 %v552_v25, %v456_v21  ;;  %v650_v37 = vadd.f32 %v12608_v33, %v559_v22 }
  0xe7   :  { %v643_v42 = vpop.f32.mrf.mxu1 }
  0xe8   :  { %657 = vst.msk [vmem:[#allocation2 + $0x30] sm:$0xff] %vm653_vm5, %v650_v37  ;;  %v644_v45 = vadd.f32 %v643_v42, %v553_v36 }
  0xea   :  { %656 = vst.msk [vmem:[#allocation2 + $0x20] sm:$0xff] %vm653_vm5, %v644_v45 }
  0xeb   :  { %v685_v52 = vld [vmem:[#allocation2 + $0x10] sm:$0xff] }
  0xec   :  { %v913_v58 = vsel %vm905_vm9, %v685_v52, 0.0  ;;  %v829_v59 = vsel %vm821_vm0, %v685_v52, 0.0 }
  0xed   :  { %v683_v62 = vld [vmem:[#allocation2] sm:$0xff]  ;;  %v928_v63 = vsel %vm653_vm5, %v913_v58, 0.0  ;;  %v844_v0 = vsel %vm653_vm5, %v829_v59, 0.0 }
  0xee   :  { %v911_v1 = vsel %vm903_vm11, %v683_v62, 0.0  ;;  %v930_v2 = vadd.f32 %v929_v47, %v928_v63  ;;  %v827_v3 = vsel %vm819_vm15, %v683_v62, 0.0  ;;  %v846_v4 = vadd.f32 %v845_v53, %v844_v0 }
  0xef   :  { %v689_v23 = vld [vmem:[#allocation2 + $0x30] sm:$0xff]  ;;  %v919_v6 = vsel %vm653_vm5, %v911_v1, 0.0  ;;  %v835_v7 = vsel %vm653_vm5, %v827_v3, 0.0 }
  0xf0   :  { %v833_v8 = vsel %vm825_vm2, %v689_v23, 0.0  ;;  %v917_v10 = vsel %vm909_vm14, %v689_v23, 0.0  ;;  %v921_v11 = vadd.f32 %v920_v48, %v919_v6  ;;  %v931_v24 = vrot.slane %v930_v2, 4 }
  0xf1   :  { %v862_v12 = vsel %vm653_vm5, %v833_v8, 0.0  ;;  %v946_v55 = vsel %vm653_vm5, %v917_v10, 0.0  ;;  %v687_v13 = vld [vmem:[#allocation2 + $0x20] sm:$0xff]  ;;  %v837_v14 = vadd.f32 %v836_v51, %v835_v7  ;;  %v847_v15 = vrot.slane %v846_v4, 4 }
  0xf2   :  { %v864_v16 = vadd.f32 %v863_v5, %v862_v12  ;;  %v915_v17 = vsel %vm907_vm13, %v687_v13, 0.0  ;;  %v922_v18 = vrot.slane %v921_v11, 4  ;;  %v932_v19 = vadd.f32 %v931_v24, %v930_v2 }
  0xf3   :  { %v937_v20 = vsel %vm653_vm5, %v915_v17, 0.0  ;;  %v948_v21 = vadd.f32 %v947_v39, %v946_v55  ;;  %v831_v38 = vsel %vm823_vm1, %v687_v13, 0.0  ;;  %v838_v22 = vrot.slane %v837_v14, 4 }
  0xf4   :  { %v865_v30 = vrot.slane %v864_v16, 4  ;;  %v923_v31 = vadd.f32 %v922_v18, %v921_v11  ;;  %v933_v32 = vrot.slane %v932_v19, 2  ;;  %v939_v25 = vadd.f32 %v938_v50, %v937_v20 }
  0xf5   :  { %v949_v33 = vrot.slane %v948_v21, 4  ;;  %v839_v34 = vadd.f32 %v838_v22, %v837_v14  ;;  %v848_v36 = vadd.f32 %v847_v15, %v846_v4  ;;  %v853_v37 = vsel %vm653_vm5, %v831_v38, 0.0 }
  0xf6   :  { %v866_v28 = vadd.f32 %v865_v30, %v864_v16  ;;  %v924_v40 = vrot.slane %v923_v31, 2  ;;  %v934_v41 = vadd.f32 %v933_v32, %v932_v19  ;;  %v940_v42 = vrot.slane %v939_v25, 4 }
  0xf7   :  { %v950_v43 = vadd.f32 %v949_v33, %v948_v21  ;;  %v840_v44 = vrot.slane %v839_v34, 2  ;;  %v849_v45 = vrot.slane %v848_v36, 2  ;;  %v855_v47 = vadd.f32 %v854_v60, %v853_v37 }
  0xf8   :  { %v867_v26 = vrot.slane %v866_v28, 2  ;;  %v925_v48 = vadd.f32 %v924_v40, %v923_v31  ;;  %v941_v27 = vadd.f32 %v940_v42, %v939_v25  ;;  %v935_v56 = vrot.slane %v934_v41, 1 }
  0xf9   :  { %v951_v29 = vrot.slane %v950_v43, 2  ;;  %v841_v39 = vadd.f32 %v840_v44, %v839_v34  ;;  %v856_v51 = vrot.slane %v855_v47, 4  ;;  %v850_v53 = vadd.f32 %v849_v45, %v848_v36 }
  0xfa   :  { %v926_v50 = vrot.slane %v925_v48, 1  ;;  %v942_v52 = vrot.slane %v941_v27, 2  ;;  %v868_v63 = vadd.f32 %v867_v26, %v866_v28  ;;  %v936_v4 = vadd.f32 %v935_v56, %v934_v41 }
  0xfb   :  { %v952_v57 = vadd.f32 %v951_v29, %v950_v43  ;;  %v857_v58 = vadd.f32 %v856_v51, %v855_v47  ;;  %v842_v62 = vrot.slane %v841_v39, 1  ;;  %v851_v60 = vrot.slane %v850_v53, 1 }
  0xfc   :  { %v943_v59 = vadd.f32 %v942_v52, %v941_v27  ;;  %v927_v0 = vadd.f32 %v926_v50, %v925_v48  ;;  %v869_v7 = vrot.slane %v868_v63, 1 }
  0xfd   :  { %v953_v1 = vrot.slane %v952_v57, 1  ;;  %v858_v2 = vrot.slane %v857_v58, 2  ;;  %v843_v6 = vadd.f32 %v842_v62, %v841_v39  ;;  %v852_v12 = vadd.f32 %v851_v60, %v850_v53 }
  0xfe   :  { %v944_v3 = vrot.slane %v943_v59, 1  ;;  %v1049_v10 = vsel %vm959_vm3, %v936_v4, %v927_v0  ;;  %v870_v15 = vadd.f32 %v869_v7, %v868_v63 }
  0xff   :  { %v859_v23 = vadd.f32 %v858_v2, %v857_v58  ;;  %v954_v8 = vadd.f32 %v953_v1, %v952_v57  ;;  %v960_v16 = vsel %vm959_vm3, %v852_v12, %v843_v6 }
 0x100   :  { %v945_v5 = vadd.f32 %v944_v3, %v943_v59 }
 0x101   :  { %v860_v11 = vrot.slane %v859_v23, 1 }
 0x102   :  { %v1050_v24 = vsel %vm961_vm4, %v945_v5, %v1049_v10 }
 0x103   :  { %v1051_v55 = vsel %vm963_vm6, %v954_v8, %v1050_v24  ;;  %v861_v13 = vadd.f32 %v860_v11, %v859_v23  ;;  %v672_v23 = vld [vmem:[%s16639_s9 + $0x10] sm:$0xff] }
 0x104   :  { %v1053_v14 = vsel %vm966_vm7, %v1051_v55, 0.0  ;;  %v14114_v7 = vand.u32 4294901760, %v672_v23 }
 0x105   :  { %1054 = vadd.xlane.f32.xlu0 %v1053_v14  ;;  %v962_v17 = vsel %vm961_vm4, %v861_v13, %v960_v16 }
 0x106   :  { %v964_v18 = vsel %vm963_vm6, %v870_v15, %v962_v17  ;;  %v14122_v11 = vsub.f32 %v672_v23, %v14114_v7 }
 0x107   :  { %v967_v19 = vsel %vm966_vm7, %v964_v18, 0.0 }
 0x108   :  { %968 = vadd.xlane.f32.xlu1 %v967_v19  ;;  %v14133_v55 = vand.u32 4294901760, %v14122_v11 }
 0x18e   :  { %v1055_v20 = vpop.xlane.xlu0 %1054 }
 0x18f   :  { %v1056_v21 = vmul.f32 0.03125, %v1055_v20  ;;  %v670_v20 = vld [vmem:[%s16639_s9] sm:$0xff] }
 0x191   :  { %v1058_v38 = vrot.slane %v1056_v21, 1  ;;  %v1059_v22 = vrot.slane %v1056_v21, 2  ;;  %v1060_v30 = vrot.slane %v1056_v21, 3  ;;  %v969_v31 = vpop.xlane.xlu1 %968  ;;  %v14063_v25 = vsub.f32 %v927_v0, %v1056_v21 }
 0x192   :  { %v971_v32 = vmul.f32 0.03125, %v969_v31  ;;  %v14163_v21 = vand.u32 4294901760, %v670_v20 }
 0x193   :  { %v14065_v33 = vsub.f32 %v936_v4, %v1058_v38  ;;  %v14067_v34 = vsub.f32 %v945_v5, %v1059_v22  ;;  %v14069_v36 = vsub.f32 %v954_v8, %v1060_v30  ;;  %v1069_v48 = vmul.f32 %v14063_v25, %v14063_v25  ;;  %v673_v4 = vld [vmem:[%s16639_s9 + $0x18] sm:$0xff]  ;;  %v671_v5 = vld [vmem:[%s16639_s9 + $0x8] sm:$0xff] }
 0x194   :  { %v973_v37 = vrot.slane %v971_v32, 1  ;;  %v974_v28 = vrot.slane %v971_v32, 2  ;;  %v975_v40 = vrot.slane %v971_v32, 3  ;;  %v14077_v44 = vsub.f32 %v843_v6, %v971_v32 }
 0x195   :  { %v1070_v41 = vmul.f32 %v14065_v33, %v14065_v33  ;;  %v1071_v42 = vmul.f32 %v14067_v34, %v14067_v34  ;;  %v1072_v43 = vmul.f32 %v14069_v36, %v14069_v36  ;;  %v14112_v6 = vand.u32 4294901760, %v673_v4 }
 0x196   :  { %v14079_v45 = vsub.f32 %v852_v12, %v973_v37  ;;  %v14081_v47 = vsub.f32 %v861_v13, %v974_v28  ;;  %v14083_v26 = vsub.f32 %v870_v15, %v975_v40  ;;  %v984_v57 = vmul.f32 %v14077_v44, %v14077_v44 }
 0x197   :  { %v1077_v27 = vrot.slane %v1070_v41, 7  ;;  %v1079_v29 = vrot.slane %v1071_v42, 6  ;;  %v1081_v53 = vrot.slane %v1072_v43, 5  ;;  %v14116_v8 = vand.u32 4294901760, %v671_v5  ;;  %12610 = vmatpush3.msra.mxu0 %v14112_v6 }
 0x198   :  { %v985_v39 = vmul.f32 %v14079_v45, %v14079_v45  ;;  %v986_v51 = vmul.f32 %v14081_v47, %v14081_v47  ;;  %v987_v50 = vmul.f32 %v14083_v26, %v14083_v26  ;;  %v14119_v10 = vsub.f32 %v673_v4, %v14112_v6  ;;  %12611 = vmatprep.subr.mxu0 %v16642_v61 }
 0x199   :  { %v1078_v52 = vsel %vm959_vm3, %v1077_v27, %v1069_v48  ;;  %v14125_v24 = vsub.f32 %v671_v5, %v14116_v8  ;;  %12612 = vmatpush3.msra.mxu0 %v14114_v7  ;;  %v1255_v15 = vsub.f32 %v14122_v11, %v14133_v55  ;;  %v14166_v38 = vsub.f32 %v670_v20, %v14163_v21 }
 0x19a   :  { %v1080_v56 = vsel %vm961_vm4, %v1079_v29, %v1078_v52  ;;  %v992_v58 = vrot.slane %v985_v39, 7  ;;  %v994_v59 = vrot.slane %v986_v51, 6  ;;  %v996_v1 = vrot.slane %v987_v50, 5  ;;  %12613 = vmatprep.subr.mxu0 %v16642_v61 }
 0x19b   :  { %v1082_v62 = vsel %vm963_vm6, %v1081_v53, %v1080_v56  ;;  %v14130_v12 = vand.u32 4294901760, %v14119_v10  ;;  %v14136_v13 = vand.u32 4294901760, %v14125_v24  ;;  %12614 = vmatpush3.msra.mxu0 %v14116_v8  ;;  %v14150_v18 = vand.u32 4294901760, %v1255_v15  ;;  %v12041_v15 = vld [vmem:[%s16637_s7] ss:$0 sm:$0xff] }
 0x19c   :  { %v1084_v63 = vsel %vm966_vm7, %v1082_v62, 0.0  ;;  %v993_v0 = vsel %vm959_vm3, %v992_v58, %v984_v57  ;;  %12615 = vmatprep.subr.mxu0 %v16642_v61  ;;  %v14171_v22 = vand.u32 4294901760, %v14166_v38 }
 0x19d   :  { %1085 = vadd.xlane.f32.xlu0 %v1084_v63  ;;  %v995_v2 = vsel %vm961_vm4, %v994_v59, %v993_v0  ;;  %v1248_v14 = vsub.f32 %v14119_v10, %v14130_v12  ;;  %v1262_v16 = vsub.f32 %v14125_v24, %v14136_v13  ;;  %12616 = vmatpush3.msra.mxu0 %v14163_v21  ;;  %v12040_v0 = vld [vmem:[%s16636_s6] ss:$0 sm:$0xff] }
 0x19e   :  { %v997_v3 = vsel %vm963_vm6, %v996_v1, %v995_v2  ;;  %12631 = vmatprep.subr.mxu0 %v16642_v61  ;;  %v1269_v30 = vsub.f32 %v14166_v38, %v14171_v22 }
 0x19f   :  { %v999_v60 = vsel %vm966_vm7, %v997_v3, 0.0  ;;  %v14148_v17 = vand.u32 4294901760, %v1248_v14  ;;  %v14153_v19 = vand.u32 4294901760, %v1262_v16 }
 0x1a0   :  { %v14175_v31 = vand.u32 4294901760, %v1269_v30 }
 0x1a1   :  { %1000 = vadd.xlane.f32.xlu0 %v999_v60  ;;  %12621 = vmatpush3.msra.mxu1 %v14148_v17  ;;  %16692 = vst [vmem:[#allocation11_spill] sm:$0xff] %v14153_v19 }
 0x1a2   :  { %12622 = vmatprep.subr.mxu1 %v16642_v61  ;;  %16693 = vst [vmem:[#allocation12_spill] sm:$0xff] %v14175_v31 }
 0x1a3   :  { %12623 = vmatpush3.msra.mxu1 %v14150_v18 }
 0x1a4   :  { %12624 = vmatprep.subr.mxu1 %v16642_v61 }
 0x1a5   :  { %12625 = vmatpush3.msra.mxu1 %v14153_v19 }
 0x1a6   :  { %12626 = vmatprep.subr.mxu1 %v16642_v61 }
 0x1a7   :  { %12627 = vmatpush3.msra.mxu1 %v14175_v31 }
 0x1a8   :  { %12642 = vmatprep.subr.mxu1 %v16642_v61 }
 0x226   :  { %v1086_v32 = vpop.xlane.xlu0 %1085 }
 0x227   :  { %v1087_v37 = vmul.f32 0.032258064, %v1086_v32 }
 0x229   :  { %13545 = vrsqrt.f32 %v1087_v37  ;;  %vm1090_vm9 = vcmp.eq.f32.partialorder %v1087_v37, inf  ;;  %v1093_v43 = vand.u32 2147483648, %v1087_v37  ;;  %vm1092_vm10 = vcmp.eq.f32.partialorder %v1087_v37, 0.0 }
 0x22a   :  { %v1001_v28 = vpop.xlane.xlu0 %1000 }
 0x22b   :  { %v1003_v40 = vmul.f32 0.032258064, %v1001_v28 }
 0x22d   :  { %13547 = vrsqrt.f32 %v1003_v40  ;;  %vm1006_vm11 = vcmp.eq.f32.partialorder %v1003_v40, inf  ;;  %v1009_v50 = vand.u32 2147483648, %v1003_v40  ;;  %vm1008_vm12 = vcmp.eq.f32.partialorder %v1003_v40, 0.0 }
 0x236   :  { %v13546_v41 = vpop.eup %13545 }
 0x237   :  { %v1089_v42 = vmul.f32 %v13546_v41, %v1087_v37  ;;  %v12038_v41 = vld [vmem:[%s16634_s4] ss:$0 sm:$0xff] }
 0x239   :  { %v1091_v48 = vsel %vm1090_vm9, %v1087_v37, %v1089_v42 }
 0x23a   :  { %v13548_v27 = vpop.eup %13547  ;;  %v1094_v29 = vsel %vm1092_vm10, %v1093_v43, %v1091_v48 }
 0x23b   :  { %v1095_v39 = vadd.f32 1e-06, %v1094_v29  ;;  %v1005_v51 = vmul.f32 %v13548_v27, %v1003_v40 }
 0x23d   :  { %13549 = vrcp.f32 %v1095_v39  ;;  %v1007_v52 = vsel %vm1006_vm11, %v1003_v40, %v1005_v51  ;;  %v669_v39 = vld [vmem:[%s16638_s8 + $0x18] sm:$0xff] }
 0x23e   :  { %v1010_v53 = vsel %vm1008_vm12, %v1009_v50, %v1007_v52 }
 0x23f   :  { %v1011_v56 = vadd.f32 1e-06, %v1010_v53  ;;  %v668_v53 = vld [vmem:[%s16638_s8 + $0x10] sm:$0xff] }
 0x241   :  { %13551 = vrcp.f32 %v1011_v56 }
 0x24a   :  { %v13550_v57 = vpop.eup %13549 }
 0x24b   :  { %v1098_v58 = vrot.slane %v13550_v57, 1  ;;  %v1099_v59 = vrot.slane %v13550_v57, 2  ;;  %v1100_v62 = vrot.slane %v13550_v57, 3  ;;  %v1105_v63 = vmul.f32 %v13550_v57, %v14063_v25 }
 0x24d   :  { %v1106_v1 = vmul.f32 %v1098_v58, %v14065_v33  ;;  %v1107_v2 = vmul.f32 %v1099_v59, %v14067_v34  ;;  %v1108_v3 = vmul.f32 %v1100_v62, %v14069_v36  ;;  %v1115_v4 = vmul.f32 %v12040_v0, %v1105_v63 }
 0x24e   :  { %v13552_v60 = vpop.eup %13551  ;;  %v14218_v59 = vand.u32 4294901760, %v669_v39  ;;  %v14227_v63 = vand.u32 4294901760, %v668_v53 }
 0x24f   :  { %v1116_v23 = vmul.f32 %v12040_v0, %v1106_v1  ;;  %v1117_v5 = vmul.f32 %v12040_v0, %v1107_v2  ;;  %v1118_v14 = vmul.f32 %v12040_v0, %v1108_v3  ;;  %v1014_v25 = vrot.slane %v13552_v60, 1  ;;  %v666_v1 = vld [vmem:[%s16638_s8] sm:$0xff] }
 0x250   :  { %v1015_v32 = vrot.slane %v13552_v60, 2  ;;  %v1125_v37 = vadd.f32 %v12041_v15, %v1115_v4  ;;  %v1016_v48 = vrot.slane %v13552_v60, 3  ;;  %v1021_v51 = vmul.f32 %v13552_v60, %v14077_v44  ;;  %v667_v44 = vld [vmem:[%s16638_s8 + $0x8] sm:$0xff] }
 0x251   :  { %v1126_v16 = vadd.f32 %v12041_v15, %v1116_v23  ;;  %v1127_v20 = vadd.f32 %v12041_v15, %v1117_v5  ;;  %v1128_v30 = vadd.f32 %v12041_v15, %v1118_v14  ;;  %v1022_v33 = vmul.f32 %v1014_v25, %v14079_v45 }
 0x252   :  { %v1023_v42 = vmul.f32 %v1015_v32, %v14081_v47  ;;  %v12039_v47 = vld [vmem:[%s16635_s5] ss:$0 sm:$0xff]  ;;  %v1024_v56 = vmul.f32 %v1016_v48, %v14083_v26  ;;  %v1031_v62 = vmul.f32 %v12038_v41, %v1021_v51  ;;  %v14235_v4 = vsub.f32 %v669_v39, %v14218_v59 }
 0x253   :  { %v1133_v34 = vrot.slane %v1126_v16, 7  ;;  %v1135_v28 = vrot.slane %v1127_v20, 6  ;;  %v1137_v40 = vrot.slane %v1128_v30, 5  ;;  %v1032_v27 = vmul.f32 %v12038_v41, %v1022_v33 }
 0x254   :  { %v1033_v52 = vmul.f32 %v12038_v41, %v1023_v42  ;;  %v1034_v2 = vmul.f32 %v12038_v41, %v1024_v56  ;;  %v14237_v23 = vand.u32 4294901760, %v667_v44  ;;  %v1041_v5 = vadd.f32 %v12039_v47, %v1031_v62 }
 0x255   :  { %v1134_v36 = vsel %vm959_vm3, %v1133_v34, %v1125_v37  ;;  %v1042_v57 = vadd.f32 %v12039_v47, %v1032_v27  ;;  %v14242_v15 = vsub.f32 %v668_v53, %v14227_v63  ;;  %v14244_v25 = vand.u32 4294901760, %v666_v1 }
 0x256   :  { %v1136_v43 = vsel %vm961_vm4, %v1135_v28, %v1134_v36  ;;  %v1043_v0 = vadd.f32 %v12039_v47, %v1033_v52  ;;  %v1044_v20 = vadd.f32 %v12039_v47, %v1034_v2  ;;  %v14250_v32 = vand.u32 4294901760, %v14235_v4 }
 0x257   :  { %v1138_v29 = vsel %vm963_vm6, %v1137_v40, %v1136_v43  ;;  %v1630_v3 = vrot.slane %v1042_v57, 7  ;;  %v14253_v33 = vsub.f32 %v667_v44, %v14237_v23  ;;  %v14259_v37 = vand.u32 4294901760, %v14242_v15 }
 0x258   :  { %v1139_v45 = vsel %vm653_vm5, %v1138_v29, 0  ;;  %2139 = vrot.lane.b32.xlu1 %v1138_v29, %s13767_s26  ;;  %v1632_v16 = vrot.slane %v1043_v0, 6  ;;  %v14262_v34 = vsub.f32 %v666_v1, %v14244_v25  ;;  %v1634_v36 = vrot.slane %v1044_v20, 5 }
 0x259   :  { %v14207_v50 = vand.u32 4294901760, %v1139_v45  ;;  %v1631_v30 = vsel %vm959_vm3, %v1630_v3, %v1041_v5  ;;  %v1745_v40 = vsub.f32 %v14235_v4, %v14250_v32  ;;  %v14272_v41 = vand.u32 4294901760, %v14253_v33 }
 0x25a   :  { %v1633_v28 = vsel %vm961_vm4, %v1632_v16, %v1631_v30  ;;  %v1752_v43 = vsub.f32 %v14242_v15, %v14259_v37  ;;  %v14284_v48 = vand.u32 4294901760, %v14262_v34 }
 0x25b   :  { %v1211_v58 = vsub.f32 %v1139_v45, %v14207_v50  ;;  %12629 = vmatmul.mubr.f32.vlgmr.msra.gmra.mxu1 %v14207_v50  ;;  %v14277_v42 = vsel %vm963_vm6, %v1634_v36, %v1633_v28  ;;  %v14291_v27 = vand.u32 4294901760, %v1745_v40  ;;  %v1759_v29 = vsub.f32 %v14253_v33, %v14272_v41 }
 0x25c   :  { %12643 = vmatpush3.msra.mxu1 %v14112_v6  ;;  %12650 = vmatprep.mubr.msk.f32.mxu1 %vm13766_vm8, %v16642_v61  ;;  %v1636_v45 = vsel %vm653_vm5, %v14277_v42, 0  ;;  %v14301_v39 = vand.u32 4294901760, %v1752_v43  ;;  %v1766_v51 = vsub.f32 %v14262_v34, %v14284_v48 }
 0x25d   :  { %12644 = vmatprep.subr.mxu1 %v16642_v61  ;;  %v1212_v26 = vand.u32 4294901760, %v1211_v58  ;;  %v14307_v47 = vand.u32 4294901760, %v1636_v45  ;;  %v14311_v52 = vand.u32 4294901760, %v1759_v29 }
 0x25e   :  { %12645 = vmatpush3.msra.mxu1 %v14114_v7  ;;  %v14317_v53 = vand.u32 4294901760, %v1766_v51 }
 0x25f   :  { %12646 = vmatprep.subr.mxu1 %v16642_v61  ;;  %v1213_v60 = vsub.f32 %v1211_v58, %v1212_v26  ;;  %v1708_v56 = vsub.f32 %v1636_v45, %v14307_v47 }
 0x260   :  { %12647 = vmatpush3.msra.mxu1 %v14116_v8 }
 0x261   :  { %12648 = vmatprep.subr.mxu1 %v16642_v61  ;;  %v1214_v14 = vand.u32 4294901760, %v1213_v60  ;;  %v1709_v57 = vand.u32 4294901760, %v1708_v56 }
 0x262   :  { %12649 = vmatpush3.msra.mxu1 %v14163_v21 }
 0x263   :  { %12651 = vmatmul.mubr.f32.vlgmr.msra.gmra.mxu1 %v1212_v26  ;;  %12664 = vmatprep.subr.mxu1 %v16642_v61 }
 0x264   :  { %12618 = vmatmul.mubr.f32.vlgmr.msra.gmra.mxu0 %v1214_v14  ;;  %12665 = vmatpush3.msra.mxu1 %v14112_v6 }
 0x265   :  { %12632 = vmatpush3.msra.mxu0 %v14119_v10  ;;  %12666 = vmatprep.subr.mxu1 %v16642_v61 }
 0x266   :  { %12633 = vmatprep.subr.mxu0 %v16642_v61  ;;  %12667 = vmatpush3.msra.mxu1 %v14114_v7 }
 0x267   :  { %12634 = vmatpush3.msra.mxu0 %v14122_v11  ;;  %12668 = vmatprep.subr.mxu1 %v16642_v61 }
 0x268   :  { %12635 = vmatprep.subr.mxu0 %v16642_v61  ;;  %12669 = vmatpush3.msra.mxu1 %v14116_v8 }
 0x269   :  { %12636 = vmatpush3.msra.mxu0 %v14125_v24  ;;  %12670 = vmatprep.subr.mxu1 %v16642_v61 }
 0x26a   :  { %12637 = vmatprep.subr.mxu0 %v16642_v61  ;;  %12639 = vmatprep.mubr.msk.f32.mxu0 %vm13766_vm8, %v16642_v61 }
 0x26b   :  { %12638 = vmatpush3.msra.mxu0 %v14166_v38  ;;  %12671 = vmatpush3.msra.mxu1 %v14163_v21 }
 0x26c   :  { %12672 = vmatprep.mubr.msk.f32.mxu1 %vm13766_vm8, %v16642_v61  ;;  %12640 = vmatmul.mubr.f32.vlgmr.msra.gmra.mxu0 %v1211_v58  ;;  %v1710_v58 = vsub.f32 %v1708_v56, %v1709_v57 }
 0x26d   :  { %12653 = vmatprep.subr.mxu0 %v16642_v61  ;;  %12673 = vmatmul.mubr.f32.vlgmr.msra.gmra.mxu1 %v14207_v50 }
 0x26e   :  { %12686 = vmatprep.subr.mxu1 %v16642_v61  ;;  %12654 = vmatpush3.msra.mxu0 %v14130_v12 }
 0x26f   :  { %12687 = vmatpush3.msra.mxu1 %v14291_v27  ;;  %12655 = vmatprep.subr.mxu0 %v16642_v61 }
 0x270   :  { %12688 = vmatprep.subr.mxu1 %v16642_v61  ;;  %12656 = vmatpush3.msra.mxu0 %v14133_v55 }
 0x271   :  { %12689 = vmatpush3.msra.mxu1 %v14301_v39  ;;  %12657 = vmatprep.subr.mxu0 %v16642_v61 }
 0x272   :  { %12690 = vmatprep.subr.mxu1 %v16642_v61  ;;  %12658 = vmatpush3.msra.mxu0 %v14136_v13 }
 0x273   :  { %12691 = vmatpush3.msra.mxu1 %v14311_v52  ;;  %12659 = vmatprep.subr.mxu0 %v16642_v61 }
 0x274   :  { %12692 = vmatprep.subr.mxu1 %v16642_v61  ;;  %12660 = vmatpush3.msra.mxu0 %v14171_v22 }
 0x275   :  { %12661 = vmatprep.mubr.msk.f32.mxu0 %vm13766_vm8, %v16642_v61  ;;  %12693 = vmatpush3.msra.mxu1 %v14317_v53 }
 0x276   :  { %12694 = vmatprep.mubr.msk.f32.mxu1 %vm13766_vm8, %v16642_v61  ;;  %12662 = vmatmul.mubr.f32.vlgmr.msra.gmra.mxu0 %v14207_v50  ;;  %v1711_v50 = vand.u32 4294901760, %v1710_v58 }
 0x277   :  { %12675 = vmatprep.subr.mxu0 %v16642_v61  ;;  %12695 = vmatmul.mubr.f32.vlgmr.msra.gmra.mxu1 %v14307_v47 }
 0x278   :  { %12708 = vmatprep.subr.mxu1 %v16642_v61  ;;  %12676 = vmatpush3.msra.mxu0 %v14218_v59 }
 0x279   :  { %12709 = vmatpush3.msra.mxu1 %v14218_v59  ;;  %12677 = vmatprep.subr.mxu0 %v16642_v61 }
 0x27a   :  { %12710 = vmatprep.subr.mxu1 %v16642_v61  ;;  %12678 = vmatpush3.msra.mxu0 %v14227_v63 }
 0x27b   :  { %12711 = vmatpush3.msra.mxu1 %v14227_v63  ;;  %12679 = vmatprep.subr.mxu0 %v16642_v61 }
 0x27c   :  { %12712 = vmatprep.subr.mxu1 %v16642_v61  ;;  %12680 = vmatpush3.msra.mxu0 %v14237_v23 }
 0x27d   :  { %12713 = vmatpush3.msra.mxu1 %v14237_v23  ;;  %12681 = vmatprep.subr.mxu0 %v16642_v61 }
 0x27e   :  { %12714 = vmatprep.subr.mxu1 %v16642_v61  ;;  %12682 = vmatpush3.msra.mxu0 %v14244_v25 }
 0x27f   :  { %12683 = vmatprep.mubr.msk.f32.mxu0 %vm13766_vm8, %v16642_v61  ;;  %12715 = vmatpush3.msra.mxu1 %v14244_v25 }
 0x280   :  { %12716 = vmatprep.mubr.msk.f32.mxu1 %vm13766_vm8, %v16642_v61  ;;  %12684 = vmatmul.mubr.f32.vlgmr.msra.gmra.mxu0 %v1711_v50 }
 0x281   :  { %12697 = vmatprep.subr.mxu0 %v16642_v61  ;;  %12717 = vmatmul.mubr.f32.vlgmr.msra.gmra.mxu1 %v1709_v57 }
 0x282   :  { %12730 = vmatprep.subr.mxu1 %v16642_v61  ;;  %12698 = vmatpush3.msra.mxu0 %v14235_v4 }
 0x283   :  { %12731 = vmatpush3.msra.mxu1 %v14218_v59  ;;  %12699 = vmatprep.subr.mxu0 %v16642_v61 }
 0x284   :  { %12732 = vmatprep.subr.mxu1 %v16642_v61  ;;  %12700 = vmatpush3.msra.mxu0 %v14242_v15 }
 0x285   :  { %12733 = vmatpush3.msra.mxu1 %v14227_v63  ;;  %12701 = vmatprep.subr.mxu0 %v16642_v61 }
 0x286   :  { %12734 = vmatprep.subr.mxu1 %v16642_v61  ;;  %12702 = vmatpush3.msra.mxu0 %v14253_v33 }
 0x287   :  { %12735 = vmatpush3.msra.mxu1 %v14237_v23  ;;  %12703 = vmatprep.subr.mxu0 %v16642_v61 }
 0x288   :  { %12736 = vmatprep.subr.mxu1 %v16642_v61  ;;  %12704 = vmatpush3.msra.mxu0 %v14262_v34 }
 0x289   :  { %12705 = vmatprep.mubr.msk.f32.mxu0 %vm13766_vm8, %v16642_v61  ;;  %12737 = vmatpush3.msra.mxu1 %v14244_v25 }
 0x28a   :  { %12738 = vmatprep.mubr.msk.f32.mxu1 %vm13766_vm8, %v16642_v61  ;;  %12706 = vmatmul.mubr.f32.vlgmr.msra.gmra.mxu0 %v1708_v56 }
 0x28b   :  { %12719 = vmatprep.subr.mxu0 %v16642_v61  ;;  %12739 = vmatmul.mubr.f32.vlgmr.msra.gmra.mxu1 %v14307_v47 }
 0x28c   :  { %12720 = vmatpush3.msra.mxu0 %v14250_v32  ;;  %12727 = vmatprep.mubr.msk.f32.mxu0 %vm13766_vm8, %v16642_v61 }
 0x28d   :  { %12721 = vmatprep.subr.mxu0 %v16642_v61  ;;  %12752 = vmatprep.subr.mxu1 %v16642_v61 }
 0x28e   :  { %12722 = vmatpush3.msra.mxu0 %v14259_v37  ;;  %12753 = vmatpush3.msra.mxu1 %v14148_v17 }
 0x28f   :  { %12723 = vmatprep.subr.mxu0 %v16642_v61  ;;  %12754 = vmatprep.subr.mxu1 %v16642_v61 }
 0x290   :  { %12724 = vmatpush3.msra.mxu0 %v14272_v41  ;;  %12755 = vmatpush3.msra.mxu1 %v14150_v18 }
 0x291   :  { %12725 = vmatprep.subr.mxu0 %v16642_v61  ;;  %12756 = vmatprep.subr.mxu1 %v16642_v61 }
 0x292   :  { %12726 = vmatpush3.msra.mxu0 %v14284_v48  ;;  %12757 = vmatpush3.msra.mxu1 %v14153_v19 }
 0x293   :  { %12728 = vmatmul.mubr.f32.vlgmr.msra.gmra.mxu0 %v14307_v47  ;;  %12758 = vmatprep.subr.mxu1 %v16642_v61 }
 0x294   :  { %12759 = vmatpush3.msra.mxu1 %v14175_v31  ;;  %12741 = vmatprep.subr.mxu0 %v16642_v61 }
 0x295   :  { %12760 = vmatprep.mubr.msk.f32.mxu1 %vm13766_vm8, %v16642_v61  ;;  %12774 = vmatprep.subr.mxu1 %v16642_v61 }
 0x296   :  { %12742 = vmatpush3.msra.mxu0 %v14112_v6  ;;  %12749 = vmatprep.mubr.msk.f32.mxu0 %vm13766_vm8, %v16642_v61 }
 0x297   :  { %12743 = vmatprep.subr.mxu0 %v16642_v61 }
 0x298   :  { %12744 = vmatpush3.msra.mxu0 %v14114_v7 }
 0x299   :  { %12745 = vmatprep.subr.mxu0 %v16642_v61 }
 0x29a   :  { %12746 = vmatpush3.msra.mxu0 %v14116_v8 }
 0x29b   :  { %12747 = vmatprep.subr.mxu0 %v16642_v61 }
 0x29c   :  { %12748 = vmatpush3.msra.mxu0 %v14163_v21 }
 0x29d   :  { %12763 = vmatprep.subr.mxu0 %v16642_v61 }
 0x31b   :  { %v1307_v44 = vpop.f32.mrf.mxu1 }
 0x31d   :  { %v12630_v62 = vpop.f32.mrf.mxu1 }
 0x323   :  { %v1464_v26 = vpop.f32.mrf.mxu1 }
 0x324   :  { %v1216_v0 = vpop.f32.mrf.mxu0 }
 0x325   :  { %v12652_v1 = vpop.f32.mrf.mxu1  ;;  %v1308_v36 = vadd.f32 %v1307_v44, %v1216_v0  ;;  %v12042_v44 = vld [vmem:[%s16640_s10] ss:$0 sm:$0xff] }
 0x326   :  { %v12619_v2 = vpop.f32.mrf.mxu0 }
 0x32c   :  { %v1387_v3 = vpop.f32.mrf.mxu0 }
 0x32d   :  { %v1622_v60 = vpop.f32.mrf.mxu1  ;;  %v1388_v40 = vadd.f32 %v1387_v3, %v1308_v36 }
 0x32e   :  { %v12641_v5 = vpop.f32.mrf.mxu0 }
 0x32f   :  { %v12674_v14 = vpop.f32.mrf.mxu1  ;;  %v1465_v43 = vadd.f32 %v1464_v26, %v1388_v40  ;;  %v12044_v40 = vld.sshfl [vmem:[%s16630_s0 + $0x40] sm:$0x33 pattern:$0x75316420] }
 0x336   :  { %v1547_v16 = vpop.f32.mrf.mxu0 }
 0x337   :  { %v1804_v20 = vpop.f32.mrf.mxu1  ;;  %v1548_v51 = vadd.f32 %v1547_v16, %v1465_v43  ;;  %v2187_v43 = vrot.slane %v12044_v40, %v13893_v46 }
 0x338   :  { %v12663_v30 = vpop.f32.mrf.mxu0 }
 0x339   :  { %v12696_v28 = vpop.f32.mrf.mxu1  ;;  %v1623_v57 = vadd.f32 %v1622_v60, %v1548_v51 }
 0x340   :  { %v1713_v29 = vpop.f32.mrf.mxu0 }
 0x341   :  { %v1961_v45 = vpop.f32.mrf.mxu1  ;;  %v1714_v58 = vadd.f32 %v1713_v29, %v1623_v57  ;;  %v2180_v29 = vcombine.high %v12044_v40, %v12044_v40 }
 0x342   :  { %v12685_v47 = vpop.f32.mrf.mxu0 }
 0x343   :  { %v12718_v56 = vpop.f32.mrf.mxu1  ;;  %v1805_v1 = vadd.f32 %v1804_v20, %v1714_v58  ;;  %v2194_v51 = vrot.slane %v2180_v29, %v13893_v46  ;;  %v16694_v58 = vmov 0  }
 0x345   :  { %v2204_v57 = vrot.slane %v2194_v51, %v13899_v49 }
 0x347   :  { %vm2216_vm14 = vcmp.eq.s32.totalorder %v13914_v54, %v2204_v57  ;;  %vm2215_vm0 = vcmp.eq.s32.totalorder %v13885_v35, %v2204_v57 }
 0x34a   :  { %v1884_v50 = vpop.f32.mrf.mxu0 }
 0x34b   :  { %v2119_v62 = vpop.f32.mrf.mxu1  ;;  %v1885_v14 = vadd.f32 %v1884_v50, %v1805_v1 }
 0x34c   :  { %v12707_v2 = vpop.f32.mrf.mxu0 }
 0x34d   :  { %v12740_v5 = vpop.f32.mrf.mxu1  ;;  %v1962_v61 = vadd.f32 %v1961_v45, %v1885_v14  ;;  %v2200_v45 = vrot.slane %v2187_v43, %v13899_v49 }
 0x34f   :  { %vm2214_vm13 = vcmp.eq.s32.totalorder %v13914_v54, %v2200_v45  ;;  %vm2213_vm15 = vcmp.eq.s32.totalorder %v13885_v35, %v2200_v45 }
 0x350   :  { %v2247_v50 = vsel %vm2214_vm13, 1, %v16694_v58 }
 0x353   :  { %v2044_v9 = vpop.f32.mrf.mxu0 }
 0x354   :  { %v2045_v30 = vadd.f32 %v2044_v9, %v1962_v61  ;;  %v2140_v9 = vpop.permute.xlu1 %2139 }
 0x355   :  { %v12729_v26 = vpop.f32.mrf.mxu0 }
 0x356   :  { %v2120_v0 = vadd.f32 %v2119_v62, %v2045_v30  ;;  %v2249_v62 = vsel %vm2216_vm14, 1, %v16694_v58 }
 0x358   :  { %v2129_v3 = vadd.f32 %v12042_v44, %v2120_v0  ;;  %v2195_v44 = vcombine.high %v2187_v43, %v2187_v43  ;;  %v2246_v0 = vsel %vm2213_vm15, 1, %v16694_v58 }
 0x35a   :  { %v12043_v16 = vmul.f32 -1.442695, %v2129_v3  ;;  %13553 = vtanh.f32 %v2129_v3  ;;  %v2208_v3 = vrot.slane %v2195_v44, %v13899_v49 }
 0x35c   :  { %13555 = vpow2.f32 %v12043_v16  ;;  %v12050_v16 = vld.sshfl [vmem:[%s16630_s0 + $0x24] sm:$0x33 pattern:$0x75316420]  ;;  %vm2217_vm1 = vcmp.eq.s32.totalorder %v13885_v35, %v2208_v3 }
 0x367   :  { %v13554_v60 = vpop.eup %13553 }
 0x368   :  { %2149 = vrot.lane.b32.xlu0 %v13554_v60, %s13768_s16  ;;  %v2248_v60 = vsel %vm2215_vm0, 1, %v16694_v58 }
 0x369   :  { %v13556_v20 = vpop.eup %13555 }
 0x36a   :  { %v2133_v28 = vadd.f32 1.0, %v13556_v20 }
 0x36c   :  { %13557 = vrcp.f32 %v2133_v28  ;;  %v2400_v28 = vrot.slane %v12050_v16, %v13893_v46 }
 0x36e   :  { %v2413_v40 = vrot.slane %v2400_v28, %v13899_v49 }
 0x370   :  { %vm2426_vm9 = vcmp.eq.s32.totalorder %v13885_v35, %v2413_v40 }
 0x379   :  { %v14411_v36 = vpop.eup %13557 }
 0x37a   :  { %v2142_v61 = vmul.f32 %v14411_v36, %v2140_v9  ;;  %v2138_v2 = vmul.f32 %v14411_v36, %v14277_v42  ;;  %v2196_v42 = vcombine.high %v2194_v51, %v2194_v51  ;;  %v2393_v9 = vcombine.high %v12050_v16, %v12050_v16 }
 0x37b   :  { %v2408_v51 = vcombine.high %v2400_v28, %v2400_v28 }
 0x37c   :  { %2144 = vrot.lane.b32.xlu1 %v2142_v61, %s13769_s17  ;;  %v2212_v20 = vrot.slane %v2196_v42, %v13899_v49  ;;  %v2250_v61 = vsel %vm2217_vm1, 1, %v16694_v58  ;;  %v2407_v43 = vrot.slane %v2393_v9, %v13893_v46  ;;  %vm2218_vm1 = vcmp.eq.s32.totalorder %v13914_v54, %v2208_v3 }
 0x37e   :  { %vm2219_vm2 = vcmp.eq.s32.totalorder %v13885_v35, %v2212_v20  ;;  %v2417_v45 = vrot.slane %v2407_v43, %v13899_v49  ;;  %v2409_v57 = vcombine.high %v2407_v43, %v2407_v43 }
 0x37f   :  { %v2252_v29 = vsel %vm2219_vm2, 1, %v16694_v58  ;;  %vm2220_vm2 = vcmp.eq.s32.totalorder %v13914_v54, %v2212_v20 }
 0x380   :  { %vm2428_vm10 = vcmp.eq.s32.totalorder %v13885_v35, %v2417_v45 }
 0x3da   :  { %v2150_v47 = vpop.permute.xlu0 %2149 }
 0x3db   :  { %v2152_v56 = vmul.f32 %v14411_v36, %v2150_v47  ;;  %v2518_v47 = vsel %vm2426_vm9, 1, %v16694_v58  ;;  %vm2427_vm9 = vcmp.eq.s32.totalorder %v13914_v54, %v2413_v40 }
 0x3dd   :  { %2154 = vrot.lane.b32.xlu1 %v2152_v56, %s13767_s26  ;;  %v2421_v56 = vrot.slane %v2408_v51, %v13899_v49 }
 0x3df   :  { %vm2430_vm11 = vcmp.eq.s32.totalorder %v13885_v35, %v2421_v56 }
 0x3e1   :  { %2258 = vperm.xlu1 %13544, %v2247_v50   ;;  %v12049_v50 = vld.sshfl [vmem:[%s16630_s0 + $0x4] sm:$0x33 pattern:$0x75316420] }
 0x3e5   :  { %2264 = vperm.xlu1 %13544, %v2249_v62   ;;  %v2520_v62 = vsel %vm2428_vm10, 1, %v16694_v58  ;;  %vm2429_vm10 = vcmp.eq.s32.totalorder %v13914_v54, %v2417_v45 }
 0x3ee   :  { %v2145_v1 = vpop.permute.xlu1 %2144 }
 0x3ef   :  { %v2147_v5 = vadd.f32 %v2145_v1, %v2138_v2  ;;  %v2425_v1 = vrot.slane %v2409_v57, %v13899_v49  ;;  %v2352_v2 = vrot.slane %v12049_v50, %v13893_v46 }
 0x3f1   :  { %vm2432_vm12 = vcmp.eq.s32.totalorder %v13885_v35, %v2425_v1  ;;  %v2365_v44 = vrot.slane %v2352_v2, %v13899_v49  ;;  %v2360_v16 = vcombine.high %v2352_v2, %v2352_v2  ;;  %v2519_v2 = vsel %vm2427_vm9, 1, %v16694_v58 }
 0x3f3   :  { %vm2378_vm13 = vcmp.eq.s32.totalorder %v13885_v35, %v2365_v44  ;;  %v2373_v28 = vrot.slane %v2360_v16, %v13899_v49 }
 0x3f5   :  { %vm2382_vm15 = vcmp.eq.s32.totalorder %v13885_v35, %v2373_v28 }
 0x44f   :  { %v2155_v14 = vpop.permute.xlu1 %2154 }
 0x450   :  { %v14430_v30 = vadd.f32 %v2155_v14, %v2147_v5  ;;  %v2345_v5 = vcombine.high %v12049_v50, %v12049_v50  ;;  %v2522_v14 = vsel %vm2430_vm11, 1, %v16694_v58  ;;  %v2251_v50 = vsel %vm2218_vm1, 1, %v16694_v58 }
 0x451   :  { %vm2431_vm11 = vcmp.eq.s32.totalorder %v13914_v54, %v2421_v56  ;;  %vm2168_vm1 = vcmask 125952  }
 0x452   :  { %13559 = vtanh.f32 %v14430_v30  ;;  %v2523_v3 = vsel %vm2431_vm11, 1, %v16694_v58 }
 0x45f   :  { %v13560_v26 = vpop.eup %13559 }
 0x460   :  { %2160 = vrot.lane.b32.xlu0 %v13560_v26, %s13770_s20  ;;  %v2359_v26 = vrot.slane %v2345_v5, %v13893_v46 }
 0x462   :  { %v2369_v42 = vrot.slane %v2359_v26, %v13899_v49  ;;  %v2361_v9 = vcombine.high %v2359_v26, %v2359_v26 }
 0x464   :  { %2255 = vperm.xlu0 %13543, %v2246_v0   ;;  %v2524_v0 = vsel %vm2432_vm12, 1, %v16694_v58  ;;  %vm2380_vm14 = vcmp.eq.s32.totalorder %v13885_v35, %v2369_v42  ;;  %v2377_v43 = vrot.slane %v2361_v9, %v13899_v49  ;;  %vm2433_vm12 = vcmp.eq.s32.totalorder %v13914_v54, %v2425_v1 }
 0x465   :  { %v2525_v20 = vsel %vm2433_vm12, 1, %v16694_v58 }
 0x466   :  { %vm2384_vm0 = vcmp.eq.s32.totalorder %v13885_v35, %v2377_v43 }
 0x467   :  { %v2440_v51 = vsel %vm2384_vm0, 1, %v16694_v58  ;;  %vm2385_vm0 = vcmp.eq.s32.totalorder %v13914_v54, %v2377_v43 }
 0x468   :  { %2261 = vperm.xlu0 %13543, %v2248_v60   ;;  %v2434_v60 = vsel %vm2378_vm13, 1, %v16694_v58  ;;  %vm2379_vm13 = vcmp.eq.s32.totalorder %v13914_v54, %v2365_v44  ;;  %v2441_v1 = vsel %vm2385_vm0, 1, %v16694_v58  ;;  %v2259_v44 = vpop.permute.xlu1 %2258 }
 0x469   :  { %v2435_v40 = vsel %vm2379_vm13, 1, %v16694_v58  ;;  %vm2279_vm9 = vcmp.eq.s32.totalorder %v2259_v44, 1  ;;  %v13660_v44 = vld [vmem:[#allocation2 + $0x28] sm:$0xff] }
 0x46c   :  { %2267 = vperm.xlu0 %13543, %v2250_v61   ;;  %v2436_v61 = vsel %vm2380_vm14, 1, %v16694_v58  ;;  %vm2381_vm14 = vcmp.eq.s32.totalorder %v13914_v54, %v2369_v42 }
 0x46d   :  { %v2437_v45 = vsel %vm2381_vm14, 1, %v16694_v58 }
 0x470   :  { %2273 = vperm.xlu0 %13543, %v2252_v29   ;;  %v2438_v29 = vsel %vm2382_vm15, 1, %v16694_v58  ;;  %vm2383_vm15 = vcmp.eq.s32.totalorder %v13914_v54, %v2373_v28 }
 0x471   :  { %v2439_v56 = vsel %vm2383_vm15, 1, %v16694_v58 }
 0x474   :  { %2527 = vperm.xlu0 %13543, %v2518_v47  }
 0x478   :  { %2533 = vperm.xlu0 %13543, %v2520_v62   ;;  %v2253_v62 = vsel %vm2220_vm2, 1, %v16694_v58  ;;  %vm2170_vm2 = vcmask 257152  }
 0x47c   :  { %2539 = vperm.xlu0 %13543, %v2522_v14  }
 0x480   :  { %2545 = vperm.xlu0 %13543, %v2524_v0   ;;  %v2265_v0 = vpop.permute.xlu1 %2264 }
 0x484   :  { %2443 = vperm.xlu0 %13543, %v2434_v60  }
 0x488   :  { %2449 = vperm.xlu0 %13543, %v2436_v61  }
 0x48c   :  { %2455 = vperm.xlu0 %13543, %v2438_v29  }
 0x490   :  { %2461 = vperm.xlu0 %13543, %v2440_v51  }
 0x4d2   :  { %v2161_v47 = vpop.permute.xlu0 %2160 }
 0x4d3   :  { %v2163_v57 = vmul.f32 %v14411_v36, %v2161_v47  ;;  %v2521_v36 = vsel %vm2429_vm10, 1, %v16694_v58  ;;  %vm2281_vm10 = vcmp.eq.s32.totalorder %v2265_v0, 1 }
 0x4d5   :  { %2165 = vrot.lane.b32.xlu1 %v2163_v57, %s13771_s24 }
 0x4d9   :  { %2270 = vperm.xlu1 %13544, %v2251_v50  }
 0x4dd   :  { %2276 = vperm.xlu1 %13544, %v2253_v62  }
 0x4df   :  { %v2256_v5 = vpop.permute.xlu0 %2255 }
 0x4e0   :  { %vm2278_vm11 = vcmp.eq.s32.totalorder %v2256_v5, 1 }
 0x4e1   :  { %2530 = vperm.xlu1 %13544, %v2519_v2   ;;  %v13657_v2 = vld [vmem:[#allocation2] sm:$0xff] }
 0x4e3   :  { %v2262_v14 = vpop.permute.xlu0 %2261 }
 0x4e4   :  { %vm2280_vm12 = vcmp.eq.s32.totalorder %v2262_v14, 1 }
 0x4e5   :  { %2536 = vperm.xlu1 %13544, %v2521_v36  }
 0x4e7   :  { %v2268_v26 = vpop.permute.xlu0 %2267 }
 0x4e8   :  { %vm2282_vm13 = vcmp.eq.s32.totalorder %v2268_v26, 1  ;;  %v13661_v26 = vld [vmem:[#allocation2 + $0x10] sm:$0xff] }
 0x4e9   :  { %2542 = vperm.xlu1 %13544, %v2523_v3   ;;  %v13658_v3 = vld [vmem:[#allocation2 + $0x8] sm:$0xff] }
 0x4eb   :  { %v2274_v42 = vpop.permute.xlu0 %2273 }
 0x4ec   :  { %vm2284_vm0 = vcmp.eq.s32.totalorder %v2274_v42, 1 }
 0x4ed   :  { %2548 = vperm.xlu1 %13544, %v2525_v20  }
 0x4ef   :  { %v2528_v60 = vpop.permute.xlu0 %2527 }
 0x4f1   :  { %2446 = vperm.xlu1 %13544, %v2435_v40  }
 0x4f3   :  { %v14503_v28 = vpop.permute.xlu0 %2533 }
 0x4f5   :  { %2452 = vperm.xlu1 %13544, %v2437_v45  }
 0x4f9   :  { %2458 = vperm.xlu1 %13544, %v2439_v56  }
 0x4fd   :  { %2464 = vperm.xlu1 %13544, %v2441_v1   ;;  %v13659_v1 = vld [vmem:[#allocation2 + $0x20] sm:$0xff] }
 0x547   :  { %v2166_v16 = vpop.permute.xlu1 %2165 }
 0x548   :  { %2169 = vst.msk [vmem:[#allocation3] sm:$0xf] %vm2168_vm1, %v2166_v16 }
 0x549   :  { %2171 = vst.msk [vmem:[#allocation3] sm:$0xf] %vm2170_vm2, %v14430_v30  ;;  %v2540_v30 = vpop.permute.xlu0 %2539 }
 0x550   :  { %v14505_v9 = vld [vmem:[#allocation3] sm:$0xf] }
 0x551   :  { %16695 = vst [vmem:[#allocation13_spill] sm:$0xff] %v14505_v9  ;;  %v2228_v61 = vrot.slane %v14505_v9, %v13893_v46 }
 0x553   :  { %v2236_v43 = vrot.slane %v2228_v61, %v13893_v46  ;;  %v2229_v29 = vcombine.high %v2228_v61, %v2228_v61 }
 0x554   :  { %v2271_v51 = vpop.permute.xlu1 %2270 }
 0x555   :  { %v2244_v47 = vcombine.high %v2236_v43, %v2236_v43  ;;  %v2289_v57 = vrot.slane %v2236_v43, %v13899_v49  ;;  %v2243_v50 = vrot.slane %v2229_v29, %v13893_v46  ;;  %vm2283_vm14 = vcmp.eq.s32.totalorder %v2271_v51, 1  ;;  %v13662_v29 = vld [vmem:[#allocation2 + $0x18] sm:$0xff] }
 0x557   :  { %v2297_v62 = vrot.slane %v2244_v47, %v13899_v49  ;;  %v2306_v36 = vsel %vm2278_vm11, %v2289_v57, %v13657_v2  ;;  %v2307_v20 = vsel %vm2279_vm9, %v2289_v57, %v13658_v3  ;;  %v2245_v40 = vcombine.high %v2243_v50, %v2243_v50  ;;  %v13663_v47 = vld [vmem:[#allocation2 + $0x30] sm:$0xff]  ;;  %v2546_v2 = vpop.permute.xlu0 %2545 }
 0x558   :  { %2314 = vst.msk [vmem:[#allocation2] sm:$0xff] %vm653_vm5, %v2306_v36  ;;  %2315 = vst.msk [vmem:[#allocation2 + $0x8] sm:$0xff] %vm653_vm5, %v2307_v20  ;;  %v2293_v45 = vrot.slane %v2243_v50, %v13899_v49  ;;  %v2277_v56 = vpop.permute.xlu1 %2276  ;;  %v13664_v50 = vld [vmem:[#allocation2 + $0x38] sm:$0xff]  ;;  %vm2550_vm9 = vcmp.eq.s32.totalorder %v2528_v60, 1 }
 0x559   :  { %v2310_v5 = vsel %vm2282_vm13, %v2297_v62, %v13659_v1  ;;  %v2311_v16 = vsel %vm2283_vm14, %v2297_v62, %v13660_v44  ;;  %v2301_v61 = vrot.slane %v2245_v40, %v13899_v49  ;;  %vm2285_vm15 = vcmp.eq.s32.totalorder %v2277_v56, 1 }
 0x55a   :  { %2318 = vst.msk [vmem:[#allocation2 + $0x20] sm:$0xff] %vm653_vm5, %v2310_v5  ;;  %2319 = vst.msk [vmem:[#allocation2 + $0x28] sm:$0xff] %vm653_vm5, %v2311_v16  ;;  %v2308_v43 = vsel %vm2280_vm12, %v2293_v45, %v13661_v26  ;;  %v2309_v51 = vsel %vm2281_vm10, %v2293_v45, %v13662_v29  ;;  %vm2552_vm12 = vcmp.eq.s32.totalorder %v14503_v28, 1  ;;  %vm2554_vm13 = vcmp.eq.s32.totalorder %v2540_v30, 1 }
 0x55b   :  { %v2312_v57 = vsel %vm2284_vm0, %v2301_v61, %v13663_v47  ;;  %2316 = vst.msk [vmem:[#allocation2 + $0x10] sm:$0xff] %vm653_vm5, %v2308_v43  ;;  %2317 = vst.msk [vmem:[#allocation2 + $0x18] sm:$0xff] %vm653_vm5, %v2309_v51  ;;  %v2313_v62 = vsel %vm2285_vm15, %v2301_v61, %v13664_v50  ;;  %v2444_v1 = vpop.permute.xlu0 %2443  ;;  %vm2556_vm15 = vcmp.eq.s32.totalorder %v2546_v2, 1 }
 0x55c   :  { %2320 = vst.msk [vmem:[#allocation2 + $0x30] sm:$0xff] %vm653_vm5, %v2312_v57  ;;  %2321 = vst.msk [vmem:[#allocation2 + $0x38] sm:$0xff] %vm653_vm5, %v2313_v62  ;;  %v2531_v42 = vpop.permute.xlu1 %2530 }
 0x55d   :  { %vm2551_vm11 = vcmp.eq.s32.totalorder %v2531_v42, 1 }
 0x55f   :  { %v2330_v14 = vld [vmem:[#allocation2] sm:$0xff]  ;;  %v2331_v36 = vld [vmem:[#allocation2 + $0x8] sm:$0xff] }
 0x560   :  { %v2558_v0 = vsel %vm2550_vm9, %v2330_v14, 0.0  ;;  %v2559_v3 = vsel %vm2551_vm11, %v2331_v36, 0.0  ;;  %v2537_v20 = vpop.permute.xlu1 %2536  ;;  %vm2466_vm9 = vcmp.eq.s32.totalorder %v2444_v1, 1 }
 0x561   :  { %v2566_v40 = vsel %vm653_vm5, %v2558_v0, 0.0  ;;  %v2567_v45 = vsel %vm653_vm5, %v2559_v3, 0.0  ;;  %vm2553_vm10 = vcmp.eq.s32.totalorder %v2537_v20, 1  ;;  %v14527_v56 = vld [vmem:[#allocation2 + $0x20] sm:$0xff]  ;;  %v2335_v50 = vld [vmem:[#allocation2 + $0x28] sm:$0xff]  ;;  %v2450_v20 = vpop.permute.xlu0 %2449 }
 0x562   :  { %v2568_v5 = vadd.f32 %v2567_v45, %v2566_v40  ;;  %v2332_v44 = vld [vmem:[#allocation2 + $0x10] sm:$0xff]  ;;  %v2333_v16 = vld [vmem:[#allocation2 + $0x18] sm:$0xff]  ;;  %v2562_v51 = vsel %vm2554_vm13, %v14527_v56, 0.0 }
 0x563   :  { %v2560_v60 = vsel %vm2552_vm12, %v2332_v44, 0.0  ;;  %v2561_v61 = vsel %vm2553_vm10, %v2333_v16, 0.0  ;;  %v14533_v62 = vld [vmem:[#allocation2 + $0x30] sm:$0xff]  ;;  %v2584_v30 = vsel %vm653_vm5, %v2562_v51, 0.0  ;;  %v14538_v9 = vld [vmem:[#allocation2 + $0x38] sm:$0xff]  ;;  %vm2468_vm10 = vcmp.eq.s32.totalorder %v2450_v20, 1 }
 0x564   :  { %v2569_v26 = vrot.slane %v2568_v5, 4  ;;  %v2575_v43 = vsel %vm653_vm5, %v2560_v60, 0.0  ;;  %v2576_v29 = vsel %vm653_vm5, %v2561_v61, 0.0  ;;  %v2543_v47 = vpop.permute.xlu1 %2542  ;;  %v2564_v45 = vsel %vm2556_vm15, %v14533_v62, 0.0 }
 0x565   :  { %v2577_v57 = vadd.f32 %v2576_v29, %v2575_v43  ;;  %vm2555_vm14 = vcmp.eq.s32.totalorder %v2543_v47, 1 }
 0x566   :  { %v2563_v28 = vsel %vm2555_vm14, %v2335_v50, 0.0  ;;  %v2570_v42 = vadd.f32 %v2569_v26, %v2568_v5  ;;  %v2593_v26 = vsel %vm653_vm5, %v2564_v45, 0.0 }
 0x567   :  { %v2578_v0 = vrot.slane %v2577_v57, 4  ;;  %v2585_v3 = vsel %vm653_vm5, %v2563_v28, 0.0 }
 0x568   :  { %v2586_v40 = vadd.f32 %v2585_v3, %v2584_v30  ;;  %v2549_v60 = vpop.permute.xlu1 %2548  ;;  %v2571_v29 = vrot.slane %v2570_v42, 2  ;;  %v2474_v30 = vsel %vm2466_vm9, %v2330_v14, 0.0 }
 0x569   :  { %v2579_v61 = vadd.f32 %v2578_v0, %v2577_v57  ;;  %vm2557_vm0 = vcmp.eq.s32.totalorder %v2549_v60, 1  ;;  %v2456_v57 = vpop.permute.xlu0 %2455  ;;  %v2482_v54 = vsel %vm653_vm5, %v2474_v30, 0.0 }
 0x56a   :  { %v2587_v43 = vrot.slane %v2586_v40, 4  ;;  %v2565_v2 = vsel %vm2557_vm0, %v14538_v9, 0.0  ;;  %v2572_v1 = vadd.f32 %v2571_v29, %v2570_v42  ;;  %vm2470_vm13 = vcmp.eq.s32.totalorder %v2456_v57, 1 }
 0x56b   :  { %v2580_v5 = vrot.slane %v2579_v61, 2  ;;  %v2594_v51 = vsel %vm653_vm5, %v2565_v2, 0.0  ;;  %v2476_v2 = vsel %vm2468_vm10, %v2332_v44, 0.0 }
 0x56c   :  { %v2588_v47 = vadd.f32 %v2587_v43, %v2586_v40  ;;  %v2595_v28 = vadd.f32 %v2594_v51, %v2593_v26  ;;  %v2447_v3 = vpop.permute.xlu1 %2446  ;;  %v2573_v51 = vrot.slane %v2572_v1, 1 }
 0x56d   :  { %v2581_v35 = vadd.f32 %v2580_v5, %v2579_v61  ;;  %vm2467_vm11 = vcmp.eq.s32.totalorder %v2447_v3, 1  ;;  %v2462_v20 = vpop.permute.xlu0 %2461 }
 0x56e   :  { %v2589_v0 = vrot.slane %v2588_v47, 2  ;;  %v2596_v58 = vrot.slane %v2595_v28, 4  ;;  %v2475_v60 = vsel %vm2467_vm11, %v2331_v36, 0.0  ;;  %v2491_v36 = vsel %vm653_vm5, %v2476_v2, 0.0 }
 0x56f   :  { %v2483_v49 = vsel %vm653_vm5, %v2475_v60, 0.0  ;;  %v2582_v43 = vrot.slane %v2581_v35, 1  ;;  %vm2472_vm15 = vcmp.eq.s32.totalorder %v2462_v20, 1  ;;  %v2574_v60 = vadd.f32 %v2573_v51, %v2572_v1 }
 0x570   :  { %v2590_v46 = vadd.f32 %v2589_v0, %v2588_v47  ;;  %v2597_v45 = vadd.f32 %v2596_v58, %v2595_v28  ;;  %v2484_v31 = vadd.f32 %v2483_v49, %v2482_v54  ;;  %v2453_v40 = vpop.permute.xlu1 %2452  ;;  %v2478_v47 = vsel %vm2470_vm13, %v14527_v56, 0.0 }
 0x571   :  { %vm2469_vm12 = vcmp.eq.s32.totalorder %v2453_v40, 1  ;;  %v2583_v44 = vadd.f32 %v2582_v43, %v2581_v35  ;;  %v2500_v57 = vsel %vm653_vm5, %v2478_v47, 0.0 }
 0x572   :  { %v2598_v14 = vrot.slane %v2597_v45, 2  ;;  %v2485_v61 = vrot.slane %v2484_v31, 4  ;;  %v2477_v5 = vsel %vm2469_vm12, %v2333_v16, 0.0  ;;  %v2591_v26 = vrot.slane %v2590_v46, 1 }
 0x573   :  { %v2492_v42 = vsel %vm653_vm5, %v2477_v5, 0.0  ;;  %v2480_v5 = vsel %vm2472_vm15, %v14533_v62, 0.0  ;;  %v2678_v35 = vsel %vm959_vm3, %v2583_v44, %v2574_v60 }
 0x574   :  { %v2493_v29 = vadd.f32 %v2492_v42, %v2491_v36  ;;  %v2459_v58 = vpop.permute.xlu1 %2458  ;;  %v2599_v49 = vadd.f32 %v2598_v14, %v2597_v45  ;;  %v2486_v54 = vadd.f32 %v2485_v61, %v2484_v31  ;;  %v2592_v3 = vadd.f32 %v2591_v26, %v2590_v46 }
 0x575   :  { %vm2471_vm14 = vcmp.eq.s32.totalorder %v2459_v58, 1  ;;  %v2509_v14 = vsel %vm653_vm5, %v2480_v5, 0.0 }
 0x576   :  { %v2494_v28 = vrot.slane %v2493_v29, 4  ;;  %v2479_v30 = vsel %vm2471_vm14, %v2335_v50, 0.0  ;;  %v2600_v16 = vrot.slane %v2599_v49, 1  ;;  %v2487_v45 = vrot.slane %v2486_v54, 2 }
 0x577   :  { %v2501_v0 = vsel %vm653_vm5, %v2479_v30, 0.0  ;;  %v2679_v43 = vsel %vm961_vm4, %v2592_v3, %v2678_v35 }
 0x578   :  { %v2495_v2 = vadd.f32 %v2494_v28, %v2493_v29  ;;  %v2502_v40 = vadd.f32 %v2501_v0, %v2500_v57  ;;  %v2465_v56 = vpop.permute.xlu1 %2464  ;;  %v2601_v36 = vadd.f32 %v2600_v16, %v2599_v49  ;;  %v2488_v20 = vadd.f32 %v2487_v45, %v2486_v54 }
 0x579   :  { %vm2473_vm0 = vcmp.eq.s32.totalorder %v2465_v56, 1 }
 0x57a   :  { %v2496_v31 = vrot.slane %v2495_v2, 2  ;;  %v2503_v50 = vrot.slane %v2502_v40, 4  ;;  %v2481_v46 = vsel %vm2473_vm0, %v14538_v9, 0.0  ;;  %v2680_v61 = vsel %vm963_vm6, %v2601_v36, %v2679_v43 }
 0x57b   :  { %v2510_v1 = vsel %vm653_vm5, %v2481_v46, 0.0  ;;  %v2682_v42 = vsel %vm966_vm7, %v2680_v61, 0.0  ;;  %v2489_v28 = vrot.slane %v2488_v20, 1 }
 0x57c   :  { %v2497_v26 = vadd.f32 %v2496_v31, %v2495_v2  ;;  %v2504_v62 = vadd.f32 %v2503_v50, %v2502_v40  ;;  %v2511_v51 = vadd.f32 %v2510_v1, %v2509_v14  ;;  %2683 = vadd.xlane.f32.xlu0 %v2682_v42 }
 0x57d   :  { %v2490_v56 = vadd.f32 %v2489_v28, %v2488_v20 }
 0x57e   :  { %v2505_v29 = vrot.slane %v2504_v62, 2  ;;  %v2512_v47 = vrot.slane %v2511_v51, 4  ;;  %v2498_v58 = vrot.slane %v2497_v26, 1 }
 0x580   :  { %v2506_v49 = vadd.f32 %v2505_v29, %v2504_v62  ;;  %v2513_v9 = vadd.f32 %v2512_v47, %v2511_v51  ;;  %v2499_v57 = vadd.f32 %v2498_v58, %v2497_v26 }
 0x582   :  { %v2514_v30 = vrot.slane %v2513_v9, 2  ;;  %v2507_v16 = vrot.slane %v2506_v49, 1  ;;  %v2606_v40 = vsel %vm959_vm3, %v2499_v57, %v2490_v56 }
 0x584   :  { %v2515_v0 = vadd.f32 %v2514_v30, %v2513_v9  ;;  %v2508_v5 = vadd.f32 %v2507_v16, %v2506_v49 }
 0x586   :  { %v2516_v35 = vrot.slane %v2515_v0, 1  ;;  %v2607_v31 = vsel %vm961_vm4, %v2508_v5, %v2606_v40 }
 0x588   :  { %v2517_v2 = vadd.f32 %v2516_v35, %v2515_v0 }
 0x58a   :  { %v2608_v54 = vsel %vm963_vm6, %v2517_v2, %v2607_v31 }
 0x58b   :  { %v2610_v45 = vsel %vm966_vm7, %v2608_v54, 0.0 }
 0x58c   :  { %2611 = vadd.xlane.f32.xlu1 %v2610_v45 }
 0x605   :  { %v2684_v50 = vpop.xlane.xlu0 %2683 }
 0x606   :  { %v2685_v46 = vmul.f32 0.03125, %v2684_v50 }
 0x608   :  { %v2687_v43 = vrot.slane %v2685_v46, 1  ;;  %v2688_v14 = vrot.slane %v2685_v46, 2  ;;  %v2689_v1 = vrot.slane %v2685_v46, 3  ;;  %v14562_v61 = vsub.f32 %v2574_v60, %v2685_v46 }
 0x60a   :  { %v14564_v26 = vsub.f32 %v2583_v44, %v2687_v43  ;;  %v14566_v62 = vsub.f32 %v2592_v3, %v2688_v14  ;;  %v14568_v51 = vsub.f32 %v2601_v36, %v2689_v1  ;;  %v2698_v47 = vmul.f32 %v14562_v61, %v14562_v61 }
 0x60c   :  { %v2699_v42 = vmul.f32 %v14564_v26, %v14564_v26  ;;  %v2700_v20 = vmul.f32 %v14566_v62, %v14566_v62  ;;  %v2701_v29 = vmul.f32 %v14568_v51, %v14568_v51 }
 0x60e   :  { %v2706_v60 = vrot.slane %v2699_v42, 7  ;;  %v2708_v58 = vrot.slane %v2700_v20, 6  ;;  %v2710_v3 = vrot.slane %v2701_v29, 5 }
 0x610   :  { %v2707_v44 = vsel %vm959_vm3, %v2706_v60, %v2698_v47 }
 0x611   :  { %v2709_v36 = vsel %vm961_vm4, %v2708_v58, %v2707_v44 }
 0x612   :  { %v2711_v49 = vsel %vm963_vm6, %v2710_v3, %v2709_v36 }
 0x613   :  { %v2713_v9 = vsel %vm966_vm7, %v2711_v49, 0.0 }
 0x614   :  { %2714 = vadd.xlane.f32.xlu0 %v2713_v9 }
 0x615   :  { %v2612_v28 = vpop.xlane.xlu1 %2611 }
 0x616   :  { %v2613_v30 = vmul.f32 0.03125, %v2612_v28 }
 0x618   :  { %v2615_v16 = vrot.slane %v2613_v30, 1  ;;  %v2616_v0 = vrot.slane %v2613_v30, 2  ;;  %v2617_v35 = vrot.slane %v2613_v30, 3  ;;  %v14582_v40 = vsub.f32 %v2490_v56, %v2613_v30 }
 0x61a   :  { %v14584_v31 = vsub.f32 %v2499_v57, %v2615_v16  ;;  %v14586_v54 = vsub.f32 %v2508_v5, %v2616_v0  ;;  %v14588_v45 = vsub.f32 %v2517_v2, %v2617_v35  ;;  %v2626_v14 = vmul.f32 %v14582_v40, %v14582_v40 }
 0x61c   :  { %v2627_v50 = vmul.f32 %v14584_v31, %v14584_v31  ;;  %v2628_v46 = vmul.f32 %v14586_v54, %v14586_v54  ;;  %v2629_v43 = vmul.f32 %v14588_v45, %v14588_v45 }
 0x61e   :  { %v2634_v56 = vrot.slane %v2627_v50, 7  ;;  %v2636_v1 = vrot.slane %v2628_v46, 6  ;;  %v2638_v5 = vrot.slane %v2629_v43, 5 }
 0x620   :  { %v2635_v57 = vsel %vm959_vm3, %v2634_v56, %v2626_v14 }
 0x621   :  { %v2637_v2 = vsel %vm961_vm4, %v2636_v1, %v2635_v57 }
 0x622   :  { %v2639_v42 = vsel %vm963_vm6, %v2638_v5, %v2637_v2 }
 0x623   :  { %v2641_v20 = vsel %vm966_vm7, %v2639_v42, 0.0 }
 0x624   :  { %2642 = vadd.xlane.f32.xlu0 %v2641_v20  ;;  %v13665_v20 = vld [vmem:[%s16636_s6] ss:$0 sm:$0xff] }
 0x69d   :  { %v2715_v29 = vpop.xlane.xlu0 %2714 }
 0x69e   :  { %v2716_v47 = vmul.f32 0.032258064, %v2715_v29 }
 0x6a0   :  { %13561 = vrsqrt.f32 %v2716_v47  ;;  %vm2719_vm9 = vcmp.eq.f32.partialorder %v2716_v47, inf  ;;  %v2722_v36 = vand.u32 2147483648, %v2716_v47  ;;  %vm2721_vm11 = vcmp.eq.f32.partialorder %v2716_v47, 0.0 }
 0x6ad   :  { %v2643_v60 = vpop.xlane.xlu0 %2642  ;;  %v13562_v58 = vpop.eup %13561 }
 0x6ae   :  { %v2644_v44 = vmul.f32 0.032258064, %v2643_v60  ;;  %v2718_v3 = vmul.f32 %v13562_v58, %v2716_v47 }
 0x6b0   :  { %13563 = vrsqrt.f32 %v2644_v44  ;;  %v2720_v49 = vsel %vm2719_vm9, %v2716_v47, %v2718_v3  ;;  %vm2647_vm10 = vcmp.eq.f32.partialorder %v2644_v44, inf  ;;  %v2650_v0 = vand.u32 2147483648, %v2644_v44 }
 0x6b1   :  { %v2723_v9 = vsel %vm2721_vm11, %v2722_v36, %v2720_v49  ;;  %vm2649_vm12 = vcmp.eq.f32.partialorder %v2644_v44, 0.0 }
 0x6b2   :  { %v2724_v28 = vadd.f32 1e-06, %v2723_v9 }
 0x6b4   :  { %13565 = vrcp.f32 %v2724_v28 }
 0x6bd   :  { %v13564_v30 = vpop.eup %13563 }
 0x6be   :  { %v2646_v16 = vmul.f32 %v13564_v30, %v2644_v44 }
 0x6c0   :  { %v2648_v35 = vsel %vm2647_vm10, %v2644_v44, %v2646_v16  ;;  %v13666_v44 = vld [vmem:[%s16637_s7] ss:$0 sm:$0xff] }
 0x6c1   :  { %v2651_v50 = vsel %vm2649_vm12, %v2650_v0, %v2648_v35  ;;  %v13566_v46 = vpop.eup %13565 }
 0x6c2   :  { %v2652_v43 = vadd.f32 1e-06, %v2651_v50  ;;  %v2727_v14 = vrot.slane %v13566_v46, 1  ;;  %v2728_v56 = vrot.slane %v13566_v46, 2  ;;  %v2729_v1 = vrot.slane %v13566_v46, 3 }
 0x6c3   :  { %v2734_v57 = vmul.f32 %v13566_v46, %v14562_v61 }
 0x6c4   :  { %13567 = vrcp.f32 %v2652_v43  ;;  %v2735_v5 = vmul.f32 %v2727_v14, %v14564_v26  ;;  %v2736_v2 = vmul.f32 %v2728_v56, %v14566_v62  ;;  %v2737_v42 = vmul.f32 %v2729_v1, %v14568_v51 }
 0x6c5   :  { %v2738_v29 = vmul.f32 %v13665_v20, %v2734_v57  ;;  %v16696_v1 = vmov 0.0  }
 0x6c6   :  { %v2739_v47 = vmul.f32 %v13665_v20, %v2735_v5  ;;  %v2740_v60 = vmul.f32 %v13665_v20, %v2736_v2  ;;  %v2741_v58 = vmul.f32 %v13665_v20, %v2737_v42 }
 0x6c7   :  { %v2742_v26 = vadd.f32 %v13666_v44, %v2738_v29 }
 0x6c8   :  { %v2743_v61 = vadd.f32 %v13666_v44, %v2739_v47  ;;  %v2744_v3 = vadd.f32 %v13666_v44, %v2740_v60  ;;  %v2745_v36 = vadd.f32 %v13666_v44, %v2741_v58 }
 0x6ca   :  { %v2750_v49 = vrot.slane %v2743_v61, 7  ;;  %v2752_v62 = vrot.slane %v2744_v3, 6  ;;  %v2754_v9 = vrot.slane %v2745_v36, 5 }
 0x6cc   :  { %v2751_v51 = vsel %vm959_vm3, %v2750_v49, %v2742_v26 }
 0x6cd   :  { %v2753_v28 = vsel %vm961_vm4, %v2752_v62, %v2751_v51 }
 0x6ce   :  { %v2755_v30 = vsel %vm963_vm6, %v2754_v9, %v2753_v28 }
 0x6cf   :  { %v2756_v16 = vsel %vm653_vm5, %v2755_v30, 0  ;;  %3750 = vrot.lane.b32.xlu1 %v2755_v30, %s13767_s26 }
 0x6d0   :  { %v14617_v35 = vand.u32 4294901760, %v2756_v16 }
 0x6d1   :  { %v13568_v0 = vpop.eup %13567 }
 0x6d2   :  { %v2655_v50 = vrot.slane %v13568_v0, 1  ;;  %v2656_v46 = vrot.slane %v13568_v0, 2  ;;  %v2657_v43 = vrot.slane %v13568_v0, 3  ;;  %v2662_v14 = vmul.f32 %v13568_v0, %v14582_v40  ;;  %12761 = vmatmul.mubr.f32.vlgmr.msra.gmra.mxu1 %v14617_v35  ;;  %v13667_v40 = vld [vmem:[%s16634_s4] ss:$0 sm:$0xff] }
 0x6d3   :  { %v2828_v56 = vsub.f32 %v2756_v16, %v14617_v35  ;;  %12775 = vmatpush3.msra.mxu1 %v14112_v6  ;;  %12782 = vmatprep.mubr.msk.f32.mxu1 %vm13766_vm8, %v16696_v1 }
 0x6d4   :  { %v2663_v57 = vmul.f32 %v2655_v50, %v14584_v31  ;;  %v2664_v5 = vmul.f32 %v2656_v46, %v14586_v54  ;;  %v2665_v2 = vmul.f32 %v2657_v43, %v14588_v45  ;;  %12776 = vmatprep.subr.mxu1 %v16696_v1  ;;  %v2666_v20 = vmul.f32 %v13667_v40, %v2662_v14  ;;  %v13668_v54 = vld [vmem:[%s16635_s5] ss:$0 sm:$0xff]  ;;  %v16697_v46 = vld [vmem:[#allocation12_spill] sm:$0xff] }
 0x6d5   :  { %v2829_v42 = vand.u32 4294901760, %v2828_v56  ;;  %12777 = vmatpush3.msra.mxu1 %v14114_v7 }
 0x6d6   :  { %v2667_v29 = vmul.f32 %v13667_v40, %v2663_v57  ;;  %v2668_v47 = vmul.f32 %v13667_v40, %v2664_v5  ;;  %v2669_v60 = vmul.f32 %v13667_v40, %v2665_v2  ;;  %12778 = vmatprep.subr.mxu1 %v16696_v1  ;;  %v2670_v61 = vadd.f32 %v13668_v54, %v2666_v20 }
 0x6d7   :  { %v2830_v31 = vsub.f32 %v2828_v56, %v2829_v42  ;;  %12779 = vmatpush3.msra.mxu1 %v14116_v8 }
 0x6d8   :  { %v2671_v45 = vadd.f32 %v13668_v54, %v2667_v29  ;;  %v2672_v58 = vadd.f32 %v13668_v54, %v2668_v47  ;;  %12780 = vmatprep.subr.mxu1 %v16696_v1  ;;  %v2673_v3 = vadd.f32 %v13668_v54, %v2669_v60 }
 0x6d9   :  { %v2831_v44 = vand.u32 4294901760, %v2830_v31  ;;  %12781 = vmatpush3.msra.mxu1 %v14163_v21 }
 0x6da   :  { %v3247_v36 = vrot.slane %v2671_v45, 7  ;;  %v3249_v26 = vrot.slane %v2672_v58, 6  ;;  %12783 = vmatmul.mubr.f32.vlgmr.msra.gmra.mxu1 %v2829_v42  ;;  %12796 = vmatprep.subr.mxu1 %v16696_v1  ;;  %v3251_v51 = vrot.slane %v2673_v3, 5 }
 0x6db   :  { %12750 = vmatmul.mubr.f32.vlgmr.msra.gmra.mxu0 %v2831_v44  ;;  %12797 = vmatpush3.msra.mxu1 %v14112_v6 }
 0x6dc   :  { %v3248_v49 = vsel %vm959_vm3, %v3247_v36, %v2670_v61  ;;  %12764 = vmatpush3.msra.mxu0 %v14119_v10  ;;  %12798 = vmatprep.subr.mxu1 %v16696_v1 }
 0x6dd   :  { %v3250_v62 = vsel %vm961_vm4, %v3249_v26, %v3248_v49  ;;  %12765 = vmatprep.subr.mxu0 %v16696_v1  ;;  %12799 = vmatpush3.msra.mxu1 %v14114_v7 }
 0x6de   :  { %12766 = vmatpush3.msra.mxu0 %v14122_v11  ;;  %12800 = vmatprep.subr.mxu1 %v16696_v1  ;;  %v14653_v9 = vsel %vm963_vm6, %v3251_v51, %v3250_v62 }
 0x6df   :  { %12767 = vmatprep.subr.mxu0 %v16696_v1  ;;  %12801 = vmatpush3.msra.mxu1 %v14116_v8  ;;  %v3253_v28 = vsel %vm653_vm5, %v14653_v9, 0 }
 0x6e0   :  { %12768 = vmatpush3.msra.mxu0 %v14125_v24  ;;  %12802 = vmatprep.subr.mxu1 %v16696_v1  ;;  %v14670_v30 = vand.u32 4294901760, %v3253_v28 }
 0x6e1   :  { %12769 = vmatprep.subr.mxu0 %v16696_v1  ;;  %12771 = vmatprep.mubr.msk.f32.mxu0 %vm13766_vm8, %v16696_v1 }
 0x6e2   :  { %12770 = vmatpush3.msra.mxu0 %v14166_v38  ;;  %12803 = vmatpush3.msra.mxu1 %v14163_v21  ;;  %v3325_v16 = vsub.f32 %v3253_v28, %v14670_v30 }
 0x6e3   :  { %12804 = vmatprep.mubr.msk.f32.mxu1 %vm13766_vm8, %v16696_v1  ;;  %12772 = vmatmul.mubr.f32.vlgmr.msra.gmra.mxu0 %v2828_v56 }
 0x6e4   :  { %12785 = vmatprep.subr.mxu0 %v16696_v1  ;;  %12805 = vmatmul.mubr.f32.vlgmr.msra.gmra.mxu1 %v14617_v35  ;;  %v3326_v0 = vand.u32 4294901760, %v3325_v16 }
 0x6e5   :  { %12818 = vmatprep.subr.mxu1 %v16696_v1  ;;  %12786 = vmatpush3.msra.mxu0 %v14130_v12 }
 0x6e6   :  { %12819 = vmatpush3.msra.mxu1 %v14291_v27  ;;  %12787 = vmatprep.subr.mxu0 %v16696_v1  ;;  %v3327_v50 = vsub.f32 %v3325_v16, %v3326_v0 }
 0x6e7   :  { %12820 = vmatprep.subr.mxu1 %v16696_v1  ;;  %12788 = vmatpush3.msra.mxu0 %v14133_v55 }
 0x6e8   :  { %12821 = vmatpush3.msra.mxu1 %v14301_v39  ;;  %12789 = vmatprep.subr.mxu0 %v16696_v1 }
 0x6e9   :  { %12822 = vmatprep.subr.mxu1 %v16696_v1  ;;  %12790 = vmatpush3.msra.mxu0 %v14136_v13 }
 0x6ea   :  { %12823 = vmatpush3.msra.mxu1 %v14311_v52  ;;  %12791 = vmatprep.subr.mxu0 %v16696_v1 }
 0x6eb   :  { %12824 = vmatprep.subr.mxu1 %v16696_v1  ;;  %12792 = vmatpush3.msra.mxu0 %v14171_v22 }
 0x6ec   :  { %12793 = vmatprep.mubr.msk.f32.mxu0 %vm13766_vm8, %v16696_v1  ;;  %12825 = vmatpush3.msra.mxu1 %v14317_v53 }
 0x6ed   :  { %12826 = vmatprep.mubr.msk.f32.mxu1 %vm13766_vm8, %v16696_v1  ;;  %12794 = vmatmul.mubr.f32.vlgmr.msra.gmra.mxu0 %v14617_v35  ;;  %v3328_v35 = vand.u32 4294901760, %v3327_v50 }
 0x6ee   :  { %12807 = vmatprep.subr.mxu0 %v16696_v1  ;;  %12827 = vmatmul.mubr.f32.vlgmr.msra.gmra.mxu1 %v14670_v30 }
 0x6ef   :  { %12840 = vmatprep.subr.mxu1 %v16696_v1  ;;  %12808 = vmatpush3.msra.mxu0 %v14218_v59 }
 0x6f0   :  { %12841 = vmatpush3.msra.mxu1 %v14218_v59  ;;  %12809 = vmatprep.subr.mxu0 %v16696_v1 }
 0x6f1   :  { %12842 = vmatprep.subr.mxu1 %v16696_v1  ;;  %12810 = vmatpush3.msra.mxu0 %v14227_v63 }
 0x6f2   :  { %12843 = vmatpush3.msra.mxu1 %v14227_v63  ;;  %12811 = vmatprep.subr.mxu0 %v16696_v1 }
 0x6f3   :  { %12844 = vmatprep.subr.mxu1 %v16696_v1  ;;  %12812 = vmatpush3.msra.mxu0 %v14237_v23 }
 0x6f4   :  { %12845 = vmatpush3.msra.mxu1 %v14237_v23  ;;  %12813 = vmatprep.subr.mxu0 %v16696_v1 }
 0x6f5   :  { %12846 = vmatprep.subr.mxu1 %v16696_v1  ;;  %12814 = vmatpush3.msra.mxu0 %v14244_v25 }
 0x6f6   :  { %12815 = vmatprep.mubr.msk.f32.mxu0 %vm13766_vm8, %v16696_v1  ;;  %12847 = vmatpush3.msra.mxu1 %v14244_v25 }
 0x6f7   :  { %12848 = vmatprep.mubr.msk.f32.mxu1 %vm13766_vm8, %v16696_v1  ;;  %12816 = vmatmul.mubr.f32.vlgmr.msra.gmra.mxu0 %v3328_v35 }
 0x6f8   :  { %12829 = vmatprep.subr.mxu0 %v16696_v1  ;;  %12849 = vmatmul.mubr.f32.vlgmr.msra.gmra.mxu1 %v3326_v0 }
 0x6f9   :  { %12862 = vmatprep.subr.mxu1 %v16696_v1  ;;  %12830 = vmatpush3.msra.mxu0 %v14235_v4 }
 0x6fa   :  { %12863 = vmatpush3.msra.mxu1 %v14218_v59  ;;  %12831 = vmatprep.subr.mxu0 %v16696_v1 }
 0x6fb   :  { %12864 = vmatprep.subr.mxu1 %v16696_v1  ;;  %12832 = vmatpush3.msra.mxu0 %v14242_v15 }
 0x6fc   :  { %12865 = vmatpush3.msra.mxu1 %v14227_v63  ;;  %12833 = vmatprep.subr.mxu0 %v16696_v1 }
 0x6fd   :  { %12866 = vmatprep.subr.mxu1 %v16696_v1  ;;  %12834 = vmatpush3.msra.mxu0 %v14253_v33 }
 0x6fe   :  { %12867 = vmatpush3.msra.mxu1 %v14237_v23  ;;  %12835 = vmatprep.subr.mxu0 %v16696_v1 }
 0x6ff   :  { %12868 = vmatprep.subr.mxu1 %v16696_v1  ;;  %12836 = vmatpush3.msra.mxu0 %v14262_v34 }
 0x700   :  { %12837 = vmatprep.mubr.msk.f32.mxu0 %vm13766_vm8, %v16696_v1  ;;  %12869 = vmatpush3.msra.mxu1 %v14244_v25 }
 0x701   :  { %12870 = vmatprep.mubr.msk.f32.mxu1 %vm13766_vm8, %v16696_v1  ;;  %12838 = vmatmul.mubr.f32.vlgmr.msra.gmra.mxu0 %v3325_v16 }
 0x702   :  { %12851 = vmatprep.subr.mxu0 %v16696_v1  ;;  %12871 = vmatmul.mubr.f32.vlgmr.msra.gmra.mxu1 %v14670_v30 }
 0x703   :  { %12852 = vmatpush3.msra.mxu0 %v14250_v32  ;;  %12859 = vmatprep.mubr.msk.f32.mxu0 %vm13766_vm8, %v16696_v1 }
 0x704   :  { %12853 = vmatprep.subr.mxu0 %v16696_v1  ;;  %12884 = vmatprep.subr.mxu1 %v16696_v1 }
 0x705   :  { %12854 = vmatpush3.msra.mxu0 %v14259_v37  ;;  %12885 = vmatpush3.msra.mxu1 %v14148_v17 }
 0x706   :  { %12855 = vmatprep.subr.mxu0 %v16696_v1  ;;  %12886 = vmatprep.subr.mxu1 %v16696_v1 }
 0x707   :  { %12856 = vmatpush3.msra.mxu0 %v14272_v41  ;;  %12887 = vmatpush3.msra.mxu1 %v14150_v18 }
 0x708   :  { %12857 = vmatprep.subr.mxu0 %v16696_v1  ;;  %12888 = vmatprep.subr.mxu1 %v16696_v1 }
 0x709   :  { %12858 = vmatpush3.msra.mxu0 %v14284_v48  ;;  %12889 = vmatpush3.msra.mxu1 %v14153_v19 }
 0x70a   :  { %12860 = vmatmul.mubr.f32.vlgmr.msra.gmra.mxu0 %v14670_v30  ;;  %12890 = vmatprep.subr.mxu1 %v16696_v1 }
 0x70b   :  { %12891 = vmatpush3.msra.mxu1 %v16697_v46  ;;  %12873 = vmatprep.subr.mxu0 %v16696_v1 }
 0x70c   :  { %12892 = vmatprep.mubr.msk.f32.mxu1 %vm13766_vm8, %v16696_v1  ;;  %12906 = vmatprep.subr.mxu1 %v16696_v1 }
 0x70d   :  { %12874 = vmatpush3.msra.mxu0 %v14112_v6  ;;  %12881 = vmatprep.mubr.msk.f32.mxu0 %vm13766_vm8, %v16696_v1 }
 0x70e   :  { %12875 = vmatprep.subr.mxu0 %v16696_v1 }
 0x70f   :  { %12876 = vmatpush3.msra.mxu0 %v14114_v7 }
 0x710   :  { %12877 = vmatprep.subr.mxu0 %v16696_v1 }
 0x711   :  { %12878 = vmatpush3.msra.mxu0 %v14116_v8 }
 0x712   :  { %12879 = vmatprep.subr.mxu0 %v16696_v1 }
 0x713   :  { %12880 = vmatpush3.msra.mxu0 %v14163_v21 }
 0x714   :  { %12895 = vmatprep.subr.mxu0 %v16696_v1 }
 0x792   :  { %v2924_v43 = vpop.f32.mrf.mxu1 }
 0x794   :  { %v12762_v14 = vpop.f32.mrf.mxu1 }
 0x79a   :  { %v3081_v56 = vpop.f32.mrf.mxu1 }
 0x79b   :  { %v2833_v57 = vpop.f32.mrf.mxu0 }
 0x79c   :  { %v12784_v5 = vpop.f32.mrf.mxu1  ;;  %v2925_v45 = vadd.f32 %v2924_v43, %v2833_v57 }
 0x79d   :  { %v12751_v2 = vpop.f32.mrf.mxu0 }
 0x7a3   :  { %v3004_v42 = vpop.f32.mrf.mxu0 }
 0x7a4   :  { %v3239_v40 = vpop.f32.mrf.mxu1  ;;  %v3005_v58 = vadd.f32 %v3004_v42, %v2925_v45  ;;  %v12052_v45 = vld.sshfl [vmem:[%s16630_s0 + $0x44] sm:$0x33 pattern:$0x75316420] }
 0x7a5   :  { %v12773_v20 = vpop.f32.mrf.mxu0 }
 0x7a6   :  { %v12806_v29 = vpop.f32.mrf.mxu1  ;;  %v3082_v44 = vadd.f32 %v3081_v56, %v3005_v58  ;;  %v13669_v56 = vld [vmem:[%s16640_s10] ss:$0 sm:$0xff]  ;;  %v16698_v58 = vld [vmem:[#allocation8_spill] sm:$0xff] }
 0x7ad   :  { %v3164_v47 = vpop.f32.mrf.mxu0 }
 0x7ae   :  { %v3421_v60 = vpop.f32.mrf.mxu1  ;;  %v3165_v36 = vadd.f32 %v3164_v47, %v3082_v44  ;;  %v3796_v44 = vrot.slane %v12052_v45, %v16698_v58 }
 0x7af   :  { %v12795_v31 = vpop.f32.mrf.mxu0 }
 0x7b0   :  { %v12828_v54 = vpop.f32.mrf.mxu1  ;;  %v3240_v62 = vadd.f32 %v3239_v40, %v3165_v36  ;;  %v3751_v31 = vpop.permute.xlu1 %3750 }
 0x7b7   :  { %v3330_v61 = vpop.f32.mrf.mxu0 }
 0x7b8   :  { %v3578_v3 = vpop.f32.mrf.mxu1  ;;  %v3331_v51 = vadd.f32 %v3330_v61, %v3240_v62  ;;  %v3789_v61 = vcombine.high %v12052_v45, %v12052_v45 }
 0x7b9   :  { %v12817_v26 = vpop.f32.mrf.mxu0 }
 0x7ba   :  { %v12850_v49 = vpop.f32.mrf.mxu1  ;;  %v3422_v16 = vadd.f32 %v3421_v60, %v3331_v51  ;;  %v3803_v26 = vrot.slane %v3789_v61, %v16698_v58  ;;  %v16700_v51 = vld [vmem:[#allocation10_spill] sm:$0xff] }
 0x7c1   :  { %v3501_v28 = vpop.f32.mrf.mxu0 }
 0x7c2   :  { %v3736_v30 = vpop.f32.mrf.mxu1  ;;  %v3502_v35 = vadd.f32 %v3501_v28, %v3422_v16 }
 0x7c3   :  { %v12839_v0 = vpop.f32.mrf.mxu0 }
 0x7c4   :  { %v12872_v50 = vpop.f32.mrf.mxu1  ;;  %v3579_v14 = vadd.f32 %v3578_v3, %v3502_v35  ;;  %v16699_v3 = vld [vmem:[#allocation9_spill] sm:$0xff] }
 0x7c5   :  { %v3809_v36 = vrot.slane %v3796_v44, %v16699_v3  ;;  %v3813_v28 = vrot.slane %v3803_v26, %v16699_v3 }
 0x7c7   :  { %vm3823_vm13 = vcmp.eq.s32.totalorder %v16700_v51, %v3809_v36  ;;  %vm3825_vm14 = vcmp.eq.s32.totalorder %v16700_v51, %v3813_v28 }
 0x7ca   :  { %v3661_v5 = vpop.f32.mrf.mxu0 }
 0x7cb   :  { %v3662_v2 = vadd.f32 %v3661_v5, %v3579_v14 }
 0x7cc   :  { %v12861_v20 = vpop.f32.mrf.mxu0 }
 0x7cd   :  { %v3737_v43 = vadd.f32 %v3736_v30, %v3662_v2  ;;  %v16701_v30 = vmov 0   ;;  %v16702_v20 = vld [vmem:[#allocation7_spill] sm:$0xff] }
 0x7ce   :  { %v3856_v16 = vsel %vm3823_vm13, 1, %v16701_v30  ;;  %v3858_v0 = vsel %vm3825_vm14, 1, %v16701_v30  ;;  %vm3822_vm15 = vcmp.eq.s32.totalorder %v16702_v20, %v3809_v36  ;;  %vm3824_vm0 = vcmp.eq.s32.totalorder %v16702_v20, %v3813_v28 }
 0x7cf   :  { %v3740_v57 = vadd.f32 %v13669_v56, %v3737_v43  ;;  %v3804_v43 = vcombine.high %v3796_v44, %v3796_v44 }
 0x7d1   :  { %v12051_v42 = vmul.f32 -1.442695, %v3740_v57  ;;  %13569 = vtanh.f32 %v3740_v57  ;;  %v3855_v57 = vsel %vm3822_vm15, 1, %v16701_v30 }
 0x7d3   :  { %13571 = vpow2.f32 %v12051_v42  ;;  %v3817_v42 = vrot.slane %v3804_v43, %v16699_v3 }
 0x7d5   :  { %vm3826_vm9 = vcmp.eq.s32.totalorder %v16702_v20, %v3817_v42 }
 0x7d6   :  { %v3859_v45 = vsel %vm3826_vm9, 1, %v16701_v30 }
 0x7de   :  { %v13570_v40 = vpop.eup %13569 }
 0x7df   :  { %3760 = vrot.lane.b32.xlu0 %v13570_v40, %s13768_s16  ;;  %v3805_v40 = vcombine.high %v3803_v26, %v3803_v26 }
 0x7e0   :  { %v13572_v29 = vpop.eup %13571 }
 0x7e1   :  { %v3744_v47 = vadd.f32 1.0, %v13572_v29  ;;  %v3857_v29 = vsel %vm3824_vm0, 1, %v16701_v30 }
 0x7e3   :  { %13573 = vrcp.f32 %v3744_v47  ;;  %v3821_v47 = vrot.slane %v3805_v40, %v16699_v3 }
 0x7e5   :  { %vm3828_vm11 = vcmp.eq.s32.totalorder %v16702_v20, %v3821_v47 }
 0x7e6   :  { %v3861_v36 = vsel %vm3828_vm11, 1, %v16701_v30 }
 0x7f0   :  { %v14770_v60 = vpop.eup %13573 }
 0x7f1   :  { %v3753_v54 = vmul.f32 %v14770_v60, %v3751_v31  ;;  %v3749_v35 = vmul.f32 %v14770_v60, %v14653_v9  ;;  %v12058_v9 = vld.sshfl [vmem:[%s16630_s0 + $0x28] sm:$0x33 pattern:$0x75316420] }
 0x7f2   :  { %v4016_v31 = vrot.slane %v12058_v9, %v16698_v58 }
 0x7f3   :  { %3755 = vrot.lane.b32.xlu1 %v3753_v54, %s13769_s17  ;;  %v4009_v54 = vcombine.high %v12058_v9, %v12058_v9 }
 0x7f4   :  { %v4029_v44 = vrot.slane %v4016_v31, %v16699_v3 }
 0x7f5   :  { %v4023_v61 = vrot.slane %v4009_v54, %v16698_v58 }
 0x7f6   :  { %vm4042_vm10 = vcmp.eq.s32.totalorder %v16702_v20, %v4029_v44 }
 0x7f7   :  { %v4033_v26 = vrot.slane %v4023_v61, %v16699_v3 }
 0x7f9   :  { %vm4044_vm12 = vcmp.eq.s32.totalorder %v16702_v20, %v4033_v26 }
 0x851   :  { %v3761_v49 = vpop.permute.xlu0 %3760 }
 0x852   :  { %v3763_v62 = vmul.f32 %v14770_v60, %v3761_v49  ;;  %v4024_v49 = vcombine.high %v4016_v31, %v4016_v31 }
 0x854   :  { %3765 = vrot.lane.b32.xlu1 %v3763_v62, %s13767_s26  ;;  %v4134_v62 = vsel %vm4042_vm10, 1, %v16701_v30  ;;  %v4037_v28 = vrot.slane %v4024_v49, %v16699_v3  ;;  %vm3827_vm10 = vcmp.eq.s32.totalorder %v16700_v51, %v3817_v42 }
 0x856   :  { %vm4046_vm13 = vcmp.eq.s32.totalorder %v16702_v20, %v4037_v28 }
 0x857   :  { %v4138_v43 = vsel %vm4046_vm13, 1, %v16701_v30  ;;  %vm4043_vm13 = vcmp.eq.s32.totalorder %v16700_v51, %v4029_v44 }
 0x858   :  { %3867 = vperm.xlu1 %13544, %v3856_v16   ;;  %v4025_v16 = vcombine.high %v4023_v61, %v4023_v61 }
 0x85c   :  { %3873 = vperm.xlu1 %13544, %v3858_v0   ;;  %v12057_v0 = vld.sshfl [vmem:[%s16630_s0 + $0x8] sm:$0x33 pattern:$0x75316420] }
 0x865   :  { %v3756_v50 = vpop.permute.xlu1 %3755 }
 0x866   :  { %v3758_v14 = vadd.f32 %v3756_v50, %v3749_v35  ;;  %v4136_v50 = vsel %vm4044_vm12, 1, %v16701_v30  ;;  %v4041_v35 = vrot.slane %v4025_v16, %v16699_v3  ;;  %vm3829_vm12 = vcmp.eq.s32.totalorder %v16700_v51, %v3821_v47 }
 0x868   :  { %vm4048_vm14 = vcmp.eq.s32.totalorder %v16702_v20, %v4041_v35 }
 0x869   :  { %v4140_v40 = vsel %vm4048_vm14, 1, %v16701_v30  ;;  %vm4045_vm14 = vcmp.eq.s32.totalorder %v16700_v51, %v4033_v26 }
 0x8c6   :  { %v3766_v5 = vpop.permute.xlu1 %3765 }
 0x8c7   :  { %v14789_v2 = vadd.f32 %v3766_v5, %v3758_v14  ;;  %v3968_v14 = vrot.slane %v12057_v0, %v16698_v58  ;;  %v3961_v5 = vcombine.high %v12057_v0, %v12057_v0 }
 0x8c9   :  { %13575 = vtanh.f32 %v14789_v2 }
 0x8d6   :  { %v13576_v56 = vpop.eup %13575 }
 0x8d7   :  { %3771 = vrot.lane.b32.xlu0 %v13576_v56, %s13770_s20  ;;  %v3981_v56 = vrot.slane %v3968_v14, %v16699_v3 }
 0x8d9   :  { %vm3994_vm15 = vcmp.eq.s32.totalorder %v16702_v20, %v3981_v56 }
 0x8da   :  { %v4050_v31 = vsel %vm3994_vm15, 1, %v16701_v30  ;;  %vm4047_vm15 = vcmp.eq.s32.totalorder %v16700_v51, %v4037_v28 }
 0x8db   :  { %3864 = vperm.xlu0 %13543, %v3855_v57   ;;  %v3975_v57 = vrot.slane %v3961_v5, %v16698_v58  ;;  %v4135_v5 = vsel %vm4043_vm13, 1, %v16701_v30  ;;  %v4139_v42 = vsel %vm4047_vm15, 1, %v16701_v30 }
 0x8dd   :  { %v3985_v9 = vrot.slane %v3975_v57, %v16699_v3 }
 0x8df   :  { %3870 = vperm.xlu0 %13543, %v3857_v29   ;;  %v3976_v29 = vcombine.high %v3968_v14, %v3968_v14  ;;  %vm3996_vm0 = vcmp.eq.s32.totalorder %v16702_v20, %v3985_v9  ;;  %v3862_v14 = vsel %vm3829_vm12, 1, %v16701_v30 }
 0x8e0   :  { %v4052_v61 = vsel %vm3996_vm0, 1, %v16701_v30  ;;  %vm4049_vm0 = vcmp.eq.s32.totalorder %v16700_v51, %v4041_v35 }
 0x8e1   :  { %v3989_v54 = vrot.slane %v3976_v29, %v16699_v3  ;;  %v4141_v47 = vsel %vm4049_vm0, 1, %v16701_v30 }
 0x8e3   :  { %3876 = vperm.xlu0 %13543, %v3859_v45   ;;  %v3977_v45 = vcombine.high %v3975_v57, %v3975_v57  ;;  %vm3998_vm9 = vcmp.eq.s32.totalorder %v16702_v20, %v3989_v54  ;;  %v3868_v57 = vpop.permute.xlu1 %3867 }
 0x8e4   :  { %v4054_v49 = vsel %vm3998_vm9, 1, %v16701_v30  ;;  %vm3995_vm9 = vcmp.eq.s32.totalorder %v16700_v51, %v3981_v56  ;;  %vm3888_vm13 = vcmp.eq.s32.totalorder %v3868_v57, 1  ;;  %v13672_v57 = vld [vmem:[#allocation2 + $0x20] sm:$0xff] }
 0x8e5   :  { %v4051_v44 = vsel %vm3995_vm9, 1, %v16701_v30 }
 0x8e7   :  { %3882 = vperm.xlu0 %13543, %v3861_v36   ;;  %v3993_v36 = vrot.slane %v3977_v45, %v16699_v3  ;;  %v3874_v29 = vpop.permute.xlu1 %3873 }
 0x8e9   :  { %vm4000_vm11 = vcmp.eq.s32.totalorder %v16702_v20, %v3993_v36  ;;  %vm4001_vm12 = vcmp.eq.s32.totalorder %v16700_v51, %v3993_v36 }
 0x8ea   :  { %v4057_v35 = vsel %vm4001_vm12, 1, %v16701_v30 }
 0x8eb   :  { %4143 = vperm.xlu0 %13543, %v4134_v62   ;;  %v4056_v62 = vsel %vm4000_vm11, 1, %v16701_v30  ;;  %vm3997_vm11 = vcmp.eq.s32.totalorder %v16700_v51, %v3985_v9 }
 0x8ec   :  { %v4053_v26 = vsel %vm3997_vm11, 1, %v16701_v30 }
 0x8ef   :  { %4149 = vperm.xlu0 %13543, %v4136_v50   ;;  %v3860_v50 = vsel %vm3827_vm10, 1, %v16701_v30  ;;  %vm3999_vm10 = vcmp.eq.s32.totalorder %v16700_v51, %v3989_v54 }
 0x8f0   :  { %v4055_v28 = vsel %vm3999_vm10, 1, %v16701_v30 }
 0x8f3   :  { %4155 = vperm.xlu0 %13543, %v4138_v43  }
 0x8f7   :  { %4161 = vperm.xlu0 %13543, %v4140_v40  }
 0x8fb   :  { %4059 = vperm.xlu0 %13543, %v4050_v31  }
 0x8ff   :  { %4065 = vperm.xlu0 %13543, %v4052_v61  }
 0x903   :  { %4071 = vperm.xlu0 %13543, %v4054_v49  }
 0x907   :  { %4077 = vperm.xlu0 %13543, %v4056_v62  }
 0x949   :  { %v3772_v16 = vpop.permute.xlu0 %3771 }
 0x94a   :  { %v3774_v0 = vmul.f32 %v14770_v60, %v3772_v16  ;;  %v4137_v60 = vsel %vm4045_vm14, 1, %v16701_v30  ;;  %vm3890_vm14 = vcmp.eq.s32.totalorder %v3874_v29, 1 }
 0x94c   :  { %3776 = vrot.lane.b32.xlu1 %v3774_v0, %s13771_s24 }
 0x950   :  { %3879 = vperm.xlu1 %13544, %v3860_v50  }
 0x954   :  { %3885 = vperm.xlu1 %13544, %v3862_v14  }
 0x956   :  { %v3865_v43 = vpop.permute.xlu0 %3864 }
 0x957   :  { %vm3887_vm15 = vcmp.eq.s32.totalorder %v3865_v43, 1 }
 0x958   :  { %4146 = vperm.xlu1 %13544, %v4135_v5  }
 0x95a   :  { %v3871_v56 = vpop.permute.xlu0 %3870 }
 0x95b   :  { %vm3889_vm0 = vcmp.eq.s32.totalorder %v3871_v56, 1 }
 0x95c   :  { %4152 = vperm.xlu1 %13544, %v4137_v60   ;;  %v13670_v60 = vld [vmem:[#allocation2] sm:$0xff] }
 0x95e   :  { %v3877_v40 = vpop.permute.xlu0 %3876 }
 0x95f   :  { %vm3891_vm9 = vcmp.eq.s32.totalorder %v3877_v40, 1  ;;  %v13674_v40 = vld [vmem:[#allocation2 + $0x10] sm:$0xff] }
 0x960   :  { %4158 = vperm.xlu1 %13544, %v4139_v42  }
 0x962   :  { %v3883_v9 = vpop.permute.xlu0 %3882 }
 0x963   :  { %vm3893_vm12 = vcmp.eq.s32.totalorder %v3883_v9, 1 }
 0x964   :  { %4164 = vperm.xlu1 %13544, %v4141_v47   ;;  %v13671_v47 = vld [vmem:[#allocation2 + $0x8] sm:$0xff] }
 0x966   :  { %v4144_v54 = vpop.permute.xlu0 %4143 }
 0x968   :  { %4062 = vperm.xlu1 %13544, %v4051_v44  }
 0x96a   :  { %v14862_v45 = vpop.permute.xlu0 %4149 }
 0x96c   :  { %4068 = vperm.xlu1 %13544, %v4053_v26  }
 0x970   :  { %4074 = vperm.xlu1 %13544, %v4055_v28  }
 0x974   :  { %4080 = vperm.xlu1 %13544, %v4057_v35  }
 0x9be   :  { %v3777_v31 = vpop.permute.xlu1 %3776 }
 0x9bf   :  { %3779 = vst.msk [vmem:[#allocation3] sm:$0xf] %vm2168_vm1, %v3777_v31  ;;  %v13673_v31 = vld [vmem:[#allocation2 + $0x28] sm:$0xff] }
 0x9c0   :  { %3780 = vst.msk [vmem:[#allocation3] sm:$0xf] %vm2170_vm2, %v14789_v2  ;;  %v4156_v2 = vpop.permute.xlu0 %4155 }
 0x9c7   :  { %v14864_v61 = vld [vmem:[#allocation3] sm:$0xf] }
 0x9c8   :  { %16703 = vst [vmem:[#allocation14_spill] sm:$0xff] %v14864_v61  ;;  %v3837_v36 = vrot.slane %v14864_v61, %v16698_v58 }
 0x9ca   :  { %v3845_v49 = vrot.slane %v3837_v36, %v16698_v58  ;;  %v3838_v62 = vcombine.high %v3837_v36, %v3837_v36 }
 0x9cb   :  { %v3880_v16 = vpop.permute.xlu1 %3879 }
 0x9cc   :  { %v3853_v0 = vcombine.high %v3845_v49, %v3845_v49  ;;  %v3898_v50 = vrot.slane %v3845_v49, %v16699_v3  ;;  %v3852_v14 = vrot.slane %v3838_v62, %v16698_v58  ;;  %vm3892_vm11 = vcmp.eq.s32.totalorder %v3880_v16, 1 }
 0x9ce   :  { %v3906_v5 = vrot.slane %v3853_v0, %v16699_v3  ;;  %v3915_v42 = vsel %vm3887_vm15, %v3898_v50, %v13670_v60  ;;  %v3916_v44 = vsel %vm3888_vm13, %v3898_v50, %v13671_v47  ;;  %v3854_v26 = vcombine.high %v3852_v14, %v3852_v14  ;;  %v13675_v0 = vld [vmem:[#allocation2 + $0x18] sm:$0xff]  ;;  %v13676_v50 = vld [vmem:[#allocation2 + $0x30] sm:$0xff] }
 0x9cf   :  { %3923 = vst.msk [vmem:[#allocation2] sm:$0xff] %vm653_vm5, %v3915_v42  ;;  %3924 = vst.msk [vmem:[#allocation2 + $0x8] sm:$0xff] %vm653_vm5, %v3916_v44  ;;  %v3902_v28 = vrot.slane %v3852_v14, %v16699_v3  ;;  %v3886_v35 = vpop.permute.xlu1 %3885  ;;  %v4162_v42 = vpop.permute.xlu0 %4161  ;;  %vm4166_vm13 = vcmp.eq.s32.totalorder %v4144_v54, 1 }
 0x9d0   :  { %v3919_v43 = vsel %vm3891_vm9, %v3906_v5, %v13672_v57  ;;  %v3920_v36 = vsel %vm3892_vm11, %v3906_v5, %v13673_v31  ;;  %v3910_v49 = vrot.slane %v3854_v26, %v16699_v3  ;;  %vm3894_vm10 = vcmp.eq.s32.totalorder %v3886_v35, 1  ;;  %v13677_v5 = vld [vmem:[#allocation2 + $0x38] sm:$0xff] }
 0x9d1   :  { %3927 = vst.msk [vmem:[#allocation2 + $0x20] sm:$0xff] %vm653_vm5, %v3919_v43  ;;  %3928 = vst.msk [vmem:[#allocation2 + $0x28] sm:$0xff] %vm653_vm5, %v3920_v36  ;;  %v3917_v62 = vsel %vm3889_vm0, %v3902_v28, %v13674_v40  ;;  %v3918_v16 = vsel %vm3890_vm14, %v3902_v28, %v13675_v0  ;;  %vm4168_vm0 = vcmp.eq.s32.totalorder %v14862_v45, 1  ;;  %vm4170_vm9 = vcmp.eq.s32.totalorder %v4156_v2, 1 }
 0x9d2   :  { %v3921_v14 = vsel %vm3893_vm12, %v3910_v49, %v13676_v50  ;;  %3925 = vst.msk [vmem:[#allocation2 + $0x10] sm:$0xff] %vm653_vm5, %v3917_v62  ;;  %3926 = vst.msk [vmem:[#allocation2 + $0x18] sm:$0xff] %vm653_vm5, %v3918_v16  ;;  %v3922_v60 = vsel %vm3894_vm10, %v3910_v49, %v13677_v5  ;;  %vm4172_vm10 = vcmp.eq.s32.totalorder %v4162_v42, 1 }
 0x9d3   :  { %3929 = vst.msk [vmem:[#allocation2 + $0x30] sm:$0xff] %vm653_vm5, %v3921_v14  ;;  %3930 = vst.msk [vmem:[#allocation2 + $0x38] sm:$0xff] %vm653_vm5, %v3922_v60  ;;  %v4147_v9 = vpop.permute.xlu1 %4146  ;;  %v4060_v43 = vpop.permute.xlu0 %4059 }
 0x9d4   :  { %vm4167_vm15 = vcmp.eq.s32.totalorder %v4147_v9, 1 }
 0x9d6   :  { %v3946_v56 = vld [vmem:[#allocation2] sm:$0xff]  ;;  %v3947_v47 = vld [vmem:[#allocation2 + $0x8] sm:$0xff] }
 0x9d7   :  { %v4174_v29 = vsel %vm4166_vm13, %v3946_v56, 0.0  ;;  %v4175_v44 = vsel %vm4167_vm15, %v3947_v47, 0.0  ;;  %v4153_v26 = vpop.permute.xlu1 %4152  ;;  %vm4082_vm13 = vcmp.eq.s32.totalorder %v4060_v43, 1 }
 0x9d8   :  { %v4182_v28 = vsel %vm653_vm5, %v4174_v29, 0.0  ;;  %v4183_v35 = vsel %vm653_vm5, %v4175_v44, 0.0  ;;  %vm4169_vm14 = vcmp.eq.s32.totalorder %v4153_v26, 1  ;;  %v14886_v57 = vld [vmem:[#allocation2 + $0x20] sm:$0xff]  ;;  %v3951_v60 = vld [vmem:[#allocation2 + $0x28] sm:$0xff] }
 0x9d9   :  { %v4184_v31 = vadd.f32 %v4183_v35, %v4182_v28  ;;  %v3948_v36 = vld [vmem:[#allocation2 + $0x10] sm:$0xff]  ;;  %v3949_v49 = vld [vmem:[#allocation2 + $0x18] sm:$0xff]  ;;  %v4178_v50 = vsel %vm4170_vm9, %v14886_v57, 0.0  ;;  %v4066_v28 = vpop.permute.xlu0 %4065 }
 0x9da   :  { %v4176_v54 = vsel %vm4168_vm0, %v3948_v36, 0.0  ;;  %v4177_v40 = vsel %vm4169_vm14, %v3949_v49, 0.0  ;;  %v14892_v9 = vld [vmem:[#allocation2 + $0x30] sm:$0xff]  ;;  %v4200_v2 = vsel %vm653_vm5, %v4178_v50, 0.0  ;;  %v14897_v20 = vld [vmem:[#allocation2 + $0x38] sm:$0xff]  ;;  %vm4084_vm14 = vcmp.eq.s32.totalorder %v4066_v28, 1 }
 0x9db   :  { %v4185_v62 = vrot.slane %v4184_v31, 4  ;;  %v4191_v0 = vsel %vm653_vm5, %v4176_v54, 0.0  ;;  %v4192_v16 = vsel %vm653_vm5, %v4177_v40, 0.0  ;;  %v4159_v14 = vpop.permute.xlu1 %4158  ;;  %v4180_v54 = vsel %vm4172_vm10, %v14892_v9, 0.0 }
 0x9dc   :  { %v4193_v5 = vadd.f32 %v4192_v16, %v4191_v0  ;;  %vm4171_vm11 = vcmp.eq.s32.totalorder %v4159_v14, 1 }
 0x9dd   :  { %v4179_v45 = vsel %vm4171_vm11, %v3951_v60, 0.0  ;;  %v4186_v29 = vadd.f32 %v4185_v62, %v4184_v31  ;;  %v4209_v62 = vsel %vm653_vm5, %v4180_v54, 0.0 }
 0x9de   :  { %v4194_v44 = vrot.slane %v4193_v5, 4  ;;  %v4201_v26 = vsel %vm653_vm5, %v4179_v45, 0.0 }
 0x9df   :  { %v4202_v35 = vadd.f32 %v4201_v26, %v4200_v2  ;;  %v4165_v40 = vpop.permute.xlu1 %4164  ;;  %v4187_v16 = vrot.slane %v4186_v29, 2  ;;  %v4090_v2 = vsel %vm4082_vm13, %v3946_v56, 0.0 }
 0x9e0   :  { %v4195_v61 = vadd.f32 %v4194_v44, %v4193_v5  ;;  %vm4173_vm12 = vcmp.eq.s32.totalorder %v4165_v40, 1  ;;  %v4072_v5 = vpop.permute.xlu0 %4071  ;;  %v4098_v3 = vsel %vm653_vm5, %v4090_v2, 0.0 }
 0x9e1   :  { %v4203_v0 = vrot.slane %v4202_v35, 4  ;;  %v4181_v42 = vsel %vm4173_vm12, %v14897_v20, 0.0  ;;  %v4188_v43 = vadd.f32 %v4187_v16, %v4186_v29  ;;  %vm4086_vm9 = vcmp.eq.s32.totalorder %v4072_v5, 1 }
 0x9e2   :  { %v4196_v31 = vrot.slane %v4195_v61, 2  ;;  %v4210_v50 = vsel %vm653_vm5, %v4181_v42, 0.0  ;;  %v4092_v42 = vsel %vm4084_vm14, %v3948_v36, 0.0 }
 0x9e3   :  { %v4204_v14 = vadd.f32 %v4203_v0, %v4202_v35  ;;  %v4211_v45 = vadd.f32 %v4210_v50, %v4209_v62  ;;  %v4063_v26 = vpop.permute.xlu1 %4062  ;;  %v4189_v50 = vrot.slane %v4188_v43, 1 }
 0x9e4   :  { %v4197_v30 = vadd.f32 %v4196_v31, %v4195_v61  ;;  %vm4083_vm15 = vcmp.eq.s32.totalorder %v4063_v26, 1  ;;  %v4078_v28 = vpop.permute.xlu0 %4077 }
 0x9e5   :  { %v4205_v44 = vrot.slane %v4204_v14, 2  ;;  %v4212_v51 = vrot.slane %v4211_v45, 4  ;;  %v4091_v40 = vsel %vm4083_vm15, %v3947_v47, 0.0  ;;  %v4107_v47 = vsel %vm653_vm5, %v4092_v42, 0.0 }
 0x9e6   :  { %v4099_v58 = vsel %vm653_vm5, %v4091_v40, 0.0  ;;  %v4198_v0 = vrot.slane %v4197_v30, 1  ;;  %vm4088_vm10 = vcmp.eq.s32.totalorder %v4078_v28, 1  ;;  %v4190_v40 = vadd.f32 %v4189_v50, %v4188_v43 }
 0x9e7   :  { %v4206_v46 = vadd.f32 %v4205_v44, %v4204_v14  ;;  %v4213_v54 = vadd.f32 %v4212_v51, %v4211_v45  ;;  %v4100_v19 = vadd.f32 %v4099_v58, %v4098_v3  ;;  %v4069_v35 = vpop.permute.xlu1 %4068  ;;  %v4094_v14 = vsel %vm4086_vm9, %v14886_v57, 0.0 }
 0x9e8   :  { %vm4085_vm0 = vcmp.eq.s32.totalorder %v4069_v35, 1  ;;  %v4199_v36 = vadd.f32 %v4198_v0, %v4197_v30  ;;  %v4116_v5 = vsel %vm653_vm5, %v4094_v14, 0.0 }
 0x9e9   :  { %v4214_v56 = vrot.slane %v4213_v54, 2  ;;  %v4101_v61 = vrot.slane %v4100_v19, 4  ;;  %v4093_v31 = vsel %vm4085_vm0, %v3949_v49, 0.0  ;;  %v4207_v62 = vrot.slane %v4206_v46, 1 }
 0x9ea   :  { %v4108_v29 = vsel %vm653_vm5, %v4093_v31, 0.0  ;;  %v4096_v31 = vsel %vm4088_vm10, %v14892_v9, 0.0 }
 0x9eb   :  { %v4109_v16 = vadd.f32 %v4108_v29, %v4107_v47  ;;  %v4075_v51 = vpop.permute.xlu1 %4074  ;;  %v4215_v58 = vadd.f32 %v4214_v56, %v4213_v54  ;;  %v4102_v3 = vadd.f32 %v4101_v61, %v4100_v19  ;;  %v4208_v26 = vadd.f32 %v4207_v62, %v4206_v46 }
 0x9ec   :  { %vm4087_vm11 = vcmp.eq.s32.totalorder %v4075_v51, 1  ;;  %v4294_v19 = vsel %vm959_vm3, %v4199_v36, %v4190_v40  ;;  %v4125_v56 = vsel %vm653_vm5, %v4096_v31, 0.0 }
 0x9ed   :  { %v4110_v45 = vrot.slane %v4109_v16, 4  ;;  %v4095_v2 = vsel %vm4087_vm11, %v3951_v60, 0.0  ;;  %v4216_v49 = vrot.slane %v4215_v58, 1  ;;  %v4103_v54 = vrot.slane %v4102_v3, 2 }
 0x9ee   :  { %v4117_v44 = vsel %vm653_vm5, %v4095_v2, 0.0  ;;  %v4295_v0 = vsel %vm961_vm4, %v4208_v26, %v4294_v19 }
 0x9ef   :  { %v4111_v42 = vadd.f32 %v4110_v45, %v4109_v16  ;;  %v4118_v35 = vadd.f32 %v4117_v44, %v4116_v5  ;;  %v4081_v57 = vpop.permute.xlu1 %4080  ;;  %v4217_v47 = vadd.f32 %v4216_v49, %v4215_v58  ;;  %v4104_v28 = vadd.f32 %v4103_v54, %v4102_v3 }
 0x9f0   :  { %vm4089_vm12 = vcmp.eq.s32.totalorder %v4081_v57, 1 }
 0x9f1   :  { %v4112_v30 = vrot.slane %v4111_v42, 2  ;;  %v4119_v60 = vrot.slane %v4118_v35, 4  ;;  %v4097_v46 = vsel %vm4089_vm12, %v14897_v20, 0.0  ;;  %v4296_v61 = vsel %vm963_vm6, %v4217_v47, %v4295_v0 }
 0x9f2   :  { %v4126_v43 = vsel %vm653_vm5, %v4097_v46, 0.0  ;;  %v4298_v29 = vsel %vm966_vm7, %v4296_v61, 0.0  ;;  %v4105_v45 = vrot.slane %v4104_v28, 1 }
 0x9f3   :  { %v4113_v62 = vadd.f32 %v4112_v30, %v4111_v42  ;;  %v4120_v9 = vadd.f32 %v4119_v60, %v4118_v35  ;;  %v4127_v50 = vadd.f32 %v4126_v43, %v4125_v56  ;;  %4299 = vadd.xlane.f32.xlu0 %v4298_v29 }
 0x9f4   :  { %v4106_v57 = vadd.f32 %v4105_v45, %v4104_v28 }
 0x9f5   :  { %v4121_v16 = vrot.slane %v4120_v9, 2  ;;  %v4128_v14 = vrot.slane %v4127_v50, 4  ;;  %v4114_v51 = vrot.slane %v4113_v62, 1 }
 0x9f7   :  { %v4122_v58 = vadd.f32 %v4121_v16, %v4120_v9  ;;  %v4129_v20 = vadd.f32 %v4128_v14, %v4127_v50  ;;  %v4115_v5 = vadd.f32 %v4114_v51, %v4113_v62 }
 0x9f9   :  { %v4130_v2 = vrot.slane %v4129_v20, 2  ;;  %v4123_v49 = vrot.slane %v4122_v58, 1  ;;  %v4222_v35 = vsel %vm959_vm3, %v4115_v5, %v4106_v57 }
 0x9fb   :  { %v4131_v44 = vadd.f32 %v4130_v2, %v4129_v20  ;;  %v4124_v31 = vadd.f32 %v4123_v49, %v4122_v58 }
 0x9fd   :  { %v4132_v19 = vrot.slane %v4131_v44, 1  ;;  %v4223_v30 = vsel %vm961_vm4, %v4124_v31, %v4222_v35 }
 0x9ff   :  { %v4133_v42 = vadd.f32 %v4132_v19, %v4131_v44 }
 0xa01   :  { %v4224_v3 = vsel %vm963_vm6, %v4133_v42, %v4223_v30 }
 0xa02   :  { %v4226_v54 = vsel %vm966_vm7, %v4224_v3, 0.0 }
 0xa03   :  { %4227 = vadd.xlane.f32.xlu1 %v4226_v54 }
 0xa7c   :  { %v4300_v60 = vpop.xlane.xlu0 %4299 }
 0xa7d   :  { %v4301_v46 = vmul.f32 0.03125, %v4300_v60 }
 0xa7f   :  { %v4303_v0 = vrot.slane %v4301_v46, 1  ;;  %v4304_v56 = vrot.slane %v4301_v46, 2  ;;  %v4305_v43 = vrot.slane %v4301_v46, 3  ;;  %v14921_v61 = vsub.f32 %v4190_v40, %v4301_v46 }
 0xa81   :  { %v14923_v62 = vsub.f32 %v4199_v36, %v4303_v0  ;;  %v14925_v9 = vsub.f32 %v4208_v26, %v4304_v56  ;;  %v14927_v50 = vsub.f32 %v4217_v47, %v4305_v43  ;;  %v4314_v14 = vmul.f32 %v14921_v61, %v14921_v61 }
 0xa83   :  { %v4315_v29 = vmul.f32 %v14923_v62, %v14923_v62  ;;  %v4316_v28 = vmul.f32 %v14925_v9, %v14925_v9  ;;  %v4317_v16 = vmul.f32 %v14927_v50, %v14927_v50 }
 0xa85   :  { %v4322_v40 = vrot.slane %v4315_v29, 7  ;;  %v4324_v51 = vrot.slane %v4316_v28, 6  ;;  %v4326_v26 = vrot.slane %v4317_v16, 5 }
 0xa87   :  { %v4323_v36 = vsel %vm959_vm3, %v4322_v40, %v4314_v14 }
 0xa88   :  { %v4325_v47 = vsel %vm961_vm4, %v4324_v51, %v4323_v36 }
 0xa89   :  { %v4327_v58 = vsel %vm963_vm6, %v4326_v26, %v4325_v47 }
 0xa8a   :  { %v4329_v20 = vsel %vm966_vm7, %v4327_v58, 0.0 }
 0xa8b   :  { %4330 = vadd.xlane.f32.xlu0 %v4329_v20 }
 0xa8c   :  { %v4228_v45 = vpop.xlane.xlu1 %4227 }
 0xa8d   :  { %v4229_v2 = vmul.f32 0.03125, %v4228_v45 }
 0xa8f   :  { %v4231_v49 = vrot.slane %v4229_v2, 1  ;;  %v4232_v44 = vrot.slane %v4229_v2, 2  ;;  %v4233_v19 = vrot.slane %v4229_v2, 3  ;;  %v14941_v35 = vsub.f32 %v4106_v57, %v4229_v2 }
 0xa91   :  { %v14943_v30 = vsub.f32 %v4115_v5, %v4231_v49  ;;  %v14945_v3 = vsub.f32 %v4124_v31, %v4232_v44  ;;  %v14947_v54 = vsub.f32 %v4133_v42, %v4233_v19  ;;  %v4242_v56 = vmul.f32 %v14941_v35, %v14941_v35 }
 0xa93   :  { %v4243_v60 = vmul.f32 %v14943_v30, %v14943_v30  ;;  %v4244_v46 = vmul.f32 %v14945_v3, %v14945_v3  ;;  %v4245_v0 = vmul.f32 %v14947_v54, %v14947_v54 }
 0xa95   :  { %v4250_v57 = vrot.slane %v4243_v60, 7  ;;  %v4252_v43 = vrot.slane %v4244_v46, 6  ;;  %v4254_v31 = vrot.slane %v4245_v0, 5 }
 0xa97   :  { %v4251_v5 = vsel %vm959_vm3, %v4250_v57, %v4242_v56 }
 0xa98   :  { %v4253_v42 = vsel %vm961_vm4, %v4252_v43, %v4251_v5 }
 0xa99   :  { %v4255_v29 = vsel %vm963_vm6, %v4254_v31, %v4253_v42 }
 0xa9a   :  { %v4257_v28 = vsel %vm966_vm7, %v4255_v29, 0.0 }
 0xa9b   :  { %4258 = vadd.xlane.f32.xlu0 %v4257_v28  ;;  %v13678_v28 = vld [vmem:[%s16636_s6] ss:$0 sm:$0xff] }
 0xb14   :  { %v4331_v16 = vpop.xlane.xlu0 %4330 }
 0xb15   :  { %v4332_v14 = vmul.f32 0.032258064, %v4331_v16 }
 0xb17   :  { %13577 = vrsqrt.f32 %v4332_v14  ;;  %vm4335_vm13 = vcmp.eq.f32.partialorder %v4332_v14, inf  ;;  %v4338_v47 = vand.u32 2147483648, %v4332_v14  ;;  %vm4337_vm15 = vcmp.eq.f32.partialorder %v4332_v14, 0.0 }
 0xb24   :  { %v4259_v40 = vpop.xlane.xlu0 %4258  ;;  %v13578_v51 = vpop.eup %13577 }
 0xb25   :  { %v4260_v36 = vmul.f32 0.032258064, %v4259_v40  ;;  %v4334_v26 = vmul.f32 %v13578_v51, %v4332_v14 }
 0xb27   :  { %13579 = vrsqrt.f32 %v4260_v36  ;;  %v4336_v58 = vsel %vm4335_vm13, %v4332_v14, %v4334_v26  ;;  %vm4263_vm14 = vcmp.eq.f32.partialorder %v4260_v36, inf  ;;  %v4266_v44 = vand.u32 2147483648, %v4260_v36 }
 0xb28   :  { %v4339_v20 = vsel %vm4337_vm15, %v4338_v47, %v4336_v58  ;;  %vm4265_vm0 = vcmp.eq.f32.partialorder %v4260_v36, 0.0 }
 0xb29   :  { %v4340_v45 = vadd.f32 1e-06, %v4339_v20 }
 0xb2b   :  { %13581 = vrcp.f32 %v4340_v45 }
 0xb34   :  { %v13580_v2 = vpop.eup %13579 }
 0xb35   :  { %v4262_v49 = vmul.f32 %v13580_v2, %v4260_v36 }
 0xb37   :  { %v4264_v19 = vsel %vm4263_vm14, %v4260_v36, %v4262_v49  ;;  %v13679_v36 = vld [vmem:[%s16637_s7] ss:$0 sm:$0xff] }
 0xb38   :  { %v4267_v60 = vsel %vm4265_vm0, %v4266_v44, %v4264_v19  ;;  %v13582_v46 = vpop.eup %13581 }
 0xb39   :  { %v4268_v0 = vadd.f32 1e-06, %v4267_v60  ;;  %v4343_v56 = vrot.slane %v13582_v46, 1  ;;  %v4344_v57 = vrot.slane %v13582_v46, 2  ;;  %v4345_v43 = vrot.slane %v13582_v46, 3 }
 0xb3a   :  { %v4350_v5 = vmul.f32 %v13582_v46, %v14921_v61 }
 0xb3b   :  { %13583 = vrcp.f32 %v4268_v0  ;;  %v4351_v31 = vmul.f32 %v4343_v56, %v14923_v62  ;;  %v4352_v42 = vmul.f32 %v4344_v57, %v14925_v9  ;;  %v4353_v29 = vmul.f32 %v4345_v43, %v14927_v50 }
 0xb3c   :  { %v4354_v16 = vmul.f32 %v13678_v28, %v4350_v5 }
 0xb3d   :  { %v4355_v14 = vmul.f32 %v13678_v28, %v4351_v31  ;;  %v4356_v40 = vmul.f32 %v13678_v28, %v4352_v42  ;;  %v4357_v51 = vmul.f32 %v13678_v28, %v4353_v29 }
 0xb3e   :  { %v4358_v62 = vadd.f32 %v13679_v36, %v4354_v16 }
 0xb3f   :  { %v4359_v61 = vadd.f32 %v13679_v36, %v4355_v14  ;;  %v4360_v26 = vadd.f32 %v13679_v36, %v4356_v40  ;;  %v4361_v47 = vadd.f32 %v13679_v36, %v4357_v51 }
 0xb41   :  { %v4366_v58 = vrot.slane %v4359_v61, 7  ;;  %v4368_v9 = vrot.slane %v4360_v26, 6  ;;  %v4370_v20 = vrot.slane %v4361_v47, 5 }
 0xb43   :  { %v4367_v50 = vsel %vm959_vm3, %v4366_v58, %v4358_v62 }
 0xb44   :  { %v4369_v45 = vsel %vm961_vm4, %v4368_v9, %v4367_v50 }
 0xb45   :  { %v4371_v2 = vsel %vm963_vm6, %v4370_v20, %v4369_v45 }
 0xb46   :  { %v4372_v49 = vsel %vm653_vm5, %v4371_v2, 0  ;;  %5366 = vrot.lane.b32.xlu1 %v4371_v2, %s13767_s26 }
 0xb47   :  { %v14976_v19 = vand.u32 4294901760, %v4372_v49 }
 0xb48   :  { %v13584_v44 = vpop.eup %13583 }
 0xb49   :  { %v4271_v60 = vrot.slane %v13584_v44, 1  ;;  %v4272_v46 = vrot.slane %v13584_v44, 2  ;;  %v4273_v0 = vrot.slane %v13584_v44, 3  ;;  %v4278_v56 = vmul.f32 %v13584_v44, %v14941_v35  ;;  %12893 = vmatmul.mubr.f32.vlgmr.msra.gmra.mxu1 %v14976_v19  ;;  %v13680_v35 = vld [vmem:[%s16634_s4] ss:$0 sm:$0xff] }
 0xb4a   :  { %v4444_v57 = vsub.f32 %v4372_v49, %v14976_v19  ;;  %12907 = vmatpush3.msra.mxu1 %v14112_v6  ;;  %12914 = vmatprep.mubr.msk.f32.mxu1 %vm13766_vm8, %v16696_v1 }
 0xb4b   :  { %v4279_v43 = vmul.f32 %v4271_v60, %v14943_v30  ;;  %v4280_v5 = vmul.f32 %v4272_v46, %v14945_v3  ;;  %v4281_v31 = vmul.f32 %v4273_v0, %v14947_v54  ;;  %12908 = vmatprep.subr.mxu1 %v16696_v1  ;;  %v4282_v29 = vmul.f32 %v13680_v35, %v4278_v56  ;;  %v13681_v3 = vld [vmem:[%s16635_s5] ss:$0 sm:$0xff]  ;;  %v16704_v60 = vld [vmem:[#allocation11_spill] sm:$0xff]  ;;  %v16705_v46 = vld [vmem:[#allocation12_spill] sm:$0xff] }
 0xb4c   :  { %v4445_v42 = vand.u32 4294901760, %v4444_v57  ;;  %12909 = vmatpush3.msra.mxu1 %v14114_v7 }
 0xb4d   :  { %v4283_v28 = vmul.f32 %v13680_v35, %v4279_v43  ;;  %v4284_v16 = vmul.f32 %v13680_v35, %v4280_v5  ;;  %v4285_v14 = vmul.f32 %v13680_v35, %v4281_v31  ;;  %12910 = vmatprep.subr.mxu1 %v16696_v1  ;;  %v4286_v36 = vadd.f32 %v13681_v3, %v4282_v29 }
 0xb4e   :  { %v4446_v30 = vsub.f32 %v4444_v57, %v4445_v42  ;;  %12911 = vmatpush3.msra.mxu1 %v14116_v8 }
 0xb4f   :  { %v4287_v54 = vadd.f32 %v13681_v3, %v4283_v28  ;;  %v4288_v40 = vadd.f32 %v13681_v3, %v4284_v16  ;;  %12912 = vmatprep.subr.mxu1 %v16696_v1  ;;  %v4289_v61 = vadd.f32 %v13681_v3, %v4285_v14 }
 0xb50   :  { %v4447_v51 = vand.u32 4294901760, %v4446_v30  ;;  %12913 = vmatpush3.msra.mxu1 %v14163_v21 }
 0xb51   :  { %v4863_v26 = vrot.slane %v4287_v54, 7  ;;  %v4865_v47 = vrot.slane %v4288_v40, 6  ;;  %12915 = vmatmul.mubr.f32.vlgmr.msra.gmra.mxu1 %v4445_v42  ;;  %12928 = vmatprep.subr.mxu1 %v16696_v1  ;;  %v4867_v9 = vrot.slane %v4289_v61, 5 }
 0xb52   :  { %12882 = vmatmul.mubr.f32.vlgmr.msra.gmra.mxu0 %v4447_v51  ;;  %12929 = vmatpush3.msra.mxu1 %v14112_v6 }
 0xb53   :  { %v4864_v62 = vsel %vm959_vm3, %v4863_v26, %v4286_v36  ;;  %12896 = vmatpush3.msra.mxu0 %v14119_v10  ;;  %12930 = vmatprep.subr.mxu1 %v16696_v1 }
 0xb54   :  { %v4866_v58 = vsel %vm961_vm4, %v4865_v47, %v4864_v62  ;;  %12897 = vmatprep.subr.mxu0 %v16696_v1  ;;  %12931 = vmatpush3.msra.mxu1 %v14114_v7 }
 0xb55   :  { %12898 = vmatpush3.msra.mxu0 %v14122_v11  ;;  %12932 = vmatprep.subr.mxu1 %v16696_v1  ;;  %v15012_v50 = vsel %vm963_vm6, %v4867_v9, %v4866_v58 }
 0xb56   :  { %12899 = vmatprep.subr.mxu0 %v16696_v1  ;;  %12933 = vmatpush3.msra.mxu1 %v14116_v8  ;;  %v4869_v20 = vsel %vm653_vm5, %v15012_v50, 0 }
 0xb57   :  { %12900 = vmatpush3.msra.mxu0 %v14125_v24  ;;  %12934 = vmatprep.subr.mxu1 %v16696_v1  ;;  %v15029_v45 = vand.u32 4294901760, %v4869_v20 }
 0xb58   :  { %12901 = vmatprep.subr.mxu0 %v16696_v1  ;;  %12903 = vmatprep.mubr.msk.f32.mxu0 %vm13766_vm8, %v16696_v1 }
 0xb59   :  { %12902 = vmatpush3.msra.mxu0 %v14166_v38  ;;  %12935 = vmatpush3.msra.mxu1 %v14163_v21  ;;  %v4941_v2 = vsub.f32 %v4869_v20, %v15029_v45 }
 0xb5a   :  { %12936 = vmatprep.mubr.msk.f32.mxu1 %vm13766_vm8, %v16696_v1  ;;  %12904 = vmatmul.mubr.f32.vlgmr.msra.gmra.mxu0 %v4444_v57 }
 0xb5b   :  { %12917 = vmatprep.subr.mxu0 %v16696_v1  ;;  %12937 = vmatmul.mubr.f32.vlgmr.msra.gmra.mxu1 %v14976_v19  ;;  %v4942_v49 = vand.u32 4294901760, %v4941_v2 }
 0xb5c   :  { %12950 = vmatprep.subr.mxu1 %v16696_v1  ;;  %12918 = vmatpush3.msra.mxu0 %v14130_v12 }
 0xb5d   :  { %12951 = vmatpush3.msra.mxu1 %v14291_v27  ;;  %12919 = vmatprep.subr.mxu0 %v16696_v1  ;;  %v4943_v44 = vsub.f32 %v4941_v2, %v4942_v49 }
 0xb5e   :  { %12952 = vmatprep.subr.mxu1 %v16696_v1  ;;  %12920 = vmatpush3.msra.mxu0 %v14133_v55 }
 0xb5f   :  { %12953 = vmatpush3.msra.mxu1 %v14301_v39  ;;  %12921 = vmatprep.subr.mxu0 %v16696_v1 }
 0xb60   :  { %12954 = vmatprep.subr.mxu1 %v16696_v1  ;;  %12922 = vmatpush3.msra.mxu0 %v14136_v13 }
 0xb61   :  { %12955 = vmatpush3.msra.mxu1 %v14311_v52  ;;  %12923 = vmatprep.subr.mxu0 %v16696_v1 }
 0xb62   :  { %12956 = vmatprep.subr.mxu1 %v16696_v1  ;;  %12924 = vmatpush3.msra.mxu0 %v14171_v22 }
 0xb63   :  { %12925 = vmatprep.mubr.msk.f32.mxu0 %vm13766_vm8, %v16696_v1  ;;  %12957 = vmatpush3.msra.mxu1 %v14317_v53 }
 0xb64   :  { %12958 = vmatprep.mubr.msk.f32.mxu1 %vm13766_vm8, %v16696_v1  ;;  %12926 = vmatmul.mubr.f32.vlgmr.msra.gmra.mxu0 %v14976_v19  ;;  %v4944_v19 = vand.u32 4294901760, %v4943_v44 }
 0xb65   :  { %12939 = vmatprep.subr.mxu0 %v16696_v1  ;;  %12959 = vmatmul.mubr.f32.vlgmr.msra.gmra.mxu1 %v15029_v45 }
 0xb66   :  { %12972 = vmatprep.subr.mxu1 %v16696_v1  ;;  %12940 = vmatpush3.msra.mxu0 %v14218_v59 }
 0xb67   :  { %12973 = vmatpush3.msra.mxu1 %v14218_v59  ;;  %12941 = vmatprep.subr.mxu0 %v16696_v1 }
 0xb68   :  { %12974 = vmatprep.subr.mxu1 %v16696_v1  ;;  %12942 = vmatpush3.msra.mxu0 %v14227_v63 }
 0xb69   :  { %12975 = vmatpush3.msra.mxu1 %v14227_v63  ;;  %12943 = vmatprep.subr.mxu0 %v16696_v1 }
 0xb6a   :  { %12976 = vmatprep.subr.mxu1 %v16696_v1  ;;  %12944 = vmatpush3.msra.mxu0 %v14237_v23 }
 0xb6b   :  { %12977 = vmatpush3.msra.mxu1 %v14237_v23  ;;  %12945 = vmatprep.subr.mxu0 %v16696_v1 }
 0xb6c   :  { %12978 = vmatprep.subr.mxu1 %v16696_v1  ;;  %12946 = vmatpush3.msra.mxu0 %v14244_v25 }
 0xb6d   :  { %12947 = vmatprep.mubr.msk.f32.mxu0 %vm13766_vm8, %v16696_v1  ;;  %12979 = vmatpush3.msra.mxu1 %v14244_v25 }
 0xb6e   :  { %12980 = vmatprep.mubr.msk.f32.mxu1 %vm13766_vm8, %v16696_v1  ;;  %12948 = vmatmul.mubr.f32.vlgmr.msra.gmra.mxu0 %v4944_v19 }
 0xb6f   :  { %12961 = vmatprep.subr.mxu0 %v16696_v1  ;;  %12981 = vmatmul.mubr.f32.vlgmr.msra.gmra.mxu1 %v4942_v49 }
 0xb70   :  { %12994 = vmatprep.subr.mxu1 %v16696_v1  ;;  %12962 = vmatpush3.msra.mxu0 %v14235_v4 }
 0xb71   :  { %12995 = vmatpush3.msra.mxu1 %v14218_v59  ;;  %12963 = vmatprep.subr.mxu0 %v16696_v1 }
 0xb72   :  { %12996 = vmatprep.subr.mxu1 %v16696_v1  ;;  %12964 = vmatpush3.msra.mxu0 %v14242_v15 }
 0xb73   :  { %12997 = vmatpush3.msra.mxu1 %v14227_v63  ;;  %12965 = vmatprep.subr.mxu0 %v16696_v1 }
 0xb74   :  { %12998 = vmatprep.subr.mxu1 %v16696_v1  ;;  %12966 = vmatpush3.msra.mxu0 %v14253_v33 }
 0xb75   :  { %12999 = vmatpush3.msra.mxu1 %v14237_v23  ;;  %12967 = vmatprep.subr.mxu0 %v16696_v1 }
 0xb76   :  { %13000 = vmatprep.subr.mxu1 %v16696_v1  ;;  %12968 = vmatpush3.msra.mxu0 %v14262_v34 }
 0xb77   :  { %12969 = vmatprep.mubr.msk.f32.mxu0 %vm13766_vm8, %v16696_v1  ;;  %13001 = vmatpush3.msra.mxu1 %v14244_v25 }
 0xb78   :  { %13002 = vmatprep.mubr.msk.f32.mxu1 %vm13766_vm8, %v16696_v1  ;;  %12970 = vmatmul.mubr.f32.vlgmr.msra.gmra.mxu0 %v4941_v2 }
 0xb79   :  { %12983 = vmatprep.subr.mxu0 %v16696_v1  ;;  %13003 = vmatmul.mubr.f32.vlgmr.msra.gmra.mxu1 %v15029_v45 }
 0xb7a   :  { %12984 = vmatpush3.msra.mxu0 %v14250_v32  ;;  %12991 = vmatprep.mubr.msk.f32.mxu0 %vm13766_vm8, %v16696_v1 }
 0xb7b   :  { %12985 = vmatprep.subr.mxu0 %v16696_v1  ;;  %13016 = vmatprep.subr.mxu1 %v16696_v1 }
 0xb7c   :  { %12986 = vmatpush3.msra.mxu0 %v14259_v37  ;;  %13017 = vmatpush3.msra.mxu1 %v14148_v17 }
 0xb7d   :  { %12987 = vmatprep.subr.mxu0 %v16696_v1  ;;  %13018 = vmatprep.subr.mxu1 %v16696_v1 }
 0xb7e   :  { %12988 = vmatpush3.msra.mxu0 %v14272_v41  ;;  %13019 = vmatpush3.msra.mxu1 %v14150_v18 }
 0xb7f   :  { %12989 = vmatprep.subr.mxu0 %v16696_v1  ;;  %13020 = vmatprep.subr.mxu1 %v16696_v1 }
 0xb80   :  { %12990 = vmatpush3.msra.mxu0 %v14284_v48  ;;  %13021 = vmatpush3.msra.mxu1 %v16704_v60 }
 0xb81   :  { %12992 = vmatmul.mubr.f32.vlgmr.msra.gmra.mxu0 %v15029_v45  ;;  %13022 = vmatprep.subr.mxu1 %v16696_v1 }
 0xb82   :  { %13023 = vmatpush3.msra.mxu1 %v16705_v46  ;;  %13005 = vmatprep.subr.mxu0 %v16696_v1 }
 0xb83   :  { %13024 = vmatprep.mubr.msk.f32.mxu1 %vm13766_vm8, %v16696_v1  ;;  %13038 = vmatprep.subr.mxu1 %v16696_v1 }
 0xb84   :  { %13006 = vmatpush3.msra.mxu0 %v14112_v6  ;;  %13013 = vmatprep.mubr.msk.f32.mxu0 %vm13766_vm8, %v16696_v1 }
 0xb85   :  { %13007 = vmatprep.subr.mxu0 %v16696_v1 }
 0xb86   :  { %13008 = vmatpush3.msra.mxu0 %v14114_v7 }
 0xb87   :  { %13009 = vmatprep.subr.mxu0 %v16696_v1 }
 0xb88   :  { %13010 = vmatpush3.msra.mxu0 %v14116_v8 }
 0xb89   :  { %13011 = vmatprep.subr.mxu0 %v16696_v1 }
 0xb8a   :  { %13012 = vmatpush3.msra.mxu0 %v14163_v21 }
 0xb8b   :  { %13027 = vmatprep.subr.mxu0 %v16696_v1 }
 0xc09   :  { %v4540_v0 = vpop.f32.mrf.mxu1 }
 0xc0b   :  { %v12894_v56 = vpop.f32.mrf.mxu1 }
 0xc11   :  { %v4697_v57 = vpop.f32.mrf.mxu1 }
 0xc12   :  { %v4449_v43 = vpop.f32.mrf.mxu0 }
 0xc13   :  { %v12916_v5 = vpop.f32.mrf.mxu1  ;;  %v4541_v54 = vadd.f32 %v4540_v0, %v4449_v43 }
 0xc14   :  { %v12883_v31 = vpop.f32.mrf.mxu0 }
 0xc1a   :  { %v4620_v42 = vpop.f32.mrf.mxu0 }
 0xc1b   :  { %v4855_v35 = vpop.f32.mrf.mxu1  ;;  %v4621_v40 = vadd.f32 %v4620_v42, %v4541_v54  ;;  %v12060_v54 = vld.sshfl [vmem:[%s16630_s0 + $0x48] sm:$0x33 pattern:$0x75316420] }
 0xc1c   :  { %v12905_v29 = vpop.f32.mrf.mxu0 }
 0xc1d   :  { %v12938_v28 = vpop.f32.mrf.mxu1  ;;  %v4698_v51 = vadd.f32 %v4697_v57, %v4621_v40  ;;  %v13682_v57 = vld [vmem:[%s16640_s10] ss:$0 sm:$0xff]  ;;  %v16706_v40 = vld [vmem:[#allocation8_spill] sm:$0xff] }
 0xc24   :  { %v4780_v16 = vpop.f32.mrf.mxu0 }
 0xc25   :  { %v5037_v14 = vpop.f32.mrf.mxu1  ;;  %v4781_v26 = vadd.f32 %v4780_v16, %v4698_v51  ;;  %v5412_v51 = vrot.slane %v12060_v54, %v16706_v40 }
 0xc26   :  { %v12927_v30 = vpop.f32.mrf.mxu0 }
 0xc27   :  { %v12960_v3 = vpop.f32.mrf.mxu1  ;;  %v4856_v58 = vadd.f32 %v4855_v35, %v4781_v26  ;;  %v5367_v30 = vpop.permute.xlu1 %5366 }
 0xc2e   :  { %v4946_v36 = vpop.f32.mrf.mxu0 }
 0xc2f   :  { %v5194_v61 = vpop.f32.mrf.mxu1  ;;  %v4947_v9 = vadd.f32 %v4946_v36, %v4856_v58  ;;  %v5405_v36 = vcombine.high %v12060_v54, %v12060_v54 }
 0xc30   :  { %v12949_v47 = vpop.f32.mrf.mxu0 }
 0xc31   :  { %v12982_v62 = vpop.f32.mrf.mxu1  ;;  %v5038_v2 = vadd.f32 %v5037_v14, %v4947_v9  ;;  %v5419_v47 = vrot.slane %v5405_v36, %v16706_v40  ;;  %v16708_v9 = vld [vmem:[#allocation10_spill] sm:$0xff] }
 0xc38   :  { %v5117_v20 = vpop.f32.mrf.mxu0 }
 0xc39   :  { %v5352_v45 = vpop.f32.mrf.mxu1  ;;  %v5118_v19 = vadd.f32 %v5117_v20, %v5038_v2 }
 0xc3a   :  { %v12971_v49 = vpop.f32.mrf.mxu0 }
 0xc3b   :  { %v13004_v44 = vpop.f32.mrf.mxu1  ;;  %v5195_v56 = vadd.f32 %v5194_v61, %v5118_v19  ;;  %v16707_v61 = vld [vmem:[#allocation9_spill] sm:$0xff] }
 0xc3c   :  { %v5425_v26 = vrot.slane %v5412_v51, %v16707_v61  ;;  %v5429_v20 = vrot.slane %v5419_v47, %v16707_v61 }
 0xc3e   :  { %vm5439_vm9 = vcmp.eq.s32.totalorder %v16708_v9, %v5425_v26  ;;  %vm5441_vm11 = vcmp.eq.s32.totalorder %v16708_v9, %v5429_v20 }
 0xc41   :  { %v5277_v5 = vpop.f32.mrf.mxu0 }
 0xc42   :  { %v5278_v31 = vadd.f32 %v5277_v5, %v5195_v56 }
 0xc43   :  { %v12993_v29 = vpop.f32.mrf.mxu0 }
 0xc44   :  { %v5353_v0 = vadd.f32 %v5352_v45, %v5278_v31  ;;  %v16709_v45 = vmov 0   ;;  %v16710_v29 = vld [vmem:[#allocation7_spill] sm:$0xff] }
 0xc45   :  { %v5472_v2 = vsel %vm5439_vm9, 1, %v16709_v45  ;;  %v5474_v49 = vsel %vm5441_vm11, 1, %v16709_v45  ;;  %vm5438_vm10 = vcmp.eq.s32.totalorder %v16710_v29, %v5425_v26  ;;  %vm5440_vm12 = vcmp.eq.s32.totalorder %v16710_v29, %v5429_v20 }
 0xc46   :  { %v5356_v43 = vadd.f32 %v13682_v57, %v5353_v0  ;;  %v5420_v0 = vcombine.high %v5412_v51, %v5412_v51 }
 0xc48   :  { %v12059_v42 = vmul.f32 -1.442695, %v5356_v43  ;;  %13585 = vtanh.f32 %v5356_v43  ;;  %v5471_v43 = vsel %vm5438_vm10, 1, %v16709_v45 }
 0xc4a   :  { %13587 = vpow2.f32 %v12059_v42  ;;  %v5433_v42 = vrot.slane %v5420_v0, %v16707_v61 }
 0xc4c   :  { %vm5442_vm13 = vcmp.eq.s32.totalorder %v16710_v29, %v5433_v42 }
 0xc4d   :  { %v5475_v54 = vsel %vm5442_vm13, 1, %v16709_v45 }
 0xc55   :  { %v13586_v35 = vpop.eup %13585 }
 0xc56   :  { %5376 = vrot.lane.b32.xlu0 %v13586_v35, %s13768_s16  ;;  %v5421_v35 = vcombine.high %v5419_v47, %v5419_v47 }
 0xc57   :  { %v13588_v28 = vpop.eup %13587 }
 0xc58   :  { %v5360_v16 = vadd.f32 1.0, %v13588_v28  ;;  %v5473_v28 = vsel %vm5440_vm12, 1, %v16709_v45 }
 0xc5a   :  { %13589 = vrcp.f32 %v5360_v16  ;;  %v5437_v16 = vrot.slane %v5421_v35, %v16707_v61 }
 0xc5c   :  { %vm5444_vm15 = vcmp.eq.s32.totalorder %v16710_v29, %v5437_v16 }
 0xc5d   :  { %v5477_v26 = vsel %vm5444_vm15, 1, %v16709_v45 }
 0xc67   :  { %v15129_v14 = vpop.eup %13589 }
 0xc68   :  { %v5369_v3 = vmul.f32 %v15129_v14, %v5367_v30  ;;  %v5365_v19 = vmul.f32 %v15129_v14, %v15012_v50  ;;  %v12066_v50 = vld.sshfl [vmem:[%s16630_s0 + $0x2c] sm:$0x33 pattern:$0x75316420] }
 0xc69   :  { %v5632_v30 = vrot.slane %v12066_v50, %v16706_v40 }
 0xc6a   :  { %5371 = vrot.lane.b32.xlu1 %v5369_v3, %s13769_s17  ;;  %v5625_v3 = vcombine.high %v12066_v50, %v12066_v50 }
 0xc6b   :  { %v5645_v51 = vrot.slane %v5632_v30, %v16707_v61 }
 0xc6c   :  { %v5639_v36 = vrot.slane %v5625_v3, %v16706_v40 }
 0xc6d   :  { %vm5658_vm14 = vcmp.eq.s32.totalorder %v16710_v29, %v5645_v51 }
 0xc6e   :  { %v5649_v47 = vrot.slane %v5639_v36, %v16707_v61 }
 0xc70   :  { %vm5660_vm0 = vcmp.eq.s32.totalorder %v16710_v29, %v5649_v47 }
 0xcc8   :  { %v5377_v62 = vpop.permute.xlu0 %5376 }
 0xcc9   :  { %v5379_v58 = vmul.f32 %v15129_v14, %v5377_v62  ;;  %v5640_v62 = vcombine.high %v5632_v30, %v5632_v30 }
 0xccb   :  { %5381 = vrot.lane.b32.xlu1 %v5379_v58, %s13767_s26  ;;  %v5750_v58 = vsel %vm5658_vm14, 1, %v16709_v45  ;;  %v5653_v20 = vrot.slane %v5640_v62, %v16707_v61  ;;  %vm5443_vm14 = vcmp.eq.s32.totalorder %v16708_v9, %v5433_v42 }
 0xccd   :  { %vm5662_vm9 = vcmp.eq.s32.totalorder %v16710_v29, %v5653_v20 }
 0xcce   :  { %v5754_v0 = vsel %vm5662_vm9, 1, %v16709_v45  ;;  %vm5659_vm9 = vcmp.eq.s32.totalorder %v16708_v9, %v5645_v51 }
 0xccf   :  { %5483 = vperm.xlu1 %13544, %v5472_v2   ;;  %v5641_v2 = vcombine.high %v5639_v36, %v5639_v36 }
 0xcd3   :  { %5489 = vperm.xlu1 %13544, %v5474_v49   ;;  %v12065_v49 = vld.sshfl [vmem:[%s16630_s0 + $0xc] sm:$0x33 pattern:$0x75316420] }
 0xcdc   :  { %v5372_v44 = vpop.permute.xlu1 %5371 }
 0xcdd   :  { %v5374_v56 = vadd.f32 %v5372_v44, %v5365_v19  ;;  %v5752_v44 = vsel %vm5660_vm0, 1, %v16709_v45  ;;  %v5657_v19 = vrot.slane %v5641_v2, %v16707_v61  ;;  %vm5445_vm0 = vcmp.eq.s32.totalorder %v16708_v9, %v5437_v16 }
 0xcdf   :  { %vm5664_vm11 = vcmp.eq.s32.totalorder %v16710_v29, %v5657_v19 }
 0xce0   :  { %v5756_v35 = vsel %vm5664_vm11, 1, %v16709_v45  ;;  %vm5661_vm11 = vcmp.eq.s32.totalorder %v16708_v9, %v5649_v47 }
 0xd3d   :  { %v5382_v5 = vpop.permute.xlu1 %5381 }
 0xd3e   :  { %v15148_v31 = vadd.f32 %v5382_v5, %v5374_v56  ;;  %v5584_v56 = vrot.slane %v12065_v49, %v16706_v40  ;;  %v5577_v5 = vcombine.high %v12065_v49, %v12065_v49 }
 0xd40   :  { %13591 = vtanh.f32 %v15148_v31 }
 0xd4d   :  { %v13592_v57 = vpop.eup %13591 }
 0xd4e   :  { %5387 = vrot.lane.b32.xlu0 %v13592_v57, %s13770_s20  ;;  %v5597_v57 = vrot.slane %v5584_v56, %v16707_v61 }
 0xd50   :  { %vm5610_vm10 = vcmp.eq.s32.totalorder %v16710_v29, %v5597_v57 }
 0xd51   :  { %v5666_v30 = vsel %vm5610_vm10, 1, %v16709_v45  ;;  %vm5663_vm10 = vcmp.eq.s32.totalorder %v16708_v9, %v5653_v20 }
 0xd52   :  { %5480 = vperm.xlu0 %13543, %v5471_v43   ;;  %v5591_v43 = vrot.slane %v5577_v5, %v16706_v40  ;;  %v5751_v5 = vsel %vm5659_vm9, 1, %v16709_v45  ;;  %v5755_v42 = vsel %vm5663_vm10, 1, %v16709_v45 }
 0xd54   :  { %v5601_v50 = vrot.slane %v5591_v43, %v16707_v61 }
 0xd56   :  { %5486 = vperm.xlu0 %13543, %v5473_v28   ;;  %v5592_v28 = vcombine.high %v5584_v56, %v5584_v56  ;;  %vm5612_vm12 = vcmp.eq.s32.totalorder %v16710_v29, %v5601_v50  ;;  %v5478_v56 = vsel %vm5445_vm0, 1, %v16709_v45 }
 0xd57   :  { %v5668_v36 = vsel %vm5612_vm12, 1, %v16709_v45  ;;  %vm5665_vm12 = vcmp.eq.s32.totalorder %v16708_v9, %v5657_v19 }
 0xd58   :  { %v5605_v3 = vrot.slane %v5592_v28, %v16707_v61  ;;  %v5757_v16 = vsel %vm5665_vm12, 1, %v16709_v45 }
 0xd5a   :  { %5492 = vperm.xlu0 %13543, %v5475_v54   ;;  %v5593_v54 = vcombine.high %v5591_v43, %v5591_v43  ;;  %vm5614_vm13 = vcmp.eq.s32.totalorder %v16710_v29, %v5605_v3  ;;  %v5484_v43 = vpop.permute.xlu1 %5483 }
 0xd5b   :  { %v5670_v62 = vsel %vm5614_vm13, 1, %v16709_v45  ;;  %vm5611_vm13 = vcmp.eq.s32.totalorder %v16708_v9, %v5597_v57  ;;  %vm5504_vm9 = vcmp.eq.s32.totalorder %v5484_v43, 1  ;;  %v13685_v43 = vld [vmem:[#allocation2 + $0x20] sm:$0xff] }
 0xd5c   :  { %v5667_v51 = vsel %vm5611_vm13, 1, %v16709_v45 }
 0xd5e   :  { %5498 = vperm.xlu0 %13543, %v5477_v26   ;;  %v5609_v26 = vrot.slane %v5593_v54, %v16707_v61  ;;  %v5490_v28 = vpop.permute.xlu1 %5489 }
 0xd60   :  { %vm5616_vm15 = vcmp.eq.s32.totalorder %v16710_v29, %v5609_v26  ;;  %vm5617_vm0 = vcmp.eq.s32.totalorder %v16708_v9, %v5609_v26 }
 0xd61   :  { %v5673_v19 = vsel %vm5617_vm0, 1, %v16709_v45 }
 0xd62   :  { %5759 = vperm.xlu0 %13543, %v5750_v58   ;;  %v5672_v58 = vsel %vm5616_vm15, 1, %v16709_v45  ;;  %vm5613_vm15 = vcmp.eq.s32.totalorder %v16708_v9, %v5601_v50 }
 0xd63   :  { %v5669_v47 = vsel %vm5613_vm15, 1, %v16709_v45 }
 0xd66   :  { %5765 = vperm.xlu0 %13543, %v5752_v44   ;;  %v5476_v44 = vsel %vm5443_vm14, 1, %v16709_v45  ;;  %vm5615_vm14 = vcmp.eq.s32.totalorder %v16708_v9, %v5605_v3 }
 0xd67   :  { %v5671_v20 = vsel %vm5615_vm14, 1, %v16709_v45 }
 0xd6a   :  { %5771 = vperm.xlu0 %13543, %v5754_v0  }
 0xd6e   :  { %5777 = vperm.xlu0 %13543, %v5756_v35  }
 0xd72   :  { %5675 = vperm.xlu0 %13543, %v5666_v30  }
 0xd76   :  { %5681 = vperm.xlu0 %13543, %v5668_v36  }
 0xd7a   :  { %5687 = vperm.xlu0 %13543, %v5670_v62  }
 0xd7e   :  { %5693 = vperm.xlu0 %13543, %v5672_v58  }
 0xdc0   :  { %v5388_v2 = vpop.permute.xlu0 %5387 }
 0xdc1   :  { %v5390_v49 = vmul.f32 %v15129_v14, %v5388_v2  ;;  %v5753_v14 = vsel %vm5661_vm11, 1, %v16709_v45  ;;  %vm5506_vm11 = vcmp.eq.s32.totalorder %v5490_v28, 1 }
 0xdc3   :  { %5392 = vrot.lane.b32.xlu1 %v5390_v49, %s13771_s24 }
 0xdc7   :  { %5495 = vperm.xlu1 %13544, %v5476_v44  }
 0xdcb   :  { %5501 = vperm.xlu1 %13544, %v5478_v56  }
 0xdcd   :  { %v5481_v0 = vpop.permute.xlu0 %5480 }
 0xdce   :  { %vm5503_vm10 = vcmp.eq.s32.totalorder %v5481_v0, 1 }
 0xdcf   :  { %5762 = vperm.xlu1 %13544, %v5751_v5  }
 0xdd1   :  { %v5487_v57 = vpop.permute.xlu0 %5486 }
 0xdd2   :  { %vm5505_vm12 = vcmp.eq.s32.totalorder %v5487_v57, 1 }
 0xdd3   :  { %5768 = vperm.xlu1 %13544, %v5753_v14   ;;  %v13683_v14 = vld [vmem:[#allocation2] sm:$0xff] }
 0xdd5   :  { %v5493_v35 = vpop.permute.xlu0 %5492 }
 0xdd6   :  { %vm5507_vm13 = vcmp.eq.s32.totalorder %v5493_v35, 1  ;;  %v13687_v35 = vld [vmem:[#allocation2 + $0x10] sm:$0xff] }
 0xdd7   :  { %5774 = vperm.xlu1 %13544, %v5755_v42  }
 0xdd9   :  { %v5499_v50 = vpop.permute.xlu0 %5498 }
 0xdda   :  { %vm5509_vm0 = vcmp.eq.s32.totalorder %v5499_v50, 1 }
 0xddb   :  { %5780 = vperm.xlu1 %13544, %v5757_v16   ;;  %v13684_v16 = vld [vmem:[#allocation2 + $0x8] sm:$0xff] }
 0xddd   :  { %v5760_v3 = vpop.permute.xlu0 %5759 }
 0xddf   :  { %5678 = vperm.xlu1 %13544, %v5667_v51  }
 0xde1   :  { %v15221_v54 = vpop.permute.xlu0 %5765 }
 0xde3   :  { %5684 = vperm.xlu1 %13544, %v5669_v47  }
 0xde7   :  { %5690 = vperm.xlu1 %13544, %v5671_v20  }
 0xdeb   :  { %5696 = vperm.xlu1 %13544, %v5673_v19  }
 0xe35   :  { %v5393_v30 = vpop.permute.xlu1 %5392 }
 0xe36   :  { %5395 = vst.msk [vmem:[#allocation3] sm:$0xf] %vm2168_vm1, %v5393_v30  ;;  %v13686_v30 = vld [vmem:[#allocation2 + $0x28] sm:$0xff] }
 0xe37   :  { %5396 = vst.msk [vmem:[#allocation3] sm:$0xf] %vm2170_vm2, %v15148_v31  ;;  %v5772_v31 = vpop.permute.xlu0 %5771 }
 0xe3e   :  { %v15223_v36 = vld [vmem:[#allocation3] sm:$0xf] }
 0xe3f   :  { %16711 = vst [vmem:[#allocation15_spill] sm:$0xff] %v15223_v36  ;;  %v5453_v26 = vrot.slane %v15223_v36, %v16706_v40 }
 0xe41   :  { %v5461_v62 = vrot.slane %v5453_v26, %v16706_v40  ;;  %v5454_v58 = vcombine.high %v5453_v26, %v5453_v26 }
 0xe42   :  { %v5496_v2 = vpop.permute.xlu1 %5495 }
 0xe43   :  { %v5469_v49 = vcombine.high %v5461_v62, %v5461_v62  ;;  %v5514_v44 = vrot.slane %v5461_v62, %v16707_v61  ;;  %v5468_v56 = vrot.slane %v5454_v58, %v16706_v40  ;;  %vm5508_vm15 = vcmp.eq.s32.totalorder %v5496_v2, 1 }
 0xe45   :  { %v5522_v5 = vrot.slane %v5469_v49, %v16707_v61  ;;  %v5531_v42 = vsel %vm5503_vm10, %v5514_v44, %v13683_v14  ;;  %v5532_v51 = vsel %vm5504_vm9, %v5514_v44, %v13684_v16  ;;  %v5470_v47 = vcombine.high %v5468_v56, %v5468_v56  ;;  %v13688_v49 = vld [vmem:[#allocation2 + $0x18] sm:$0xff]  ;;  %v13689_v44 = vld [vmem:[#allocation2 + $0x30] sm:$0xff] }
 0xe46   :  { %5539 = vst.msk [vmem:[#allocation2] sm:$0xff] %vm653_vm5, %v5531_v42  ;;  %5540 = vst.msk [vmem:[#allocation2 + $0x8] sm:$0xff] %vm653_vm5, %v5532_v51  ;;  %v5518_v20 = vrot.slane %v5468_v56, %v16707_v61  ;;  %v5502_v19 = vpop.permute.xlu1 %5501  ;;  %v5778_v42 = vpop.permute.xlu0 %5777  ;;  %vm5782_vm9 = vcmp.eq.s32.totalorder %v5760_v3, 1 }
 0xe47   :  { %v5535_v0 = vsel %vm5507_vm13, %v5522_v5, %v13685_v43  ;;  %v5536_v26 = vsel %vm5508_vm15, %v5522_v5, %v13686_v30  ;;  %v5526_v62 = vrot.slane %v5470_v47, %v16707_v61  ;;  %vm5510_vm14 = vcmp.eq.s32.totalorder %v5502_v19, 1  ;;  %v13690_v5 = vld [vmem:[#allocation2 + $0x38] sm:$0xff] }
 0xe48   :  { %5543 = vst.msk [vmem:[#allocation2 + $0x20] sm:$0xff] %vm653_vm5, %v5535_v0  ;;  %5544 = vst.msk [vmem:[#allocation2 + $0x28] sm:$0xff] %vm653_vm5, %v5536_v26  ;;  %v5533_v58 = vsel %vm5505_vm12, %v5518_v20, %v13687_v35  ;;  %v5534_v2 = vsel %vm5506_vm11, %v5518_v20, %v13688_v49  ;;  %vm5784_vm12 = vcmp.eq.s32.totalorder %v15221_v54, 1  ;;  %vm5786_vm13 = vcmp.eq.s32.totalorder %v5772_v31, 1 }
 0xe49   :  { %v5537_v56 = vsel %vm5509_vm0, %v5526_v62, %v13689_v44  ;;  %5541 = vst.msk [vmem:[#allocation2 + $0x10] sm:$0xff] %vm653_vm5, %v5533_v58  ;;  %5542 = vst.msk [vmem:[#allocation2 + $0x18] sm:$0xff] %vm653_vm5, %v5534_v2  ;;  %v5538_v14 = vsel %vm5510_vm14, %v5526_v62, %v13690_v5  ;;  %vm5788_vm14 = vcmp.eq.s32.totalorder %v5778_v42, 1 }
 0xe4a   :  { %5545 = vst.msk [vmem:[#allocation2 + $0x30] sm:$0xff] %vm653_vm5, %v5537_v56  ;;  %5546 = vst.msk [vmem:[#allocation2 + $0x38] sm:$0xff] %vm653_vm5, %v5538_v14  ;;  %v5763_v50 = vpop.permute.xlu1 %5762  ;;  %v5676_v0 = vpop.permute.xlu0 %5675 }
 0xe4b   :  { %vm5783_vm10 = vcmp.eq.s32.totalorder %v5763_v50, 1 }
 0xe4d   :  { %v5562_v57 = vld [vmem:[#allocation2] sm:$0xff]  ;;  %v5563_v16 = vld [vmem:[#allocation2 + $0x8] sm:$0xff] }
 0xe4e   :  { %v5790_v28 = vsel %vm5782_vm9, %v5562_v57, 0.0  ;;  %v5791_v51 = vsel %vm5783_vm10, %v5563_v16, 0.0  ;;  %v5769_v47 = vpop.permute.xlu1 %5768  ;;  %vm5698_vm9 = vcmp.eq.s32.totalorder %v5676_v0, 1 }
 0xe4f   :  { %v5798_v20 = vsel %vm653_vm5, %v5790_v28, 0.0  ;;  %v5799_v19 = vsel %vm653_vm5, %v5791_v51, 0.0  ;;  %vm5785_vm11 = vcmp.eq.s32.totalorder %v5769_v47, 1  ;;  %v15245_v43 = vld [vmem:[#allocation2 + $0x20] sm:$0xff]  ;;  %v5567_v14 = vld [vmem:[#allocation2 + $0x28] sm:$0xff] }
 0xe50   :  { %v5800_v30 = vadd.f32 %v5799_v19, %v5798_v20  ;;  %v5564_v26 = vld [vmem:[#allocation2 + $0x10] sm:$0xff]  ;;  %v5565_v62 = vld [vmem:[#allocation2 + $0x18] sm:$0xff]  ;;  %v5794_v44 = vsel %vm5786_vm13, %v15245_v43, 0.0  ;;  %v5682_v20 = vpop.permute.xlu0 %5681 }
 0xe51   :  { %v5792_v3 = vsel %vm5784_vm12, %v5564_v26, 0.0  ;;  %v5793_v35 = vsel %vm5785_vm11, %v5565_v62, 0.0  ;;  %v15251_v50 = vld [vmem:[#allocation2 + $0x30] sm:$0xff]  ;;  %v5816_v31 = vsel %vm653_vm5, %v5794_v44, 0.0  ;;  %v15256_v29 = vld [vmem:[#allocation2 + $0x38] sm:$0xff]  ;;  %vm5700_vm11 = vcmp.eq.s32.totalorder %v5682_v20, 1 }
 0xe52   :  { %v5801_v58 = vrot.slane %v5800_v30, 4  ;;  %v5807_v49 = vsel %vm653_vm5, %v5792_v3, 0.0  ;;  %v5808_v2 = vsel %vm653_vm5, %v5793_v35, 0.0  ;;  %v5775_v56 = vpop.permute.xlu1 %5774  ;;  %v5796_v3 = vsel %vm5788_vm14, %v15251_v50, 0.0 }
 0xe53   :  { %v5809_v5 = vadd.f32 %v5808_v2, %v5807_v49  ;;  %vm5787_vm15 = vcmp.eq.s32.totalorder %v5775_v56, 1 }
 0xe54   :  { %v5795_v54 = vsel %vm5787_vm15, %v5567_v14, 0.0  ;;  %v5802_v28 = vadd.f32 %v5801_v58, %v5800_v30  ;;  %v5825_v58 = vsel %vm653_vm5, %v5796_v3, 0.0 }
 0xe55   :  { %v5810_v51 = vrot.slane %v5809_v5, 4  ;;  %v5817_v47 = vsel %vm653_vm5, %v5795_v54, 0.0 }
 0xe56   :  { %v5818_v19 = vadd.f32 %v5817_v47, %v5816_v31  ;;  %v5781_v35 = vpop.permute.xlu1 %5780  ;;  %v5803_v2 = vrot.slane %v5802_v28, 2  ;;  %v5706_v31 = vsel %vm5698_vm9, %v5562_v57, 0.0 }
 0xe57   :  { %v5811_v36 = vadd.f32 %v5810_v51, %v5809_v5  ;;  %vm5789_vm0 = vcmp.eq.s32.totalorder %v5781_v35, 1  ;;  %v5688_v5 = vpop.permute.xlu0 %5687  ;;  %v5714_v61 = vsel %vm653_vm5, %v5706_v31, 0.0 }
 0xe58   :  { %v5819_v49 = vrot.slane %v5818_v19, 4  ;;  %v5797_v42 = vsel %vm5789_vm0, %v15256_v29, 0.0  ;;  %v5804_v0 = vadd.f32 %v5803_v2, %v5802_v28  ;;  %vm5702_vm13 = vcmp.eq.s32.totalorder %v5688_v5, 1 }
 0xe59   :  { %v5812_v30 = vrot.slane %v5811_v36, 2  ;;  %v5826_v44 = vsel %vm653_vm5, %v5797_v42, 0.0  ;;  %v5708_v42 = vsel %vm5700_vm11, %v5564_v26, 0.0 }
 0xe5a   :  { %v5820_v56 = vadd.f32 %v5819_v49, %v5818_v19  ;;  %v5827_v54 = vadd.f32 %v5826_v44, %v5825_v58  ;;  %v5679_v47 = vpop.permute.xlu1 %5678  ;;  %v5805_v44 = vrot.slane %v5804_v0, 1 }
 0xe5b   :  { %v5813_v45 = vadd.f32 %v5812_v30, %v5811_v36  ;;  %vm5699_vm10 = vcmp.eq.s32.totalorder %v5679_v47, 1  ;;  %v5694_v20 = vpop.permute.xlu0 %5693 }
 0xe5c   :  { %v5821_v51 = vrot.slane %v5820_v56, 2  ;;  %v5828_v9 = vrot.slane %v5827_v54, 4  ;;  %v5707_v35 = vsel %vm5699_vm10, %v5563_v16, 0.0  ;;  %v5723_v16 = vsel %vm653_vm5, %v5708_v42, 0.0 }
 0xe5d   :  { %v5715_v40 = vsel %vm653_vm5, %v5707_v35, 0.0  ;;  %v5814_v49 = vrot.slane %v5813_v45, 1  ;;  %vm5704_vm14 = vcmp.eq.s32.totalorder %v5694_v20, 1 }
 0xe5e   :  { %v5822_v46 = vadd.f32 %v5821_v51, %v5820_v56  ;;  %v5829_v3 = vadd.f32 %v5828_v9, %v5827_v54  ;;  %v5716_v60 = vadd.f32 %v5715_v40, %v5714_v61  ;;  %v5685_v19 = vpop.permute.xlu1 %5684  ;;  %v5710_v9 = vsel %vm5702_vm13, %v15245_v43, 0.0 }
 0xe5f   :  { %vm5701_vm12 = vcmp.eq.s32.totalorder %v5685_v19, 1  ;;  %v5815_v61 = vadd.f32 %v5814_v49, %v5813_v45  ;;  %v5732_v5 = vsel %vm653_vm5, %v5710_v9, 0.0 }
 0xe60   :  { %v5823_v57 = vrot.slane %v5822_v46, 1  ;;  %v5830_v36 = vrot.slane %v5829_v3, 2  ;;  %v5717_v30 = vrot.slane %v5716_v60, 4  ;;  %v5709_v58 = vsel %vm5701_vm12, %v5565_v62, 0.0 }
 0xe61   :  { %v5724_v28 = vsel %vm653_vm5, %v5709_v58, 0.0  ;;  %v5806_v62 = vadd.f32 %v5805_v44, %v5804_v0 }
 0xe62   :  { %v5831_v2 = vadd.f32 %v5830_v36, %v5829_v3  ;;  %v5725_v31 = vadd.f32 %v5724_v28, %v5723_v16  ;;  %v5691_v40 = vpop.permute.xlu1 %5690  ;;  %v5718_v26 = vadd.f32 %v5717_v30, %v5716_v60  ;;  %v5824_v47 = vadd.f32 %v5823_v57, %v5822_v46 }
 0xe63   :  { %vm5703_vm15 = vcmp.eq.s32.totalorder %v5691_v40, 1  ;;  %v5712_v3 = vsel %vm5704_vm14, %v15251_v50, 0.0  ;;  %v5910_v60 = vsel %vm959_vm3, %v5815_v61, %v5806_v62 }
 0xe64   :  { %v5726_v56 = vrot.slane %v5725_v31, 4  ;;  %v5711_v54 = vsel %vm5703_vm15, %v5567_v14, 0.0  ;;  %v5832_v51 = vrot.slane %v5831_v2, 1  ;;  %v5719_v58 = vrot.slane %v5718_v26, 2 }
 0xe65   :  { %v5733_v35 = vsel %vm653_vm5, %v5711_v54, 0.0  ;;  %v5911_v0 = vsel %vm961_vm4, %v5824_v47, %v5910_v60  ;;  %v5741_v49 = vsel %vm653_vm5, %v5712_v3, 0.0 }
 0xe66   :  { %v5727_v42 = vadd.f32 %v5726_v56, %v5725_v31  ;;  %v5734_v19 = vadd.f32 %v5733_v35, %v5732_v5  ;;  %v5697_v36 = vpop.permute.xlu1 %5696  ;;  %v5833_v43 = vadd.f32 %v5832_v51, %v5831_v2  ;;  %v5720_v20 = vadd.f32 %v5719_v58, %v5718_v26 }
 0xe67   :  { %vm5705_vm0 = vcmp.eq.s32.totalorder %v5697_v36, 1 }
 0xe68   :  { %v5728_v45 = vrot.slane %v5727_v42, 2  ;;  %v5735_v14 = vrot.slane %v5734_v19, 4  ;;  %v5713_v46 = vsel %vm5705_vm0, %v15256_v29, 0.0  ;;  %v5912_v30 = vsel %vm963_vm6, %v5833_v43, %v5911_v0 }
 0xe69   :  { %v5742_v57 = vsel %vm653_vm5, %v5713_v46, 0.0  ;;  %v5914_v28 = vsel %vm966_vm7, %v5912_v30, 0.0  ;;  %v5721_v56 = vrot.slane %v5720_v20, 1 }
 0xe6a   :  { %v5729_v44 = vadd.f32 %v5728_v45, %v5727_v42  ;;  %v5736_v50 = vadd.f32 %v5735_v14, %v5734_v19  ;;  %v5743_v16 = vadd.f32 %v5742_v57, %v5741_v49  ;;  %5915 = vadd.xlane.f32.xlu0 %v5914_v28 }
 0xe6b   :  { %v5722_v36 = vadd.f32 %v5721_v56, %v5720_v20 }
 0xe6c   :  { %v5737_v2 = vrot.slane %v5736_v50, 2  ;;  %v5744_v31 = vrot.slane %v5743_v16, 4  ;;  %v5730_v9 = vrot.slane %v5729_v44, 1 }
 0xe6e   :  { %v5738_v40 = vadd.f32 %v5737_v2, %v5736_v50  ;;  %v5745_v29 = vadd.f32 %v5744_v31, %v5743_v16  ;;  %v5731_v5 = vadd.f32 %v5730_v9, %v5729_v44 }
 0xe70   :  { %v5739_v54 = vrot.slane %v5738_v40, 1  ;;  %v5746_v51 = vrot.slane %v5745_v29, 2  ;;  %v5838_v19 = vsel %vm959_vm3, %v5731_v5, %v5722_v36 }
 0xe72   :  { %v5747_v35 = vadd.f32 %v5746_v51, %v5745_v29  ;;  %v5740_v3 = vadd.f32 %v5739_v54, %v5738_v40 }
 0xe74   :  { %v5748_v60 = vrot.slane %v5747_v35, 1  ;;  %v5839_v45 = vsel %vm961_vm4, %v5740_v3, %v5838_v19 }
 0xe76   :  { %v5749_v42 = vadd.f32 %v5748_v60, %v5747_v35 }
 0xe78   :  { %v5840_v26 = vsel %vm963_vm6, %v5749_v42, %v5839_v45 }
 0xe79   :  { %v5842_v58 = vsel %vm966_vm7, %v5840_v26, 0.0 }
 0xe7a   :  { %5843 = vadd.xlane.f32.xlu1 %v5842_v58 }
 0xef3   :  { %v5916_v14 = vpop.xlane.xlu0 %5915 }
 0xef4   :  { %v5917_v46 = vmul.f32 0.03125, %v5916_v14 }
 0xef6   :  { %v5919_v0 = vrot.slane %v5917_v46, 1  ;;  %v5920_v49 = vrot.slane %v5917_v46, 2  ;;  %v5921_v57 = vrot.slane %v5917_v46, 3  ;;  %v15280_v30 = vsub.f32 %v5806_v62, %v5917_v46 }
 0xef8   :  { %v15282_v44 = vsub.f32 %v5815_v61, %v5919_v0  ;;  %v15284_v50 = vsub.f32 %v5824_v47, %v5920_v49  ;;  %v15286_v16 = vsub.f32 %v5833_v43, %v5921_v57  ;;  %v5930_v31 = vmul.f32 %v15280_v30, %v15280_v30 }
 0xefa   :  { %v5931_v28 = vmul.f32 %v15282_v44, %v15282_v44  ;;  %v5932_v20 = vmul.f32 %v15284_v50, %v15284_v50  ;;  %v5933_v2 = vmul.f32 %v15286_v16, %v15286_v16 }
 0xefc   :  { %v5938_v62 = vrot.slane %v5931_v28, 7  ;;  %v5940_v9 = vrot.slane %v5932_v20, 6  ;;  %v5942_v47 = vrot.slane %v5933_v2, 5 }
 0xefe   :  { %v5939_v61 = vsel %vm959_vm3, %v5938_v62, %v5930_v31 }
 0xeff   :  { %v5941_v43 = vsel %vm961_vm4, %v5940_v9, %v5939_v61 }
 0xf00   :  { %v5943_v40 = vsel %vm963_vm6, %v5942_v47, %v5941_v43 }
 0xf01   :  { %v5945_v29 = vsel %vm966_vm7, %v5943_v40, 0.0 }
 0xf02   :  { %5946 = vadd.xlane.f32.xlu0 %v5945_v29 }
 0xf03   :  { %v5844_v56 = vpop.xlane.xlu1 %5843 }
 0xf04   :  { %v5845_v54 = vmul.f32 0.03125, %v5844_v56 }
 0xf06   :  { %v5847_v51 = vrot.slane %v5845_v54, 1  ;;  %v5848_v35 = vrot.slane %v5845_v54, 2  ;;  %v5849_v60 = vrot.slane %v5845_v54, 3  ;;  %v15300_v19 = vsub.f32 %v5722_v36, %v5845_v54 }
 0xf08   :  { %v15302_v45 = vsub.f32 %v5731_v5, %v5847_v51  ;;  %v15304_v26 = vsub.f32 %v5740_v3, %v5848_v35  ;;  %v15306_v58 = vsub.f32 %v5749_v42, %v5849_v60  ;;  %v5858_v49 = vmul.f32 %v15300_v19, %v15300_v19 }
 0xf0a   :  { %v5859_v14 = vmul.f32 %v15302_v45, %v15302_v45  ;;  %v5860_v46 = vmul.f32 %v15304_v26, %v15304_v26  ;;  %v5861_v0 = vmul.f32 %v15306_v58, %v15306_v58 }
 0xf0c   :  { %v5866_v36 = vrot.slane %v5859_v14, 7  ;;  %v5868_v57 = vrot.slane %v5860_v46, 6  ;;  %v5870_v3 = vrot.slane %v5861_v0, 5 }
 0xf0e   :  { %v5867_v5 = vsel %vm959_vm3, %v5866_v36, %v5858_v49 }
 0xf0f   :  { %v5869_v42 = vsel %vm961_vm4, %v5868_v57, %v5867_v5 }
 0xf10   :  { %v5871_v28 = vsel %vm963_vm6, %v5870_v3, %v5869_v42 }
 0xf11   :  { %v5873_v20 = vsel %vm966_vm7, %v5871_v28, 0.0 }
 0xf12   :  { %5874 = vadd.xlane.f32.xlu0 %v5873_v20  ;;  %v13691_v20 = vld [vmem:[%s16636_s6] ss:$0 sm:$0xff] }
 0xf8b   :  { %v5947_v2 = vpop.xlane.xlu0 %5946 }
 0xf8c   :  { %v5948_v31 = vmul.f32 0.032258064, %v5947_v2 }
 0xf8e   :  { %13593 = vrsqrt.f32 %v5948_v31  ;;  %vm5951_vm9 = vcmp.eq.f32.partialorder %v5948_v31, inf  ;;  %v5954_v43 = vand.u32 2147483648, %v5948_v31  ;;  %vm5953_vm10 = vcmp.eq.f32.partialorder %v5948_v31, 0.0 }
 0xf9b   :  { %v5875_v62 = vpop.xlane.xlu0 %5874  ;;  %v13594_v61 = vpop.eup %13593 }
 0xf9c   :  { %v5876_v9 = vmul.f32 0.032258064, %v5875_v62  ;;  %v5950_v47 = vmul.f32 %v13594_v61, %v5948_v31  ;;  %v13692_v61 = vld [vmem:[%s16637_s7] ss:$0 sm:$0xff] }
 0xf9e   :  { %13595 = vrsqrt.f32 %v5876_v9  ;;  %v5952_v40 = vsel %vm5951_vm9, %v5948_v31, %v5950_v47  ;;  %vm5879_vm11 = vcmp.eq.f32.partialorder %v5876_v9, inf  ;;  %v5882_v35 = vand.u32 2147483648, %v5876_v9 }
 0xf9f   :  { %v5955_v29 = vsel %vm5953_vm10, %v5954_v43, %v5952_v40  ;;  %vm5881_vm12 = vcmp.eq.f32.partialorder %v5876_v9, 0.0 }
 0xfa0   :  { %v5956_v56 = vadd.f32 1e-06, %v5955_v29 }
 0xfa2   :  { %13597 = vrcp.f32 %v5956_v56 }
 0xfab   :  { %v13596_v54 = vpop.eup %13595 }
 0xfac   :  { %v5878_v51 = vmul.f32 %v13596_v54, %v5876_v9 }
 0xfae   :  { %v5880_v60 = vsel %vm5879_vm11, %v5876_v9, %v5878_v51 }
 0xfaf   :  { %v5883_v14 = vsel %vm5881_vm12, %v5882_v35, %v5880_v60  ;;  %v13598_v0 = vpop.eup %13597 }
 0xfb0   :  { %v5884_v46 = vadd.f32 1e-06, %v5883_v14  ;;  %v5959_v49 = vrot.slane %v13598_v0, 1  ;;  %v5960_v36 = vrot.slane %v13598_v0, 2  ;;  %v5961_v57 = vrot.slane %v13598_v0, 3 }
 0xfb1   :  { %v5966_v5 = vmul.f32 %v13598_v0, %v15280_v30 }
 0xfb2   :  { %13599 = vrcp.f32 %v5884_v46  ;;  %v5967_v3 = vmul.f32 %v5959_v49, %v15282_v44  ;;  %v5968_v42 = vmul.f32 %v5960_v36, %v15284_v50  ;;  %v5969_v28 = vmul.f32 %v5961_v57, %v15286_v16 }
 0xfb3   :  { %v5970_v2 = vmul.f32 %v13691_v20, %v5966_v5 }
 0xfb4   :  { %v5971_v31 = vmul.f32 %v13691_v20, %v5967_v3  ;;  %v5972_v62 = vmul.f32 %v13691_v20, %v5968_v42  ;;  %v5973_v9 = vmul.f32 %v13691_v20, %v5969_v28 }
 0xfb5   :  { %v5974_v44 = vadd.f32 %v13692_v61, %v5970_v2 }
 0xfb6   :  { %v5975_v47 = vadd.f32 %v13692_v61, %v5971_v31  ;;  %v5976_v30 = vadd.f32 %v13692_v61, %v5972_v62  ;;  %v5977_v43 = vadd.f32 %v13692_v61, %v5973_v9 }
 0xfb8   :  { %v5982_v40 = vrot.slane %v5975_v47, 7  ;;  %v5984_v50 = vrot.slane %v5976_v30, 6  ;;  %v5986_v29 = vrot.slane %v5977_v43, 5 }
 0xfba   :  { %v5983_v16 = vsel %vm959_vm3, %v5982_v40, %v5974_v44 }
 0xfbb   :  { %v5985_v56 = vsel %vm961_vm4, %v5984_v50, %v5983_v16 }
 0xfbc   :  { %v5987_v54 = vsel %vm963_vm6, %v5986_v29, %v5985_v56 }
 0xfbd   :  { %v5988_v35 = vsel %vm653_vm5, %v5987_v54, 0  ;;  %6982 = vrot.lane.b32.xlu1 %v5987_v54, %s13767_s26 }
 0xfbe   :  { %v15335_v60 = vand.u32 4294901760, %v5988_v35 }
 0xfbf   :  { %v13600_v51 = vpop.eup %13599 }
 0xfc0   :  { %v5887_v14 = vrot.slane %v13600_v51, 1  ;;  %v5888_v46 = vrot.slane %v13600_v51, 2  ;;  %v5889_v0 = vrot.slane %v13600_v51, 3  ;;  %v5894_v49 = vmul.f32 %v13600_v51, %v15300_v19  ;;  %13025 = vmatmul.mubr.f32.vlgmr.msra.gmra.mxu1 %v15335_v60  ;;  %v13693_v19 = vld [vmem:[%s16634_s4] ss:$0 sm:$0xff] }
 0xfc1   :  { %v6060_v36 = vsub.f32 %v5988_v35, %v15335_v60  ;;  %13039 = vmatpush3.msra.mxu1 %v14112_v6  ;;  %13046 = vmatprep.mubr.msk.f32.mxu1 %vm13766_vm8, %v16696_v1 }
 0xfc2   :  { %v5895_v57 = vmul.f32 %v5887_v14, %v15302_v45  ;;  %v5896_v5 = vmul.f32 %v5888_v46, %v15304_v26  ;;  %v5897_v3 = vmul.f32 %v5889_v0, %v15306_v58  ;;  %13040 = vmatprep.subr.mxu1 %v16696_v1  ;;  %v5898_v28 = vmul.f32 %v13693_v19, %v5894_v49  ;;  %v13694_v58 = vld [vmem:[%s16635_s5] ss:$0 sm:$0xff]  ;;  %v16712_v14 = vld [vmem:[#allocation11_spill] sm:$0xff]  ;;  %v16713_v46 = vld [vmem:[#allocation12_spill] sm:$0xff] }
 0xfc3   :  { %v6061_v42 = vand.u32 4294901760, %v6060_v36  ;;  %13041 = vmatpush3.msra.mxu1 %v14114_v7 }
 0xfc4   :  { %v5899_v20 = vmul.f32 %v13693_v19, %v5895_v57  ;;  %v5900_v2 = vmul.f32 %v13693_v19, %v5896_v5  ;;  %v5901_v45 = vmul.f32 %v13693_v19, %v5897_v3  ;;  %13042 = vmatprep.subr.mxu1 %v16696_v1  ;;  %v5902_v61 = vadd.f32 %v13694_v58, %v5898_v28 }
 0xfc5   :  { %v6062_v26 = vsub.f32 %v6060_v36, %v6061_v42  ;;  %13043 = vmatpush3.msra.mxu1 %v14116_v8 }
 0xfc6   :  { %v5903_v31 = vadd.f32 %v13694_v58, %v5899_v20  ;;  %v5904_v62 = vadd.f32 %v13694_v58, %v5900_v2  ;;  %13044 = vmatprep.subr.mxu1 %v16696_v1  ;;  %v5905_v43 = vadd.f32 %v13694_v58, %v5901_v45 }
 0xfc7   :  { %v6063_v9 = vand.u32 4294901760, %v6062_v26  ;;  %13045 = vmatpush3.msra.mxu1 %v14163_v21 }
 0xfc8   :  { %v6479_v47 = vrot.slane %v5903_v31, 7  ;;  %v6481_v30 = vrot.slane %v5904_v62, 6  ;;  %13047 = vmatmul.mubr.f32.vlgmr.msra.gmra.mxu1 %v6061_v42  ;;  %13060 = vmatprep.subr.mxu1 %v16696_v1  ;;  %v6483_v50 = vrot.slane %v5905_v43, 5 }
 0xfc9   :  { %13014 = vmatmul.mubr.f32.vlgmr.msra.gmra.mxu0 %v6063_v9  ;;  %13061 = vmatpush3.msra.mxu1 %v14112_v6 }
 0xfca   :  { %v6480_v44 = vsel %vm959_vm3, %v6479_v47, %v5902_v61  ;;  %13028 = vmatpush3.msra.mxu0 %v14119_v10  ;;  %13062 = vmatprep.subr.mxu1 %v16696_v1 }
 0xfcb   :  { %v6482_v40 = vsel %vm961_vm4, %v6481_v30, %v6480_v44  ;;  %13029 = vmatprep.subr.mxu0 %v16696_v1  ;;  %13063 = vmatpush3.msra.mxu1 %v14114_v7 }
 0xfcc   :  { %13030 = vmatpush3.msra.mxu0 %v14122_v11  ;;  %13064 = vmatprep.subr.mxu1 %v16696_v1  ;;  %v15371_v16 = vsel %vm963_vm6, %v6483_v50, %v6482_v40 }
 0xfcd   :  { %13031 = vmatprep.subr.mxu0 %v16696_v1  ;;  %13065 = vmatpush3.msra.mxu1 %v14116_v8  ;;  %v6485_v29 = vsel %vm653_vm5, %v15371_v16, 0 }
 0xfce   :  { %13032 = vmatpush3.msra.mxu0 %v14125_v24  ;;  %13066 = vmatprep.subr.mxu1 %v16696_v1  ;;  %v15388_v56 = vand.u32 4294901760, %v6485_v29 }
 0xfcf   :  { %13033 = vmatprep.subr.mxu0 %v16696_v1  ;;  %13035 = vmatprep.mubr.msk.f32.mxu0 %vm13766_vm8, %v16696_v1 }
 0xfd0   :  { %13034 = vmatpush3.msra.mxu0 %v14166_v38  ;;  %13067 = vmatpush3.msra.mxu1 %v14163_v21  ;;  %v6557_v54 = vsub.f32 %v6485_v29, %v15388_v56 }
 0xfd1   :  { %13068 = vmatprep.mubr.msk.f32.mxu1 %vm13766_vm8, %v16696_v1  ;;  %13036 = vmatmul.mubr.f32.vlgmr.msra.gmra.mxu0 %v6060_v36 }
 0xfd2   :  { %13049 = vmatprep.subr.mxu0 %v16696_v1  ;;  %13069 = vmatmul.mubr.f32.vlgmr.msra.gmra.mxu1 %v15335_v60  ;;  %v6558_v51 = vand.u32 4294901760, %v6557_v54 }
 0xfd3   :  { %13082 = vmatprep.subr.mxu1 %v16696_v1  ;;  %13050 = vmatpush3.msra.mxu0 %v14130_v12 }
 0xfd4   :  { %13083 = vmatpush3.msra.mxu1 %v14291_v27  ;;  %13051 = vmatprep.subr.mxu0 %v16696_v1  ;;  %v6559_v35 = vsub.f32 %v6557_v54, %v6558_v51 }
 0xfd5   :  { %13084 = vmatprep.subr.mxu1 %v16696_v1  ;;  %13052 = vmatpush3.msra.mxu0 %v14133_v55 }
 0xfd6   :  { %13085 = vmatpush3.msra.mxu1 %v14301_v39  ;;  %13053 = vmatprep.subr.mxu0 %v16696_v1 }
 0xfd7   :  { %13086 = vmatprep.subr.mxu1 %v16696_v1  ;;  %13054 = vmatpush3.msra.mxu0 %v14136_v13 }
 0xfd8   :  { %13087 = vmatpush3.msra.mxu1 %v14311_v52  ;;  %13055 = vmatprep.subr.mxu0 %v16696_v1 }
 0xfd9   :  { %13088 = vmatprep.subr.mxu1 %v16696_v1  ;;  %13056 = vmatpush3.msra.mxu0 %v14171_v22 }
 0xfda   :  { %13057 = vmatprep.mubr.msk.f32.mxu0 %vm13766_vm8, %v16696_v1  ;;  %13089 = vmatpush3.msra.mxu1 %v14317_v53 }
 0xfdb   :  { %13090 = vmatprep.mubr.msk.f32.mxu1 %vm13766_vm8, %v16696_v1  ;;  %13058 = vmatmul.mubr.f32.vlgmr.msra.gmra.mxu0 %v15335_v60  ;;  %v6560_v60 = vand.u32 4294901760, %v6559_v35 }
 0xfdc   :  { %13071 = vmatprep.subr.mxu0 %v16696_v1  ;;  %13091 = vmatmul.mubr.f32.vlgmr.msra.gmra.mxu1 %v15388_v56 }
 0xfdd   :  { %13104 = vmatprep.subr.mxu1 %v16696_v1  ;;  %13072 = vmatpush3.msra.mxu0 %v14218_v59 }
 0xfde   :  { %13105 = vmatpush3.msra.mxu1 %v14218_v59  ;;  %13073 = vmatprep.subr.mxu0 %v16696_v1 }
 0xfdf   :  { %13106 = vmatprep.subr.mxu1 %v16696_v1  ;;  %13074 = vmatpush3.msra.mxu0 %v14227_v63 }
 0xfe0   :  { %13107 = vmatpush3.msra.mxu1 %v14227_v63  ;;  %13075 = vmatprep.subr.mxu0 %v16696_v1 }
 0xfe1   :  { %13108 = vmatprep.subr.mxu1 %v16696_v1  ;;  %13076 = vmatpush3.msra.mxu0 %v14237_v23 }
 0xfe2   :  { %13109 = vmatpush3.msra.mxu1 %v14237_v23  ;;  %13077 = vmatprep.subr.mxu0 %v16696_v1 }
 0xfe3   :  { %13110 = vmatprep.subr.mxu1 %v16696_v1  ;;  %13078 = vmatpush3.msra.mxu0 %v14244_v25 }
 0xfe4   :  { %13079 = vmatprep.mubr.msk.f32.mxu0 %vm13766_vm8, %v16696_v1  ;;  %13111 = vmatpush3.msra.mxu1 %v14244_v25 }
 0xfe5   :  { %13112 = vmatprep.mubr.msk.f32.mxu1 %vm13766_vm8, %v16696_v1  ;;  %13080 = vmatmul.mubr.f32.vlgmr.msra.gmra.mxu0 %v6560_v60 }
 0xfe6   :  { %13093 = vmatprep.subr.mxu0 %v16696_v1  ;;  %13113 = vmatmul.mubr.f32.vlgmr.msra.gmra.mxu1 %v6558_v51 }
 0xfe7   :  { %13126 = vmatprep.subr.mxu1 %v16696_v1  ;;  %13094 = vmatpush3.msra.mxu0 %v14235_v4 }
 0xfe8   :  { %13127 = vmatpush3.msra.mxu1 %v14218_v59  ;;  %13095 = vmatprep.subr.mxu0 %v16696_v1 }
 0xfe9   :  { %13128 = vmatprep.subr.mxu1 %v16696_v1  ;;  %13096 = vmatpush3.msra.mxu0 %v14242_v15 }
 0xfea   :  { %13129 = vmatpush3.msra.mxu1 %v14227_v63  ;;  %13097 = vmatprep.subr.mxu0 %v16696_v1 }
 0xfeb   :  { %13130 = vmatprep.subr.mxu1 %v16696_v1  ;;  %13098 = vmatpush3.msra.mxu0 %v14253_v33 }
 0xfec   :  { %13131 = vmatpush3.msra.mxu1 %v14237_v23  ;;  %13099 = vmatprep.subr.mxu0 %v16696_v1 }
 0xfed   :  { %13132 = vmatprep.subr.mxu1 %v16696_v1  ;;  %13100 = vmatpush3.msra.mxu0 %v14262_v34 }
 0xfee   :  { %13101 = vmatprep.mubr.msk.f32.mxu0 %vm13766_vm8, %v16696_v1  ;;  %13133 = vmatpush3.msra.mxu1 %v14244_v25 }
 0xfef   :  { %13134 = vmatprep.mubr.msk.f32.mxu1 %vm13766_vm8, %v16696_v1  ;;  %13102 = vmatmul.mubr.f32.vlgmr.msra.gmra.mxu0 %v6557_v54 }
 0xff0   :  { %13115 = vmatprep.subr.mxu0 %v16696_v1  ;;  %13135 = vmatmul.mubr.f32.vlgmr.msra.gmra.mxu1 %v15388_v56 }
 0xff1   :  { %13116 = vmatpush3.msra.mxu0 %v14250_v32  ;;  %13123 = vmatprep.mubr.msk.f32.mxu0 %vm13766_vm8, %v16696_v1 }
 0xff2   :  { %13117 = vmatprep.subr.mxu0 %v16696_v1  ;;  %13148 = vmatprep.subr.mxu1 %v16696_v1 }
 0xff3   :  { %13118 = vmatpush3.msra.mxu0 %v14259_v37  ;;  %13149 = vmatpush3.msra.mxu1 %v14148_v17 }
 0xff4   :  { %13119 = vmatprep.subr.mxu0 %v16696_v1  ;;  %13150 = vmatprep.subr.mxu1 %v16696_v1 }
 0xff5   :  { %13120 = vmatpush3.msra.mxu0 %v14272_v41  ;;  %13151 = vmatpush3.msra.mxu1 %v14150_v18 }
 0xff6   :  { %13121 = vmatprep.subr.mxu0 %v16696_v1  ;;  %13152 = vmatprep.subr.mxu1 %v16696_v1 }
 0xff7   :  { %13122 = vmatpush3.msra.mxu0 %v14284_v48  ;;  %13153 = vmatpush3.msra.mxu1 %v16712_v14 }
 0xff8   :  { %13124 = vmatmul.mubr.f32.vlgmr.msra.gmra.mxu0 %v15388_v56  ;;  %13154 = vmatprep.subr.mxu1 %v16696_v1 }
 0xff9   :  { %13155 = vmatpush3.msra.mxu1 %v16713_v46  ;;  %13137 = vmatprep.subr.mxu0 %v16696_v1 }
 0xffa   :  { %13156 = vmatprep.mubr.msk.f32.mxu1 %vm13766_vm8, %v16696_v1  ;;  %13170 = vmatprep.subr.mxu1 %v16696_v1 }
 0xffb   :  { %13138 = vmatpush3.msra.mxu0 %v14112_v6  ;;  %13145 = vmatprep.mubr.msk.f32.mxu0 %vm13766_vm8, %v16696_v1 }
 0xffc   :  { %13139 = vmatprep.subr.mxu0 %v16696_v1 }
 0xffd   :  { %13140 = vmatpush3.msra.mxu0 %v14114_v7 }
 0xffe   :  { %13141 = vmatprep.subr.mxu0 %v16696_v1 }
 0xfff   :  { %13142 = vmatpush3.msra.mxu0 %v14116_v8 }
0x1000   :  { %13143 = vmatprep.subr.mxu0 %v16696_v1 }
0x1001   :  { %13144 = vmatpush3.msra.mxu0 %v14163_v21 }
0x1002   :  { %13159 = vmatprep.subr.mxu0 %v16696_v1 }
0x1080   :  { %v6156_v0 = vpop.f32.mrf.mxu1 }
0x1082   :  { %v13026_v49 = vpop.f32.mrf.mxu1 }
0x1088   :  { %v6313_v36 = vpop.f32.mrf.mxu1 }
0x1089   :  { %v6065_v57 = vpop.f32.mrf.mxu0 }
0x108a   :  { %v13048_v5 = vpop.f32.mrf.mxu1  ;;  %v6157_v31 = vadd.f32 %v6156_v0, %v6065_v57 }
0x108b   :  { %v13015_v3 = vpop.f32.mrf.mxu0 }
0x1091   :  { %v6236_v42 = vpop.f32.mrf.mxu0 }
0x1092   :  { %v6471_v19 = vpop.f32.mrf.mxu1  ;;  %v6237_v62 = vadd.f32 %v6236_v42, %v6157_v31  ;;  %v12068_v31 = vld.sshfl [vmem:[%s16630_s0 + $0x4c] sm:$0x33 pattern:$0x75316420] }
0x1093   :  { %v13037_v28 = vpop.f32.mrf.mxu0 }
0x1094   :  { %v13070_v20 = vpop.f32.mrf.mxu1  ;;  %v6314_v9 = vadd.f32 %v6313_v36, %v6237_v62  ;;  %v13695_v36 = vld [vmem:[%s16640_s10] ss:$0 sm:$0xff]  ;;  %v16714_v62 = vld [vmem:[#allocation8_spill] sm:$0xff] }
0x109b   :  { %v6396_v2 = vpop.f32.mrf.mxu0 }
0x109c   :  { %v6653_v45 = vpop.f32.mrf.mxu1  ;;  %v6397_v30 = vadd.f32 %v6396_v2, %v6314_v9  ;;  %v7028_v9 = vrot.slane %v12068_v31, %v16714_v62 }
0x109d   :  { %v13059_v26 = vpop.f32.mrf.mxu0 }
0x109e   :  { %v13092_v58 = vpop.f32.mrf.mxu1  ;;  %v6472_v40 = vadd.f32 %v6471_v19, %v6397_v30  ;;  %v6983_v26 = vpop.permute.xlu1 %6982 }
0x10a5   :  { %v6562_v61 = vpop.f32.mrf.mxu0 }
0x10a6   :  { %v6810_v47 = vpop.f32.mrf.mxu1  ;;  %v6563_v50 = vadd.f32 %v6562_v61, %v6472_v40  ;;  %v7021_v61 = vcombine.high %v12068_v31, %v12068_v31 }
0x10a7   :  { %v13081_v43 = vpop.f32.mrf.mxu0 }
0x10a8   :  { %v13114_v44 = vpop.f32.mrf.mxu1  ;;  %v6654_v54 = vadd.f32 %v6653_v45, %v6563_v50  ;;  %v7035_v43 = vrot.slane %v7021_v61, %v16714_v62  ;;  %v16716_v50 = vld [vmem:[#allocation10_spill] sm:$0xff] }
0x10af   :  { %v6733_v29 = vpop.f32.mrf.mxu0 }
0x10b0   :  { %v6968_v56 = vpop.f32.mrf.mxu1  ;;  %v6734_v60 = vadd.f32 %v6733_v29, %v6654_v54 }
0x10b1   :  { %v13103_v51 = vpop.f32.mrf.mxu0 }
0x10b2   :  { %v13136_v35 = vpop.f32.mrf.mxu1  ;;  %v6811_v49 = vadd.f32 %v6810_v47, %v6734_v60  ;;  %v16715_v47 = vld [vmem:[#allocation9_spill] sm:$0xff] }
0x10b3   :  { %v7041_v30 = vrot.slane %v7028_v9, %v16715_v47  ;;  %v7045_v29 = vrot.slane %v7035_v43, %v16715_v47 }
0x10b5   :  { %vm7055_vm13 = vcmp.eq.s32.totalorder %v16716_v50, %v7041_v30  ;;  %vm7057_vm15 = vcmp.eq.s32.totalorder %v16716_v50, %v7045_v29 }
0x10b8   :  { %v6893_v5 = vpop.f32.mrf.mxu0 }
0x10b9   :  { %v6894_v3 = vadd.f32 %v6893_v5, %v6811_v49 }
0x10ba   :  { %v13125_v28 = vpop.f32.mrf.mxu0 }
0x10bb   :  { %v6969_v0 = vadd.f32 %v6968_v56, %v6894_v3  ;;  %v16717_v56 = vmov 0   ;;  %v16718_v28 = vld [vmem:[#allocation7_spill] sm:$0xff] }
0x10bc   :  { %v7088_v54 = vsel %vm7055_vm13, 1, %v16717_v56  ;;  %v7090_v51 = vsel %vm7057_vm15, 1, %v16717_v56  ;;  %vm7054_vm14 = vcmp.eq.s32.totalorder %v16718_v28, %v7041_v30  ;;  %vm7056_vm0 = vcmp.eq.s32.totalorder %v16718_v28, %v7045_v29 }
0x10bd   :  { %v6972_v57 = vadd.f32 %v13695_v36, %v6969_v0  ;;  %v7036_v0 = vcombine.high %v7028_v9, %v7028_v9 }
0x10bf   :  { %v12067_v42 = vmul.f32 -1.442695, %v6972_v57  ;;  %13601 = vtanh.f32 %v6972_v57  ;;  %v7087_v57 = vsel %vm7054_vm14, 1, %v16717_v56 }
0x10c1   :  { %13603 = vpow2.f32 %v12067_v42  ;;  %v7049_v42 = vrot.slane %v7036_v0, %v16715_v47 }
0x10c3   :  { %vm7058_vm9 = vcmp.eq.s32.totalorder %v16718_v28, %v7049_v42 }
0x10c4   :  { %v7091_v31 = vsel %vm7058_vm9, 1, %v16717_v56 }
0x10cc   :  { %v13602_v19 = vpop.eup %13601 }
0x10cd   :  { %6992 = vrot.lane.b32.xlu0 %v13602_v19, %s13768_s16  ;;  %v7037_v19 = vcombine.high %v7035_v43, %v7035_v43 }
0x10ce   :  { %v13604_v20 = vpop.eup %13603 }
0x10cf   :  { %v6976_v2 = vadd.f32 1.0, %v13604_v20  ;;  %v7089_v20 = vsel %vm7056_vm0, 1, %v16717_v56 }
0x10d1   :  { %13605 = vrcp.f32 %v6976_v2  ;;  %v7053_v2 = vrot.slane %v7037_v19, %v16715_v47 }
0x10d3   :  { %vm7060_vm10 = vcmp.eq.s32.totalorder %v16718_v28, %v7053_v2 }
0x10d4   :  { %v7093_v30 = vsel %vm7060_vm10, 1, %v16717_v56 }
0x10de   :  { %v15488_v45 = vpop.eup %13605 }
0x10df   :  { %v6985_v58 = vmul.f32 %v15488_v45, %v6983_v26  ;;  %v6981_v60 = vmul.f32 %v15488_v45, %v15371_v16  ;;  %v12074_v16 = vld.sshfl [vmem:[%s16630_s0 + $0x30] sm:$0x33 pattern:$0x75316420] }
0x10e0   :  { %v7248_v26 = vrot.slane %v12074_v16, %v16714_v62 }
0x10e1   :  { %6987 = vrot.lane.b32.xlu1 %v6985_v58, %s13769_s17  ;;  %v7241_v58 = vcombine.high %v12074_v16, %v12074_v16 }
0x10e2   :  { %v7261_v9 = vrot.slane %v7248_v26, %v16715_v47 }
0x10e3   :  { %v7255_v61 = vrot.slane %v7241_v58, %v16714_v62 }
0x10e4   :  { %vm7274_vm11 = vcmp.eq.s32.totalorder %v16718_v28, %v7261_v9 }
0x10e5   :  { %v7265_v43 = vrot.slane %v7255_v61, %v16715_v47 }
0x10e7   :  { %vm7276_vm12 = vcmp.eq.s32.totalorder %v16718_v28, %v7265_v43 }
0x113f   :  { %v6993_v44 = vpop.permute.xlu0 %6992 }
0x1140   :  { %v6995_v40 = vmul.f32 %v15488_v45, %v6993_v44  ;;  %v7256_v44 = vcombine.high %v7248_v26, %v7248_v26 }
0x1142   :  { %6997 = vrot.lane.b32.xlu1 %v6995_v40, %s13767_s26  ;;  %v7366_v40 = vsel %vm7274_vm11, 1, %v16717_v56  ;;  %v7269_v29 = vrot.slane %v7256_v44, %v16715_v47  ;;  %vm7059_vm11 = vcmp.eq.s32.totalorder %v16716_v50, %v7049_v42 }
0x1144   :  { %vm7278_vm13 = vcmp.eq.s32.totalorder %v16718_v28, %v7269_v29 }
0x1145   :  { %v7370_v0 = vsel %vm7278_vm13, 1, %v16717_v56  ;;  %vm7275_vm13 = vcmp.eq.s32.totalorder %v16716_v50, %v7261_v9 }
0x1146   :  { %7099 = vperm.xlu1 %13544, %v7088_v54   ;;  %v7257_v54 = vcombine.high %v7255_v61, %v7255_v61 }
0x114a   :  { %7105 = vperm.xlu1 %13544, %v7090_v51   ;;  %v12073_v51 = vld.sshfl [vmem:[%s16630_s0 + $0x10] sm:$0x33 pattern:$0x75316420] }
0x1153   :  { %v6988_v35 = vpop.permute.xlu1 %6987 }
0x1154   :  { %v6990_v49 = vadd.f32 %v6988_v35, %v6981_v60  ;;  %v7368_v35 = vsel %vm7276_vm12, 1, %v16717_v56  ;;  %v7273_v60 = vrot.slane %v7257_v54, %v16715_v47  ;;  %vm7061_vm12 = vcmp.eq.s32.totalorder %v16716_v50, %v7053_v2 }
0x1156   :  { %vm7280_vm15 = vcmp.eq.s32.totalorder %v16718_v28, %v7273_v60 }
0x1157   :  { %v7372_v19 = vsel %vm7280_vm15, 1, %v16717_v56  ;;  %vm7277_vm15 = vcmp.eq.s32.totalorder %v16716_v50, %v7265_v43 }
0x11b4   :  { %v6998_v5 = vpop.permute.xlu1 %6997 }
0x11b5   :  { %v15507_v3 = vadd.f32 %v6998_v5, %v6990_v49  ;;  %v7200_v49 = vrot.slane %v12073_v51, %v16714_v62  ;;  %v7193_v5 = vcombine.high %v12073_v51, %v12073_v51 }
0x11b7   :  { %13607 = vtanh.f32 %v15507_v3 }
0x11c4   :  { %v13608_v36 = vpop.eup %13607 }
0x11c5   :  { %7003 = vrot.lane.b32.xlu0 %v13608_v36, %s13770_s20  ;;  %v7213_v36 = vrot.slane %v7200_v49, %v16715_v47 }
0x11c7   :  { %vm7226_vm14 = vcmp.eq.s32.totalorder %v16718_v28, %v7213_v36 }
0x11c8   :  { %v7282_v26 = vsel %vm7226_vm14, 1, %v16717_v56  ;;  %vm7279_vm14 = vcmp.eq.s32.totalorder %v16716_v50, %v7269_v29 }
0x11c9   :  { %7096 = vperm.xlu0 %13543, %v7087_v57   ;;  %v7207_v57 = vrot.slane %v7193_v5, %v16714_v62  ;;  %v7367_v5 = vsel %vm7275_vm13, 1, %v16717_v56  ;;  %v7371_v42 = vsel %vm7279_vm14, 1, %v16717_v56 }
0x11cb   :  { %v7217_v16 = vrot.slane %v7207_v57, %v16715_v47 }
0x11cd   :  { %7102 = vperm.xlu0 %13543, %v7089_v20   ;;  %v7208_v20 = vcombine.high %v7200_v49, %v7200_v49  ;;  %vm7228_vm0 = vcmp.eq.s32.totalorder %v16718_v28, %v7217_v16  ;;  %v7094_v49 = vsel %vm7061_vm12, 1, %v16717_v56 }
0x11ce   :  { %v7284_v61 = vsel %vm7228_vm0, 1, %v16717_v56  ;;  %vm7281_vm0 = vcmp.eq.s32.totalorder %v16716_v50, %v7273_v60 }
0x11cf   :  { %v7221_v58 = vrot.slane %v7208_v20, %v16715_v47  ;;  %v7373_v2 = vsel %vm7281_vm0, 1, %v16717_v56 }
0x11d1   :  { %7108 = vperm.xlu0 %13543, %v7091_v31   ;;  %v7209_v31 = vcombine.high %v7207_v57, %v7207_v57  ;;  %vm7230_vm9 = vcmp.eq.s32.totalorder %v16718_v28, %v7221_v58  ;;  %v7100_v57 = vpop.permute.xlu1 %7099 }
0x11d2   :  { %v7286_v44 = vsel %vm7230_vm9, 1, %v16717_v56  ;;  %vm7227_vm9 = vcmp.eq.s32.totalorder %v16716_v50, %v7213_v36  ;;  %vm7120_vm13 = vcmp.eq.s32.totalorder %v7100_v57, 1  ;;  %v13698_v57 = vld [vmem:[#allocation2 + $0x20] sm:$0xff] }
0x11d3   :  { %v7283_v9 = vsel %vm7227_vm9, 1, %v16717_v56 }
0x11d5   :  { %7114 = vperm.xlu0 %13543, %v7093_v30   ;;  %v7225_v30 = vrot.slane %v7209_v31, %v16715_v47  ;;  %v7106_v20 = vpop.permute.xlu1 %7105 }
0x11d7   :  { %vm7232_vm10 = vcmp.eq.s32.totalorder %v16718_v28, %v7225_v30  ;;  %vm7233_vm12 = vcmp.eq.s32.totalorder %v16716_v50, %v7225_v30 }
0x11d8   :  { %v7289_v60 = vsel %vm7233_vm12, 1, %v16717_v56 }
0x11d9   :  { %7375 = vperm.xlu0 %13543, %v7366_v40   ;;  %v7288_v40 = vsel %vm7232_vm10, 1, %v16717_v56  ;;  %vm7229_vm10 = vcmp.eq.s32.totalorder %v16716_v50, %v7217_v16 }
0x11da   :  { %v7285_v43 = vsel %vm7229_vm10, 1, %v16717_v56 }
0x11dd   :  { %7381 = vperm.xlu0 %13543, %v7368_v35   ;;  %v7092_v35 = vsel %vm7059_vm11, 1, %v16717_v56  ;;  %vm7231_vm11 = vcmp.eq.s32.totalorder %v16716_v50, %v7221_v58 }
0x11de   :  { %v7287_v29 = vsel %vm7231_vm11, 1, %v16717_v56 }
0x11e1   :  { %7387 = vperm.xlu0 %13543, %v7370_v0  }
0x11e5   :  { %7393 = vperm.xlu0 %13543, %v7372_v19  }
0x11e9   :  { %7291 = vperm.xlu0 %13543, %v7282_v26  }
0x11ed   :  { %7297 = vperm.xlu0 %13543, %v7284_v61  }
0x11f1   :  { %7303 = vperm.xlu0 %13543, %v7286_v44  }
0x11f5   :  { %7309 = vperm.xlu0 %13543, %v7288_v40  }
0x1237   :  { %v7004_v54 = vpop.permute.xlu0 %7003 }
0x1238   :  { %v7006_v51 = vmul.f32 %v15488_v45, %v7004_v54  ;;  %v7369_v45 = vsel %vm7277_vm15, 1, %v16717_v56  ;;  %vm7122_vm15 = vcmp.eq.s32.totalorder %v7106_v20, 1 }
0x123a   :  { %7008 = vrot.lane.b32.xlu1 %v7006_v51, %s13771_s24 }
0x123e   :  { %7111 = vperm.xlu1 %13544, %v7092_v35  }
0x1242   :  { %7117 = vperm.xlu1 %13544, %v7094_v49  }
0x1244   :  { %v7097_v0 = vpop.permute.xlu0 %7096 }
0x1245   :  { %vm7119_vm14 = vcmp.eq.s32.totalorder %v7097_v0, 1 }
0x1246   :  { %7378 = vperm.xlu1 %13544, %v7367_v5  }
0x1248   :  { %v7103_v36 = vpop.permute.xlu0 %7102 }
0x1249   :  { %vm7121_vm0 = vcmp.eq.s32.totalorder %v7103_v36, 1 }
0x124a   :  { %7384 = vperm.xlu1 %13544, %v7369_v45   ;;  %v13696_v45 = vld [vmem:[#allocation2] sm:$0xff] }
0x124c   :  { %v7109_v19 = vpop.permute.xlu0 %7108 }
0x124d   :  { %vm7123_vm9 = vcmp.eq.s32.totalorder %v7109_v19, 1  ;;  %v13700_v19 = vld [vmem:[#allocation2 + $0x10] sm:$0xff] }
0x124e   :  { %7390 = vperm.xlu1 %13544, %v7371_v42  }
0x1250   :  { %v7115_v16 = vpop.permute.xlu0 %7114 }
0x1251   :  { %vm7125_vm12 = vcmp.eq.s32.totalorder %v7115_v16, 1 }
0x1252   :  { %7396 = vperm.xlu1 %13544, %v7373_v2   ;;  %v13697_v2 = vld [vmem:[#allocation2 + $0x8] sm:$0xff] }
0x1254   :  { %v7376_v58 = vpop.permute.xlu0 %7375 }
0x1256   :  { %7294 = vperm.xlu1 %13544, %v7283_v9  }
0x1258   :  { %v15580_v31 = vpop.permute.xlu0 %7381 }
0x125a   :  { %7300 = vperm.xlu1 %13544, %v7285_v43  }
0x125e   :  { %7306 = vperm.xlu1 %13544, %v7287_v29  }
0x1262   :  { %7312 = vperm.xlu1 %13544, %v7289_v60  }
0x12ac   :  { %v7009_v26 = vpop.permute.xlu1 %7008 }
0x12ad   :  { %7011 = vst.msk [vmem:[#allocation3] sm:$0xf] %vm2168_vm1, %v7009_v26  ;;  %v13699_v26 = vld [vmem:[#allocation2 + $0x28] sm:$0xff] }
0x12ae   :  { %7012 = vst.msk [vmem:[#allocation3] sm:$0xf] %vm2170_vm2, %v15507_v3  ;;  %v7388_v3 = vpop.permute.xlu0 %7387 }
0x12b5   :  { %v15582_v61 = vld [vmem:[#allocation3] sm:$0xf] }
0x12b6   :  { %16719 = vst [vmem:[#allocation16_spill] sm:$0xff] %v15582_v61  ;;  %v7069_v30 = vrot.slane %v15582_v61, %v16714_v62 }
0x12b8   :  { %v7077_v44 = vrot.slane %v7069_v30, %v16714_v62  ;;  %v7070_v40 = vcombine.high %v7069_v30, %v7069_v30 }
0x12b9   :  { %v7112_v54 = vpop.permute.xlu1 %7111 }
0x12ba   :  { %v7085_v51 = vcombine.high %v7077_v44, %v7077_v44  ;;  %v7130_v35 = vrot.slane %v7077_v44, %v16715_v47  ;;  %v7084_v49 = vrot.slane %v7070_v40, %v16714_v62  ;;  %vm7124_vm10 = vcmp.eq.s32.totalorder %v7112_v54, 1 }
0x12bc   :  { %v7138_v5 = vrot.slane %v7085_v51, %v16715_v47  ;;  %v7147_v42 = vsel %vm7119_vm14, %v7130_v35, %v13696_v45  ;;  %v7148_v9 = vsel %vm7120_vm13, %v7130_v35, %v13697_v2  ;;  %v7086_v43 = vcombine.high %v7084_v49, %v7084_v49  ;;  %v13701_v51 = vld [vmem:[#allocation2 + $0x18] sm:$0xff]  ;;  %v13702_v35 = vld [vmem:[#allocation2 + $0x30] sm:$0xff] }
0x12bd   :  { %7155 = vst.msk [vmem:[#allocation2] sm:$0xff] %vm653_vm5, %v7147_v42  ;;  %7156 = vst.msk [vmem:[#allocation2 + $0x8] sm:$0xff] %vm653_vm5, %v7148_v9  ;;  %v7134_v29 = vrot.slane %v7084_v49, %v16715_v47  ;;  %v7118_v60 = vpop.permute.xlu1 %7117  ;;  %v7394_v42 = vpop.permute.xlu0 %7393  ;;  %vm7398_vm13 = vcmp.eq.s32.totalorder %v7376_v58, 1 }
0x12be   :  { %v7151_v0 = vsel %vm7123_vm9, %v7138_v5, %v13698_v57  ;;  %v7152_v30 = vsel %vm7124_vm10, %v7138_v5, %v13699_v26  ;;  %v7142_v44 = vrot.slane %v7086_v43, %v16715_v47  ;;  %vm7126_vm11 = vcmp.eq.s32.totalorder %v7118_v60, 1  ;;  %v13703_v5 = vld [vmem:[#allocation2 + $0x38] sm:$0xff] }
0x12bf   :  { %7159 = vst.msk [vmem:[#allocation2 + $0x20] sm:$0xff] %vm653_vm5, %v7151_v0  ;;  %7160 = vst.msk [vmem:[#allocation2 + $0x28] sm:$0xff] %vm653_vm5, %v7152_v30  ;;  %v7149_v40 = vsel %vm7121_vm0, %v7134_v29, %v13700_v19  ;;  %v7150_v54 = vsel %vm7122_vm15, %v7134_v29, %v13701_v51  ;;  %vm7400_vm0 = vcmp.eq.s32.totalorder %v15580_v31, 1  ;;  %vm7402_vm9 = vcmp.eq.s32.totalorder %v7388_v3, 1 }
0x12c0   :  { %v7153_v49 = vsel %vm7125_vm12, %v7142_v44, %v13702_v35  ;;  %7157 = vst.msk [vmem:[#allocation2 + $0x10] sm:$0xff] %vm653_vm5, %v7149_v40  ;;  %7158 = vst.msk [vmem:[#allocation2 + $0x18] sm:$0xff] %vm653_vm5, %v7150_v54  ;;  %v7154_v45 = vsel %vm7126_vm11, %v7142_v44, %v13703_v5  ;;  %vm7404_vm11 = vcmp.eq.s32.totalorder %v7394_v42, 1 }
0x12c1   :  { %7161 = vst.msk [vmem:[#allocation2 + $0x30] sm:$0xff] %vm653_vm5, %v7153_v49  ;;  %7162 = vst.msk [vmem:[#allocation2 + $0x38] sm:$0xff] %vm653_vm5, %v7154_v45  ;;  %v7379_v16 = vpop.permute.xlu1 %7378  ;;  %v7292_v0 = vpop.permute.xlu0 %7291 }
0x12c2   :  { %vm7399_vm14 = vcmp.eq.s32.totalorder %v7379_v16, 1 }
0x12c4   :  { %v7178_v36 = vld [vmem:[#allocation2] sm:$0xff]  ;;  %v7179_v2 = vld [vmem:[#allocation2 + $0x8] sm:$0xff] }
0x12c5   :  { %v7406_v20 = vsel %vm7398_vm13, %v7178_v36, 0.0  ;;  %v7407_v9 = vsel %vm7399_vm14, %v7179_v2, 0.0  ;;  %v7385_v43 = vpop.permute.xlu1 %7384  ;;  %vm7314_vm13 = vcmp.eq.s32.totalorder %v7292_v0, 1 }
0x12c6   :  { %v7414_v29 = vsel %vm653_vm5, %v7406_v20, 0.0  ;;  %v7415_v60 = vsel %vm653_vm5, %v7407_v9, 0.0  ;;  %vm7401_vm15 = vcmp.eq.s32.totalorder %v7385_v43, 1  ;;  %v15604_v57 = vld [vmem:[#allocation2 + $0x20] sm:$0xff]  ;;  %v7183_v45 = vld [vmem:[#allocation2 + $0x28] sm:$0xff] }
0x12c7   :  { %v7416_v26 = vadd.f32 %v7415_v60, %v7414_v29  ;;  %v7180_v30 = vld [vmem:[#allocation2 + $0x10] sm:$0xff]  ;;  %v7181_v44 = vld [vmem:[#allocation2 + $0x18] sm:$0xff]  ;;  %v7410_v35 = vsel %vm7402_vm9, %v15604_v57, 0.0  ;;  %v7298_v29 = vpop.permute.xlu0 %7297 }
0x12c8   :  { %v7408_v58 = vsel %vm7400_vm0, %v7180_v30, 0.0  ;;  %v7409_v19 = vsel %vm7401_vm15, %v7181_v44, 0.0  ;;  %v15610_v16 = vld [vmem:[#allocation2 + $0x30] sm:$0xff]  ;;  %v7432_v3 = vsel %vm653_vm5, %v7410_v35, 0.0  ;;  %v15615_v28 = vld [vmem:[#allocation2 + $0x38] sm:$0xff]  ;;  %vm7316_vm15 = vcmp.eq.s32.totalorder %v7298_v29, 1 }
0x12c9   :  { %v7417_v40 = vrot.slane %v7416_v26, 4  ;;  %v7423_v51 = vsel %vm653_vm5, %v7408_v58, 0.0  ;;  %v7424_v54 = vsel %vm653_vm5, %v7409_v19, 0.0  ;;  %v7391_v49 = vpop.permute.xlu1 %7390  ;;  %v7412_v58 = vsel %vm7404_vm11, %v15610_v16, 0.0 }
0x12ca   :  { %v7425_v5 = vadd.f32 %v7424_v54, %v7423_v51  ;;  %vm7403_vm10 = vcmp.eq.s32.totalorder %v7391_v49, 1 }
0x12cb   :  { %v7411_v31 = vsel %vm7403_vm10, %v7183_v45, 0.0  ;;  %v7418_v20 = vadd.f32 %v7417_v40, %v7416_v26  ;;  %v7441_v40 = vsel %vm653_vm5, %v7412_v58, 0.0 }
0x12cc   :  { %v7426_v9 = vrot.slane %v7425_v5, 4  ;;  %v7433_v43 = vsel %vm653_vm5, %v7411_v31, 0.0 }
0x12cd   :  { %v7434_v60 = vadd.f32 %v7433_v43, %v7432_v3  ;;  %v7397_v19 = vpop.permute.xlu1 %7396  ;;  %v7419_v54 = vrot.slane %v7418_v20, 2  ;;  %v7322_v3 = vsel %vm7314_vm13, %v7178_v36, 0.0 }
0x12ce   :  { %v7427_v61 = vadd.f32 %v7426_v9, %v7425_v5  ;;  %vm7405_vm12 = vcmp.eq.s32.totalorder %v7397_v19, 1  ;;  %v7304_v5 = vpop.permute.xlu0 %7303  ;;  %v7330_v47 = vsel %vm653_vm5, %v7322_v3, 0.0 }
0x12cf   :  { %v7435_v51 = vrot.slane %v7434_v60, 4  ;;  %v7413_v42 = vsel %vm7405_vm12, %v15615_v28, 0.0  ;;  %v7420_v0 = vadd.f32 %v7419_v54, %v7418_v20  ;;  %vm7318_vm9 = vcmp.eq.s32.totalorder %v7304_v5, 1 }
0x12d0   :  { %v7428_v26 = vrot.slane %v7427_v61, 2  ;;  %v7442_v35 = vsel %vm653_vm5, %v7413_v42, 0.0  ;;  %v7324_v42 = vsel %vm7316_vm15, %v7180_v30, 0.0 }
0x12d1   :  { %v7436_v49 = vadd.f32 %v7435_v51, %v7434_v60  ;;  %v7443_v31 = vadd.f32 %v7442_v35, %v7441_v40  ;;  %v7295_v43 = vpop.permute.xlu1 %7294  ;;  %v7421_v35 = vrot.slane %v7420_v0, 1 }
0x12d2   :  { %v7429_v56 = vadd.f32 %v7428_v26, %v7427_v61  ;;  %vm7315_vm14 = vcmp.eq.s32.totalorder %v7295_v43, 1  ;;  %v7310_v29 = vpop.permute.xlu0 %7309 }
0x12d3   :  { %v7437_v9 = vrot.slane %v7436_v49, 2  ;;  %v7444_v50 = vrot.slane %v7443_v31, 4  ;;  %v7323_v19 = vsel %vm7315_vm14, %v7179_v2, 0.0  ;;  %v7339_v2 = vsel %vm653_vm5, %v7324_v42, 0.0 }
0x12d4   :  { %v7331_v62 = vsel %vm653_vm5, %v7323_v19, 0.0  ;;  %v7430_v51 = vrot.slane %v7429_v56, 1  ;;  %vm7320_vm11 = vcmp.eq.s32.totalorder %v7310_v29, 1 }
0x12d5   :  { %v7438_v46 = vadd.f32 %v7437_v9, %v7436_v49  ;;  %v7445_v58 = vadd.f32 %v7444_v50, %v7443_v31  ;;  %v7332_v14 = vadd.f32 %v7331_v62, %v7330_v47  ;;  %v7301_v60 = vpop.permute.xlu1 %7300  ;;  %v7326_v50 = vsel %vm7318_vm9, %v15604_v57, 0.0 }
0x12d6   :  { %vm7317_vm0 = vcmp.eq.s32.totalorder %v7301_v60, 1  ;;  %v7431_v47 = vadd.f32 %v7430_v51, %v7429_v56  ;;  %v7348_v5 = vsel %vm653_vm5, %v7326_v50, 0.0 }
0x12d7   :  { %v7439_v36 = vrot.slane %v7438_v46, 1  ;;  %v7446_v61 = vrot.slane %v7445_v58, 2  ;;  %v7333_v26 = vrot.slane %v7332_v14, 4  ;;  %v7325_v40 = vsel %vm7317_vm0, %v7181_v44, 0.0 }
0x12d8   :  { %v7340_v20 = vsel %vm653_vm5, %v7325_v40, 0.0  ;;  %v7422_v44 = vadd.f32 %v7421_v35, %v7420_v0 }
0x12d9   :  { %v7447_v54 = vadd.f32 %v7446_v61, %v7445_v58  ;;  %v7341_v3 = vadd.f32 %v7340_v20, %v7339_v2  ;;  %v7307_v62 = vpop.permute.xlu1 %7306  ;;  %v7334_v30 = vadd.f32 %v7333_v26, %v7332_v14  ;;  %v7440_v43 = vadd.f32 %v7439_v36, %v7438_v46 }
0x12da   :  { %vm7319_vm10 = vcmp.eq.s32.totalorder %v7307_v62, 1  ;;  %v7328_v58 = vsel %vm7320_vm11, %v15610_v16, 0.0  ;;  %v7526_v14 = vsel %vm959_vm3, %v7431_v47, %v7422_v44 }
0x12db   :  { %v7342_v49 = vrot.slane %v7341_v3, 4  ;;  %v7327_v31 = vsel %vm7319_vm10, %v7183_v45, 0.0  ;;  %v7448_v9 = vrot.slane %v7447_v54, 1  ;;  %v7335_v40 = vrot.slane %v7334_v30, 2 }
0x12dc   :  { %v7349_v19 = vsel %vm653_vm5, %v7327_v31, 0.0  ;;  %v7527_v0 = vsel %vm961_vm4, %v7440_v43, %v7526_v14  ;;  %v7357_v51 = vsel %vm653_vm5, %v7328_v58, 0.0 }
0x12dd   :  { %v7343_v42 = vadd.f32 %v7342_v49, %v7341_v3  ;;  %v7350_v60 = vadd.f32 %v7349_v19, %v7348_v5  ;;  %v7313_v61 = vpop.permute.xlu1 %7312  ;;  %v7449_v57 = vadd.f32 %v7448_v9, %v7447_v54  ;;  %v7336_v29 = vadd.f32 %v7335_v40, %v7334_v30 }
0x12de   :  { %vm7321_vm12 = vcmp.eq.s32.totalorder %v7313_v61, 1 }
0x12df   :  { %v7344_v56 = vrot.slane %v7343_v42, 2  ;;  %v7351_v45 = vrot.slane %v7350_v60, 4  ;;  %v7329_v46 = vsel %vm7321_vm12, %v15615_v28, 0.0  ;;  %v7528_v26 = vsel %vm963_vm6, %v7449_v57, %v7527_v0 }
0x12e0   :  { %v7358_v36 = vsel %vm653_vm5, %v7329_v46, 0.0  ;;  %v7530_v20 = vsel %vm966_vm7, %v7528_v26, 0.0  ;;  %v7337_v49 = vrot.slane %v7336_v29, 1 }
0x12e1   :  { %v7345_v35 = vadd.f32 %v7344_v56, %v7343_v42  ;;  %v7352_v16 = vadd.f32 %v7351_v45, %v7350_v60  ;;  %v7359_v2 = vadd.f32 %v7358_v36, %v7357_v51  ;;  %7531 = vadd.xlane.f32.xlu0 %v7530_v20 }
0x12e2   :  { %v7338_v61 = vadd.f32 %v7337_v49, %v7336_v29 }
0x12e3   :  { %v7353_v54 = vrot.slane %v7352_v16, 2  ;;  %v7360_v3 = vrot.slane %v7359_v2, 4  ;;  %v7346_v50 = vrot.slane %v7345_v35, 1 }
0x12e5   :  { %v7354_v62 = vadd.f32 %v7353_v54, %v7352_v16  ;;  %v7361_v28 = vadd.f32 %v7360_v3, %v7359_v2  ;;  %v7347_v5 = vadd.f32 %v7346_v50, %v7345_v35 }
0x12e7   :  { %v7355_v31 = vrot.slane %v7354_v62, 1  ;;  %v7362_v9 = vrot.slane %v7361_v28, 2  ;;  %v7454_v60 = vsel %vm959_vm3, %v7347_v5, %v7338_v61 }
0x12e9   :  { %v7363_v19 = vadd.f32 %v7362_v9, %v7361_v28  ;;  %v7356_v58 = vadd.f32 %v7355_v31, %v7354_v62 }
0x12eb   :  { %v7364_v14 = vrot.slane %v7363_v19, 1  ;;  %v7455_v56 = vsel %vm961_vm4, %v7356_v58, %v7454_v60 }
0x12ed   :  { %v7365_v42 = vadd.f32 %v7364_v14, %v7363_v19 }
0x12ef   :  { %v7456_v30 = vsel %vm963_vm6, %v7365_v42, %v7455_v56 }
0x12f0   :  { %v7458_v40 = vsel %vm966_vm7, %v7456_v30, 0.0 }
0x12f1   :  { %7459 = vadd.xlane.f32.xlu1 %v7458_v40 }
0x136a   :  { %v7532_v45 = vpop.xlane.xlu0 %7531 }
0x136b   :  { %v7533_v46 = vmul.f32 0.03125, %v7532_v45 }
0x136d   :  { %v7535_v0 = vrot.slane %v7533_v46, 1  ;;  %v7536_v51 = vrot.slane %v7533_v46, 2  ;;  %v7537_v36 = vrot.slane %v7533_v46, 3  ;;  %v15639_v26 = vsub.f32 %v7422_v44, %v7533_v46 }
0x136f   :  { %v15641_v35 = vsub.f32 %v7431_v47, %v7535_v0  ;;  %v15643_v16 = vsub.f32 %v7440_v43, %v7536_v51  ;;  %v15645_v2 = vsub.f32 %v7449_v57, %v7537_v36  ;;  %v7546_v3 = vmul.f32 %v15639_v26, %v15639_v26 }
0x1371   :  { %v7547_v20 = vmul.f32 %v15641_v35, %v15641_v35  ;;  %v7548_v29 = vmul.f32 %v15643_v16, %v15643_v16  ;;  %v7549_v54 = vmul.f32 %v15645_v2, %v15645_v2 }
0x1373   :  { %v7554_v44 = vrot.slane %v7547_v20, 7  ;;  %v7556_v50 = vrot.slane %v7548_v29, 6  ;;  %v7558_v43 = vrot.slane %v7549_v54, 5 }
0x1375   :  { %v7555_v47 = vsel %vm959_vm3, %v7554_v44, %v7546_v3 }
0x1376   :  { %v7557_v57 = vsel %vm961_vm4, %v7556_v50, %v7555_v47 }
0x1377   :  { %v7559_v62 = vsel %vm963_vm6, %v7558_v43, %v7557_v57 }
0x1378   :  { %v7561_v28 = vsel %vm966_vm7, %v7559_v62, 0.0 }
0x1379   :  { %7562 = vadd.xlane.f32.xlu0 %v7561_v28 }
0x137a   :  { %v7460_v49 = vpop.xlane.xlu1 %7459 }
0x137b   :  { %v7461_v31 = vmul.f32 0.03125, %v7460_v49 }
0x137d   :  { %v7463_v9 = vrot.slane %v7461_v31, 1  ;;  %v7464_v19 = vrot.slane %v7461_v31, 2  ;;  %v7465_v14 = vrot.slane %v7461_v31, 3  ;;  %v15659_v60 = vsub.f32 %v7338_v61, %v7461_v31 }
0x137f   :  { %v15661_v56 = vsub.f32 %v7347_v5, %v7463_v9  ;;  %v15663_v30 = vsub.f32 %v7356_v58, %v7464_v19  ;;  %v15665_v40 = vsub.f32 %v7365_v42, %v7465_v14  ;;  %v7474_v51 = vmul.f32 %v15659_v60, %v15659_v60 }
0x1381   :  { %v7475_v45 = vmul.f32 %v15661_v56, %v15661_v56  ;;  %v7476_v46 = vmul.f32 %v15663_v30, %v15663_v30  ;;  %v7477_v0 = vmul.f32 %v15665_v40, %v15665_v40 }
0x1383   :  { %v7482_v61 = vrot.slane %v7475_v45, 7  ;;  %v7484_v36 = vrot.slane %v7476_v46, 6  ;;  %v7486_v58 = vrot.slane %v7477_v0, 5 }
0x1385   :  { %v7483_v5 = vsel %vm959_vm3, %v7482_v61, %v7474_v51 }
0x1386   :  { %v7485_v42 = vsel %vm961_vm4, %v7484_v36, %v7483_v5 }
0x1387   :  { %v7487_v20 = vsel %vm963_vm6, %v7486_v58, %v7485_v42 }
0x1388   :  { %v7489_v29 = vsel %vm966_vm7, %v7487_v20, 0.0 }
0x1389   :  { %7490 = vadd.xlane.f32.xlu0 %v7489_v29  ;;  %v13704_v29 = vld [vmem:[%s16636_s6] ss:$0 sm:$0xff] }
0x1402   :  { %v7563_v54 = vpop.xlane.xlu0 %7562 }
0x1403   :  { %v7564_v3 = vmul.f32 0.032258064, %v7563_v54 }
0x1405   :  { %13609 = vrsqrt.f32 %v7564_v3  ;;  %vm7567_vm13 = vcmp.eq.f32.partialorder %v7564_v3, inf  ;;  %v7570_v57 = vand.u32 2147483648, %v7564_v3  ;;  %vm7569_vm14 = vcmp.eq.f32.partialorder %v7564_v3, 0.0 }
0x1412   :  { %v7491_v44 = vpop.xlane.xlu0 %7490  ;;  %v13610_v47 = vpop.eup %13609 }
0x1413   :  { %v7492_v50 = vmul.f32 0.032258064, %v7491_v44  ;;  %v7566_v43 = vmul.f32 %v13610_v47, %v7564_v3  ;;  %v13705_v47 = vld [vmem:[%s16637_s7] ss:$0 sm:$0xff] }
0x1415   :  { %13611 = vrsqrt.f32 %v7492_v50  ;;  %v7568_v62 = vsel %vm7567_vm13, %v7564_v3, %v7566_v43  ;;  %vm7495_vm15 = vcmp.eq.f32.partialorder %v7492_v50, inf  ;;  %v7498_v19 = vand.u32 2147483648, %v7492_v50 }
0x1416   :  { %v7571_v28 = vsel %vm7569_vm14, %v7570_v57, %v7568_v62  ;;  %vm7497_vm0 = vcmp.eq.f32.partialorder %v7492_v50, 0.0 }
0x1417   :  { %v7572_v49 = vadd.f32 1e-06, %v7571_v28 }
0x1419   :  { %13613 = vrcp.f32 %v7572_v49 }
0x1422   :  { %v13612_v31 = vpop.eup %13611 }
0x1423   :  { %v7494_v9 = vmul.f32 %v13612_v31, %v7492_v50 }
0x1425   :  { %v7496_v14 = vsel %vm7495_vm15, %v7492_v50, %v7494_v9 }
0x1426   :  { %v7499_v45 = vsel %vm7497_vm0, %v7498_v19, %v7496_v14  ;;  %v13614_v0 = vpop.eup %13613 }
0x1427   :  { %v7500_v46 = vadd.f32 1e-06, %v7499_v45  ;;  %v7575_v51 = vrot.slane %v13614_v0, 1  ;;  %v7576_v61 = vrot.slane %v13614_v0, 2  ;;  %v7577_v36 = vrot.slane %v13614_v0, 3 }
0x1428   :  { %v7582_v5 = vmul.f32 %v13614_v0, %v15639_v26 }
0x1429   :  { %13615 = vrcp.f32 %v7500_v46  ;;  %v7583_v58 = vmul.f32 %v7575_v51, %v15641_v35  ;;  %v7584_v42 = vmul.f32 %v7576_v61, %v15643_v16  ;;  %v7585_v20 = vmul.f32 %v7577_v36, %v15645_v2 }
0x142a   :  { %v7586_v54 = vmul.f32 %v13704_v29, %v7582_v5 }
0x142b   :  { %v7587_v3 = vmul.f32 %v13704_v29, %v7583_v58  ;;  %v7588_v44 = vmul.f32 %v13704_v29, %v7584_v42  ;;  %v7589_v50 = vmul.f32 %v13704_v29, %v7585_v20 }
0x142c   :  { %v7590_v35 = vadd.f32 %v13705_v47, %v7586_v54 }
0x142d   :  { %v7591_v43 = vadd.f32 %v13705_v47, %v7587_v3  ;;  %v7592_v26 = vadd.f32 %v13705_v47, %v7588_v44  ;;  %v7593_v57 = vadd.f32 %v13705_v47, %v7589_v50 }
0x142f   :  { %v7598_v62 = vrot.slane %v7591_v43, 7  ;;  %v7600_v16 = vrot.slane %v7592_v26, 6  ;;  %v7602_v28 = vrot.slane %v7593_v57, 5 }
0x1431   :  { %v7599_v2 = vsel %vm959_vm3, %v7598_v62, %v7590_v35 }
0x1432   :  { %v7601_v49 = vsel %vm961_vm4, %v7600_v16, %v7599_v2 }
0x1433   :  { %v7603_v31 = vsel %vm963_vm6, %v7602_v28, %v7601_v49 }
0x1434   :  { %v7604_v19 = vsel %vm653_vm5, %v7603_v31, 0  ;;  %8598 = vrot.lane.b32.xlu1 %v7603_v31, %s13767_s26 }
0x1435   :  { %v15694_v14 = vand.u32 4294901760, %v7604_v19 }
0x1436   :  { %v13616_v9 = vpop.eup %13615 }
0x1437   :  { %v7503_v45 = vrot.slane %v13616_v9, 1  ;;  %v7504_v46 = vrot.slane %v13616_v9, 2  ;;  %v7505_v0 = vrot.slane %v13616_v9, 3  ;;  %v7510_v51 = vmul.f32 %v13616_v9, %v15659_v60  ;;  %13157 = vmatmul.mubr.f32.vlgmr.msra.gmra.mxu1 %v15694_v14  ;;  %v13706_v60 = vld [vmem:[%s16634_s4] ss:$0 sm:$0xff] }
0x1438   :  { %v7676_v61 = vsub.f32 %v7604_v19, %v15694_v14  ;;  %13171 = vmatpush3.msra.mxu1 %v14112_v6  ;;  %13178 = vmatprep.mubr.msk.f32.mxu1 %vm13766_vm8, %v16696_v1 }
0x1439   :  { %v7511_v36 = vmul.f32 %v7503_v45, %v15661_v56  ;;  %v7512_v5 = vmul.f32 %v7504_v46, %v15663_v30  ;;  %v7513_v58 = vmul.f32 %v7505_v0, %v15665_v40  ;;  %13172 = vmatprep.subr.mxu1 %v16696_v1  ;;  %v7514_v20 = vmul.f32 %v13706_v60, %v7510_v51  ;;  %v13707_v40 = vld [vmem:[%s16635_s5] ss:$0 sm:$0xff]  ;;  %v16720_v45 = vld [vmem:[#allocation11_spill] sm:$0xff]  ;;  %v16721_v46 = vld [vmem:[#allocation12_spill] sm:$0xff] }
0x143a   :  { %v7677_v42 = vand.u32 4294901760, %v7676_v61  ;;  %13173 = vmatpush3.msra.mxu1 %v14114_v7 }
0x143b   :  { %v7515_v29 = vmul.f32 %v13706_v60, %v7511_v36  ;;  %v7516_v54 = vmul.f32 %v13706_v60, %v7512_v5  ;;  %v7517_v56 = vmul.f32 %v13706_v60, %v7513_v58  ;;  %13174 = vmatprep.subr.mxu1 %v16696_v1  ;;  %v7518_v47 = vadd.f32 %v13707_v40, %v7514_v20 }
0x143c   :  { %v7678_v30 = vsub.f32 %v7676_v61, %v7677_v42  ;;  %13175 = vmatpush3.msra.mxu1 %v14116_v8 }
0x143d   :  { %v7519_v3 = vadd.f32 %v13707_v40, %v7515_v29  ;;  %v7520_v44 = vadd.f32 %v13707_v40, %v7516_v54  ;;  %13176 = vmatprep.subr.mxu1 %v16696_v1  ;;  %v7521_v57 = vadd.f32 %v13707_v40, %v7517_v56 }
0x143e   :  { %v7679_v50 = vand.u32 4294901760, %v7678_v30  ;;  %13177 = vmatpush3.msra.mxu1 %v14163_v21 }
0x143f   :  { %v8095_v43 = vrot.slane %v7519_v3, 7  ;;  %v8097_v26 = vrot.slane %v7520_v44, 6  ;;  %13179 = vmatmul.mubr.f32.vlgmr.msra.gmra.mxu1 %v7677_v42  ;;  %13192 = vmatprep.subr.mxu1 %v16696_v1  ;;  %v8099_v16 = vrot.slane %v7521_v57, 5 }
0x1440   :  { %13146 = vmatmul.mubr.f32.vlgmr.msra.gmra.mxu0 %v7679_v50  ;;  %13193 = vmatpush3.msra.mxu1 %v14112_v6 }
0x1441   :  { %v8096_v35 = vsel %vm959_vm3, %v8095_v43, %v7518_v47  ;;  %13160 = vmatpush3.msra.mxu0 %v14119_v10  ;;  %13194 = vmatprep.subr.mxu1 %v16696_v1 }
0x1442   :  { %v8098_v62 = vsel %vm961_vm4, %v8097_v26, %v8096_v35  ;;  %13161 = vmatprep.subr.mxu0 %v16696_v1  ;;  %13195 = vmatpush3.msra.mxu1 %v14114_v7 }
0x1443   :  { %13162 = vmatpush3.msra.mxu0 %v14122_v11  ;;  %13196 = vmatprep.subr.mxu1 %v16696_v1  ;;  %v15730_v2 = vsel %vm963_vm6, %v8099_v16, %v8098_v62 }
0x1444   :  { %13163 = vmatprep.subr.mxu0 %v16696_v1  ;;  %13197 = vmatpush3.msra.mxu1 %v14116_v8  ;;  %v8101_v28 = vsel %vm653_vm5, %v15730_v2, 0 }
0x1445   :  { %13164 = vmatpush3.msra.mxu0 %v14125_v24  ;;  %13198 = vmatprep.subr.mxu1 %v16696_v1  ;;  %v15747_v49 = vand.u32 4294901760, %v8101_v28 }
0x1446   :  { %13165 = vmatprep.subr.mxu0 %v16696_v1  ;;  %13167 = vmatprep.mubr.msk.f32.mxu0 %vm13766_vm8, %v16696_v1 }
0x1447   :  { %13166 = vmatpush3.msra.mxu0 %v14166_v38  ;;  %13199 = vmatpush3.msra.mxu1 %v14163_v21  ;;  %v8173_v31 = vsub.f32 %v8101_v28, %v15747_v49 }
0x1448   :  { %13200 = vmatprep.mubr.msk.f32.mxu1 %vm13766_vm8, %v16696_v1  ;;  %13168 = vmatmul.mubr.f32.vlgmr.msra.gmra.mxu0 %v7676_v61 }
0x1449   :  { %13181 = vmatprep.subr.mxu0 %v16696_v1  ;;  %13201 = vmatmul.mubr.f32.vlgmr.msra.gmra.mxu1 %v15694_v14  ;;  %v8174_v9 = vand.u32 4294901760, %v8173_v31 }
0x144a   :  { %13214 = vmatprep.subr.mxu1 %v16696_v1  ;;  %13182 = vmatpush3.msra.mxu0 %v14130_v12 }
0x144b   :  { %13215 = vmatpush3.msra.mxu1 %v14291_v27  ;;  %13183 = vmatprep.subr.mxu0 %v16696_v1  ;;  %v8175_v19 = vsub.f32 %v8173_v31, %v8174_v9 }
0x144c   :  { %13216 = vmatprep.subr.mxu1 %v16696_v1  ;;  %13184 = vmatpush3.msra.mxu0 %v14133_v55 }
0x144d   :  { %13217 = vmatpush3.msra.mxu1 %v14301_v39  ;;  %13185 = vmatprep.subr.mxu0 %v16696_v1 }
0x144e   :  { %13218 = vmatprep.subr.mxu1 %v16696_v1  ;;  %13186 = vmatpush3.msra.mxu0 %v14136_v13 }
0x144f   :  { %13219 = vmatpush3.msra.mxu1 %v14311_v52  ;;  %13187 = vmatprep.subr.mxu0 %v16696_v1 }
0x1450   :  { %13220 = vmatprep.subr.mxu1 %v16696_v1  ;;  %13188 = vmatpush3.msra.mxu0 %v14171_v22 }
0x1451   :  { %13189 = vmatprep.mubr.msk.f32.mxu0 %vm13766_vm8, %v16696_v1  ;;  %13221 = vmatpush3.msra.mxu1 %v14317_v53 }
0x1452   :  { %13222 = vmatprep.mubr.msk.f32.mxu1 %vm13766_vm8, %v16696_v1  ;;  %13190 = vmatmul.mubr.f32.vlgmr.msra.gmra.mxu0 %v15694_v14  ;;  %v8176_v14 = vand.u32 4294901760, %v8175_v19 }
0x1453   :  { %13203 = vmatprep.subr.mxu0 %v16696_v1  ;;  %13223 = vmatmul.mubr.f32.vlgmr.msra.gmra.mxu1 %v15747_v49 }
0x1454   :  { %13236 = vmatprep.subr.mxu1 %v16696_v1  ;;  %13204 = vmatpush3.msra.mxu0 %v14218_v59 }
0x1455   :  { %13237 = vmatpush3.msra.mxu1 %v14218_v59  ;;  %13205 = vmatprep.subr.mxu0 %v16696_v1 }
0x1456   :  { %13238 = vmatprep.subr.mxu1 %v16696_v1  ;;  %13206 = vmatpush3.msra.mxu0 %v14227_v63 }
0x1457   :  { %13239 = vmatpush3.msra.mxu1 %v14227_v63  ;;  %13207 = vmatprep.subr.mxu0 %v16696_v1 }
0x1458   :  { %13240 = vmatprep.subr.mxu1 %v16696_v1  ;;  %13208 = vmatpush3.msra.mxu0 %v14237_v23 }
0x1459   :  { %13241 = vmatpush3.msra.mxu1 %v14237_v23  ;;  %13209 = vmatprep.subr.mxu0 %v16696_v1 }
0x145a   :  { %13242 = vmatprep.subr.mxu1 %v16696_v1  ;;  %13210 = vmatpush3.msra.mxu0 %v14244_v25 }
0x145b   :  { %13211 = vmatprep.mubr.msk.f32.mxu0 %vm13766_vm8, %v16696_v1  ;;  %13243 = vmatpush3.msra.mxu1 %v14244_v25 }
0x145c   :  { %13244 = vmatprep.mubr.msk.f32.mxu1 %vm13766_vm8, %v16696_v1  ;;  %13212 = vmatmul.mubr.f32.vlgmr.msra.gmra.mxu0 %v8176_v14 }
0x145d   :  { %13225 = vmatprep.subr.mxu0 %v16696_v1  ;;  %13245 = vmatmul.mubr.f32.vlgmr.msra.gmra.mxu1 %v8174_v9 }
0x145e   :  { %13258 = vmatprep.subr.mxu1 %v16696_v1  ;;  %13226 = vmatpush3.msra.mxu0 %v14235_v4 }
0x145f   :  { %13259 = vmatpush3.msra.mxu1 %v14218_v59  ;;  %13227 = vmatprep.subr.mxu0 %v16696_v1 }
0x1460   :  { %13260 = vmatprep.subr.mxu1 %v16696_v1  ;;  %13228 = vmatpush3.msra.mxu0 %v14242_v15 }
0x1461   :  { %13261 = vmatpush3.msra.mxu1 %v14227_v63  ;;  %13229 = vmatprep.subr.mxu0 %v16696_v1 }
0x1462   :  { %13262 = vmatprep.subr.mxu1 %v16696_v1  ;;  %13230 = vmatpush3.msra.mxu0 %v14253_v33 }
0x1463   :  { %13263 = vmatpush3.msra.mxu1 %v14237_v23  ;;  %13231 = vmatprep.subr.mxu0 %v16696_v1 }
0x1464   :  { %13264 = vmatprep.subr.mxu1 %v16696_v1  ;;  %13232 = vmatpush3.msra.mxu0 %v14262_v34 }
0x1465   :  { %13233 = vmatprep.mubr.msk.f32.mxu0 %vm13766_vm8, %v16696_v1  ;;  %13265 = vmatpush3.msra.mxu1 %v14244_v25 }
0x1466   :  { %13266 = vmatprep.mubr.msk.f32.mxu1 %vm13766_vm8, %v16696_v1  ;;  %13234 = vmatmul.mubr.f32.vlgmr.msra.gmra.mxu0 %v8173_v31 }
0x1467   :  { %13247 = vmatprep.subr.mxu0 %v16696_v1  ;;  %13267 = vmatmul.mubr.f32.vlgmr.msra.gmra.mxu1 %v15747_v49 }
0x1468   :  { %13248 = vmatpush3.msra.mxu0 %v14250_v32  ;;  %13255 = vmatprep.mubr.msk.f32.mxu0 %vm13766_vm8, %v16696_v1 }
0x1469   :  { %13249 = vmatprep.subr.mxu0 %v16696_v1  ;;  %13280 = vmatprep.subr.mxu1 %v16696_v1 }
0x146a   :  { %13250 = vmatpush3.msra.mxu0 %v14259_v37  ;;  %13281 = vmatpush3.msra.mxu1 %v14148_v17 }
0x146b   :  { %13251 = vmatprep.subr.mxu0 %v16696_v1  ;;  %13282 = vmatprep.subr.mxu1 %v16696_v1 }
0x146c   :  { %13252 = vmatpush3.msra.mxu0 %v14272_v41  ;;  %13283 = vmatpush3.msra.mxu1 %v14150_v18 }
0x146d   :  { %13253 = vmatprep.subr.mxu0 %v16696_v1  ;;  %13284 = vmatprep.subr.mxu1 %v16696_v1 }
0x146e   :  { %13254 = vmatpush3.msra.mxu0 %v14284_v48  ;;  %13285 = vmatpush3.msra.mxu1 %v16720_v45 }
0x146f   :  { %13256 = vmatmul.mubr.f32.vlgmr.msra.gmra.mxu0 %v15747_v49  ;;  %13286 = vmatprep.subr.mxu1 %v16696_v1 }
0x1470   :  { %13287 = vmatpush3.msra.mxu1 %v16721_v46  ;;  %13269 = vmatprep.subr.mxu0 %v16696_v1 }
0x1471   :  { %13288 = vmatprep.mubr.msk.f32.mxu1 %vm13766_vm8, %v16696_v1  ;;  %13302 = vmatprep.subr.mxu1 %v16696_v1 }
0x1472   :  { %13270 = vmatpush3.msra.mxu0 %v14112_v6  ;;  %13277 = vmatprep.mubr.msk.f32.mxu0 %vm13766_vm8, %v16696_v1 }
0x1473   :  { %13271 = vmatprep.subr.mxu0 %v16696_v1 }
0x1474   :  { %13272 = vmatpush3.msra.mxu0 %v14114_v7 }
0x1475   :  { %13273 = vmatprep.subr.mxu0 %v16696_v1 }
0x1476   :  { %13274 = vmatpush3.msra.mxu0 %v14116_v8 }
0x1477   :  { %13275 = vmatprep.subr.mxu0 %v16696_v1 }
0x1478   :  { %13276 = vmatpush3.msra.mxu0 %v14163_v21 }
0x1479   :  { %13291 = vmatprep.subr.mxu0 %v16696_v1 }
0x14f7   :  { %v7772_v0 = vpop.f32.mrf.mxu1 }
0x14f9   :  { %v13158_v51 = vpop.f32.mrf.mxu1 }
0x14ff   :  { %v7929_v61 = vpop.f32.mrf.mxu1 }
0x1500   :  { %v7681_v36 = vpop.f32.mrf.mxu0 }
0x1501   :  { %v13180_v5 = vpop.f32.mrf.mxu1  ;;  %v7773_v3 = vadd.f32 %v7772_v0, %v7681_v36 }
0x1502   :  { %v13147_v58 = vpop.f32.mrf.mxu0 }
0x1508   :  { %v7852_v42 = vpop.f32.mrf.mxu0 }
0x1509   :  { %v8087_v60 = vpop.f32.mrf.mxu1  ;;  %v7853_v44 = vadd.f32 %v7852_v42, %v7773_v3  ;;  %v12076_v3 = vld.sshfl [vmem:[%s16630_s0 + $0x50] sm:$0x33 pattern:$0x75316420] }
0x150a   :  { %v13169_v20 = vpop.f32.mrf.mxu0 }
0x150b   :  { %v13202_v29 = vpop.f32.mrf.mxu1  ;;  %v7930_v50 = vadd.f32 %v7929_v61, %v7853_v44  ;;  %v13708_v61 = vld [vmem:[%s16640_s10] ss:$0 sm:$0xff]  ;;  %v16722_v44 = vld [vmem:[#allocation8_spill] sm:$0xff] }
0x1512   :  { %v8012_v54 = vpop.f32.mrf.mxu0 }
0x1513   :  { %v8269_v56 = vpop.f32.mrf.mxu1  ;;  %v8013_v26 = vadd.f32 %v8012_v54, %v7930_v50  ;;  %v8644_v50 = vrot.slane %v12076_v3, %v16722_v44 }
0x1514   :  { %v13191_v30 = vpop.f32.mrf.mxu0 }
0x1515   :  { %v13224_v40 = vpop.f32.mrf.mxu1  ;;  %v8088_v62 = vadd.f32 %v8087_v60, %v8013_v26  ;;  %v8599_v30 = vpop.permute.xlu1 %8598 }
0x151c   :  { %v8178_v47 = vpop.f32.mrf.mxu0 }
0x151d   :  { %v8426_v43 = vpop.f32.mrf.mxu1  ;;  %v8179_v16 = vadd.f32 %v8178_v47, %v8088_v62  ;;  %v8637_v47 = vcombine.high %v12076_v3, %v12076_v3 }
0x151e   :  { %v13213_v57 = vpop.f32.mrf.mxu0 }
0x151f   :  { %v13246_v35 = vpop.f32.mrf.mxu1  ;;  %v8270_v31 = vadd.f32 %v8269_v56, %v8179_v16  ;;  %v8651_v57 = vrot.slane %v8637_v47, %v16722_v44  ;;  %v16724_v16 = vld [vmem:[#allocation10_spill] sm:$0xff] }
0x1526   :  { %v8349_v28 = vpop.f32.mrf.mxu0 }
0x1527   :  { %v8584_v49 = vpop.f32.mrf.mxu1  ;;  %v8350_v14 = vadd.f32 %v8349_v28, %v8270_v31 }
0x1528   :  { %v13235_v9 = vpop.f32.mrf.mxu0 }
0x1529   :  { %v13268_v19 = vpop.f32.mrf.mxu1  ;;  %v8427_v51 = vadd.f32 %v8426_v43, %v8350_v14  ;;  %v16723_v43 = vld [vmem:[#allocation9_spill] sm:$0xff] }
0x152a   :  { %v8657_v26 = vrot.slane %v8644_v50, %v16723_v43  ;;  %v8661_v28 = vrot.slane %v8651_v57, %v16723_v43 }
0x152c   :  { %vm8671_vm9 = vcmp.eq.s32.totalorder %v16724_v16, %v8657_v26  ;;  %vm8673_vm10 = vcmp.eq.s32.totalorder %v16724_v16, %v8661_v28 }
0x152f   :  { %v8509_v5 = vpop.f32.mrf.mxu0 }
0x1530   :  { %v8510_v58 = vadd.f32 %v8509_v5, %v8427_v51 }
0x1531   :  { %v13257_v20 = vpop.f32.mrf.mxu0 }
0x1532   :  { %v8585_v0 = vadd.f32 %v8584_v49, %v8510_v58  ;;  %v16725_v49 = vmov 0   ;;  %v16726_v20 = vld [vmem:[#allocation7_spill] sm:$0xff] }
0x1533   :  { %v8704_v31 = vsel %vm8671_vm9, 1, %v16725_v49  ;;  %v8706_v9 = vsel %vm8673_vm10, 1, %v16725_v49  ;;  %vm8670_vm11 = vcmp.eq.s32.totalorder %v16726_v20, %v8657_v26  ;;  %vm8672_vm12 = vcmp.eq.s32.totalorder %v16726_v20, %v8661_v28 }
0x1534   :  { %v8588_v36 = vadd.f32 %v13708_v61, %v8585_v0  ;;  %v8652_v0 = vcombine.high %v8644_v50, %v8644_v50 }
0x1536   :  { %v12075_v42 = vmul.f32 -1.442695, %v8588_v36  ;;  %13617 = vtanh.f32 %v8588_v36  ;;  %v8703_v36 = vsel %vm8670_vm11, 1, %v16725_v49 }
0x1538   :  { %13619 = vpow2.f32 %v12075_v42  ;;  %v8665_v42 = vrot.slane %v8652_v0, %v16723_v43 }
0x153a   :  { %vm8674_vm13 = vcmp.eq.s32.totalorder %v16726_v20, %v8665_v42 }
0x153b   :  { %v8707_v3 = vsel %vm8674_vm13, 1, %v16725_v49 }
0x1543   :  { %v13618_v60 = vpop.eup %13617 }
0x1544   :  { %8608 = vrot.lane.b32.xlu0 %v13618_v60, %s13768_s16  ;;  %v8653_v60 = vcombine.high %v8651_v57, %v8651_v57 }
0x1545   :  { %v13620_v29 = vpop.eup %13619 }
0x1546   :  { %v8592_v54 = vadd.f32 1.0, %v13620_v29  ;;  %v8705_v29 = vsel %vm8672_vm12, 1, %v16725_v49 }
0x1548   :  { %13621 = vrcp.f32 %v8592_v54  ;;  %v8669_v54 = vrot.slane %v8653_v60, %v16723_v43 }
0x154a   :  { %vm8676_vm14 = vcmp.eq.s32.totalorder %v16726_v20, %v8669_v54 }
0x154b   :  { %v8709_v26 = vsel %vm8676_vm14, 1, %v16725_v49 }
0x1555   :  { %v15847_v56 = vpop.eup %13621 }
0x1556   :  { %v8601_v40 = vmul.f32 %v15847_v56, %v8599_v30  ;;  %v8597_v14 = vmul.f32 %v15847_v56, %v15730_v2  ;;  %v12082_v2 = vld.sshfl [vmem:[%s16630_s0 + $0x34] sm:$0x33 pattern:$0x75316420] }
0x1557   :  { %v8864_v30 = vrot.slane %v12082_v2, %v16722_v44 }
0x1558   :  { %8603 = vrot.lane.b32.xlu1 %v8601_v40, %s13769_s17  ;;  %v8857_v40 = vcombine.high %v12082_v2, %v12082_v2 }
0x1559   :  { %v8877_v50 = vrot.slane %v8864_v30, %v16723_v43 }
0x155a   :  { %v8871_v47 = vrot.slane %v8857_v40, %v16722_v44 }
0x155b   :  { %vm8890_vm15 = vcmp.eq.s32.totalorder %v16726_v20, %v8877_v50 }
0x155c   :  { %v8881_v57 = vrot.slane %v8871_v47, %v16723_v43 }
0x155e   :  { %vm8892_vm0 = vcmp.eq.s32.totalorder %v16726_v20, %v8881_v57 }
0x15b6   :  { %v8609_v35 = vpop.permute.xlu0 %8608 }
0x15b7   :  { %v8611_v62 = vmul.f32 %v15847_v56, %v8609_v35  ;;  %v8872_v35 = vcombine.high %v8864_v30, %v8864_v30 }
0x15b9   :  { %8613 = vrot.lane.b32.xlu1 %v8611_v62, %s13767_s26  ;;  %v8982_v62 = vsel %vm8890_vm15, 1, %v16725_v49  ;;  %v8885_v28 = vrot.slane %v8872_v35, %v16723_v43  ;;  %vm8675_vm15 = vcmp.eq.s32.totalorder %v16724_v16, %v8665_v42 }
0x15bb   :  { %vm8894_vm9 = vcmp.eq.s32.totalorder %v16726_v20, %v8885_v28 }
0x15bc   :  { %v8986_v0 = vsel %vm8894_vm9, 1, %v16725_v49  ;;  %vm8891_vm9 = vcmp.eq.s32.totalorder %v16724_v16, %v8877_v50 }
0x15bd   :  { %8715 = vperm.xlu1 %13544, %v8704_v31   ;;  %v8873_v31 = vcombine.high %v8871_v47, %v8871_v47 }
0x15c1   :  { %8721 = vperm.xlu1 %13544, %v8706_v9   ;;  %v12081_v9 = vld.sshfl [vmem:[%s16630_s0 + $0x14] sm:$0x33 pattern:$0x75316420] }
0x15ca   :  { %v8604_v19 = vpop.permute.xlu1 %8603 }
0x15cb   :  { %v8606_v51 = vadd.f32 %v8604_v19, %v8597_v14  ;;  %v8984_v19 = vsel %vm8892_vm0, 1, %v16725_v49  ;;  %v8889_v14 = vrot.slane %v8873_v31, %v16723_v43  ;;  %vm8677_vm0 = vcmp.eq.s32.totalorder %v16724_v16, %v8669_v54 }
0x15cd   :  { %vm8896_vm10 = vcmp.eq.s32.totalorder %v16726_v20, %v8889_v14 }
0x15ce   :  { %v8988_v60 = vsel %vm8896_vm10, 1, %v16725_v49  ;;  %vm8893_vm10 = vcmp.eq.s32.totalorder %v16724_v16, %v8881_v57 }
0x162b   :  { %v8614_v5 = vpop.permute.xlu1 %8613 }
0x162c   :  { %v15866_v58 = vadd.f32 %v8614_v5, %v8606_v51  ;;  %v8816_v51 = vrot.slane %v12081_v9, %v16722_v44  ;;  %v8809_v5 = vcombine.high %v12081_v9, %v12081_v9 }
0x162e   :  { %13623 = vtanh.f32 %v15866_v58 }
0x163b   :  { %v13624_v61 = vpop.eup %13623 }
0x163c   :  { %8619 = vrot.lane.b32.xlu0 %v13624_v61, %s13770_s20  ;;  %v8829_v61 = vrot.slane %v8816_v51, %v16723_v43 }
0x163e   :  { %vm8842_vm11 = vcmp.eq.s32.totalorder %v16726_v20, %v8829_v61 }
0x163f   :  { %v8898_v30 = vsel %vm8842_vm11, 1, %v16725_v49  ;;  %vm8895_vm11 = vcmp.eq.s32.totalorder %v16724_v16, %v8885_v28 }
0x1640   :  { %8712 = vperm.xlu0 %13543, %v8703_v36   ;;  %v8823_v36 = vrot.slane %v8809_v5, %v16722_v44  ;;  %v8983_v5 = vsel %vm8891_vm9, 1, %v16725_v49  ;;  %v8987_v42 = vsel %vm8895_vm11, 1, %v16725_v49 }
0x1642   :  { %v8833_v2 = vrot.slane %v8823_v36, %v16723_v43 }
0x1644   :  { %8718 = vperm.xlu0 %13543, %v8705_v29   ;;  %v8824_v29 = vcombine.high %v8816_v51, %v8816_v51  ;;  %vm8844_vm12 = vcmp.eq.s32.totalorder %v16726_v20, %v8833_v2  ;;  %v8710_v51 = vsel %vm8677_vm0, 1, %v16725_v49 }
0x1645   :  { %v8900_v47 = vsel %vm8844_vm12, 1, %v16725_v49  ;;  %vm8897_vm12 = vcmp.eq.s32.totalorder %v16724_v16, %v8889_v14 }
0x1646   :  { %v8837_v40 = vrot.slane %v8824_v29, %v16723_v43  ;;  %v8989_v54 = vsel %vm8897_vm12, 1, %v16725_v49 }
0x1648   :  { %8724 = vperm.xlu0 %13543, %v8707_v3   ;;  %v8825_v3 = vcombine.high %v8823_v36, %v8823_v36  ;;  %vm8846_vm13 = vcmp.eq.s32.totalorder %v16726_v20, %v8837_v40  ;;  %v8716_v36 = vpop.permute.xlu1 %8715 }
0x1649   :  { %v8902_v35 = vsel %vm8846_vm13, 1, %v16725_v49  ;;  %vm8843_vm13 = vcmp.eq.s32.totalorder %v16724_v16, %v8829_v61  ;;  %vm8736_vm9 = vcmp.eq.s32.totalorder %v8716_v36, 1  ;;  %v13711_v36 = vld [vmem:[#allocation2 + $0x20] sm:$0xff] }
0x164a   :  { %v8899_v50 = vsel %vm8843_vm13, 1, %v16725_v49 }
0x164c   :  { %8730 = vperm.xlu0 %13543, %v8709_v26   ;;  %v8841_v26 = vrot.slane %v8825_v3, %v16723_v43  ;;  %v8722_v29 = vpop.permute.xlu1 %8721 }
0x164e   :  { %vm8848_vm14 = vcmp.eq.s32.totalorder %v16726_v20, %v8841_v26  ;;  %vm8849_vm0 = vcmp.eq.s32.totalorder %v16724_v16, %v8841_v26 }
0x164f   :  { %v8905_v14 = vsel %vm8849_vm0, 1, %v16725_v49 }
0x1650   :  { %8991 = vperm.xlu0 %13543, %v8982_v62   ;;  %v8904_v62 = vsel %vm8848_vm14, 1, %v16725_v49  ;;  %vm8845_vm14 = vcmp.eq.s32.totalorder %v16724_v16, %v8833_v2 }
0x1651   :  { %v8901_v57 = vsel %vm8845_vm14, 1, %v16725_v49 }
0x1654   :  { %8997 = vperm.xlu0 %13543, %v8984_v19   ;;  %v8708_v19 = vsel %vm8675_vm15, 1, %v16725_v49  ;;  %vm8847_vm15 = vcmp.eq.s32.totalorder %v16724_v16, %v8837_v40 }
0x1655   :  { %v8903_v28 = vsel %vm8847_vm15, 1, %v16725_v49 }
0x1658   :  { %9003 = vperm.xlu0 %13543, %v8986_v0  }
0x165c   :  { %9009 = vperm.xlu0 %13543, %v8988_v60  }
0x1660   :  { %8907 = vperm.xlu0 %13543, %v8898_v30  }
0x1664   :  { %8913 = vperm.xlu0 %13543, %v8900_v47  }
0x1668   :  { %8919 = vperm.xlu0 %13543, %v8902_v35  }
0x166c   :  { %8925 = vperm.xlu0 %13543, %v8904_v62  }
0x16ae   :  { %v8620_v31 = vpop.permute.xlu0 %8619 }
0x16af   :  { %v8622_v9 = vmul.f32 %v15847_v56, %v8620_v31  ;;  %v8985_v56 = vsel %vm8893_vm10, 1, %v16725_v49  ;;  %vm8738_vm10 = vcmp.eq.s32.totalorder %v8722_v29, 1 }
0x16b1   :  { %8624 = vrot.lane.b32.xlu1 %v8622_v9, %s13771_s24 }
0x16b5   :  { %8727 = vperm.xlu1 %13544, %v8708_v19  }
0x16b9   :  { %8733 = vperm.xlu1 %13544, %v8710_v51  }
0x16bb   :  { %v8713_v0 = vpop.permute.xlu0 %8712 }
0x16bc   :  { %vm8735_vm11 = vcmp.eq.s32.totalorder %v8713_v0, 1 }
0x16bd   :  { %8994 = vperm.xlu1 %13544, %v8983_v5  }
0x16bf   :  { %v8719_v61 = vpop.permute.xlu0 %8718 }
0x16c0   :  { %vm8737_vm12 = vcmp.eq.s32.totalorder %v8719_v61, 1 }
0x16c1   :  { %9000 = vperm.xlu1 %13544, %v8985_v56   ;;  %v13709_v56 = vld [vmem:[#allocation2] sm:$0xff] }
0x16c3   :  { %v8725_v60 = vpop.permute.xlu0 %8724 }
0x16c4   :  { %vm8739_vm13 = vcmp.eq.s32.totalorder %v8725_v60, 1  ;;  %v13713_v60 = vld [vmem:[#allocation2 + $0x10] sm:$0xff] }
0x16c5   :  { %9006 = vperm.xlu1 %13544, %v8987_v42  }
0x16c7   :  { %v8731_v2 = vpop.permute.xlu0 %8730 }
0x16c8   :  { %vm8741_vm0 = vcmp.eq.s32.totalorder %v8731_v2, 1 }
0x16c9   :  { %9012 = vperm.xlu1 %13544, %v8989_v54   ;;  %v13710_v54 = vld [vmem:[#allocation2 + $0x8] sm:$0xff] }
0x16cb   :  { %v8992_v40 = vpop.permute.xlu0 %8991 }
0x16cd   :  { %8910 = vperm.xlu1 %13544, %v8899_v50  }
0x16cf   :  { %v15939_v3 = vpop.permute.xlu0 %8997 }
0x16d1   :  { %8916 = vperm.xlu1 %13544, %v8901_v57  }
0x16d5   :  { %8922 = vperm.xlu1 %13544, %v8903_v28  }
0x16d9   :  { %8928 = vperm.xlu1 %13544, %v8905_v14  }
0x1723   :  { %v8625_v30 = vpop.permute.xlu1 %8624 }
0x1724   :  { %8627 = vst.msk [vmem:[#allocation3] sm:$0xf] %vm2168_vm1, %v8625_v30  ;;  %v13712_v30 = vld [vmem:[#allocation2 + $0x28] sm:$0xff] }
0x1725   :  { %8628 = vst.msk [vmem:[#allocation3] sm:$0xf] %vm2170_vm2, %v15866_v58  ;;  %v9004_v58 = vpop.permute.xlu0 %9003 }
0x172c   :  { %v15941_v47 = vld [vmem:[#allocation3] sm:$0xf] }
0x172d   :  { %16727 = vst [vmem:[#allocation17_spill] sm:$0xff] %v15941_v47  ;;  %v8685_v26 = vrot.slane %v15941_v47, %v16722_v44 }
0x172f   :  { %v8693_v35 = vrot.slane %v8685_v26, %v16722_v44  ;;  %v8686_v62 = vcombine.high %v8685_v26, %v8685_v26 }
0x1730   :  { %v8728_v31 = vpop.permute.xlu1 %8727 }
0x1731   :  { %v8701_v9 = vcombine.high %v8693_v35, %v8693_v35  ;;  %v8746_v19 = vrot.slane %v8693_v35, %v16723_v43  ;;  %v8700_v51 = vrot.slane %v8686_v62, %v16722_v44  ;;  %vm8740_vm14 = vcmp.eq.s32.totalorder %v8728_v31, 1 }
0x1733   :  { %v8754_v5 = vrot.slane %v8701_v9, %v16723_v43  ;;  %v8763_v42 = vsel %vm8735_vm11, %v8746_v19, %v13709_v56  ;;  %v8764_v50 = vsel %vm8736_vm9, %v8746_v19, %v13710_v54  ;;  %v8702_v57 = vcombine.high %v8700_v51, %v8700_v51  ;;  %v13714_v9 = vld [vmem:[#allocation2 + $0x18] sm:$0xff]  ;;  %v13715_v19 = vld [vmem:[#allocation2 + $0x30] sm:$0xff] }
0x1734   :  { %8771 = vst.msk [vmem:[#allocation2] sm:$0xff] %vm653_vm5, %v8763_v42  ;;  %8772 = vst.msk [vmem:[#allocation2 + $0x8] sm:$0xff] %vm653_vm5, %v8764_v50  ;;  %v8750_v28 = vrot.slane %v8700_v51, %v16723_v43  ;;  %v8734_v14 = vpop.permute.xlu1 %8733  ;;  %v9010_v42 = vpop.permute.xlu0 %9009  ;;  %vm9014_vm9 = vcmp.eq.s32.totalorder %v8992_v40, 1 }
0x1735   :  { %v8767_v0 = vsel %vm8739_vm13, %v8754_v5, %v13711_v36  ;;  %v8768_v26 = vsel %vm8740_vm14, %v8754_v5, %v13712_v30  ;;  %v8758_v35 = vrot.slane %v8702_v57, %v16723_v43  ;;  %vm8742_vm15 = vcmp.eq.s32.totalorder %v8734_v14, 1  ;;  %v13716_v5 = vld [vmem:[#allocation2 + $0x38] sm:$0xff] }
0x1736   :  { %8775 = vst.msk [vmem:[#allocation2 + $0x20] sm:$0xff] %vm653_vm5, %v8767_v0  ;;  %8776 = vst.msk [vmem:[#allocation2 + $0x28] sm:$0xff] %vm653_vm5, %v8768_v26  ;;  %v8765_v62 = vsel %vm8737_vm12, %v8750_v28, %v13713_v60  ;;  %v8766_v31 = vsel %vm8738_vm10, %v8750_v28, %v13714_v9  ;;  %vm9016_vm12 = vcmp.eq.s32.totalorder %v15939_v3, 1  ;;  %vm9018_vm13 = vcmp.eq.s32.totalorder %v9004_v58, 1 }
0x1737   :  { %v8769_v51 = vsel %vm8741_vm0, %v8758_v35, %v13715_v19  ;;  %8773 = vst.msk [vmem:[#allocation2 + $0x10] sm:$0xff] %vm653_vm5, %v8765_v62  ;;  %8774 = vst.msk [vmem:[#allocation2 + $0x18] sm:$0xff] %vm653_vm5, %v8766_v31  ;;  %v8770_v56 = vsel %vm8742_vm15, %v8758_v35, %v13716_v5  ;;  %vm9020_vm15 = vcmp.eq.s32.totalorder %v9010_v42, 1 }
0x1738   :  { %8777 = vst.msk [vmem:[#allocation2 + $0x30] sm:$0xff] %vm653_vm5, %v8769_v51  ;;  %8778 = vst.msk [vmem:[#allocation2 + $0x38] sm:$0xff] %vm653_vm5, %v8770_v56  ;;  %v8995_v2 = vpop.permute.xlu1 %8994  ;;  %v8908_v0 = vpop.permute.xlu0 %8907 }
0x1739   :  { %vm9015_vm11 = vcmp.eq.s32.totalorder %v8995_v2, 1 }
0x173b   :  { %v8794_v61 = vld [vmem:[#allocation2] sm:$0xff]  ;;  %v8795_v54 = vld [vmem:[#allocation2 + $0x8] sm:$0xff] }
0x173c   :  { %v9022_v29 = vsel %vm9014_vm9, %v8794_v61, 0.0  ;;  %v9023_v50 = vsel %vm9015_vm11, %v8795_v54, 0.0  ;;  %v9001_v57 = vpop.permute.xlu1 %9000  ;;  %vm8930_vm9 = vcmp.eq.s32.totalorder %v8908_v0, 1 }
0x173d   :  { %v9030_v28 = vsel %vm653_vm5, %v9022_v29, 0.0  ;;  %v9031_v14 = vsel %vm653_vm5, %v9023_v50, 0.0  ;;  %vm9017_vm10 = vcmp.eq.s32.totalorder %v9001_v57, 1  ;;  %v15963_v36 = vld [vmem:[#allocation2 + $0x20] sm:$0xff]  ;;  %v8799_v56 = vld [vmem:[#allocation2 + $0x28] sm:$0xff] }
0x173e   :  { %v9032_v30 = vadd.f32 %v9031_v14, %v9030_v28  ;;  %v8796_v26 = vld [vmem:[#allocation2 + $0x10] sm:$0xff]  ;;  %v8797_v35 = vld [vmem:[#allocation2 + $0x18] sm:$0xff]  ;;  %v9026_v19 = vsel %vm9018_vm13, %v15963_v36, 0.0  ;;  %v8914_v28 = vpop.permute.xlu0 %8913 }
0x173f   :  { %v9024_v40 = vsel %vm9016_vm12, %v8796_v26, 0.0  ;;  %v9025_v60 = vsel %vm9017_vm10, %v8797_v35, 0.0  ;;  %v15969_v2 = vld [vmem:[#allocation2 + $0x30] sm:$0xff]  ;;  %v9048_v58 = vsel %vm653_vm5, %v9026_v19, 0.0  ;;  %v15974_v20 = vld [vmem:[#allocation2 + $0x38] sm:$0xff]  ;;  %vm8932_vm10 = vcmp.eq.s32.totalorder %v8914_v28, 1 }
0x1740   :  { %v9033_v62 = vrot.slane %v9032_v30, 4  ;;  %v9039_v9 = vsel %vm653_vm5, %v9024_v40, 0.0  ;;  %v9040_v31 = vsel %vm653_vm5, %v9025_v60, 0.0  ;;  %v9007_v51 = vpop.permute.xlu1 %9006  ;;  %v9028_v40 = vsel %vm9020_vm15, %v15969_v2, 0.0 }
0x1741   :  { %v9041_v5 = vadd.f32 %v9040_v31, %v9039_v9  ;;  %vm9019_vm14 = vcmp.eq.s32.totalorder %v9007_v51, 1 }
0x1742   :  { %v9027_v3 = vsel %vm9019_vm14, %v8799_v56, 0.0  ;;  %v9034_v29 = vadd.f32 %v9033_v62, %v9032_v30  ;;  %v9057_v62 = vsel %vm653_vm5, %v9028_v40, 0.0 }
0x1743   :  { %v9042_v50 = vrot.slane %v9041_v5, 4  ;;  %v9049_v57 = vsel %vm653_vm5, %v9027_v3, 0.0 }
0x1744   :  { %v9050_v14 = vadd.f32 %v9049_v57, %v9048_v58  ;;  %v9013_v60 = vpop.permute.xlu1 %9012  ;;  %v9035_v31 = vrot.slane %v9034_v29, 2  ;;  %v8938_v58 = vsel %vm8930_vm9, %v8794_v61, 0.0 }
0x1745   :  { %v9043_v47 = vadd.f32 %v9042_v50, %v9041_v5  ;;  %vm9021_vm0 = vcmp.eq.s32.totalorder %v9013_v60, 1  ;;  %v8920_v5 = vpop.permute.xlu0 %8919  ;;  %v8946_v43 = vsel %vm653_vm5, %v8938_v58, 0.0 }
0x1746   :  { %v9051_v9 = vrot.slane %v9050_v14, 4  ;;  %v9029_v42 = vsel %vm9021_vm0, %v15974_v20, 0.0  ;;  %v9036_v0 = vadd.f32 %v9035_v31, %v9034_v29  ;;  %vm8934_vm13 = vcmp.eq.s32.totalorder %v8920_v5, 1 }
0x1747   :  { %v9044_v30 = vrot.slane %v9043_v47, 2  ;;  %v9058_v19 = vsel %vm653_vm5, %v9029_v42, 0.0  ;;  %v8940_v42 = vsel %vm8932_vm10, %v8796_v26, 0.0 }
0x1748   :  { %v9052_v51 = vadd.f32 %v9051_v9, %v9050_v14  ;;  %v9059_v3 = vadd.f32 %v9058_v19, %v9057_v62  ;;  %v8911_v57 = vpop.permute.xlu1 %8910  ;;  %v9037_v19 = vrot.slane %v9036_v0, 1 }
0x1749   :  { %v9045_v49 = vadd.f32 %v9044_v30, %v9043_v47  ;;  %vm8931_vm11 = vcmp.eq.s32.totalorder %v8911_v57, 1  ;;  %v8926_v28 = vpop.permute.xlu0 %8925 }
0x174a   :  { %v9053_v50 = vrot.slane %v9052_v51, 2  ;;  %v9060_v16 = vrot.slane %v9059_v3, 4  ;;  %v8939_v60 = vsel %vm8931_vm11, %v8795_v54, 0.0  ;;  %v8955_v54 = vsel %vm653_vm5, %v8940_v42, 0.0 }
0x174b   :  { %v8947_v44 = vsel %vm653_vm5, %v8939_v60, 0.0  ;;  %v9046_v9 = vrot.slane %v9045_v49, 1  ;;  %vm8936_vm15 = vcmp.eq.s32.totalorder %v8926_v28, 1 }
0x174c   :  { %v9054_v46 = vadd.f32 %v9053_v50, %v9052_v51  ;;  %v9061_v40 = vadd.f32 %v9060_v16, %v9059_v3  ;;  %v8948_v45 = vadd.f32 %v8947_v44, %v8946_v43  ;;  %v8917_v14 = vpop.permute.xlu1 %8916  ;;  %v8942_v16 = vsel %vm8934_vm13, %v15963_v36, 0.0 }
0x174d   :  { %vm8933_vm12 = vcmp.eq.s32.totalorder %v8917_v14, 1  ;;  %v9047_v43 = vadd.f32 %v9046_v9, %v9045_v49  ;;  %v8964_v5 = vsel %vm653_vm5, %v8942_v16, 0.0 }
0x174e   :  { %v9055_v61 = vrot.slane %v9054_v46, 1  ;;  %v9062_v47 = vrot.slane %v9061_v40, 2  ;;  %v8949_v30 = vrot.slane %v8948_v45, 4  ;;  %v8941_v62 = vsel %vm8933_vm12, %v8797_v35, 0.0 }
0x174f   :  { %v8956_v29 = vsel %vm653_vm5, %v8941_v62, 0.0  ;;  %v9038_v35 = vadd.f32 %v9037_v19, %v9036_v0 }
0x1750   :  { %v9063_v31 = vadd.f32 %v9062_v47, %v9061_v40  ;;  %v8957_v58 = vadd.f32 %v8956_v29, %v8955_v54  ;;  %v8923_v44 = vpop.permute.xlu1 %8922  ;;  %v8950_v26 = vadd.f32 %v8949_v30, %v8948_v45  ;;  %v9056_v57 = vadd.f32 %v9055_v61, %v9054_v46 }
0x1751   :  { %vm8935_vm14 = vcmp.eq.s32.totalorder %v8923_v44, 1  ;;  %v8944_v40 = vsel %vm8936_vm15, %v15969_v2, 0.0  ;;  %v9142_v45 = vsel %vm959_vm3, %v9047_v43, %v9038_v35 }
0x1752   :  { %v8958_v51 = vrot.slane %v8957_v58, 4  ;;  %v8943_v3 = vsel %vm8935_vm14, %v8799_v56, 0.0  ;;  %v9064_v50 = vrot.slane %v9063_v31, 1  ;;  %v8951_v62 = vrot.slane %v8950_v26, 2 }
0x1753   :  { %v8965_v60 = vsel %vm653_vm5, %v8943_v3, 0.0  ;;  %v9143_v0 = vsel %vm961_vm4, %v9056_v57, %v9142_v45  ;;  %v8973_v9 = vsel %vm653_vm5, %v8944_v40, 0.0 }
0x1754   :  { %v8959_v42 = vadd.f32 %v8958_v51, %v8957_v58  ;;  %v8966_v14 = vadd.f32 %v8965_v60, %v8964_v5  ;;  %v8929_v47 = vpop.permute.xlu1 %8928  ;;  %v9065_v36 = vadd.f32 %v9064_v50, %v9063_v31  ;;  %v8952_v28 = vadd.f32 %v8951_v62, %v8950_v26 }
0x1755   :  { %vm8937_vm0 = vcmp.eq.s32.totalorder %v8929_v47, 1 }
0x1756   :  { %v8960_v49 = vrot.slane %v8959_v42, 2  ;;  %v8967_v56 = vrot.slane %v8966_v14, 4  ;;  %v8945_v46 = vsel %vm8937_vm0, %v15974_v20, 0.0  ;;  %v9144_v30 = vsel %vm963_vm6, %v9065_v36, %v9143_v0 }
0x1757   :  { %v8974_v61 = vsel %vm653_vm5, %v8945_v46, 0.0  ;;  %v9146_v29 = vsel %vm966_vm7, %v9144_v30, 0.0  ;;  %v8953_v51 = vrot.slane %v8952_v28, 1 }
0x1758   :  { %v8961_v19 = vadd.f32 %v8960_v49, %v8959_v42  ;;  %v8968_v2 = vadd.f32 %v8967_v56, %v8966_v14  ;;  %v8975_v54 = vadd.f32 %v8974_v61, %v8973_v9  ;;  %9147 = vadd.xlane.f32.xlu0 %v9146_v29 }
0x1759   :  { %v8954_v47 = vadd.f32 %v8953_v51, %v8952_v28 }
0x175a   :  { %v8969_v31 = vrot.slane %v8968_v2, 2  ;;  %v8976_v58 = vrot.slane %v8975_v54, 4  ;;  %v8962_v16 = vrot.slane %v8961_v19, 1 }
0x175c   :  { %v8970_v44 = vadd.f32 %v8969_v31, %v8968_v2  ;;  %v8977_v20 = vadd.f32 %v8976_v58, %v8975_v54  ;;  %v8963_v5 = vadd.f32 %v8962_v16, %v8961_v19 }
0x175e   :  { %v8971_v3 = vrot.slane %v8970_v44, 1  ;;  %v8978_v50 = vrot.slane %v8977_v20, 2  ;;  %v9070_v14 = vsel %vm959_vm3, %v8963_v5, %v8954_v47 }
0x1760   :  { %v8979_v60 = vadd.f32 %v8978_v50, %v8977_v20  ;;  %v8972_v40 = vadd.f32 %v8971_v3, %v8970_v44 }
0x1762   :  { %v8980_v45 = vrot.slane %v8979_v60, 1  ;;  %v9071_v49 = vsel %vm961_vm4, %v8972_v40, %v9070_v14 }
0x1764   :  { %v8981_v42 = vadd.f32 %v8980_v45, %v8979_v60 }
0x1766   :  { %v9072_v26 = vsel %vm963_vm6, %v8981_v42, %v9071_v49 }
0x1767   :  { %v9074_v62 = vsel %vm966_vm7, %v9072_v26, 0.0 }
0x1768   :  { %9075 = vadd.xlane.f32.xlu1 %v9074_v62 }
0x17e1   :  { %v9148_v56 = vpop.xlane.xlu0 %9147 }
0x17e2   :  { %v9149_v46 = vmul.f32 0.03125, %v9148_v56 }
0x17e4   :  { %v9151_v0 = vrot.slane %v9149_v46, 1  ;;  %v9152_v9 = vrot.slane %v9149_v46, 2  ;;  %v9153_v61 = vrot.slane %v9149_v46, 3  ;;  %v15998_v30 = vsub.f32 %v9038_v35, %v9149_v46 }
0x17e6   :  { %v16000_v19 = vsub.f32 %v9047_v43, %v9151_v0  ;;  %v16002_v2 = vsub.f32 %v9056_v57, %v9152_v9  ;;  %v16004_v54 = vsub.f32 %v9065_v36, %v9153_v61  ;;  %v9162_v58 = vmul.f32 %v15998_v30, %v15998_v30 }
0x17e8   :  { %v9163_v29 = vmul.f32 %v16000_v19, %v16000_v19  ;;  %v9164_v28 = vmul.f32 %v16002_v2, %v16002_v2  ;;  %v9165_v31 = vmul.f32 %v16004_v54, %v16004_v54 }
0x17ea   :  { %v9170_v35 = vrot.slane %v9163_v29, 7  ;;  %v9172_v16 = vrot.slane %v9164_v28, 6  ;;  %v9174_v57 = vrot.slane %v9165_v31, 5 }
0x17ec   :  { %v9171_v43 = vsel %vm959_vm3, %v9170_v35, %v9162_v58 }
0x17ed   :  { %v9173_v36 = vsel %vm961_vm4, %v9172_v16, %v9171_v43 }
0x17ee   :  { %v9175_v44 = vsel %vm963_vm6, %v9174_v57, %v9173_v36 }
0x17ef   :  { %v9177_v20 = vsel %vm966_vm7, %v9175_v44, 0.0 }
0x17f0   :  { %9178 = vadd.xlane.f32.xlu0 %v9177_v20 }
0x17f1   :  { %v9076_v51 = vpop.xlane.xlu1 %9075 }
0x17f2   :  { %v9077_v3 = vmul.f32 0.03125, %v9076_v51 }
0x17f4   :  { %v9079_v50 = vrot.slane %v9077_v3, 1  ;;  %v9080_v60 = vrot.slane %v9077_v3, 2  ;;  %v9081_v45 = vrot.slane %v9077_v3, 3  ;;  %v16018_v14 = vsub.f32 %v8954_v47, %v9077_v3 }
0x17f6   :  { %v16020_v49 = vsub.f32 %v8963_v5, %v9079_v50  ;;  %v16022_v26 = vsub.f32 %v8972_v40, %v9080_v60  ;;  %v16024_v62 = vsub.f32 %v8981_v42, %v9081_v45  ;;  %v9090_v9 = vmul.f32 %v16018_v14, %v16018_v14 }
0x17f8   :  { %v9091_v56 = vmul.f32 %v16020_v49, %v16020_v49  ;;  %v9092_v46 = vmul.f32 %v16022_v26, %v16022_v26  ;;  %v9093_v0 = vmul.f32 %v16024_v62, %v16024_v62 }
0x17fa   :  { %v9098_v47 = vrot.slane %v9091_v56, 7  ;;  %v9100_v61 = vrot.slane %v9092_v46, 6  ;;  %v9102_v40 = vrot.slane %v9093_v0, 5 }
0x17fc   :  { %v9099_v5 = vsel %vm959_vm3, %v9098_v47, %v9090_v9 }
0x17fd   :  { %v9101_v42 = vsel %vm961_vm4, %v9100_v61, %v9099_v5 }
0x17fe   :  { %v9103_v29 = vsel %vm963_vm6, %v9102_v40, %v9101_v42 }
0x17ff   :  { %v9105_v28 = vsel %vm966_vm7, %v9103_v29, 0.0 }
0x1800   :  { %9106 = vadd.xlane.f32.xlu0 %v9105_v28  ;;  %v13717_v28 = vld [vmem:[%s16636_s6] ss:$0 sm:$0xff] }
0x1879   :  { %v9179_v31 = vpop.xlane.xlu0 %9178 }
0x187a   :  { %v9180_v58 = vmul.f32 0.032258064, %v9179_v31 }
0x187c   :  { %13625 = vrsqrt.f32 %v9180_v58  ;;  %vm9183_vm9 = vcmp.eq.f32.partialorder %v9180_v58, inf  ;;  %v9186_v36 = vand.u32 2147483648, %v9180_v58  ;;  %vm9185_vm11 = vcmp.eq.f32.partialorder %v9180_v58, 0.0 }
0x1889   :  { %v9107_v35 = vpop.xlane.xlu0 %9106  ;;  %v13626_v43 = vpop.eup %13625 }
0x188a   :  { %v9108_v16 = vmul.f32 0.032258064, %v9107_v35  ;;  %v9182_v57 = vmul.f32 %v13626_v43, %v9180_v58  ;;  %v13718_v43 = vld [vmem:[%s16637_s7] ss:$0 sm:$0xff] }
0x188c   :  { %13627 = vrsqrt.f32 %v9108_v16  ;;  %v9184_v44 = vsel %vm9183_vm9, %v9180_v58, %v9182_v57  ;;  %vm9111_vm10 = vcmp.eq.f32.partialorder %v9108_v16, inf  ;;  %v9114_v60 = vand.u32 2147483648, %v9108_v16 }
0x188d   :  { %v9187_v20 = vsel %vm9185_vm11, %v9186_v36, %v9184_v44  ;;  %vm9113_vm12 = vcmp.eq.f32.partialorder %v9108_v16, 0.0 }
0x188e   :  { %v9188_v51 = vadd.f32 1e-06, %v9187_v20 }
0x1890   :  { %13629 = vrcp.f32 %v9188_v51 }
0x1899   :  { %v13628_v3 = vpop.eup %13627 }
0x189a   :  { %v9110_v50 = vmul.f32 %v13628_v3, %v9108_v16 }
0x189c   :  { %v9112_v45 = vsel %vm9111_vm10, %v9108_v16, %v9110_v50 }
0x189d   :  { %v9115_v56 = vsel %vm9113_vm12, %v9114_v60, %v9112_v45  ;;  %v13630_v0 = vpop.eup %13629 }
0x189e   :  { %v9116_v46 = vadd.f32 1e-06, %v9115_v56  ;;  %v9191_v9 = vrot.slane %v13630_v0, 1  ;;  %v9192_v47 = vrot.slane %v13630_v0, 2  ;;  %v9193_v61 = vrot.slane %v13630_v0, 3 }
0x189f   :  { %v9198_v5 = vmul.f32 %v13630_v0, %v15998_v30 }
0x18a0   :  { %13631 = vrcp.f32 %v9116_v46  ;;  %v9199_v40 = vmul.f32 %v9191_v9, %v16000_v19  ;;  %v9200_v42 = vmul.f32 %v9192_v47, %v16002_v2  ;;  %v9201_v29 = vmul.f32 %v9193_v61, %v16004_v54 }
0x18a1   :  { %v9202_v31 = vmul.f32 %v13717_v28, %v9198_v5 }
0x18a2   :  { %v9203_v58 = vmul.f32 %v13717_v28, %v9199_v40  ;;  %v9204_v35 = vmul.f32 %v13717_v28, %v9200_v42  ;;  %v9205_v16 = vmul.f32 %v13717_v28, %v9201_v29 }
0x18a3   :  { %v9206_v19 = vadd.f32 %v13718_v43, %v9202_v31 }
0x18a4   :  { %v9207_v57 = vadd.f32 %v13718_v43, %v9203_v58  ;;  %v9208_v30 = vadd.f32 %v13718_v43, %v9204_v35  ;;  %v9209_v36 = vadd.f32 %v13718_v43, %v9205_v16 }
0x18a6   :  { %v9214_v44 = vrot.slane %v9207_v57, 7  ;;  %v9216_v2 = vrot.slane %v9208_v30, 6  ;;  %v9218_v20 = vrot.slane %v9209_v36, 5 }
0x18a8   :  { %v9215_v54 = vsel %vm959_vm3, %v9214_v44, %v9206_v19 }
0x18a9   :  { %v9217_v51 = vsel %vm961_vm4, %v9216_v2, %v9215_v54 }
0x18aa   :  { %v9219_v3 = vsel %vm963_vm6, %v9218_v20, %v9217_v51 }
0x18ab   :  { %v9220_v60 = vsel %vm653_vm5, %v9219_v3, 0  ;;  %10214 = vrot.lane.b32.xlu1 %v9219_v3, %s13767_s26 }
0x18ac   :  { %v16053_v45 = vand.u32 4294901760, %v9220_v60 }
0x18ad   :  { %v13632_v50 = vpop.eup %13631 }
0x18ae   :  { %v9119_v56 = vrot.slane %v13632_v50, 1  ;;  %v9120_v46 = vrot.slane %v13632_v50, 2  ;;  %v9121_v0 = vrot.slane %v13632_v50, 3  ;;  %v9126_v9 = vmul.f32 %v13632_v50, %v16018_v14  ;;  %13289 = vmatmul.mubr.f32.vlgmr.msra.gmra.mxu1 %v16053_v45  ;;  %v13719_v14 = vld [vmem:[%s16634_s4] ss:$0 sm:$0xff] }
0x18af   :  { %v9292_v47 = vsub.f32 %v9220_v60, %v16053_v45  ;;  %13303 = vmatpush3.msra.mxu1 %v14112_v6  ;;  %13310 = vmatprep.mubr.msk.f32.mxu1 %vm13766_vm8, %v16696_v1 }
0x18b0   :  { %v9127_v61 = vmul.f32 %v9119_v56, %v16020_v49  ;;  %v9128_v5 = vmul.f32 %v9120_v46, %v16022_v26  ;;  %v9129_v40 = vmul.f32 %v9121_v0, %v16024_v62  ;;  %13304 = vmatprep.subr.mxu1 %v16696_v1  ;;  %v9130_v29 = vmul.f32 %v13719_v14, %v9126_v9  ;;  %v13720_v62 = vld [vmem:[%s16635_s5] ss:$0 sm:$0xff]  ;;  %v16728_v56 = vld [vmem:[#allocation11_spill] sm:$0xff] }
0x18b1   :  { %v9293_v42 = vand.u32 4294901760, %v9292_v47  ;;  %13305 = vmatpush3.msra.mxu1 %v14114_v7 }
0x18b2   :  { %v9131_v28 = vmul.f32 %v13719_v14, %v9127_v61  ;;  %v9132_v31 = vmul.f32 %v13719_v14, %v9128_v5  ;;  %v9133_v49 = vmul.f32 %v13719_v14, %v9129_v40  ;;  %13306 = vmatprep.subr.mxu1 %v16696_v1  ;;  %v9134_v43 = vadd.f32 %v13720_v62, %v9130_v29 }
0x18b3   :  { %v9294_v26 = vsub.f32 %v9292_v47, %v9293_v42  ;;  %13307 = vmatpush3.msra.mxu1 %v14116_v8 }
0x18b4   :  { %v9135_v58 = vadd.f32 %v13720_v62, %v9131_v28  ;;  %v9136_v35 = vadd.f32 %v13720_v62, %v9132_v31  ;;  %13308 = vmatprep.subr.mxu1 %v16696_v1  ;;  %v9137_v36 = vadd.f32 %v13720_v62, %v9133_v49 }
0x18b5   :  { %v9295_v16 = vand.u32 4294901760, %v9294_v26  ;;  %13309 = vmatpush3.msra.mxu1 %v14163_v21 }
0x18b6   :  { %v9711_v57 = vrot.slane %v9135_v58, 7  ;;  %v9713_v30 = vrot.slane %v9136_v35, 6  ;;  %13311 = vmatmul.mubr.f32.vlgmr.msra.gmra.mxu1 %v9293_v42  ;;  %13324 = vmatprep.subr.mxu1 %v16696_v1  ;;  %v9715_v2 = vrot.slane %v9137_v36, 5 }
0x18b7   :  { %13278 = vmatmul.mubr.f32.vlgmr.msra.gmra.mxu0 %v9295_v16  ;;  %13325 = vmatpush3.msra.mxu1 %v14112_v6 }
0x18b8   :  { %v9712_v19 = vsel %vm959_vm3, %v9711_v57, %v9134_v43  ;;  %13292 = vmatpush3.msra.mxu0 %v14119_v10  ;;  %13326 = vmatprep.subr.mxu1 %v16696_v1 }
0x18b9   :  { %v9714_v44 = vsel %vm961_vm4, %v9713_v30, %v9712_v19  ;;  %13293 = vmatprep.subr.mxu0 %v16696_v1  ;;  %13327 = vmatpush3.msra.mxu1 %v14114_v7 }
0x18ba   :  { %13294 = vmatpush3.msra.mxu0 %v14122_v11  ;;  %13328 = vmatprep.subr.mxu1 %v16696_v1  ;;  %v16089_v54 = vsel %vm963_vm6, %v9715_v2, %v9714_v44 }
0x18bb   :  { %13295 = vmatprep.subr.mxu0 %v16696_v1  ;;  %13329 = vmatpush3.msra.mxu1 %v14116_v8  ;;  %v9717_v20 = vsel %vm653_vm5, %v16089_v54, 0 }
0x18bc   :  { %13296 = vmatpush3.msra.mxu0 %v14125_v24  ;;  %13330 = vmatprep.subr.mxu1 %v16696_v1  ;;  %v16106_v51 = vand.u32 4294901760, %v9717_v20 }
0x18bd   :  { %13297 = vmatprep.subr.mxu0 %v16696_v1  ;;  %13299 = vmatprep.mubr.msk.f32.mxu0 %vm13766_vm8, %v16696_v1 }
0x18be   :  { %13298 = vmatpush3.msra.mxu0 %v14166_v38  ;;  %13331 = vmatpush3.msra.mxu1 %v14163_v21  ;;  %v9789_v3 = vsub.f32 %v9717_v20, %v16106_v51 }
0x18bf   :  { %13332 = vmatprep.mubr.msk.f32.mxu1 %vm13766_vm8, %v16696_v1  ;;  %13300 = vmatmul.mubr.f32.vlgmr.msra.gmra.mxu0 %v9292_v47 }
0x18c0   :  { %13313 = vmatprep.subr.mxu0 %v16696_v1  ;;  %13333 = vmatmul.mubr.f32.vlgmr.msra.gmra.mxu1 %v16053_v45  ;;  %v9790_v50 = vand.u32 4294901760, %v9789_v3 }
0x18c1   :  { %13346 = vmatprep.subr.mxu1 %v16696_v1  ;;  %13314 = vmatpush3.msra.mxu0 %v14130_v12 }
0x18c2   :  { %13347 = vmatpush3.msra.mxu1 %v14291_v27  ;;  %13315 = vmatprep.subr.mxu0 %v16696_v1  ;;  %v9791_v60 = vsub.f32 %v9789_v3, %v9790_v50 }
0x18c3   :  { %13348 = vmatprep.subr.mxu1 %v16696_v1  ;;  %13316 = vmatpush3.msra.mxu0 %v14133_v55 }
0x18c4   :  { %13349 = vmatpush3.msra.mxu1 %v14301_v39  ;;  %13317 = vmatprep.subr.mxu0 %v16696_v1 }
0x18c5   :  { %13350 = vmatprep.subr.mxu1 %v16696_v1  ;;  %13318 = vmatpush3.msra.mxu0 %v14136_v13 }
0x18c6   :  { %13351 = vmatpush3.msra.mxu1 %v14311_v52  ;;  %13319 = vmatprep.subr.mxu0 %v16696_v1 }
0x18c7   :  { %13352 = vmatprep.subr.mxu1 %v16696_v1  ;;  %13320 = vmatpush3.msra.mxu0 %v14171_v22 }
0x18c8   :  { %13321 = vmatprep.mubr.msk.f32.mxu0 %vm13766_vm8, %v16696_v1  ;;  %13353 = vmatpush3.msra.mxu1 %v14317_v53 }
0x18c9   :  { %13354 = vmatprep.mubr.msk.f32.mxu1 %vm13766_vm8, %v16696_v1  ;;  %13322 = vmatmul.mubr.f32.vlgmr.msra.gmra.mxu0 %v16053_v45  ;;  %v9792_v45 = vand.u32 4294901760, %v9791_v60 }
0x18ca   :  { %13335 = vmatprep.subr.mxu0 %v16696_v1  ;;  %13355 = vmatmul.mubr.f32.vlgmr.msra.gmra.mxu1 %v16106_v51 }
0x18cb   :  { %13368 = vmatprep.subr.mxu1 %v16696_v1  ;;  %13336 = vmatpush3.msra.mxu0 %v14218_v59 }
0x18cc   :  { %13369 = vmatpush3.msra.mxu1 %v14218_v59  ;;  %13337 = vmatprep.subr.mxu0 %v16696_v1 }
0x18cd   :  { %13370 = vmatprep.subr.mxu1 %v16696_v1  ;;  %13338 = vmatpush3.msra.mxu0 %v14227_v63 }
0x18ce   :  { %13371 = vmatpush3.msra.mxu1 %v14227_v63  ;;  %13339 = vmatprep.subr.mxu0 %v16696_v1 }
0x18cf   :  { %13372 = vmatprep.subr.mxu1 %v16696_v1  ;;  %13340 = vmatpush3.msra.mxu0 %v14237_v23 }
0x18d0   :  { %13373 = vmatpush3.msra.mxu1 %v14237_v23  ;;  %13341 = vmatprep.subr.mxu0 %v16696_v1 }
0x18d1   :  { %13374 = vmatprep.subr.mxu1 %v16696_v1  ;;  %13342 = vmatpush3.msra.mxu0 %v14244_v25 }
0x18d2   :  { %13343 = vmatprep.mubr.msk.f32.mxu0 %vm13766_vm8, %v16696_v1  ;;  %13375 = vmatpush3.msra.mxu1 %v14244_v25 }
0x18d3   :  { %13376 = vmatprep.mubr.msk.f32.mxu1 %vm13766_vm8, %v16696_v1  ;;  %13344 = vmatmul.mubr.f32.vlgmr.msra.gmra.mxu0 %v9792_v45 }
0x18d4   :  { %13357 = vmatprep.subr.mxu0 %v16696_v1  ;;  %13377 = vmatmul.mubr.f32.vlgmr.msra.gmra.mxu1 %v9790_v50 }
0x18d5   :  { %13390 = vmatprep.subr.mxu1 %v16696_v1  ;;  %13358 = vmatpush3.msra.mxu0 %v14235_v4 }
0x18d6   :  { %13391 = vmatpush3.msra.mxu1 %v14218_v59  ;;  %13359 = vmatprep.subr.mxu0 %v16696_v1 }
0x18d7   :  { %13392 = vmatprep.subr.mxu1 %v16696_v1  ;;  %13360 = vmatpush3.msra.mxu0 %v14242_v15 }
0x18d8   :  { %13393 = vmatpush3.msra.mxu1 %v14227_v63  ;;  %13361 = vmatprep.subr.mxu0 %v16696_v1 }
0x18d9   :  { %13394 = vmatprep.subr.mxu1 %v16696_v1  ;;  %13362 = vmatpush3.msra.mxu0 %v14253_v33 }
0x18da   :  { %13395 = vmatpush3.msra.mxu1 %v14237_v23  ;;  %13363 = vmatprep.subr.mxu0 %v16696_v1 }
0x18db   :  { %13396 = vmatprep.subr.mxu1 %v16696_v1  ;;  %13364 = vmatpush3.msra.mxu0 %v14262_v34 }
0x18dc   :  { %13365 = vmatprep.mubr.msk.f32.mxu0 %vm13766_vm8, %v16696_v1  ;;  %13397 = vmatpush3.msra.mxu1 %v14244_v25 }
0x18dd   :  { %13398 = vmatprep.mubr.msk.f32.mxu1 %vm13766_vm8, %v16696_v1  ;;  %13366 = vmatmul.mubr.f32.vlgmr.msra.gmra.mxu0 %v9789_v3 }
0x18de   :  { %13379 = vmatprep.subr.mxu0 %v16696_v1  ;;  %13399 = vmatmul.mubr.f32.vlgmr.msra.gmra.mxu1 %v16106_v51 }
0x18df   :  { %13380 = vmatpush3.msra.mxu0 %v14250_v32  ;;  %13387 = vmatprep.mubr.msk.f32.mxu0 %vm13766_vm8, %v16696_v1 }
0x18e0   :  { %13381 = vmatprep.subr.mxu0 %v16696_v1  ;;  %13412 = vmatprep.subr.mxu1 %v16696_v1 }
0x18e1   :  { %13382 = vmatpush3.msra.mxu0 %v14259_v37  ;;  %13413 = vmatpush3.msra.mxu1 %v14148_v17  ;;  %v16729_v17 = vld [vmem:[#allocation12_spill] sm:$0xff] }
0x18e2   :  { %13383 = vmatprep.subr.mxu0 %v16696_v1  ;;  %13414 = vmatprep.subr.mxu1 %v16696_v1 }
0x18e3   :  { %13384 = vmatpush3.msra.mxu0 %v14272_v41  ;;  %13415 = vmatpush3.msra.mxu1 %v14150_v18 }
0x18e4   :  { %13385 = vmatprep.subr.mxu0 %v16696_v1  ;;  %13416 = vmatprep.subr.mxu1 %v16696_v1 }
0x18e5   :  { %13386 = vmatpush3.msra.mxu0 %v14284_v48  ;;  %13417 = vmatpush3.msra.mxu1 %v16728_v56 }
0x18e6   :  { %13388 = vmatmul.mubr.f32.vlgmr.msra.gmra.mxu0 %v16106_v51  ;;  %13418 = vmatprep.subr.mxu1 %v16696_v1 }
0x18e7   :  { %13419 = vmatpush3.msra.mxu1 %v16729_v17  ;;  %13401 = vmatprep.subr.mxu0 %v16696_v1 }
0x18e8   :  { %13420 = vmatprep.mubr.msk.f32.mxu1 %vm13766_vm8, %v16696_v1  ;;  %13434 = vmatprep.subr.mxu1 %v16696_v1 }
0x18e9   :  { %13402 = vmatpush3.msra.mxu0 %v14112_v6  ;;  %13409 = vmatprep.mubr.msk.f32.mxu0 %vm13766_vm8, %v16696_v1 }
0x18ea   :  { %13403 = vmatprep.subr.mxu0 %v16696_v1 }
0x18eb   :  { %13404 = vmatpush3.msra.mxu0 %v14114_v7 }
0x18ec   :  { %13405 = vmatprep.subr.mxu0 %v16696_v1 }
0x18ed   :  { %13406 = vmatpush3.msra.mxu0 %v14116_v8 }
0x18ee   :  { %13407 = vmatprep.subr.mxu0 %v16696_v1 }
0x18ef   :  { %13408 = vmatpush3.msra.mxu0 %v14163_v21 }
0x18f0   :  { %13423 = vmatprep.subr.mxu0 %v16696_v1 }
0x196e   :  { %v9388_v18 = vpop.f32.mrf.mxu1 }
0x1970   :  { %v13290_v46 = vpop.f32.mrf.mxu1 }
0x1971   :  { %v13721_v46 = vld [vmem:[%s16640_s10] ss:$0 sm:$0xff] }
0x1976   :  { %v9545_v0 = vpop.f32.mrf.mxu1 }
0x1977   :  { %v9297_v9 = vpop.f32.mrf.mxu0 }
0x1978   :  { %v13312_v47 = vpop.f32.mrf.mxu1  ;;  %v9389_v26 = vadd.f32 %v9388_v18, %v9297_v9 }
0x1979   :  { %v13279_v61 = vpop.f32.mrf.mxu0 }
0x197f   :  { %v9468_v5 = vpop.f32.mrf.mxu0 }
0x1980   :  { %v9703_v40 = vpop.f32.mrf.mxu1  ;;  %v9469_v62 = vadd.f32 %v9468_v5, %v9389_v26  ;;  %v16731_v26 = vld [vmem:[#allocation9_spill] sm:$0xff] }
0x1981   :  { %v13301_v42 = vpop.f32.mrf.mxu0 }
0x1982   :  { %v13334_v14 = vpop.f32.mrf.mxu1  ;;  %v9546_v58 = vadd.f32 %v9545_v0, %v9469_v62  ;;  %v10215_v42 = vpop.permute.xlu1 %10214 }
0x1989   :  { %v9628_v29 = vpop.f32.mrf.mxu0 }
0x198a   :  { %v9885_v28 = vpop.f32.mrf.mxu1  ;;  %v9629_v43 = vadd.f32 %v9628_v29, %v9546_v58  ;;  %v12084_v29 = vld.sshfl [vmem:[%s16630_s0 + $0x54] sm:$0x33 pattern:$0x75316420] }
0x198b   :  { %v13323_v31 = vpop.f32.mrf.mxu0 }
0x198c   :  { %v13356_v49 = vpop.f32.mrf.mxu1  ;;  %v9704_v36 = vadd.f32 %v9703_v40, %v9629_v43  ;;  %v16732_v43 = vld [vmem:[#allocation10_spill] sm:$0xff] }
0x198d   :  { %v10253_v49 = vcombine.high %v12084_v29, %v12084_v29 }
0x1993   :  { %v9794_v35 = vpop.f32.mrf.mxu0 }
0x1994   :  { %v10042_v16 = vpop.f32.mrf.mxu1  ;;  %v9795_v19 = vadd.f32 %v9794_v35, %v9704_v36 }
0x1995   :  { %v13345_v57 = vpop.f32.mrf.mxu0 }
0x1996   :  { %v13378_v30 = vpop.f32.mrf.mxu1  ;;  %v9886_v20 = vadd.f32 %v9885_v28, %v9795_v19  ;;  %v16730_v28 = vld [vmem:[#allocation8_spill] sm:$0xff] }
0x1997   :  { %v10260_v31 = vrot.slane %v12084_v29, %v16730_v28  ;;  %v10267_v58 = vrot.slane %v10253_v49, %v16730_v28  ;;  %v16733_v30 = vmov 0  }
0x1999   :  { %v10273_v62 = vrot.slane %v10260_v31, %v16731_v26  ;;  %v10277_v57 = vrot.slane %v10267_v58, %v16731_v26 }
0x199b   :  { %vm10287_vm13 = vcmp.eq.s32.totalorder %v16732_v43, %v10273_v62  ;;  %vm10289_vm14 = vcmp.eq.s32.totalorder %v16732_v43, %v10277_v57 }
0x199c   :  { %v10320_v36 = vsel %vm10287_vm13, 1, %v16733_v30  ;;  %v10322_v19 = vsel %vm10289_vm14, 1, %v16733_v30 }
0x199d   :  { %v9965_v44 = vpop.f32.mrf.mxu0 }
0x199e   :  { %v10200_v2 = vpop.f32.mrf.mxu1  ;;  %v9966_v50 = vadd.f32 %v9965_v44, %v9886_v20 }
0x199f   :  { %v13367_v51 = vpop.f32.mrf.mxu0 }
0x19a0   :  { %v13400_v3 = vpop.f32.mrf.mxu1  ;;  %v10043_v60 = vadd.f32 %v10042_v16, %v9966_v50  ;;  %v16734_v50 = vld [vmem:[#allocation7_spill] sm:$0xff] }
0x19a1   :  { %vm10286_vm15 = vcmp.eq.s32.totalorder %v16734_v50, %v10273_v62  ;;  %vm10288_vm0 = vcmp.eq.s32.totalorder %v16734_v50, %v10277_v57 }
0x19a6   :  { %v10125_v45 = vpop.f32.mrf.mxu0 }
0x19a7   :  { %v10126_v56 = vadd.f32 %v10125_v45, %v10043_v60  ;;  %v10268_v60 = vcombine.high %v10260_v31, %v10260_v31 }
0x19a8   :  { %v13389_v17 = vpop.f32.mrf.mxu0 }
0x19a9   :  { %v10201_v18 = vadd.f32 %v10200_v2, %v10126_v56  ;;  %v10319_v56 = vsel %vm10286_vm15, 1, %v16733_v30  ;;  %v10281_v17 = vrot.slane %v10268_v60, %v16731_v26 }
0x19ab   :  { %v10204_v0 = vadd.f32 %v13721_v46, %v10201_v18  ;;  %v10269_v18 = vcombine.high %v10267_v58, %v10267_v58  ;;  %v10321_v46 = vsel %vm10288_vm0, 1, %v16733_v30  ;;  %vm10290_vm9 = vcmp.eq.s32.totalorder %v16734_v50, %v10281_v17 }
0x19ad   :  { %v12083_v9 = vmul.f32 -1.442695, %v10204_v0  ;;  %13633 = vtanh.f32 %v10204_v0  ;;  %v10285_v0 = vrot.slane %v10269_v18, %v16731_v26 }
0x19af   :  { %13635 = vpow2.f32 %v12083_v9  ;;  %vm10292_vm11 = vcmp.eq.s32.totalorder %v16734_v50, %v10285_v0 }
0x19ba   :  { %v13634_v47 = vpop.eup %13633 }
0x19bb   :  { %10224 = vrot.lane.b32.xlu0 %v13634_v47, %s13768_s16 }
0x19bc   :  { %v13636_v61 = vpop.eup %13635 }
0x19bd   :  { %v10208_v5 = vadd.f32 1.0, %v13636_v61  ;;  %v10323_v61 = vsel %vm10290_vm9, 1, %v16733_v30 }
0x19bf   :  { %13637 = vrcp.f32 %v10208_v5 }
0x19cc   :  { %v16206_v40 = vpop.eup %13637 }
0x19cd   :  { %v10217_v14 = vmul.f32 %v16206_v40, %v10215_v42  ;;  %v10213_v2 = vmul.f32 %v16206_v40, %v16089_v54  ;;  %v12090_v54 = vld.sshfl [vmem:[%s16630_s0 + $0x38] sm:$0x33 pattern:$0x75316420] }
0x19ce   :  { %v10480_v9 = vrot.slane %v12090_v54, %v16730_v28  ;;  %v10473_v47 = vcombine.high %v12090_v54, %v12090_v54 }
0x19cf   :  { %10219 = vrot.lane.b32.xlu1 %v10217_v14, %s13769_s17  ;;  %v10325_v14 = vsel %vm10292_vm11, 1, %v16733_v30 }
0x19d0   :  { %v10493_v5 = vrot.slane %v10480_v9, %v16731_v26  ;;  %v10487_v42 = vrot.slane %v10473_v47, %v16730_v28  ;;  %v10488_v31 = vcombine.high %v10480_v9, %v10480_v9 }
0x19d2   :  { %vm10506_vm10 = vcmp.eq.s32.totalorder %v16734_v50, %v10493_v5  ;;  %v10497_v29 = vrot.slane %v10487_v42, %v16731_v26  ;;  %v10501_v62 = vrot.slane %v10488_v31, %v16731_v26  ;;  %v10489_v58 = vcombine.high %v10487_v42, %v10487_v42 }
0x19d3   :  { %v10598_v49 = vsel %vm10506_vm10, 1, %v16733_v30  ;;  %vm10291_vm10 = vcmp.eq.s32.totalorder %v16732_v43, %v10281_v17 }
0x19d4   :  { %vm10508_vm12 = vcmp.eq.s32.totalorder %v16734_v50, %v10497_v29  ;;  %vm10510_vm13 = vcmp.eq.s32.totalorder %v16734_v50, %v10501_v62  ;;  %v10505_v57 = vrot.slane %v10489_v58, %v16731_v26  ;;  %v10324_v31 = vsel %vm10291_vm10, 1, %v16733_v30 }
0x19d6   :  { %vm10512_vm14 = vcmp.eq.s32.totalorder %v16734_v50, %v10505_v57 }
0x1a2d   :  { %v10225_v35 = vpop.permute.xlu0 %10224 }
0x1a2e   :  { %v10227_v16 = vmul.f32 %v16206_v40, %v10225_v35  ;;  %v12089_v35 = vld.sshfl [vmem:[%s16630_s0 + $0x18] sm:$0x33 pattern:$0x75316420] }
0x1a30   :  { %10229 = vrot.lane.b32.xlu1 %v10227_v16, %s13767_s26  ;;  %v10600_v16 = vsel %vm10508_vm12, 1, %v16733_v30  ;;  %vm10293_vm12 = vcmp.eq.s32.totalorder %v16732_v43, %v10285_v0 }
0x1a34   :  { %10331 = vperm.xlu1 %13544, %v10320_v36   ;;  %v10432_v36 = vrot.slane %v12089_v35, %v16730_v28 }
0x1a38   :  { %10337 = vperm.xlu1 %13544, %v10322_v19   ;;  %v10425_v19 = vcombine.high %v12089_v35, %v12089_v35 }
0x1a41   :  { %v10220_v44 = vpop.permute.xlu1 %10219 }
0x1a42   :  { %v10222_v20 = vadd.f32 %v10220_v44, %v10213_v2  ;;  %v10602_v44 = vsel %vm10510_vm13, 1, %v16733_v30  ;;  %v10445_v2 = vrot.slane %v10432_v36, %v16731_v26  ;;  %vm10507_vm13 = vcmp.eq.s32.totalorder %v16732_v43, %v10493_v5 }
0x1a43   :  { %v10599_v58 = vsel %vm10507_vm13, 1, %v16733_v30 }
0x1a44   :  { %vm10458_vm15 = vcmp.eq.s32.totalorder %v16734_v50, %v10445_v2 }
0x1aa2   :  { %v10230_v51 = vpop.permute.xlu1 %10229 }
0x1aa3   :  { %v16225_v3 = vadd.f32 %v10230_v51, %v10222_v20  ;;  %v10439_v20 = vrot.slane %v10425_v19, %v16730_v28  ;;  %v10604_v51 = vsel %vm10512_vm14, 1, %v16733_v30  ;;  %vm10509_vm14 = vcmp.eq.s32.totalorder %v16732_v43, %v10497_v29 }
0x1aa5   :  { %13639 = vtanh.f32 %v16225_v3  ;;  %v10449_v60 = vrot.slane %v10439_v20, %v16731_v26  ;;  %v10441_v54 = vcombine.high %v10439_v20, %v10439_v20 }
0x1aa7   :  { %vm10460_vm0 = vcmp.eq.s32.totalorder %v16734_v50, %v10449_v60  ;;  %v10457_v9 = vrot.slane %v10441_v54, %v16731_v26 }
0x1aa9   :  { %vm10464_vm11 = vcmp.eq.s32.totalorder %v16734_v50, %v10457_v9 }
0x1ab2   :  { %v13640_v45 = vpop.eup %13639 }
0x1ab3   :  { %10235 = vrot.lane.b32.xlu0 %v13640_v45, %s13770_s20  ;;  %v10440_v45 = vcombine.high %v10432_v36, %v10432_v36  ;;  %v10332_v36 = vpop.permute.xlu1 %10331 }
0x1ab4   :  { %vm10352_vm13 = vcmp.eq.s32.totalorder %v10332_v36, 1  ;;  %v13726_v36 = vld [vmem:[#allocation2 + $0x10] sm:$0xff] }
0x1ab5   :  { %v10453_v18 = vrot.slane %v10440_v45, %v16731_v26 }
0x1ab7   :  { %10328 = vperm.xlu0 %13543, %v10319_v56   ;;  %v10514_v56 = vsel %vm10458_vm15, 1, %v16733_v30  ;;  %vm10462_vm9 = vcmp.eq.s32.totalorder %v16734_v50, %v10453_v18  ;;  %vm10511_vm15 = vcmp.eq.s32.totalorder %v16732_v43, %v10501_v62  ;;  %vm10463_vm10 = vcmp.eq.s32.totalorder %v16732_v43, %v10453_v18 }
0x1ab8   :  { %v10518_v47 = vsel %vm10462_vm9, 1, %v16733_v30  ;;  %v10603_v17 = vsel %vm10511_vm15, 1, %v16733_v30  ;;  %vm10459_vm9 = vcmp.eq.s32.totalorder %v16732_v43, %v10445_v2  ;;  %v10519_v62 = vsel %vm10463_vm10, 1, %v16733_v30 }
0x1ab9   :  { %v10515_v5 = vsel %vm10459_vm9, 1, %v16733_v30 }
0x1abb   :  { %10334 = vperm.xlu0 %13543, %v10321_v46   ;;  %v10516_v46 = vsel %vm10460_vm0, 1, %v16733_v30  ;;  %vm10513_vm0 = vcmp.eq.s32.totalorder %v16732_v43, %v10505_v57 }
0x1abc   :  { %v10605_v0 = vsel %vm10513_vm0, 1, %v16733_v30 }
0x1abf   :  { %10340 = vperm.xlu0 %13543, %v10323_v61   ;;  %v10520_v61 = vsel %vm10464_vm11, 1, %v16733_v30  ;;  %vm10461_vm11 = vcmp.eq.s32.totalorder %v16732_v43, %v10449_v60 }
0x1ac0   :  { %v10517_v29 = vsel %vm10461_vm11, 1, %v16733_v30 }
0x1ac3   :  { %10346 = vperm.xlu0 %13543, %v10325_v14  }
0x1ac7   :  { %10607 = vperm.xlu0 %13543, %v10598_v49   ;;  %v10326_v49 = vsel %vm10293_vm12, 1, %v16733_v30  ;;  %vm10465_vm12 = vcmp.eq.s32.totalorder %v16732_v43, %v10457_v9 }
0x1ac8   :  { %v10521_v35 = vsel %vm10465_vm12, 1, %v16733_v30 }
0x1acb   :  { %10613 = vperm.xlu0 %13543, %v10600_v16  }
0x1acf   :  { %10619 = vperm.xlu0 %13543, %v10602_v44   ;;  %v10338_v44 = vpop.permute.xlu1 %10337 }
0x1ad3   :  { %10625 = vperm.xlu0 %13543, %v10604_v51  }
0x1ad7   :  { %10523 = vperm.xlu0 %13543, %v10514_v56  }
0x1adb   :  { %10529 = vperm.xlu0 %13543, %v10516_v46  }
0x1adf   :  { %10535 = vperm.xlu0 %13543, %v10518_v47  }
0x1ae3   :  { %10541 = vperm.xlu0 %13543, %v10520_v61  }
0x1b25   :  { %v10236_v42 = vpop.permute.xlu0 %10235 }
0x1b26   :  { %v10238_v14 = vmul.f32 %v16206_v40, %v10236_v42  ;;  %v10601_v40 = vsel %vm10509_vm14, 1, %v16733_v30  ;;  %vm10354_vm14 = vcmp.eq.s32.totalorder %v10338_v44, 1 }
0x1b28   :  { %10240 = vrot.lane.b32.xlu1 %v10238_v14, %s13771_s24  ;;  %v13722_v14 = vld [vmem:[#allocation2] sm:$0xff] }
0x1b2c   :  { %10343 = vperm.xlu1 %13544, %v10324_v31  }
0x1b30   :  { %10349 = vperm.xlu1 %13544, %v10326_v49   ;;  %v13723_v49 = vld [vmem:[#allocation2 + $0x8] sm:$0xff] }
0x1b32   :  { %v10329_v16 = vpop.permute.xlu0 %10328 }
0x1b33   :  { %vm10351_vm15 = vcmp.eq.s32.totalorder %v10329_v16, 1 }
0x1b34   :  { %10610 = vperm.xlu1 %13544, %v10599_v58  }
0x1b36   :  { %v10335_v57 = vpop.permute.xlu0 %10334 }
0x1b37   :  { %vm10353_vm0 = vcmp.eq.s32.totalorder %v10335_v57, 1 }
0x1b38   :  { %10616 = vperm.xlu1 %13544, %v10601_v40  }
0x1b3a   :  { %v10341_v19 = vpop.permute.xlu0 %10340 }
0x1b3b   :  { %vm10355_vm9 = vcmp.eq.s32.totalorder %v10341_v19, 1 }
0x1b3c   :  { %10622 = vperm.xlu1 %13544, %v10603_v17  }
0x1b3e   :  { %v10347_v2 = vpop.permute.xlu0 %10346 }
0x1b3f   :  { %vm10357_vm12 = vcmp.eq.s32.totalorder %v10347_v2, 1 }
0x1b40   :  { %10628 = vperm.xlu1 %13544, %v10605_v0  }
0x1b42   :  { %v10608_v51 = vpop.permute.xlu0 %10607 }
0x1b44   :  { %10526 = vperm.xlu1 %13544, %v10515_v5   ;;  %v13724_v5 = vld [vmem:[#allocation2 + $0x20] sm:$0xff] }
0x1b46   :  { %v16298_v60 = vpop.permute.xlu0 %10613 }
0x1b48   :  { %10532 = vperm.xlu1 %13544, %v10517_v29  }
0x1b4c   :  { %10538 = vperm.xlu1 %13544, %v10519_v62   ;;  %v13725_v62 = vld [vmem:[#allocation2 + $0x28] sm:$0xff] }
0x1b50   :  { %10544 = vperm.xlu1 %13544, %v10521_v35  }
0x1b9a   :  { %v10241_v20 = vpop.permute.xlu1 %10240 }
0x1b9b   :  { %10243 = vst.msk [vmem:[#allocation3] sm:$0xf] %vm2168_vm1, %v10241_v20  ;;  %v13727_v20 = vld [vmem:[#allocation2 + $0x18] sm:$0xff] }
0x1b9c   :  { %10244 = vst.msk [vmem:[#allocation3] sm:$0xf] %vm2170_vm2, %v16225_v3  ;;  %v10620_v3 = vpop.permute.xlu0 %10619 }
0x1ba3   :  { %v16300_v45 = vld [vmem:[#allocation3] sm:$0xf] }
0x1ba4   :  { %16735 = vst [vmem:[#allocation11_spill] sm:$0xff] %v16300_v45  ;;  %v10301_v56 = vrot.slane %v16300_v45, %v16730_v28 }
0x1ba6   :  { %v10309_v18 = vrot.slane %v10301_v56, %v16730_v28  ;;  %v10302_v54 = vcombine.high %v10301_v56, %v10301_v56 }
0x1ba7   :  { %v10344_v46 = vpop.permute.xlu1 %10343 }
0x1ba8   :  { %v10317_v9 = vcombine.high %v10309_v18, %v10309_v18  ;;  %v10362_v47 = vrot.slane %v10309_v18, %v16731_v26  ;;  %v10316_v61 = vrot.slane %v10302_v54, %v16730_v28  ;;  %vm10356_vm11 = vcmp.eq.s32.totalorder %v10344_v46, 1  ;;  %v13728_v18 = vld [vmem:[#allocation2 + $0x30] sm:$0xff]  ;;  %v13729_v46 = vld [vmem:[#allocation2 + $0x38] sm:$0xff] }
0x1baa   :  { %v10370_v42 = vrot.slane %v10317_v9, %v16731_v26  ;;  %v10379_v31 = vsel %vm10351_vm15, %v10362_v47, %v13722_v14  ;;  %v10380_v58 = vsel %vm10352_vm13, %v10362_v47, %v13723_v49  ;;  %v10318_v40 = vcombine.high %v10316_v61, %v10316_v61  ;;  %v10626_v47 = vpop.permute.xlu0 %10625 }
0x1bab   :  { %10387 = vst.msk [vmem:[#allocation2] sm:$0xff] %vm653_vm5, %v10379_v31  ;;  %10388 = vst.msk [vmem:[#allocation2 + $0x8] sm:$0xff] %vm653_vm5, %v10380_v58  ;;  %v10366_v17 = vrot.slane %v10316_v61, %v16731_v26  ;;  %v10350_v0 = vpop.permute.xlu1 %10349  ;;  %vm10630_vm13 = vcmp.eq.s32.totalorder %v10608_v51, 1 }
0x1bac   :  { %v10383_v29 = vsel %vm10355_vm9, %v10370_v42, %v13724_v5  ;;  %v10384_v35 = vsel %vm10356_vm11, %v10370_v42, %v13725_v62  ;;  %v10374_v16 = vrot.slane %v10318_v40, %v16731_v26  ;;  %vm10358_vm10 = vcmp.eq.s32.totalorder %v10350_v0, 1 }
0x1bad   :  { %10391 = vst.msk [vmem:[#allocation2 + $0x20] sm:$0xff] %vm653_vm5, %v10383_v29  ;;  %10392 = vst.msk [vmem:[#allocation2 + $0x28] sm:$0xff] %vm653_vm5, %v10384_v35  ;;  %v10381_v19 = vsel %vm10353_vm0, %v10366_v17, %v13726_v36  ;;  %v10382_v56 = vsel %vm10354_vm14, %v10366_v17, %v13727_v20  ;;  %vm10632_vm0 = vcmp.eq.s32.totalorder %v16298_v60, 1  ;;  %vm10634_vm9 = vcmp.eq.s32.totalorder %v10620_v3, 1 }
0x1bae   :  { %v10385_v54 = vsel %vm10357_vm12, %v10374_v16, %v13728_v18  ;;  %10389 = vst.msk [vmem:[#allocation2 + $0x10] sm:$0xff] %vm653_vm5, %v10381_v19  ;;  %10390 = vst.msk [vmem:[#allocation2 + $0x18] sm:$0xff] %vm653_vm5, %v10382_v56  ;;  %v10386_v9 = vsel %vm10358_vm10, %v10374_v16, %v13729_v46  ;;  %v10524_v40 = vpop.permute.xlu0 %10523  ;;  %vm10636_vm10 = vcmp.eq.s32.totalorder %v10626_v47, 1 }
0x1baf   :  { %10393 = vst.msk [vmem:[#allocation2 + $0x30] sm:$0xff] %vm653_vm5, %v10385_v54  ;;  %10394 = vst.msk [vmem:[#allocation2 + $0x38] sm:$0xff] %vm653_vm5, %v10386_v9  ;;  %v10611_v2 = vpop.permute.xlu1 %10610 }
0x1bb0   :  { %vm10631_vm15 = vcmp.eq.s32.totalorder %v10611_v2, 1 }
0x1bb2   :  { %v10410_v57 = vld [vmem:[#allocation2] sm:$0xff]  ;;  %v10411_v61 = vld [vmem:[#allocation2 + $0x8] sm:$0xff]  ;;  %v10530_v2 = vpop.permute.xlu0 %10529 }
0x1bb3   :  { %v10638_v44 = vsel %vm10630_vm13, %v10410_v57, 0.0  ;;  %v10639_v42 = vsel %vm10631_vm15, %v10411_v61, 0.0  ;;  %v10617_v14 = vpop.permute.xlu1 %10616  ;;  %vm10546_vm13 = vcmp.eq.s32.totalorder %v10524_v40, 1 }
0x1bb4   :  { %v10646_v31 = vsel %vm653_vm5, %v10638_v44, 0.0  ;;  %v10647_v49 = vsel %vm653_vm5, %v10639_v42, 0.0  ;;  %vm10633_vm14 = vcmp.eq.s32.totalorder %v10617_v14, 1  ;;  %v16322_v58 = vld [vmem:[#allocation2 + $0x20] sm:$0xff]  ;;  %v10415_v56 = vld [vmem:[#allocation2 + $0x28] sm:$0xff] }
0x1bb5   :  { %v10648_v17 = vadd.f32 %v10647_v49, %v10646_v31  ;;  %v10412_v0 = vld [vmem:[#allocation2 + $0x10] sm:$0xff]  ;;  %v10413_v5 = vld [vmem:[#allocation2 + $0x18] sm:$0xff]  ;;  %v10642_v36 = vsel %vm10634_vm9, %v16322_v58, 0.0 }
0x1bb6   :  { %v10640_v51 = vsel %vm10632_vm0, %v10412_v0, 0.0  ;;  %v10641_v29 = vsel %vm10633_vm14, %v10413_v5, 0.0  ;;  %v16328_v18 = vld [vmem:[#allocation2 + $0x30] sm:$0xff]  ;;  %v10664_v3 = vsel %vm653_vm5, %v10642_v36, 0.0  ;;  %v16333_v49 = vld [vmem:[#allocation2 + $0x38] sm:$0xff]  ;;  %vm10548_vm14 = vcmp.eq.s32.totalorder %v10530_v2, 1 }
0x1bb7   :  { %v10649_v62 = vrot.slane %v10648_v17, 4  ;;  %v10655_v35 = vsel %vm653_vm5, %v10640_v51, 0.0  ;;  %v10656_v16 = vsel %vm653_vm5, %v10641_v29, 0.0  ;;  %v10623_v19 = vpop.permute.xlu1 %10622  ;;  %v10644_v42 = vsel %vm10636_vm10, %v16328_v18, 0.0 }
0x1bb8   :  { %v10657_v20 = vadd.f32 %v10656_v16, %v10655_v35  ;;  %vm10635_vm11 = vcmp.eq.s32.totalorder %v10623_v19, 1  ;;  %v10554_v19 = vsel %vm10546_vm13, %v10410_v57, 0.0 }
0x1bb9   :  { %v10643_v60 = vsel %vm10635_vm11, %v10415_v56, 0.0  ;;  %v10650_v54 = vadd.f32 %v10649_v62, %v10648_v17  ;;  %v10673_v62 = vsel %vm653_vm5, %v10644_v42, 0.0  ;;  %v10562_v45 = vsel %vm653_vm5, %v10554_v19, 0.0 }
0x1bba   :  { %v10658_v46 = vrot.slane %v10657_v20, 4  ;;  %v10665_v9 = vsel %vm653_vm5, %v10643_v60, 0.0 }
0x1bbb   :  { %v10666_v44 = vadd.f32 %v10665_v9, %v10664_v3  ;;  %v10629_v14 = vpop.permute.xlu1 %10628  ;;  %v10651_v29 = vrot.slane %v10650_v54, 2 }
0x1bbc   :  { %v10659_v31 = vadd.f32 %v10658_v46, %v10657_v20  ;;  %vm10637_vm12 = vcmp.eq.s32.totalorder %v10629_v14, 1  ;;  %v10536_v20 = vpop.permute.xlu0 %10535 }
0x1bbd   :  { %v10667_v51 = vrot.slane %v10666_v44, 4  ;;  %v10645_v47 = vsel %vm10637_vm12, %v16333_v49, 0.0  ;;  %v10652_v40 = vadd.f32 %v10651_v29, %v10650_v54  ;;  %vm10550_vm9 = vcmp.eq.s32.totalorder %v10536_v20, 1 }
0x1bbe   :  { %v10660_v17 = vrot.slane %v10659_v31, 2  ;;  %v10674_v35 = vsel %vm653_vm5, %v10645_v47, 0.0  ;;  %v10556_v47 = vsel %vm10548_vm14, %v10412_v0, 0.0 }
0x1bbf   :  { %v10668_v16 = vadd.f32 %v10667_v51, %v10666_v44  ;;  %v10675_v36 = vadd.f32 %v10674_v35, %v10673_v62  ;;  %v10527_v60 = vpop.permute.xlu1 %10526  ;;  %v10653_v35 = vrot.slane %v10652_v40, 1 }
0x1bc0   :  { %v10661_v3 = vadd.f32 %v10660_v17, %v10659_v31  ;;  %vm10547_vm15 = vcmp.eq.s32.totalorder %v10527_v60, 1  ;;  %v10542_v2 = vpop.permute.xlu0 %10541 }
0x1bc1   :  { %v10669_v46 = vrot.slane %v10668_v16, 2  ;;  %v10676_v9 = vrot.slane %v10675_v36, 4  ;;  %v10555_v14 = vsel %vm10547_vm15, %v10411_v61, 0.0  ;;  %v10571_v61 = vsel %vm653_vm5, %v10556_v47, 0.0 }
0x1bc2   :  { %v10563_v43 = vsel %vm653_vm5, %v10555_v14, 0.0  ;;  %v10662_v51 = vrot.slane %v10661_v3, 1  ;;  %vm10552_vm10 = vcmp.eq.s32.totalorder %v10542_v2, 1 }
0x1bc3   :  { %v10670_v50 = vadd.f32 %v10669_v46, %v10668_v16  ;;  %v10677_v42 = vadd.f32 %v10676_v9, %v10675_v36  ;;  %v10564_v26 = vadd.f32 %v10563_v43, %v10562_v45  ;;  %v10533_v44 = vpop.permute.xlu1 %10532  ;;  %v10558_v16 = vsel %vm10550_vm9, %v16322_v58, 0.0 }
0x1bc4   :  { %vm10549_vm0 = vcmp.eq.s32.totalorder %v10533_v44, 1  ;;  %v10663_v45 = vadd.f32 %v10662_v51, %v10661_v3  ;;  %v10580_v20 = vsel %vm653_vm5, %v10558_v16, 0.0 }
0x1bc5   :  { %v10671_v57 = vrot.slane %v10670_v50, 1  ;;  %v10678_v31 = vrot.slane %v10677_v42, 2  ;;  %v10565_v17 = vrot.slane %v10564_v26, 4  ;;  %v10557_v62 = vsel %vm10549_vm0, %v10413_v5, 0.0 }
0x1bc6   :  { %v10572_v54 = vsel %vm653_vm5, %v10557_v62, 0.0  ;;  %v10654_v5 = vadd.f32 %v10653_v35, %v10652_v40 }
0x1bc7   :  { %v10679_v29 = vadd.f32 %v10678_v31, %v10677_v42  ;;  %v10573_v19 = vadd.f32 %v10572_v54, %v10571_v61  ;;  %v10539_v43 = vpop.permute.xlu1 %10538  ;;  %v10566_v0 = vadd.f32 %v10565_v17, %v10564_v26  ;;  %v10672_v46 = vadd.f32 %v10671_v57, %v10670_v50 }
0x1bc8   :  { %vm10551_vm11 = vcmp.eq.s32.totalorder %v10539_v43, 1  ;;  %v10560_v42 = vsel %vm10552_vm10, %v16328_v18, 0.0  ;;  %v10758_v26 = vsel %vm959_vm3, %v10663_v45, %v10654_v5 }
0x1bc9   :  { %v10574_v36 = vrot.slane %v10573_v19, 4  ;;  %v10559_v60 = vsel %vm10551_vm11, %v10415_v56, 0.0  ;;  %v10680_v9 = vrot.slane %v10679_v29, 1  ;;  %v10567_v62 = vrot.slane %v10566_v0, 2 }
0x1bca   :  { %v10581_v14 = vsel %vm653_vm5, %v10559_v60, 0.0  ;;  %v10759_v40 = vsel %vm961_vm4, %v10672_v46, %v10758_v26  ;;  %v10589_v51 = vsel %vm653_vm5, %v10560_v42, 0.0 }
0x1bcb   :  { %v10575_v47 = vadd.f32 %v10574_v36, %v10573_v19  ;;  %v10582_v44 = vadd.f32 %v10581_v14, %v10580_v20  ;;  %v10545_v31 = vpop.permute.xlu1 %10544  ;;  %v10681_v58 = vadd.f32 %v10680_v9, %v10679_v29  ;;  %v10568_v29 = vadd.f32 %v10567_v62, %v10566_v0 }
0x1bcc   :  { %vm10553_vm12 = vcmp.eq.s32.totalorder %v10545_v31, 1 }
0x1bcd   :  { %v10576_v3 = vrot.slane %v10575_v47, 2  ;;  %v10583_v56 = vrot.slane %v10582_v44, 4  ;;  %v10561_v50 = vsel %vm10553_vm12, %v16333_v49, 0.0  ;;  %v10760_v17 = vsel %vm963_vm6, %v10681_v58, %v10759_v40 }
0x1bce   :  { %v10590_v57 = vsel %vm653_vm5, %v10561_v50, 0.0  ;;  %v10762_v2 = vsel %vm966_vm7, %v10760_v17, 0.0  ;;  %v10569_v9 = vrot.slane %v10568_v29, 1 }
0x1bcf   :  { %v10577_v35 = vadd.f32 %v10576_v3, %v10575_v47  ;;  %v10584_v61 = vadd.f32 %v10583_v56, %v10582_v44  ;;  %v10591_v54 = vadd.f32 %v10590_v57, %v10589_v51  ;;  %10763 = vadd.xlane.f32.xlu0 %v10762_v2 }
0x1bd0   :  { %v10570_v50 = vadd.f32 %v10569_v9, %v10568_v29 }
0x1bd1   :  { %v10585_v19 = vrot.slane %v10584_v61, 2  ;;  %v10592_v16 = vrot.slane %v10591_v54, 4  ;;  %v10578_v43 = vrot.slane %v10577_v35, 1 }
0x1bd3   :  { %v10586_v36 = vadd.f32 %v10585_v19, %v10584_v61  ;;  %v10593_v60 = vadd.f32 %v10592_v16, %v10591_v54  ;;  %v10579_v42 = vadd.f32 %v10578_v43, %v10577_v35 }
0x1bd5   :  { %v10587_v20 = vrot.slane %v10586_v36, 1  ;;  %v10594_v14 = vrot.slane %v10593_v60, 2  ;;  %v10686_v44 = vsel %vm959_vm3, %v10579_v42, %v10570_v50 }
0x1bd7   :  { %v10595_v31 = vadd.f32 %v10594_v14, %v10593_v60  ;;  %v10588_v26 = vadd.f32 %v10587_v20, %v10586_v36 }
0x1bd9   :  { %v10596_v40 = vrot.slane %v10595_v31, 1  ;;  %v10687_v3 = vsel %vm961_vm4, %v10588_v26, %v10686_v44 }
0x1bdb   :  { %v10597_v47 = vadd.f32 %v10596_v40, %v10595_v31 }
0x1bdd   :  { %v10688_v0 = vsel %vm963_vm6, %v10597_v47, %v10687_v3 }
0x1bde   :  { %v10690_v62 = vsel %vm966_vm7, %v10688_v0, 0.0 }
0x1bdf   :  { %10691 = vadd.xlane.f32.xlu1 %v10690_v62 }
0x1c58   :  { %v10764_v56 = vpop.xlane.xlu0 %10763 }
0x1c59   :  { %v10765_v51 = vmul.f32 0.03125, %v10764_v56 }
0x1c5b   :  { %v10767_v57 = vrot.slane %v10765_v51, 1  ;;  %v10768_v17 = vrot.slane %v10765_v51, 2  ;;  %v10769_v61 = vrot.slane %v10765_v51, 3  ;;  %v16357_v35 = vsub.f32 %v10654_v5, %v10765_v51 }
0x1c5d   :  { %v16359_v54 = vsub.f32 %v10663_v45, %v10767_v57  ;;  %v16361_v2 = vsub.f32 %v10672_v46, %v10768_v17  ;;  %v16363_v29 = vsub.f32 %v10681_v58, %v10769_v61  ;;  %v10778_v36 = vmul.f32 %v16357_v35, %v16357_v35 }
0x1c5f   :  { %v10779_v19 = vmul.f32 %v16359_v54, %v16359_v54  ;;  %v10780_v16 = vmul.f32 %v16361_v2, %v16361_v2  ;;  %v10781_v43 = vmul.f32 %v16363_v29, %v16363_v29 }
0x1c61   :  { %v10786_v5 = vrot.slane %v10779_v19, 7  ;;  %v10788_v60 = vrot.slane %v10780_v16, 6  ;;  %v10790_v46 = vrot.slane %v10781_v43, 5 }
0x1c63   :  { %v10787_v45 = vsel %vm959_vm3, %v10786_v5, %v10778_v36 }
0x1c64   :  { %v10789_v58 = vsel %vm961_vm4, %v10788_v60, %v10787_v45 }
0x1c65   :  { %v10791_v9 = vsel %vm963_vm6, %v10790_v46, %v10789_v58 }
0x1c66   :  { %v10793_v20 = vsel %vm966_vm7, %v10791_v9, 0.0 }
0x1c67   :  { %10794 = vadd.xlane.f32.xlu0 %v10793_v20 }
0x1c68   :  { %v10692_v14 = vpop.xlane.xlu1 %10691 }
0x1c69   :  { %v10693_v31 = vmul.f32 0.03125, %v10692_v14 }
0x1c6b   :  { %v10695_v40 = vrot.slane %v10693_v31, 1  ;;  %v10696_v44 = vrot.slane %v10693_v31, 2  ;;  %v10697_v3 = vrot.slane %v10693_v31, 3  ;;  %v16377_v0 = vsub.f32 %v10570_v50, %v10693_v31 }
0x1c6d   :  { %v16379_v62 = vsub.f32 %v10579_v42, %v10695_v40  ;;  %v16381_v56 = vsub.f32 %v10588_v26, %v10696_v44  ;;  %v16383_v51 = vsub.f32 %v10597_v47, %v10697_v3  ;;  %v10706_v19 = vmul.f32 %v16377_v0, %v16377_v0 }
0x1c6f   :  { %v10707_v57 = vmul.f32 %v16379_v62, %v16379_v62  ;;  %v10708_v17 = vmul.f32 %v16381_v56, %v16381_v56  ;;  %v10709_v61 = vmul.f32 %v16383_v51, %v16383_v51 }
0x1c71   :  { %v10714_v50 = vrot.slane %v10707_v57, 7  ;;  %v10716_v16 = vrot.slane %v10708_v17, 6  ;;  %v10718_v26 = vrot.slane %v10709_v61, 5 }
0x1c73   :  { %v10715_v42 = vsel %vm959_vm3, %v10714_v50, %v10706_v19 }
0x1c74   :  { %v10717_v47 = vsel %vm961_vm4, %v10716_v16, %v10715_v42 }
0x1c75   :  { %v10719_v43 = vsel %vm963_vm6, %v10718_v26, %v10717_v47 }
0x1c76   :  { %v10721_v36 = vsel %vm966_vm7, %v10719_v43, 0.0 }
0x1c77   :  { %10722 = vadd.xlane.f32.xlu0 %v10721_v36 }
0x1cf0   :  { %v10795_v5 = vpop.xlane.xlu0 %10794 }
0x1cf1   :  { %v10796_v60 = vmul.f32 0.032258064, %v10795_v5 }
0x1cf3   :  { %13641 = vrsqrt.f32 %v10796_v60  ;;  %vm10799_vm13 = vcmp.eq.f32.partialorder %v10796_v60, inf  ;;  %v10802_v20 = vand.u32 2147483648, %v10796_v60  ;;  %vm10801_vm15 = vcmp.eq.f32.partialorder %v10796_v60, 0.0 }
0x1d00   :  { %v10723_v45 = vpop.xlane.xlu0 %10722  ;;  %v13642_v58 = vpop.eup %13641 }
0x1d01   :  { %v10724_v46 = vmul.f32 0.032258064, %v10723_v45  ;;  %v10798_v9 = vmul.f32 %v13642_v58, %v10796_v60 }
0x1d03   :  { %13643 = vrsqrt.f32 %v10724_v46  ;;  %v10800_v14 = vsel %vm10799_vm13, %v10796_v60, %v10798_v9  ;;  %vm10727_vm14 = vcmp.eq.f32.partialorder %v10724_v46, inf  ;;  %v10730_v57 = vand.u32 2147483648, %v10724_v46  ;;  %v13730_v60 = vld [vmem:[%s16636_s6] ss:$0 sm:$0xff] }
0x1d04   :  { %v10803_v31 = vsel %vm10801_vm15, %v10802_v20, %v10800_v14  ;;  %vm10729_vm0 = vcmp.eq.f32.partialorder %v10724_v46, 0.0  ;;  %v13731_v20 = vld [vmem:[%s16637_s7] ss:$0 sm:$0xff] }
0x1d05   :  { %v10804_v40 = vadd.f32 1e-06, %v10803_v31 }
0x1d07   :  { %13645 = vrcp.f32 %v10804_v40 }
0x1d10   :  { %v13644_v44 = vpop.eup %13643 }
0x1d11   :  { %v10726_v3 = vmul.f32 %v13644_v44, %v10724_v46 }
0x1d13   :  { %v10728_v17 = vsel %vm10727_vm14, %v10724_v46, %v10726_v3 }
0x1d14   :  { %v10731_v61 = vsel %vm10729_vm0, %v10730_v57, %v10728_v17  ;;  %v13646_v50 = vpop.eup %13645 }
0x1d15   :  { %v10732_v19 = vadd.f32 1e-06, %v10731_v61  ;;  %v10807_v16 = vrot.slane %v13646_v50, 1  ;;  %v10808_v42 = vrot.slane %v13646_v50, 2  ;;  %v10809_v26 = vrot.slane %v13646_v50, 3 }
0x1d16   :  { %v10814_v47 = vmul.f32 %v13646_v50, %v16357_v35 }
0x1d17   :  { %13647 = vrcp.f32 %v10732_v19  ;;  %v10815_v43 = vmul.f32 %v10807_v16, %v16359_v54  ;;  %v10816_v36 = vmul.f32 %v10808_v42, %v16361_v2  ;;  %v10817_v5 = vmul.f32 %v10809_v26, %v16363_v29 }
0x1d18   :  { %v10818_v45 = vmul.f32 %v13730_v60, %v10814_v47 }
0x1d19   :  { %v10819_v46 = vmul.f32 %v13730_v60, %v10815_v43  ;;  %v10820_v58 = vmul.f32 %v13730_v60, %v10816_v36  ;;  %v10821_v9 = vmul.f32 %v13730_v60, %v10817_v5 }
0x1d1a   :  { %v10822_v54 = vadd.f32 %v13731_v20, %v10818_v45 }
0x1d1b   :  { %v10823_v14 = vadd.f32 %v13731_v20, %v10819_v46  ;;  %v10824_v35 = vadd.f32 %v13731_v20, %v10820_v58  ;;  %v10825_v31 = vadd.f32 %v13731_v20, %v10821_v9 }
0x1d1d   :  { %v10830_v40 = vrot.slane %v10823_v14, 7  ;;  %v10832_v2 = vrot.slane %v10824_v35, 6  ;;  %v10834_v44 = vrot.slane %v10825_v31, 5 }
0x1d1f   :  { %v10831_v29 = vsel %vm959_vm3, %v10830_v40, %v10822_v54 }
0x1d20   :  { %v10833_v3 = vsel %vm961_vm4, %v10832_v2, %v10831_v29 }
0x1d21   :  { %v10835_v57 = vsel %vm963_vm6, %v10834_v44, %v10833_v3 }
0x1d22   :  { %v10836_v61 = vsel %vm653_vm5, %v10835_v57, 0  ;;  %11830 = vrot.lane.b32.xlu1 %v10835_v57, %s13767_s26 }
0x1d23   :  { %v16412_v19 = vand.u32 4294901760, %v10836_v61 }
0x1d24   :  { %v13648_v17 = vpop.eup %13647 }
0x1d25   :  { %v10735_v50 = vrot.slane %v13648_v17, 1  ;;  %v10736_v16 = vrot.slane %v13648_v17, 2  ;;  %v10737_v42 = vrot.slane %v13648_v17, 3  ;;  %v10742_v26 = vmul.f32 %v13648_v17, %v16377_v0  ;;  %13421 = vmatmul.mubr.f32.vlgmr.msra.gmra.mxu1 %v16412_v19  ;;  %v13732_v0 = vld [vmem:[%s16634_s4] ss:$0 sm:$0xff] }
0x1d26   :  { %v10908_v47 = vsub.f32 %v10836_v61, %v16412_v19  ;;  %13435 = vmatpush3.msra.mxu1 %v14112_v6  ;;  %13442 = vmatprep.mubr.msk.f32.mxu1 %vm13766_vm8, %v16696_v1 }
0x1d27   :  { %v10743_v43 = vmul.f32 %v10735_v50, %v16379_v62  ;;  %v10744_v36 = vmul.f32 %v10736_v16, %v16381_v56  ;;  %v10745_v5 = vmul.f32 %v10737_v42, %v16383_v51  ;;  %13436 = vmatprep.subr.mxu1 %v16696_v1  ;;  %v10746_v45 = vmul.f32 %v13732_v0, %v10742_v26  ;;  %v13733_v51 = vld [vmem:[%s16635_s5] ss:$0 sm:$0xff] }
0x1d28   :  { %v10909_v60 = vand.u32 4294901760, %v10908_v47  ;;  %13437 = vmatpush3.msra.mxu1 %v14114_v7 }
0x1d29   :  { %v10747_v46 = vmul.f32 %v13732_v0, %v10743_v43  ;;  %v10748_v58 = vmul.f32 %v13732_v0, %v10744_v36  ;;  %v10749_v62 = vmul.f32 %v13732_v0, %v10745_v5  ;;  %13438 = vmatprep.subr.mxu1 %v16696_v1  ;;  %v10750_v35 = vadd.f32 %v13733_v51, %v10746_v45 }
0x1d2a   :  { %v10910_v56 = vsub.f32 %v10908_v47, %v10909_v60  ;;  %13439 = vmatpush3.msra.mxu1 %v14116_v8 }
0x1d2b   :  { %v10751_v9 = vadd.f32 %v13733_v51, %v10747_v46  ;;  %v10752_v20 = vadd.f32 %v13733_v51, %v10748_v58  ;;  %13440 = vmatprep.subr.mxu1 %v16696_v1  ;;  %v10753_v40 = vadd.f32 %v13733_v51, %v10749_v62 }
0x1d2c   :  { %v10911_v14 = vand.u32 4294901760, %v10910_v56  ;;  %13441 = vmatpush3.msra.mxu1 %v14163_v21 }
0x1d2d   :  { %v11327_v31 = vrot.slane %v10751_v9, 7  ;;  %v11329_v54 = vrot.slane %v10752_v20, 6  ;;  %13443 = vmatmul.mubr.f32.vlgmr.msra.gmra.mxu1 %v10909_v60  ;;  %13456 = vmatprep.subr.mxu1 %v16696_v1  ;;  %v11331_v44 = vrot.slane %v10753_v40, 5  ;;  %v13734_v60 = vld [vmem:[%s16640_s10] ss:$0 sm:$0xff] }
0x1d2e   :  { %13410 = vmatmul.mubr.f32.vlgmr.msra.gmra.mxu0 %v10911_v14  ;;  %13457 = vmatpush3.msra.mxu1 %v14112_v6  ;;  %v12056_v20 = vld [vmem:[%s16630_s0 + $0x68] sm:$0xf]  ;;  %v12088_v40 = vld [vmem:[%s16630_s0 + $0x78] sm:$0xf] }
0x1d2f   :  { %v11328_v2 = vsel %vm959_vm3, %v11327_v31, %v10750_v35  ;;  %13424 = vmatpush3.msra.mxu0 %v14119_v10  ;;  %13458 = vmatprep.subr.mxu1 %v16696_v1  ;;  %vm5547_vm3 = vcmp.ne.s32.totalorder %v12056_v20, 0  ;;  %v12072_v31 = vld [vmem:[%s16630_s0 + $0x70] sm:$0xf]  ;;  %v16744_v20 = vld [vmem:[#allocation11_spill] sm:$0xff] }
0x1d30   :  { %v11330_v29 = vsel %vm961_vm4, %v11329_v54, %v11328_v2  ;;  %13425 = vmatprep.subr.mxu0 %v16696_v1  ;;  %13459 = vmatpush3.msra.mxu1 %v14114_v7  ;;  %v5548_v54 = vsel %vm5547_vm3, 1, %v16733_v30  ;;  %vm8779_vm4 = vcmp.ne.s32.totalorder %v12072_v31, 0 }
0x1d31   :  { %13426 = vmatpush3.msra.mxu0 %v14122_v11  ;;  %13460 = vmatprep.subr.mxu1 %v16696_v1  ;;  %v16448_v6 = vsel %vm963_vm6, %v11331_v44, %v11330_v29  ;;  %v8780_v2 = vsel %vm8779_vm4, 1, %v16733_v30  ;;  %vm12011_vm6 = vcmp.ne.s32.totalorder %v12088_v40, 0 }
0x1d32   :  { %13427 = vmatprep.subr.mxu0 %v16696_v1  ;;  %13461 = vmatpush3.msra.mxu1 %v14116_v8  ;;  %v11333_v7 = vsel %vm653_vm5, %v16448_v6, 0  ;;  %v12012_v29 = vsel %vm12011_vm6, 1, %v16733_v30 }
0x1d33   :  { %13428 = vmatpush3.msra.mxu0 %v14125_v24  ;;  %13462 = vmatprep.subr.mxu1 %v16696_v1  ;;  %v16465_v8 = vand.u32 4294901760, %v11333_v7 }
0x1d34   :  { %13429 = vmatprep.subr.mxu0 %v16696_v1  ;;  %13431 = vmatprep.mubr.msk.f32.mxu0 %vm13766_vm8, %v16696_v1 }
0x1d35   :  { %13430 = vmatpush3.msra.mxu0 %v14166_v38  ;;  %13463 = vmatpush3.msra.mxu1 %v14163_v21  ;;  %v11405_v10 = vsub.f32 %v11333_v7, %v16465_v8 }
0x1d36   :  { %13464 = vmatprep.mubr.msk.f32.mxu1 %vm13766_vm8, %v16696_v1  ;;  %13432 = vmatmul.mubr.f32.vlgmr.msra.gmra.mxu0 %v10908_v47 }
0x1d37   :  { %13445 = vmatprep.subr.mxu0 %v16696_v1  ;;  %13465 = vmatmul.mubr.f32.vlgmr.msra.gmra.mxu1 %v16412_v19  ;;  %v11406_v11 = vand.u32 4294901760, %v11405_v10 }
0x1d38   :  { %13478 = vmatprep.subr.mxu1 %v16696_v1  ;;  %13446 = vmatpush3.msra.mxu0 %v14130_v12 }
0x1d39   :  { %13479 = vmatpush3.msra.mxu1 %v14291_v27  ;;  %13447 = vmatprep.subr.mxu0 %v16696_v1  ;;  %v11407_v24 = vsub.f32 %v11405_v10, %v11406_v11 }
0x1d3a   :  { %13480 = vmatprep.subr.mxu1 %v16696_v1  ;;  %13448 = vmatpush3.msra.mxu0 %v14133_v55 }
0x1d3b   :  { %13481 = vmatpush3.msra.mxu1 %v14301_v39  ;;  %13449 = vmatprep.subr.mxu0 %v16696_v1  ;;  %v11408_v12 = vand.u32 4294901760, %v11407_v24  ;;  %v12048_v24 = vld [vmem:[%s16630_s0 + $0x64] sm:$0xf] }
0x1d3c   :  { %13482 = vmatprep.subr.mxu1 %v16696_v1  ;;  %13450 = vmatpush3.msra.mxu0 %v14136_v13 }
0x1d3d   :  { %13483 = vmatpush3.msra.mxu1 %v14311_v52  ;;  %13451 = vmatprep.subr.mxu0 %v16696_v1 }
0x1d3e   :  { %13484 = vmatprep.subr.mxu1 %v16696_v1  ;;  %13452 = vmatpush3.msra.mxu0 %v14171_v22 }
0x1d3f   :  { %13453 = vmatprep.mubr.msk.f32.mxu0 %vm13766_vm8, %v16696_v1  ;;  %13485 = vmatpush3.msra.mxu1 %v14317_v53 }
0x1d40   :  { %13486 = vmatprep.mubr.msk.f32.mxu1 %vm13766_vm8, %v16696_v1  ;;  %13454 = vmatmul.mubr.f32.vlgmr.msra.gmra.mxu0 %v16412_v19 }
0x1d41   :  { %13467 = vmatprep.subr.mxu0 %v16696_v1  ;;  %13487 = vmatmul.mubr.f32.vlgmr.msra.gmra.mxu1 %v16465_v8 }
0x1d42   :  { %13500 = vmatprep.subr.mxu1 %v16696_v1  ;;  %13468 = vmatpush3.msra.mxu0 %v14218_v59 }
0x1d43   :  { %13501 = vmatpush3.msra.mxu1 %v14218_v59  ;;  %13469 = vmatprep.subr.mxu0 %v16696_v1 }
0x1d44   :  { %13502 = vmatprep.subr.mxu1 %v16696_v1  ;;  %13470 = vmatpush3.msra.mxu0 %v14227_v63 }
0x1d45   :  { %13503 = vmatpush3.msra.mxu1 %v14227_v63  ;;  %13471 = vmatprep.subr.mxu0 %v16696_v1 }
0x1d46   :  { %13504 = vmatprep.subr.mxu1 %v16696_v1  ;;  %13472 = vmatpush3.msra.mxu0 %v14237_v23 }
0x1d47   :  { %13505 = vmatpush3.msra.mxu1 %v14237_v23  ;;  %13473 = vmatprep.subr.mxu0 %v16696_v1 }
0x1d48   :  { %13506 = vmatprep.subr.mxu1 %v16696_v1  ;;  %13474 = vmatpush3.msra.mxu0 %v14244_v25 }
0x1d49   :  { %13475 = vmatprep.mubr.msk.f32.mxu0 %vm13766_vm8, %v16696_v1  ;;  %13507 = vmatpush3.msra.mxu1 %v14244_v25 }
0x1d4a   :  { %13508 = vmatprep.mubr.msk.f32.mxu1 %vm13766_vm8, %v16696_v1  ;;  %13476 = vmatmul.mubr.f32.vlgmr.msra.gmra.mxu0 %v11408_v12 }
0x1d4b   :  { %13489 = vmatprep.subr.mxu0 %v16696_v1  ;;  %13509 = vmatmul.mubr.f32.vlgmr.msra.gmra.mxu1 %v11406_v11 }
0x1d4c   :  { %13522 = vmatprep.subr.mxu1 %v16696_v1  ;;  %13490 = vmatpush3.msra.mxu0 %v14235_v4 }
0x1d4d   :  { %13523 = vmatpush3.msra.mxu1 %v14218_v59  ;;  %13491 = vmatprep.subr.mxu0 %v16696_v1 }
0x1d4e   :  { %13524 = vmatprep.subr.mxu1 %v16696_v1  ;;  %13492 = vmatpush3.msra.mxu0 %v14242_v15 }
0x1d4f   :  { %13525 = vmatpush3.msra.mxu1 %v14227_v63  ;;  %13493 = vmatprep.subr.mxu0 %v16696_v1 }
0x1d50   :  { %13526 = vmatprep.subr.mxu1 %v16696_v1  ;;  %13494 = vmatpush3.msra.mxu0 %v14253_v33 }
0x1d51   :  { %13527 = vmatpush3.msra.mxu1 %v14237_v23  ;;  %13495 = vmatprep.subr.mxu0 %v16696_v1 }
0x1d52   :  { %13528 = vmatprep.subr.mxu1 %v16696_v1  ;;  %13496 = vmatpush3.msra.mxu0 %v14262_v34 }
0x1d53   :  { %13497 = vmatprep.mubr.msk.f32.mxu0 %vm13766_vm8, %v16696_v1  ;;  %13529 = vmatpush3.msra.mxu1 %v14244_v25 }
0x1d54   :  { %13530 = vmatprep.mubr.msk.f32.mxu1 %vm13766_vm8, %v16696_v1  ;;  %13498 = vmatmul.mubr.f32.vlgmr.msra.gmra.mxu0 %v11405_v10 }
0x1d55   :  { %13511 = vmatprep.subr.mxu0 %v16696_v1  ;;  %13531 = vmatmul.mubr.f32.vlgmr.msra.gmra.mxu1 %v16465_v8 }
0x1d56   :  { %13512 = vmatpush3.msra.mxu0 %v14250_v32  ;;  %13519 = vmatprep.mubr.msk.f32.mxu0 %vm13766_vm8, %v16696_v1  ;;  %vm3931_vm8 = vcmp.ne.s32.totalorder %v12048_v24, 0 }
0x1d57   :  { %13513 = vmatprep.subr.mxu0 %v16696_v1 }
0x1d58   :  { %13514 = vmatpush3.msra.mxu0 %v14259_v37 }
0x1d59   :  { %13515 = vmatprep.subr.mxu0 %v16696_v1 }
0x1d5a   :  { %13516 = vmatpush3.msra.mxu0 %v14272_v41 }
0x1d5b   :  { %13517 = vmatprep.subr.mxu0 %v16696_v1 }
0x1d5c   :  { %13518 = vmatpush3.msra.mxu0 %v14284_v48 }
0x1d5d   :  { %13520 = vmatmul.mubr.f32.vlgmr.msra.gmra.mxu0 %v16465_v8 }
0x1d94   :  { %v11831_v51 = vpop.permute.xlu1 %11830 }
0x1de5   :  { %v11004_v55 = vpop.f32.mrf.mxu1 }
0x1de7   :  { %v13422_v13 = vpop.f32.mrf.mxu1 }
0x1de8   :  { %v3932_v13 = vsel %vm3931_vm8, 1, %v16733_v30 }
0x1ded   :  { %v11161_v21 = vpop.f32.mrf.mxu1 }
0x1dee   :  { %v10913_v38 = vpop.f32.mrf.mxu0 }
0x1def   :  { %v13444_v22 = vpop.f32.mrf.mxu1  ;;  %v11005_v34 = vadd.f32 %v11004_v55, %v10913_v38  ;;  %v12064_v55 = vld [vmem:[%s16630_s0 + $0x6c] sm:$0xf] }
0x1df0   :  { %v13411_v59 = vpop.f32.mrf.mxu0  ;;  %vm7163_vm9 = vcmp.ne.s32.totalorder %v12064_v55, 0  ;;  %v12080_v22 = vld [vmem:[%s16630_s0 + $0x74] sm:$0xf] }
0x1df1   :  { %v7164_v59 = vsel %vm7163_vm9, 1, %v16733_v30  ;;  %vm10395_vm11 = vcmp.ne.s32.totalorder %v12080_v22, 0 }
0x1df6   :  { %v11084_v63 = vpop.f32.mrf.mxu0 }
0x1df7   :  { %v11319_v4 = vpop.f32.mrf.mxu1  ;;  %v11085_v41 = vadd.f32 %v11084_v63, %v11005_v34  ;;  %v16736_v63 = vld [vmem:[#allocation9_spill] sm:$0xff] }
0x1df8   :  { %v13433_v23 = vpop.f32.mrf.mxu0 }
0x1df9   :  { %v13466_v15 = vpop.f32.mrf.mxu1  ;;  %v11162_v27 = vadd.f32 %v11161_v21, %v11085_v41 }
0x1dfa   :  { %v10396_v15 = vsel %vm10395_vm11, 1, %v16733_v30 }
0x1e00   :  { %v11244_v25 = vpop.f32.mrf.mxu0 }
0x1e01   :  { %v11501_v32 = vpop.f32.mrf.mxu1  ;;  %v11245_v52 = vadd.f32 %v11244_v25, %v11162_v27  ;;  %v16737_v25 = vld [vmem:[#allocation7_spill] sm:$0xff] }
0x1e02   :  { %v13455_v33 = vpop.f32.mrf.mxu0 }
0x1e03   :  { %v13488_v37 = vpop.f32.mrf.mxu1  ;;  %v11320_v3 = vadd.f32 %v11319_v4, %v11245_v52 }
0x1e0a   :  { %v11410_v48 = vpop.f32.mrf.mxu0 }
0x1e0b   :  { %v11658_v39 = vpop.f32.mrf.mxu1  ;;  %v11411_v57 = vadd.f32 %v11410_v48, %v11320_v3  ;;  %v16738_v3 = vld [vmem:[#allocation10_spill] sm:$0xff] }
0x1e0c   :  { %v13477_v53 = vpop.f32.mrf.mxu0 }
0x1e0d   :  { %v13510_v1 = vpop.f32.mrf.mxu1  ;;  %v11502_v19 = vadd.f32 %v11501_v32, %v11411_v57 }
0x1e14   :  { %v11581_v17 = vpop.f32.mrf.mxu0 }
0x1e15   :  { %v11816_v61 = vpop.f32.mrf.mxu1  ;;  %v11582_v42 = vadd.f32 %v11581_v17, %v11502_v19 }
0x1e16   :  { %v13499_v50 = vpop.f32.mrf.mxu0 }
0x1e17   :  { %v13532_v16 = vpop.f32.mrf.mxu1  ;;  %v11659_v26 = vadd.f32 %v11658_v39, %v11582_v42 }
0x1e1d   :  { %v11741_v47 = vpop.f32.mrf.mxu0 }
0x1e1e   :  { %v11742_v43 = vadd.f32 %v11741_v47, %v11659_v26 }
0x1e1f   :  { %v13521_v36 = vpop.f32.mrf.mxu0 }
0x1e20   :  { %v11817_v5 = vadd.f32 %v11816_v61, %v11742_v43 }
0x1e22   :  { %v11820_v0 = vadd.f32 %v13734_v60, %v11817_v5  ;;  %v16739_v60 = vld [vmem:[#allocation13_spill] sm:$0xff] }
0x1e24   :  { %v12091_v45 = vmul.f32 -1.442695, %v11820_v0  ;;  %13649 = vtanh.f32 %v11820_v0  ;;  %v16740_v0 = vld [vmem:[#allocation14_spill] sm:$0xff] }
0x1e26   :  { %13651 = vpow2.f32 %v12091_v45 }
0x1e31   :  { %v13650_v46 = vpop.eup %13649 }
0x1e32   :  { %11840 = vrot.lane.b32.xlu0 %v13650_v46, %s13768_s16 }
0x1e33   :  { %v13652_v58 = vpop.eup %13651 }
0x1e34   :  { %v11824_v62 = vadd.f32 1.0, %v13652_v58  ;;  %v16742_v58 = vld [vmem:[#allocation16_spill] sm:$0xff] }
0x1e36   :  { %13653 = vrcp.f32 %v11824_v62 }
0x1e43   :  { %v13654_v56 = vpop.eup %13653 }
0x1e44   :  { %v11833_v9 = vmul.f32 %v13654_v56, %v11831_v51  ;;  %v11829_v7 = vmul.f32 %v13654_v56, %v16448_v6  ;;  %v12092_v6 = vld.sshfl [vmem:[%s16630_s0 + $0x58] sm:$0x33 pattern:$0x75316420]  ;;  %s13772_s0 = smov [#allocation4]  }
0x1e45   :  { %v11876_v21 = vrot.slane %v12092_v6, %v16730_v28  ;;  %v11869_v38 = vcombine.high %v12092_v6, %v12092_v6  ;;  %v16743_v51 = vld [vmem:[#allocation17_spill] sm:$0xff] }
0x1e46   :  { %11835 = vrot.lane.b32.xlu1 %v11833_v9, %s13769_s17 }
0x1e47   :  { %v11889_v4 = vrot.slane %v11876_v21, %v16736_v63  ;;  %v11883_v23 = vrot.slane %v11869_v38, %v16730_v28  ;;  %v11884_v33 = vcombine.high %v11876_v21, %v11876_v21 }
0x1e49   :  { %vm11902_vm10 = vcmp.eq.s32.totalorder %v16737_v25, %v11889_v4  ;;  %v11893_v32 = vrot.slane %v11883_v23, %v16736_v63  ;;  %v11897_v34 = vrot.slane %v11884_v33, %v16736_v63  ;;  %v11885_v41 = vcombine.high %v11883_v23, %v11883_v23 }
0x1e4a   :  { %v11935_v37 = vsel %vm11902_vm10, 1, %v16733_v30  ;;  %vm11903_vm14 = vcmp.eq.s32.totalorder %v16738_v3, %v11889_v4 }
0x1e4b   :  { %vm11904_vm12 = vcmp.eq.s32.totalorder %v16737_v25, %v11893_v32  ;;  %vm11906_vm13 = vcmp.eq.s32.totalorder %v16737_v25, %v11897_v34  ;;  %v11901_v48 = vrot.slane %v11885_v41, %v16736_v63  ;;  %v11936_v57 = vsel %vm11903_vm14, 1, %v16733_v30 }
0x1e4c   :  { %v11937_v27 = vsel %vm11904_vm12, 1, %v16733_v30  ;;  %v11939_v39 = vsel %vm11906_vm13, 1, %v16733_v30  ;;  %vm11905_vm0 = vcmp.eq.s32.totalorder %v16738_v3, %v11893_v32  ;;  %vm11907_vm3 = vcmp.eq.s32.totalorder %v16738_v3, %v11897_v34 }
0x1e4d   :  { %vm11908_vm15 = vcmp.eq.s32.totalorder %v16737_v25, %v11901_v48  ;;  %v11938_v17 = vsel %vm11905_vm0, 1, %v16733_v30  ;;  %v11940_v61 = vsel %vm11907_vm3, 1, %v16733_v30  ;;  %vm11909_vm4 = vcmp.eq.s32.totalorder %v16738_v3, %v11901_v48 }
0x1e4e   :  { %v11941_v52 = vsel %vm11908_vm15, 1, %v16733_v30  ;;  %v11942_v19 = vsel %vm11909_vm4, 1, %v16733_v30  ;;  %v16741_v30 = vld [vmem:[#allocation15_spill] sm:$0xff] }
0x1ea4   :  { %v11841_v14 = vpop.permute.xlu0 %11840 }
0x1ea5   :  { %v11843_v35 = vmul.f32 %v13654_v56, %v11841_v14 }
0x1ea7   :  { %11845 = vrot.lane.b32.xlu1 %v11843_v35, %s13767_s26 }
0x1eab   :  { %5550 = vperm.xlu1 %13544, %v5548_v54  }
0x1eaf   :  { %8782 = vperm.xlu1 %13544, %v8780_v2  }
0x1eb3   :  { %12014 = vperm.xlu1 %13544, %v12012_v29  }
0x1eb8   :  { %v11836_v44 = vpop.permute.xlu1 %11835 }
0x1eb9   :  { %v11838_v8 = vadd.f32 %v11836_v44, %v11829_v7 }
0x1f19   :  { %v11846_v10 = vpop.permute.xlu1 %11845 }
0x1f1a   :  { %v16558_v11 = vadd.f32 %v11846_v10, %v11838_v8 }
0x1f1c   :  { %13655 = vtanh.f32 %v16558_v11 }
0x1f26   :  { %v5551_v16 = vpop.permute.xlu1 %5550 }
0x1f27   :  { %vm5552_vm9 = vcmp.eq.s32.totalorder %v5551_v16, 1 }
0x1f29   :  { %v13656_v12 = vpop.eup %13655 }
0x1f2a   :  { %11851 = vrot.lane.b32.xlu0 %v13656_v12, %s13770_s20  ;;  %v8783_v26 = vpop.permute.xlu1 %8782  ;;  %s12025_s20 = sshll.u32 %s13772_s0, 4  ;;  %s12026_s20 = int_to_ptr.vmem [resolvable:$true] %s12025_s20 }
0x1f2b   :  { %vm8784_vm10 = vcmp.eq.s32.totalorder %v8783_v26, 1  ;;  %p13746_p1 = scmp.lt.s32.totalorder %s12026_s20, %s12026_s20 }
0x1f2e   :  { %3934 = vperm.xlu0 %13543, %v3932_v13   ;;  %v12015_v43 = vpop.permute.xlu1 %12014 }
0x1f2f   :  { %vm12016_vm12 = vcmp.eq.s32.totalorder %v12015_v43, 1 }
0x1f32   :  { %7166 = vperm.xlu0 %13543, %v7164_v59  }
0x1f36   :  { %10398 = vperm.xlu0 %13543, %v10396_v15  }
0x1f3a   :  { %11944 = vperm.xlu0 %13543, %v11935_v37  }
0x1f3e   :  { %11950 = vperm.xlu0 %13543, %v11937_v27  }
0x1f42   :  { %11956 = vperm.xlu0 %13543, %v11939_v39  }
0x1f46   :  { %11962 = vperm.xlu0 %13543, %v11941_v52  }
0x1f9c   :  { %v11852_v53 = vpop.permute.xlu0 %11851 }
0x1f9d   :  { %v11854_v1 = vmul.f32 %v13654_v56, %v11852_v53 }
0x1f9f   :  { %11856 = vrot.lane.b32.xlu1 %v11854_v1, %s13771_s24  ;;  %s13741_s24 = scalar_lea.vmem %s12026_s20, 64 }
0x1fa0   :  { %p13742_p0 = scmp.ne.s32.totalorder %s12026_s20, %s13741_s24  ;;  %p13747_p2 = scmp.lt.s32.totalorder %s13741_s24, %s13741_s24 }
0x1fa2   :  { %p13748_p3 = por %p13747_p2, %p13746_p1 }
0x1fa3   :  { %11947 = vperm.xlu1 %13544, %v11936_v57  }
0x1fa4   :  { %p13749_p4 = pnand %p13748_p3, %p13742_p0 }
0x1fa7   :  { %11953 = vperm.xlu1 %13544, %v11938_v17  }
0x1fa9   :  { %v3935_v50 = vpop.permute.xlu0 %3934 }
0x1faa   :  { %vm3936_vm6 = vcmp.eq.s32.totalorder %v3935_v50, 1 }
0x1fab   :  { %11959 = vperm.xlu1 %13544, %v11940_v61   ;;  %v3937_v45 = vsel %vm3936_vm6, %v16740_v0, %v16739_v60 }
0x1fac   :  { %v5553_v46 = vsel %vm5552_vm9, %v16741_v30, %v3937_v45 }
0x1fad   :  { %v7167_v42 = vpop.permute.xlu0 %7166 }
0x1fae   :  { %vm7168_vm8 = vcmp.eq.s32.totalorder %v7167_v42, 1 }
0x1faf   :  { %11965 = vperm.xlu1 %13544, %v11942_v19   ;;  %v7169_v62 = vsel %vm7168_vm8, %v16742_v58, %v5553_v46 }
0x1fb0   :  { %v8785_v9 = vsel %vm8784_vm10, %v16743_v51, %v7169_v62 }
0x1fb1   :  { %v10399_v47 = vpop.permute.xlu0 %10398 }
0x1fb2   :  { %vm10400_vm11 = vcmp.eq.s32.totalorder %v10399_v47, 1 }
0x1fb3   :  { %v10401_v14 = vsel %vm10400_vm11, %v16744_v20, %v8785_v9 }
0x1fb5   :  { %v11945_v36 = vpop.permute.xlu0 %11944 }
0x1fb9   :  { %v11951_v56 = vpop.permute.xlu0 %11950 }
0x1fbd   :  { %v11957_v40 = vpop.permute.xlu0 %11956 }
0x2011   :  { %v11857_v5 = vpop.permute.xlu1 %11856 }
0x2012   :  { %11859 = vst.msk [vmem:[#allocation3] sm:$0xf] %vm2168_vm1, %v11857_v5 }
0x2013   :  { %11860 = vst.msk [vmem:[#allocation3] sm:$0xf] %vm2170_vm2, %v16558_v11 }
0x201a   :  { %v11861_v35 = vld [vmem:[#allocation3] sm:$0xf] }
0x201b   :  { %v11917_v31 = vrot.slane %v11861_v35, %v16730_v28  ;;  %v12017_v54 = vsel %vm12016_vm12, %v11861_v35, %v10401_v14 }
0x201c   :  { %12018 = vst.msk [vmem:[#allocation4] sm:$0xf] %vm966_vm7, %v12017_v54 }
0x201d   :  { %v11925_v2 = vrot.slane %v11917_v31, %v16730_v28  ;;  %v11918_v29 = vcombine.high %v11917_v31, %v11917_v31 }
0x201e   :  { %13752 = shalt.err (!%p13749_p4)
}
0x201f   :  { %12028 = dma.vmem_to_hbm [thread:$0]  %s12026_s20, 64, %s16641_s11, [#allocation5]   ;;  %v11948_v44 = vpop.permute.xlu1 %11947  ;;  %v11978_v7 = vrot.slane %v11925_v2, %v16736_v63  ;;  %v11932_v8 = vrot.slane %v11918_v29, %v16730_v28  ;;  %v11933_v10 = vcombine.high %v11925_v2, %v11925_v2  ;;  %vm11967_vm7 = vcmp.eq.s32.totalorder %v11945_v36, 1  ;;  %v13735_v11 = vld [vmem:[#allocation2] sm:$0xff]  ;;  %v13736_v12 = vld [vmem:[#allocation2 + $0x8] sm:$0xff]  ;;  %v11963_v21 = vpop.permute.xlu0 %11962  ;;  %v13737_v28 = vld [vmem:[#allocation2 + $0x10] sm:$0xff] }
0x2020   :  { %vm11968_vm1 = vcmp.eq.s32.totalorder %v11948_v44, 1  ;;  %vm11969_vm2 = vcmp.eq.s32.totalorder %v11951_v56, 1  ;;  %vm11971_vm13 = vcmp.eq.s32.totalorder %v11957_v40, 1  ;;  %v13738_v4 = vld [vmem:[#allocation2 + $0x20] sm:$0xff]  ;;  %v13739_v15 = vld [vmem:[#allocation2 + $0x18] sm:$0xff]  ;;  %vm11973_vm14 = vcmp.eq.s32.totalorder %v11963_v21, 1 }
0x2021   :  { %v11995_v24 = vsel %vm11967_vm7, %v11978_v7, %v13735_v11  ;;  %v11996_v55 = vsel %vm11968_vm1, %v11978_v7, %v13736_v12  ;;  %v11982_v6 = vrot.slane %v11932_v8, %v16736_v63  ;;  %v11986_v13 = vrot.slane %v11933_v10, %v16736_v63  ;;  %v13740_v34 = vld [vmem:[#allocation2 + $0x28] sm:$0xff] }
0x2022   :  { %12003 = vst.msk [vmem:[#allocation2] sm:$0xff] %vm653_vm5, %v11995_v24  ;;  %12004 = vst.msk [vmem:[#allocation2 + $0x8] sm:$0xff] %vm653_vm5, %v11996_v55  ;;  %v11934_v22 = vcombine.high %v11932_v8, %v11932_v8 }
0x2023   :  { %v11954_v38 = vpop.permute.xlu1 %11953  ;;  %v11997_v59 = vsel %vm11969_vm2, %v11982_v6, %v13737_v28  ;;  %v11999_v23 = vsel %vm11971_vm13, %v11986_v13, %v13738_v4 }
0x2024   :  { %vm11970_vm15 = vcmp.eq.s32.totalorder %v11954_v38, 1  ;;  %12005 = vst.msk [vmem:[#allocation2 + $0x10] sm:$0xff] %vm653_vm5, %v11997_v59  ;;  %12007 = vst.msk [vmem:[#allocation2 + $0x20] sm:$0xff] %vm653_vm5, %v11999_v23  ;;  %v11990_v32 = vrot.slane %v11934_v22, %v16736_v63 }
0x2025   :  { %v11998_v25 = vsel %vm11970_vm15, %v11982_v6, %v13739_v15 }
0x2026   :  { %12006 = vst.msk [vmem:[#allocation2 + $0x18] sm:$0xff] %vm653_vm5, %v11998_v25  ;;  %v12001_v37 = vsel %vm11973_vm14, %v11990_v32, %v16328_v18 }
0x2027   :  { %v11960_v33 = vpop.permute.xlu1 %11959  ;;  %12009 = vst.msk [vmem:[#allocation2 + $0x30] sm:$0xff] %vm653_vm5, %v12001_v37 }
0x2028   :  { %vm11972_vm0 = vcmp.eq.s32.totalorder %v11960_v33, 1 }
0x2029   :  { %v12000_v41 = vsel %vm11972_vm0, %v11986_v13, %v13740_v34 }
0x202a   :  { %12008 = vst.msk [vmem:[#allocation2 + $0x28] sm:$0xff] %vm653_vm5, %v12000_v41 }
0x202b   :  { %v11966_v27 = vpop.permute.xlu1 %11965 }
0x202c   :  { %vm11974_vm3 = vcmp.eq.s32.totalorder %v11966_v27, 1 }
0x202d   :  { %v12002_v48 = vsel %vm11974_vm3, %v11990_v32, %v16333_v49 }
0x202e   :  { %12010 = vst.msk [vmem:[#allocation2 + $0x38] sm:$0xff] %vm653_vm5, %v12002_v48 }
0x202f   :  { %13761 = dma.done.wait [#allocation5], 64  }
0x2030   :  { %13762 = vsyncadd [#allocation5], 4294967232 }
0x2031   :  { %12032 = vsyncpa [#allocation5], 1 }

</bundles_post_ra>
